<compile_context>
chip_gen: v7x
topology: tpu7x:2x2x1
jax: 0.10.0
libtpu: 0.0.40
codegen_flags: <defaults>
</compile_context>

<pallas_src>
import functools

import numpy as np

import jax
import jax.numpy as jnp
from jax import lax
from jax.experimental import pallas as pl
from jax.experimental.pallas import tpu as pltpu


# --------------------- static layout helpers (trace time) ---------------------

def _phase_coords(batch, h0, w0, nbits):
    """Full-resolution (p, q) coordinates for every column of the layer input
    whose layout carries `nbits` sub-pixel phase bits per spatial dimension.

    Column digits, major -> minor: a_{nbits-1}, b_{nbits-1}, ..., a_0, b_0,
    n, i, j  (a_k / b_k are the row / col phase bits added by layer k).
    p = i*2^nbits + sum_k a_k * 2^(nbits-1-k)   (a_0 is the MSB), q likewise.
    """
    r = 2 ** nbits
    m = r * r * batch * h0 * w0
    cols = np.arange(m, dtype=np.int64)
    j = cols % w0
    t = cols // w0
    i = t % h0
    t = t // h0
    t = t // batch                       # drop the batch digit
    p = i * r
    q = j * r
    for k in range(nbits):
        b_k = t % 2
        t //= 2
        a_k = t % 2
        t //= 2
        p = p + a_k * (2 ** (nbits - 1 - k))
        q = q + b_k * (2 ** (nbits - 1 - k))
    return (p.astype(np.int32).reshape(1, m),
            q.astype(np.int32).reshape(1, m))


def _unscramble(y, batch, h0, w0, nbits):
    """(C, 4^nbits * batch*h0*w0) phase-major -> (batch, C, h0*2^nbits, w0*2^nbits).

    One reshape + transpose + reshape in XLA, applied once to the final output.
    """
    c = y.shape[0]
    y = y.reshape((c,) + (2, 2) * nbits + (batch, h0, w0))
    ax_a = {k: 1 + 2 * (nbits - 1 - k) for k in range(nbits)}
    ax_b = {k: 2 + 2 * (nbits - 1 - k) for k in range(nbits)}
    ax_n = 1 + 2 * nbits
    ax_i, ax_j = ax_n + 1, ax_n + 2
    order = ([ax_n, 0, ax_i] + [ax_a[k] for k in range(nbits)]
             + [ax_j] + [ax_b[k] for k in range(nbits)])
    y = jnp.transpose(y, order)
    return y.reshape(batch, c, h0 * 2 ** nbits, w0 * 2 ** nbits)


def _full_spec(arr):
    """Whole array as a single VMEM block (grid=(1,))."""
    nd = arr.ndim
    return pl.BlockSpec(arr.shape, lambda i: (0,) * nd)


# ------------------------------ in-kernel helpers ------------------------------

def _apply_act(y, act):
    if act is None or act in ("none", "identity"):
        return y
    if act == "relu":
        return jnp.maximum(y, 0.0)
    if act == "tanh":
        return jnp.tanh(y)
    if act == "sigmoid":
        return jax.nn.sigmoid(y)
    if act == "leakyrelu":
        return jnp.where(y >= 0.0, y, 0.2 * y)
    raise ValueError(f"unknown final_act: {act}")


def _shift_plus1(t, coord, bit_strides, spatial_stride, coord_max, width):
    """out[:, m] = t[:, m'] where column m' has full-res coordinate coord(m)+1;
    zero where coord == coord_max - 1 (falls off the feature map).

    `coord+1` in the phase-major column layout is a carry chain over the phase
    value-bits (LSB first, strides `bit_strides`) ending in the spatial digit
    (stride `spatial_stride`): each carry case is one static lane roll selected
    by a bit-mask of `coord`.
    """
    nbits = len(bit_strides)
    out = jnp.zeros_like(t)
    acc = 0
    for case in range(nbits + 1):
        if case < nbits:
            delta = bit_strides[case] - acc
            mask = (coord & ((1 << (case + 1)) - 1)) == ((1 << case) - 1)
        else:
            delta = spatial_stride - acc
            mask = ((coord & ((1 << nbits) - 1)) == ((1 << nbits) - 1)) & (
                coord < coord_max - 1)
        shift = (-delta) % width
        src = pltpu.roll(t, shift, axis=1) if shift else t
        out = jnp.where(mask, src, out)
        if case < nbits:
            acc += bit_strides[case]
    return out


# ------------------------- the fused generator kernel -------------------------

def _make_generator_kernel(cfg):
    """Whole Generator forward in a single kernel.

    Per layer: 9 per-tap MXU matmuls (bf16 in, f32 acc) on the lane-dense
    (C, M) activation, phase-aware overlap-add with XLU rolls + VPU selects,
    lane-axis concat of the 4 sub-pixel phases, then fused BatchNorm (batch
    stats, f32) + ReLU (or conv-bias + final activation for the last layer).
    """
    layers = cfg["layers"]
    n_layers = len(layers)
    m0, h0, w0 = cfg["m0"], cfg["h0"], cfg["w0"]
    eps = cfg["eps"]
    final_act = cfg["final_act"]

    def kernel(*refs):
        it = iter(refs)
        x_ref = next(it)
        w_refs, s_refs = [], []
        for lyr in layers:
            w_refs.append(next(it))                       # (9, Cout, Cin) bf16
            if lyr["has_bn"]:
                s_refs.append((next(it), next(it)))       # gamma, beta (Cout,1)
            else:
                s_refs.append((next(it),))                # bias (Cout,1)
        pq_refs = [(next(it), next(it)) for _ in range(n_layers)]
        out_ref = next(it)

        x = x_ref[...].astype(jnp.float32)                # (C0, m0)
        for li, lyr in enumerate(layers):
            nbits = li                                    # phase bits per dim
            r = 2 ** nbits
            m_in = r * r * m0

            # 1) the 9 per-tap matmuls (MXU, bf16 inputs, f32 accumulation).
            xb = x.astype(jnp.bfloat16)
            taps = [jnp.dot(w_refs[li][k], xb,
                            preferred_element_type=jnp.float32)
                    for k in range(9)]                    # each (Cout, m_in)

            # 2) phase-aware overlap-add (static XLU lane rolls + masks).
            p_col = pq_refs[li][0][...]                   # (1, m_in) int32
            q_col = pq_refs[li][1][...]
            row_bits = [2 * (4 ** (nbits - 1 - s)) * m0 for s in range(nbits)]
            col_bits = [(4 ** (nbits - 1 - s)) * m0 for s in range(nbits)]

            def sp(t):    # tap value at (p+1, q)
                return _shift_plus1(t, p_col, row_bits, w0, h0 * r, m_in)

            def sq(t):    # tap value at (p, q+1)
                return _shift_plus1(t, q_col, col_bits, 1, w0 * r, m_in)

            def tap(kh, kw):
                return taps[3 * kh + kw]

            y00 = tap(1, 1)
            y01 = tap(1, 2) + sq(tap(1, 0))
            y10 = tap(2, 1) + sp(tap(0, 1))
            y11 = tap(2, 2) + sq(tap(2, 0)) + sp(tap(0, 2)) + sp(sq(tap(0, 0)))
            # Newest phase bits become the most-significant column digits.
            y = jnp.concatenate([y00, y01, y10, y11], axis=1)   # (Cout, 4*m_in)

            # 3) fused BatchNorm (training-mode batch stats, f32) + activation.
            if lyr["has_bn"]:
                inv_m = 1.0 / (4 * m_in)
                mean = jnp.sum(y, axis=1, keepdims=True) * inv_m
                d = y - mean
                var = jnp.sum(d * d, axis=1, keepdims=True) * inv_m
                gamma = s_refs[li][0][...]
                beta = s_refs[li][1][...]
                y = d * (gamma * lax.rsqrt(var + eps)) + beta
                y = jnp.maximum(y, 0.0)
                # conv bias dropped: exactly cancelled by the mean subtraction
            else:
                y = _apply_act(y + s_refs[li][0][...], final_act)
            x = y

        out_ref[...] = x

    return kernel


# ---------------------------------- wrapper -----------------------------------

def generator_forward(params, x_nchw, final_act="tanh", eps=1e-5):
    """Whole Generator forward = 1 pallas_call + one final XLA un-interleave."""
    n, c0, h0, w0 = x_nchw.shape
    m0 = n * h0 * w0
    n_layers = len(params)

    # Channels-first, lane-dense input (C0, M0); columns ordered (n, i, j).
    x_cm = jnp.transpose(x_nchw.astype(jnp.float32), (1, 0, 2, 3)).reshape(c0, m0)

    layers_cfg, operands = [], [x_cm]
    for p in params:
        _, cout, cin = p["w_taps"].shape
        has_bn = p["gamma"] is not None
        layers_cfg.append(dict(cin=cin, cout=cout, has_bn=has_bn))
        operands.append(p["w_taps"])
        if has_bn:
            operands += [p["gamma_col"], p["beta_col"]]
        else:
            operands += [p["bias_col"]]          # final layer: bias only
    # Static per-column full-res coordinates for each layer's input layout
    # (numpy at trace time; in-kernel they only feed cheap bit-mask compares).
    for li in range(n_layers):
        pc, qc = _phase_coords(n, h0, w0, li)
        operands += [jnp.asarray(pc), jnp.asarray(qc)]

    c_last = layers_cfg[-1]["cout"]
    m_final = (4 ** n_layers) * m0
    kernel = _make_generator_kernel(dict(
        m0=m0, h0=h0, w0=w0, layers=layers_cfg, final_act=final_act, eps=eps))

    out_pm = pl.pallas_call(
        kernel,
        out_shape=jax.ShapeDtypeStruct((c_last, m_final), jnp.float32),
        grid_spec=pltpu.PrefetchScalarGridSpec(
            num_scalar_prefetch=0,
            grid=(1,),                     # whole net is VMEM-resident
            in_specs=[_full_spec(a) for a in operands],
            out_specs=pl.BlockSpec((c_last, m_final), lambda i: (0, 0)),
        ),
        compiler_params=pltpu.CompilerParams(
            dimension_semantics=("arbitrary",)),
    )(*operands)

    # TODO(synk): the one-time phase-major -> NCHW un-interleave (a stride-2^L
    # scatter) stays in XLA; it runs once on the final output only.
    return _unscramble(out_pm, n, h0, w0, n_layers)


# ------------------------------- parameters -----------------------------------

def init_generator_params(key, out_channels=3, latent_dim=16,
                          num_doublesize=3, num_filters=8):
    # Mirrors the PyTorch Generator: every layer is
    #   ConvTranspose2d(kernel_size=3, stride=2, padding=1, output_padding=1)
    # (the sub-pixel decomposition in the kernel is hard-wired to exactly
    # these hyper-parameters), BatchNorm2d + ReLU on all but the last layer.
    assert num_doublesize >= 2
    dims = [latent_dim, num_filters * 2 ** (num_doublesize - 2)]
    for i in range(num_doublesize - 2):
        dims.append(num_filters * 2 ** (num_doublesize - 3 - i))
    dims.append(out_channels)

    params = []
    n_layers = len(dims) - 1
    for li in range(n_layers):
        cin, cout = dims[li], dims[li + 1]
        key, wk, bk = jax.random.split(key, 3)
        has_bn = li < n_layers - 1
        params.append(dict(
            W=0.02 * jax.random.normal(wk, (cin, cout, 3, 3), jnp.float32),
            b=0.02 * jax.random.normal(bk, (cout,), jnp.float32),
            gamma=jnp.ones((cout,), jnp.float32) if has_bn else None,
            beta=jnp.zeros((cout,), jnp.float32) if has_bn else None))
    return params


def prepare_params(params):
    """PyTorch ConvTranspose2d weight (Cin, Cout, kH, kW) -> per-tap matrices
    (9, Cout, Cin) bf16 for the MXU, plus column-shaped BN/bias params."""
    prepped = []
    for p in params:
        cin, cout = p["W"].shape[0], p["W"].shape[1]
        w_taps = jnp.transpose(p["W"], (2, 3, 1, 0)).reshape(9, cout, cin)
        q = dict(p)
        q["w_taps"] = w_taps.astype(jnp.bfloat16)
        if p["gamma"] is not None:
            q["gamma_col"] = p["gamma"].reshape(cout, 1).astype(jnp.float32)
            q["beta_col"] = p["beta"].reshape(cout, 1).astype(jnp.float32)
        else:
            q["bias_col"] = p["b"].reshape(cout, 1).astype(jnp.float32)
        prepped.append(q)
    return prepped


# --------------------------- pure-JAX f32 reference ---------------------------

def _ref_conv_transpose(x, w, b):
    """ConvTranspose2d(k=3, s=2, p=1, output_padding=1), NCHW, f32."""
    n, _, h, wd = x.shape
    cout = w.shape[1]
    out = jnp.zeros((n, cout, 2 * h, 2 * wd), jnp.float32)
    for kh in range(3):
        for kw in range(3):
            t = jnp.einsum("ncij,co->noij", x, w[:, :, kh, kw])
            canvas = jnp.zeros((n, cout, 2 * h + 2, 2 * wd + 2), jnp.float32)
            canvas = canvas.at[:, :, kh:kh + 2 * h:2, kw:kw + 2 * wd:2].set(t)
            out = out + canvas[:, :, 1:1 + 2 * h, 1:1 + 2 * wd]
    return out + b.reshape(1, cout, 1, 1)


def generator_reference(params, x, final_act="tanh", eps=1e-5):
    y = x.astype(jnp.float32)
    for p in params:
        y = _ref_conv_transpose(y, p["W"], p["b"])
        if p["gamma"] is not None:
            mean = jnp.mean(y, axis=(0, 2, 3), keepdims=True)
            var = jnp.mean((y - mean) ** 2, axis=(0, 2, 3), keepdims=True)
            y = (y - mean) * lax.rsqrt(var + eps)
            y = y * p["gamma"].reshape(1, -1, 1, 1) + p["beta"].reshape(1, -1, 1, 1)
            y = jnp.maximum(y, 0.0)
        else:
            y = _apply_act(y, final_act)
    return y


# ----------------------------------- main --------------------------------------

if __name__ == "__main__":
    key = jax.random.PRNGKey(0)
    pkey, xkey = jax.random.split(key)

    # Small config consistent with the module: latent_dim=16, num_doublesize=3,
    # num_filters=8, out_channels=3.  Batch 8 so that every lane dimension in
    # the fused kernel (128 / 512 / 2048 / 8192) is a multiple of 128.
    params = prepare_params(init_generator_params(
        pkey, out_channels=3, latent_dim=16, num_doublesize=3, num_filters=8))
    x = jax.random.normal(xkey, (8, 16, 4, 4), jnp.float32)

    fwd = jax.jit(functools.partial(generator_forward, final_act="tanh"))
    out = jax.block_until_ready(fwd(params, x))

    # 3 stride-2 transposed-conv layers: 4 -> 8 -> 16 -> 32 spatial.
    assert out.shape == (8, 3, 32, 32), out.shape
    assert bool(jnp.all(jnp.isfinite(out)))
    assert bool(jnp.all(jnp.abs(out) <= 1.0 + 1e-6))      # tanh range

    # Pure-JAX f32 reference (kernel uses bf16 MXU inputs -> loose tolerance).
    ref = generator_reference(params, x, final_act="tanh")
    err = float(jnp.max(jnp.abs(out - ref)))
    assert err < 3e-2, f"max |kernel - reference| = {err}"

    print("KERNEL_OK")
</pallas_src>

<mosaic_0001>
module attributes {stable_mosaic.version = 11 : i64} {
  func.func @kernel(%arg0: i32, %arg1: memref<16x128xf32, #tpu.memory_space<vmem>>, %arg2: memref<9x16x16xbf16, #tpu.memory_space<vmem>>, %arg3: memref<16x1xf32, #tpu.memory_space<vmem>>, %arg4: memref<16x1xf32, #tpu.memory_space<vmem>>, %arg5: memref<9x8x16xbf16, #tpu.memory_space<vmem>>, %arg6: memref<8x1xf32, #tpu.memory_space<vmem>>, %arg7: memref<8x1xf32, #tpu.memory_space<vmem>>, %arg8: memref<9x3x8xbf16, #tpu.memory_space<vmem>>, %arg9: memref<3x1xf32, #tpu.memory_space<vmem>>, %arg10: memref<1x128xi32, #tpu.memory_space<vmem>>, %arg11: memref<1x128xi32, #tpu.memory_space<vmem>>, %arg12: memref<1x512xi32, #tpu.memory_space<vmem>>, %arg13: memref<1x512xi32, #tpu.memory_space<vmem>>, %arg14: memref<1x2048xi32, #tpu.memory_space<vmem>>, %arg15: memref<1x2048xi32, #tpu.memory_space<vmem>>, %arg16: memref<3x8192xf32, #tpu.memory_space<vmem>>) attributes {dimension_semantics = [#tpu.dimension_semantics<arbitrary>], iteration_bounds = array<i64: 1>, scalar_prefetch = 0 : i64, scratch_operands = 0 : i64, tpu.core_type = #tpu.core_type<tc>, window_params = [{pipeline_mode = #tpu.pipeline_mode<synchronous>, transform_indices = @transform_0, window_bounds = array<i64: 16, 128>}, {pipeline_mode = #tpu.pipeline_mode<synchronous>, transform_indices = @transform_1, window_bounds = array<i64: 9, 16, 16>}, {pipeline_mode = #tpu.pipeline_mode<synchronous>, transform_indices = @transform_2, window_bounds = array<i64: 16, 1>}, {pipeline_mode = #tpu.pipeline_mode<synchronous>, transform_indices = @transform_3, window_bounds = array<i64: 16, 1>}, {pipeline_mode = #tpu.pipeline_mode<synchronous>, transform_indices = @transform_4, window_bounds = array<i64: 9, 8, 16>}, {pipeline_mode = #tpu.pipeline_mode<synchronous>, transform_indices = @transform_5, window_bounds = array<i64: 8, 1>}, {pipeline_mode = #tpu.pipeline_mode<synchronous>, transform_indices = @transform_6, window_bounds = array<i64: 8, 1>}, {pipeline_mode = #tpu.pipeline_mode<synchronous>, transform_indices = @transform_7, window_bounds = array<i64: 9, 3, 8>}, {pipeline_mode = #tpu.pipeline_mode<synchronous>, transform_indices = @transform_8, window_bounds = array<i64: 3, 1>}, {pipeline_mode = #tpu.pipeline_mode<synchronous>, transform_indices = @transform_9, window_bounds = array<i64: 1, 128>}, {pipeline_mode = #tpu.pipeline_mode<synchronous>, transform_indices = @transform_10, window_bounds = array<i64: 1, 128>}, {pipeline_mode = #tpu.pipeline_mode<synchronous>, transform_indices = @transform_11, window_bounds = array<i64: 1, 512>}, {pipeline_mode = #tpu.pipeline_mode<synchronous>, transform_indices = @transform_12, window_bounds = array<i64: 1, 512>}, {pipeline_mode = #tpu.pipeline_mode<synchronous>, transform_indices = @transform_13, window_bounds = array<i64: 1, 2048>}, {pipeline_mode = #tpu.pipeline_mode<synchronous>, transform_indices = @transform_14, window_bounds = array<i64: 1, 2048>}, {pipeline_mode = #tpu.pipeline_mode<synchronous>, transform_indices = @transform_15, window_bounds = array<i64: 3, 8192>}]} {
    %c0 = arith.constant 0 : index
    %c0_0 = arith.constant 0 : index
    %0 = vector.load %arg1[%c0, %c0_0] : memref<16x128xf32, #tpu.memory_space<vmem>>, vector<16x128xf32>
    %1 = arith.truncf %0 : vector<16x128xf32> to vector<16x128xbf16>
    %c0_1 = arith.constant 0 : index
    %c0_2 = arith.constant 0 : index
    %c0_3 = arith.constant 0 : index
    %2 = vector.load %arg2[%c0_1, %c0_2, %c0_3] : memref<9x16x16xbf16, #tpu.memory_space<vmem>>, vector<1x16x16xbf16>
    %3 = vector.shape_cast %2 : vector<1x16x16xbf16> to vector<16x16xbf16>
    %cst = arith.constant dense<0.000000e+00> : vector<16x128xf32>
    %4 = tpu.matmul %3, %1, %cst {dimension_numbers = #tpu.dot_dimension_numbers<[1], [0], [0], [1], [0, 0, 1, 1], [], []>} : vector<16x16xbf16>, vector<16x128xbf16>, vector<16x128xf32> -> vector<16x128xf32>
    %c1 = arith.constant 1 : index
    %c0_4 = arith.constant 0 : index
    %c0_5 = arith.constant 0 : index
    %5 = vector.load %arg2[%c1, %c0_4, %c0_5] : memref<9x16x16xbf16, #tpu.memory_space<vmem>>, vector<1x16x16xbf16>
    %6 = vector.shape_cast %5 : vector<1x16x16xbf16> to vector<16x16xbf16>
    %cst_6 = arith.constant dense<0.000000e+00> : vector<16x128xf32>
    %7 = tpu.matmul %6, %1, %cst_6 {dimension_numbers = #tpu.dot_dimension_numbers<[1], [0], [0], [1], [0, 0, 1, 1], [], []>} : vector<16x16xbf16>, vector<16x128xbf16>, vector<16x128xf32> -> vector<16x128xf32>
    %c2 = arith.constant 2 : index
    %c0_7 = arith.constant 0 : index
    %c0_8 = arith.constant 0 : index
    %8 = vector.load %arg2[%c2, %c0_7, %c0_8] : memref<9x16x16xbf16, #tpu.memory_space<vmem>>, vector<1x16x16xbf16>
    %9 = vector.shape_cast %8 : vector<1x16x16xbf16> to vector<16x16xbf16>
    %cst_9 = arith.constant dense<0.000000e+00> : vector<16x128xf32>
    %10 = tpu.matmul %9, %1, %cst_9 {dimension_numbers = #tpu.dot_dimension_numbers<[1], [0], [0], [1], [0, 0, 1, 1], [], []>} : vector<16x16xbf16>, vector<16x128xbf16>, vector<16x128xf32> -> vector<16x128xf32>
    %c3 = arith.constant 3 : index
    %c0_10 = arith.constant 0 : index
    %c0_11 = arith.constant 0 : index
    %11 = vector.load %arg2[%c3, %c0_10, %c0_11] : memref<9x16x16xbf16, #tpu.memory_space<vmem>>, vector<1x16x16xbf16>
    %12 = vector.shape_cast %11 : vector<1x16x16xbf16> to vector<16x16xbf16>
    %cst_12 = arith.constant dense<0.000000e+00> : vector<16x128xf32>
    %13 = tpu.matmul %12, %1, %cst_12 {dimension_numbers = #tpu.dot_dimension_numbers<[1], [0], [0], [1], [0, 0, 1, 1], [], []>} : vector<16x16xbf16>, vector<16x128xbf16>, vector<16x128xf32> -> vector<16x128xf32>
    %c4 = arith.constant 4 : index
    %c0_13 = arith.constant 0 : index
    %c0_14 = arith.constant 0 : index
    %14 = vector.load %arg2[%c4, %c0_13, %c0_14] : memref<9x16x16xbf16, #tpu.memory_space<vmem>>, vector<1x16x16xbf16>
    %15 = vector.shape_cast %14 : vector<1x16x16xbf16> to vector<16x16xbf16>
    %cst_15 = arith.constant dense<0.000000e+00> : vector<16x128xf32>
    %16 = tpu.matmul %15, %1, %cst_15 {dimension_numbers = #tpu.dot_dimension_numbers<[1], [0], [0], [1], [0, 0, 1, 1], [], []>} : vector<16x16xbf16>, vector<16x128xbf16>, vector<16x128xf32> -> vector<16x128xf32>
    %c5 = arith.constant 5 : index
    %c0_16 = arith.constant 0 : index
    %c0_17 = arith.constant 0 : index
    %17 = vector.load %arg2[%c5, %c0_16, %c0_17] : memref<9x16x16xbf16, #tpu.memory_space<vmem>>, vector<1x16x16xbf16>
    %18 = vector.shape_cast %17 : vector<1x16x16xbf16> to vector<16x16xbf16>
    %cst_18 = arith.constant dense<0.000000e+00> : vector<16x128xf32>
    %19 = tpu.matmul %18, %1, %cst_18 {dimension_numbers = #tpu.dot_dimension_numbers<[1], [0], [0], [1], [0, 0, 1, 1], [], []>} : vector<16x16xbf16>, vector<16x128xbf16>, vector<16x128xf32> -> vector<16x128xf32>
    %c6 = arith.constant 6 : index
    %c0_19 = arith.constant 0 : index
    %c0_20 = arith.constant 0 : index
    %20 = vector.load %arg2[%c6, %c0_19, %c0_20] : memref<9x16x16xbf16, #tpu.memory_space<vmem>>, vector<1x16x16xbf16>
    %21 = vector.shape_cast %20 : vector<1x16x16xbf16> to vector<16x16xbf16>
    %cst_21 = arith.constant dense<0.000000e+00> : vector<16x128xf32>
    %22 = tpu.matmul %21, %1, %cst_21 {dimension_numbers = #tpu.dot_dimension_numbers<[1], [0], [0], [1], [0, 0, 1, 1], [], []>} : vector<16x16xbf16>, vector<16x128xbf16>, vector<16x128xf32> -> vector<16x128xf32>
    %c7 = arith.constant 7 : index
    %c0_22 = arith.constant 0 : index
    %c0_23 = arith.constant 0 : index
    %23 = vector.load %arg2[%c7, %c0_22, %c0_23] : memref<9x16x16xbf16, #tpu.memory_space<vmem>>, vector<1x16x16xbf16>
    %24 = vector.shape_cast %23 : vector<1x16x16xbf16> to vector<16x16xbf16>
    %cst_24 = arith.constant dense<0.000000e+00> : vector<16x128xf32>
    %25 = tpu.matmul %24, %1, %cst_24 {dimension_numbers = #tpu.dot_dimension_numbers<[1], [0], [0], [1], [0, 0, 1, 1], [], []>} : vector<16x16xbf16>, vector<16x128xbf16>, vector<16x128xf32> -> vector<16x128xf32>
    %c8 = arith.constant 8 : index
    %c0_25 = arith.constant 0 : index
    %c0_26 = arith.constant 0 : index
    %26 = vector.load %arg2[%c8, %c0_25, %c0_26] : memref<9x16x16xbf16, #tpu.memory_space<vmem>>, vector<1x16x16xbf16>
    %27 = vector.shape_cast %26 : vector<1x16x16xbf16> to vector<16x16xbf16>
    %cst_27 = arith.constant dense<0.000000e+00> : vector<16x128xf32>
    %28 = tpu.matmul %27, %1, %cst_27 {dimension_numbers = #tpu.dot_dimension_numbers<[1], [0], [0], [1], [0, 0, 1, 1], [], []>} : vector<16x16xbf16>, vector<16x128xbf16>, vector<16x128xf32> -> vector<16x128xf32>
    %c0_28 = arith.constant 0 : index
    %c0_29 = arith.constant 0 : index
    %29 = vector.load %arg10[%c0_28, %c0_29] : memref<1x128xi32, #tpu.memory_space<vmem>>, vector<1x128xi32>
    %c0_30 = arith.constant 0 : index
    %c0_31 = arith.constant 0 : index
    %30 = vector.load %arg11[%c0_30, %c0_31] : memref<1x128xi32, #tpu.memory_space<vmem>>, vector<1x128xi32>
    %cst_32 = arith.constant 0.000000e+00 : f32
    %31 = vector.broadcast %cst_32 : f32 to vector<16x128xf32>
    %c0_i32 = arith.constant 0 : i32
    %32 = vector.broadcast %c0_i32 : i32 to vector<1x128xi32>
    %33 = arith.andi %30, %32 : vector<1x128xi32>
    %c0_i32_33 = arith.constant 0 : i32
    %34 = vector.broadcast %c0_i32_33 : i32 to vector<1x128xi32>
    %35 = arith.cmpi eq, %33, %34 : vector<1x128xi32>
    %c3_i32 = arith.constant 3 : i32
    %36 = vector.broadcast %c3_i32 : i32 to vector<1x128xi32>
    %37 = arith.cmpi slt, %30, %36 : vector<1x128xi32>
    %38 = arith.andi %35, %37 : vector<1x128xi1>
    %c127_i32 = arith.constant 127 : i32
    %39 = tpu.dynamic_rotate %13 by %c127_i32 dim 1 : vector<16x128xf32>, i32 -> vector<16x128xf32>
    %40 = vector.shape_cast %38 : vector<1x128xi1> to vector<1x128xi1>
    %41 = vector.broadcast %40 : vector<1x128xi1> to vector<16x128xi1>
    %42 = arith.select %41, %39, %31 : vector<16x128xi1>, vector<16x128xf32>
    %43 = arith.addf %19, %42 : vector<16x128xf32>
    %cst_34 = arith.constant 0.000000e+00 : f32
    %44 = vector.broadcast %cst_34 : f32 to vector<16x128xf32>
    %c0_i32_35 = arith.constant 0 : i32
    %45 = vector.broadcast %c0_i32_35 : i32 to vector<1x128xi32>
    %46 = arith.andi %29, %45 : vector<1x128xi32>
    %c0_i32_36 = arith.constant 0 : i32
    %47 = vector.broadcast %c0_i32_36 : i32 to vector<1x128xi32>
    %48 = arith.cmpi eq, %46, %47 : vector<1x128xi32>
    %c3_i32_37 = arith.constant 3 : i32
    %49 = vector.broadcast %c3_i32_37 : i32 to vector<1x128xi32>
    %50 = arith.cmpi slt, %29, %49 : vector<1x128xi32>
    %51 = arith.andi %48, %50 : vector<1x128xi1>
    %c124_i32 = arith.constant 124 : i32
    %52 = tpu.dynamic_rotate %7 by %c124_i32 dim 1 : vector<16x128xf32>, i32 -> vector<16x128xf32>
    %53 = vector.shape_cast %51 : vector<1x128xi1> to vector<1x128xi1>
    %54 = vector.broadcast %53 : vector<1x128xi1> to vector<16x128xi1>
    %55 = arith.select %54, %52, %44 : vector<16x128xi1>, vector<16x128xf32>
    %56 = arith.addf %25, %55 : vector<16x128xf32>
    %cst_38 = arith.constant 0.000000e+00 : f32
    %57 = vector.broadcast %cst_38 : f32 to vector<16x128xf32>
    %c0_i32_39 = arith.constant 0 : i32
    %58 = vector.broadcast %c0_i32_39 : i32 to vector<1x128xi32>
    %59 = arith.andi %30, %58 : vector<1x128xi32>
    %c0_i32_40 = arith.constant 0 : i32
    %60 = vector.broadcast %c0_i32_40 : i32 to vector<1x128xi32>
    %61 = arith.cmpi eq, %59, %60 : vector<1x128xi32>
    %c3_i32_41 = arith.constant 3 : i32
    %62 = vector.broadcast %c3_i32_41 : i32 to vector<1x128xi32>
    %63 = arith.cmpi slt, %30, %62 : vector<1x128xi32>
    %64 = arith.andi %61, %63 : vector<1x128xi1>
    %c127_i32_42 = arith.constant 127 : i32
    %65 = tpu.dynamic_rotate %22 by %c127_i32_42 dim 1 : vector<16x128xf32>, i32 -> vector<16x128xf32>
    %66 = vector.shape_cast %64 : vector<1x128xi1> to vector<1x128xi1>
    %67 = vector.broadcast %66 : vector<1x128xi1> to vector<16x128xi1>
    %68 = arith.select %67, %65, %57 : vector<16x128xi1>, vector<16x128xf32>
    %69 = arith.addf %28, %68 : vector<16x128xf32>
    %cst_43 = arith.constant 0.000000e+00 : f32
    %70 = vector.broadcast %cst_43 : f32 to vector<16x128xf32>
    %c0_i32_44 = arith.constant 0 : i32
    %71 = vector.broadcast %c0_i32_44 : i32 to vector<1x128xi32>
    %72 = arith.andi %29, %71 : vector<1x128xi32>
    %c0_i32_45 = arith.constant 0 : i32
    %73 = vector.broadcast %c0_i32_45 : i32 to vector<1x128xi32>
    %74 = arith.cmpi eq, %72, %73 : vector<1x128xi32>
    %c3_i32_46 = arith.constant 3 : i32
    %75 = vector.broadcast %c3_i32_46 : i32 to vector<1x128xi32>
    %76 = arith.cmpi slt, %29, %75 : vector<1x128xi32>
    %77 = arith.andi %74, %76 : vector<1x128xi1>
    %c124_i32_47 = arith.constant 124 : i32
    %78 = tpu.dynamic_rotate %10 by %c124_i32_47 dim 1 : vector<16x128xf32>, i32 -> vector<16x128xf32>
    %79 = vector.shape_cast %77 : vector<1x128xi1> to vector<1x128xi1>
    %80 = vector.broadcast %79 : vector<1x128xi1> to vector<16x128xi1>
    %81 = arith.select %80, %78, %70 : vector<16x128xi1>, vector<16x128xf32>
    %82 = arith.addf %69, %81 : vector<16x128xf32>
    %cst_48 = arith.constant 0.000000e+00 : f32
    %83 = vector.broadcast %cst_48 : f32 to vector<16x128xf32>
    %c0_i32_49 = arith.constant 0 : i32
    %84 = vector.broadcast %c0_i32_49 : i32 to vector<1x128xi32>
    %85 = arith.andi %30, %84 : vector<1x128xi32>
    %c0_i32_50 = arith.constant 0 : i32
    %86 = vector.broadcast %c0_i32_50 : i32 to vector<1x128xi32>
    %87 = arith.cmpi eq, %85, %86 : vector<1x128xi32>
    %c3_i32_51 = arith.constant 3 : i32
    %88 = vector.broadcast %c3_i32_51 : i32 to vector<1x128xi32>
    %89 = arith.cmpi slt, %30, %88 : vector<1x128xi32>
    %90 = arith.andi %87, %89 : vector<1x128xi1>
    %c127_i32_52 = arith.constant 127 : i32
    %91 = tpu.dynamic_rotate %4 by %c127_i32_52 dim 1 : vector<16x128xf32>, i32 -> vector<16x128xf32>
    %92 = vector.shape_cast %90 : vector<1x128xi1> to vector<1x128xi1>
    %93 = vector.broadcast %92 : vector<1x128xi1> to vector<16x128xi1>
    %94 = arith.select %93, %91, %83 : vector<16x128xi1>, vector<16x128xf32>
    %cst_53 = arith.constant 0.000000e+00 : f32
    %95 = vector.broadcast %cst_53 : f32 to vector<16x128xf32>
    %c0_i32_54 = arith.constant 0 : i32
    %96 = vector.broadcast %c0_i32_54 : i32 to vector<1x128xi32>
    %97 = arith.andi %29, %96 : vector<1x128xi32>
    %c0_i32_55 = arith.constant 0 : i32
    %98 = vector.broadcast %c0_i32_55 : i32 to vector<1x128xi32>
    %99 = arith.cmpi eq, %97, %98 : vector<1x128xi32>
    %c3_i32_56 = arith.constant 3 : i32
    %100 = vector.broadcast %c3_i32_56 : i32 to vector<1x128xi32>
    %101 = arith.cmpi slt, %29, %100 : vector<1x128xi32>
    %102 = arith.andi %99, %101 : vector<1x128xi1>
    %c124_i32_57 = arith.constant 124 : i32
    %103 = tpu.dynamic_rotate %94 by %c124_i32_57 dim 1 : vector<16x128xf32>, i32 -> vector<16x128xf32>
    %104 = vector.shape_cast %102 : vector<1x128xi1> to vector<1x128xi1>
    %105 = vector.broadcast %104 : vector<1x128xi1> to vector<16x128xi1>
    %106 = arith.select %105, %103, %95 : vector<16x128xi1>, vector<16x128xf32>
    %107 = arith.addf %82, %106 : vector<16x128xf32>
    %108 = tpu.concatenate %16, %43, %56, %107 in 1 : vector<16x128xf32>, vector<16x128xf32>, vector<16x128xf32>, vector<16x128xf32> -> vector<16x512xf32>
    %cst_58 = arith.constant dense<0.000000e+00> : vector<16xf32>
    %109 = vector.multi_reduction <add>, %108, %cst_58 [1] : vector<16x512xf32> to vector<16xf32>
    %110 = vector.shape_cast %109 : vector<16xf32> to vector<16x1xf32>
    %cst_59 = arith.constant 0.001953125 : f32
    %111 = vector.broadcast %cst_59 : f32 to vector<16x1xf32>
    %112 = arith.mulf %110, %111 : vector<16x1xf32>
    %113 = vector.broadcast %112 : vector<16x1xf32> to vector<16x512xf32>
    %114 = arith.subf %108, %113 : vector<16x512xf32>
    %115 = arith.mulf %114, %114 : vector<16x512xf32>
    %cst_60 = arith.constant dense<0.000000e+00> : vector<16xf32>
    %116 = vector.multi_reduction <add>, %115, %cst_60 [1] : vector<16x512xf32> to vector<16xf32>
    %117 = vector.shape_cast %116 : vector<16xf32> to vector<16x1xf32>
    %cst_61 = arith.constant 0.001953125 : f32
    %118 = vector.broadcast %cst_61 : f32 to vector<16x1xf32>
    %119 = arith.mulf %117, %118 : vector<16x1xf32>
    %c0_62 = arith.constant 0 : index
    %c0_63 = arith.constant 0 : index
    %120 = vector.load %arg3[%c0_62, %c0_63] : memref<16x1xf32, #tpu.memory_space<vmem>>, vector<16x1xf32>
    %c0_64 = arith.constant 0 : index
    %c0_65 = arith.constant 0 : index
    %121 = vector.load %arg4[%c0_64, %c0_65] : memref<16x1xf32, #tpu.memory_space<vmem>>, vector<16x1xf32>
    %cst_66 = arith.constant 9.99999974E-6 : f32
    %122 = vector.broadcast %cst_66 : f32 to vector<16x1xf32>
    %123 = arith.addf %119, %122 : vector<16x1xf32>
    %124 = math.rsqrt %123 : vector<16x1xf32>
    %125 = arith.mulf %120, %124 : vector<16x1xf32>
    %126 = vector.broadcast %125 : vector<16x1xf32> to vector<16x512xf32>
    %127 = arith.mulf %114, %126 : vector<16x512xf32>
    %128 = vector.broadcast %121 : vector<16x1xf32> to vector<16x512xf32>
    %129 = arith.addf %127, %128 : vector<16x512xf32>
    %cst_67 = arith.constant 0.000000e+00 : f32
    %130 = vector.broadcast %cst_67 : f32 to vector<16x512xf32>
    %131 = arith.maximumf %129, %130 : vector<16x512xf32>
    %132 = arith.truncf %131 : vector<16x512xf32> to vector<16x512xbf16>
    %c0_68 = arith.constant 0 : index
    %c0_69 = arith.constant 0 : index
    %c0_70 = arith.constant 0 : index
    %133 = vector.load %arg5[%c0_68, %c0_69, %c0_70] : memref<9x8x16xbf16, #tpu.memory_space<vmem>>, vector<1x8x16xbf16>
    %134 = vector.shape_cast %133 : vector<1x8x16xbf16> to vector<8x16xbf16>
    %cst_71 = arith.constant dense<0.000000e+00> : vector<8x512xf32>
    %135 = tpu.matmul %134, %132, %cst_71 {dimension_numbers = #tpu.dot_dimension_numbers<[1], [0], [0], [1], [0, 0, 1, 1], [], []>} : vector<8x16xbf16>, vector<16x512xbf16>, vector<8x512xf32> -> vector<8x512xf32>
    %c1_72 = arith.constant 1 : index
    %c0_73 = arith.constant 0 : index
    %c0_74 = arith.constant 0 : index
    %136 = vector.load %arg5[%c1_72, %c0_73, %c0_74] : memref<9x8x16xbf16, #tpu.memory_space<vmem>>, vector<1x8x16xbf16>
    %137 = vector.shape_cast %136 : vector<1x8x16xbf16> to vector<8x16xbf16>
    %cst_75 = arith.constant dense<0.000000e+00> : vector<8x512xf32>
    %138 = tpu.matmul %137, %132, %cst_75 {dimension_numbers = #tpu.dot_dimension_numbers<[1], [0], [0], [1], [0, 0, 1, 1], [], []>} : vector<8x16xbf16>, vector<16x512xbf16>, vector<8x512xf32> -> vector<8x512xf32>
    %c2_76 = arith.constant 2 : index
    %c0_77 = arith.constant 0 : index
    %c0_78 = arith.constant 0 : index
    %139 = vector.load %arg5[%c2_76, %c0_77, %c0_78] : memref<9x8x16xbf16, #tpu.memory_space<vmem>>, vector<1x8x16xbf16>
    %140 = vector.shape_cast %139 : vector<1x8x16xbf16> to vector<8x16xbf16>
    %cst_79 = arith.constant dense<0.000000e+00> : vector<8x512xf32>
    %141 = tpu.matmul %140, %132, %cst_79 {dimension_numbers = #tpu.dot_dimension_numbers<[1], [0], [0], [1], [0, 0, 1, 1], [], []>} : vector<8x16xbf16>, vector<16x512xbf16>, vector<8x512xf32> -> vector<8x512xf32>
    %c3_80 = arith.constant 3 : index
    %c0_81 = arith.constant 0 : index
    %c0_82 = arith.constant 0 : index
    %142 = vector.load %arg5[%c3_80, %c0_81, %c0_82] : memref<9x8x16xbf16, #tpu.memory_space<vmem>>, vector<1x8x16xbf16>
    %143 = vector.shape_cast %142 : vector<1x8x16xbf16> to vector<8x16xbf16>
    %cst_83 = arith.constant dense<0.000000e+00> : vector<8x512xf32>
    %144 = tpu.matmul %143, %132, %cst_83 {dimension_numbers = #tpu.dot_dimension_numbers<[1], [0], [0], [1], [0, 0, 1, 1], [], []>} : vector<8x16xbf16>, vector<16x512xbf16>, vector<8x512xf32> -> vector<8x512xf32>
    %c4_84 = arith.constant 4 : index
    %c0_85 = arith.constant 0 : index
    %c0_86 = arith.constant 0 : index
    %145 = vector.load %arg5[%c4_84, %c0_85, %c0_86] : memref<9x8x16xbf16, #tpu.memory_space<vmem>>, vector<1x8x16xbf16>
    %146 = vector.shape_cast %145 : vector<1x8x16xbf16> to vector<8x16xbf16>
    %cst_87 = arith.constant dense<0.000000e+00> : vector<8x512xf32>
    %147 = tpu.matmul %146, %132, %cst_87 {dimension_numbers = #tpu.dot_dimension_numbers<[1], [0], [0], [1], [0, 0, 1, 1], [], []>} : vector<8x16xbf16>, vector<16x512xbf16>, vector<8x512xf32> -> vector<8x512xf32>
    %c5_88 = arith.constant 5 : index
    %c0_89 = arith.constant 0 : index
    %c0_90 = arith.constant 0 : index
    %148 = vector.load %arg5[%c5_88, %c0_89, %c0_90] : memref<9x8x16xbf16, #tpu.memory_space<vmem>>, vector<1x8x16xbf16>
    %149 = vector.shape_cast %148 : vector<1x8x16xbf16> to vector<8x16xbf16>
    %cst_91 = arith.constant dense<0.000000e+00> : vector<8x512xf32>
    %150 = tpu.matmul %149, %132, %cst_91 {dimension_numbers = #tpu.dot_dimension_numbers<[1], [0], [0], [1], [0, 0, 1, 1], [], []>} : vector<8x16xbf16>, vector<16x512xbf16>, vector<8x512xf32> -> vector<8x512xf32>
    %c6_92 = arith.constant 6 : index
    %c0_93 = arith.constant 0 : index
    %c0_94 = arith.constant 0 : index
    %151 = vector.load %arg5[%c6_92, %c0_93, %c0_94] : memref<9x8x16xbf16, #tpu.memory_space<vmem>>, vector<1x8x16xbf16>
    %152 = vector.shape_cast %151 : vector<1x8x16xbf16> to vector<8x16xbf16>
    %cst_95 = arith.constant dense<0.000000e+00> : vector<8x512xf32>
    %153 = tpu.matmul %152, %132, %cst_95 {dimension_numbers = #tpu.dot_dimension_numbers<[1], [0], [0], [1], [0, 0, 1, 1], [], []>} : vector<8x16xbf16>, vector<16x512xbf16>, vector<8x512xf32> -> vector<8x512xf32>
    %c7_96 = arith.constant 7 : index
    %c0_97 = arith.constant 0 : index
    %c0_98 = arith.constant 0 : index
    %154 = vector.load %arg5[%c7_96, %c0_97, %c0_98] : memref<9x8x16xbf16, #tpu.memory_space<vmem>>, vector<1x8x16xbf16>
    %155 = vector.shape_cast %154 : vector<1x8x16xbf16> to vector<8x16xbf16>
    %cst_99 = arith.constant dense<0.000000e+00> : vector<8x512xf32>
    %156 = tpu.matmul %155, %132, %cst_99 {dimension_numbers = #tpu.dot_dimension_numbers<[1], [0], [0], [1], [0, 0, 1, 1], [], []>} : vector<8x16xbf16>, vector<16x512xbf16>, vector<8x512xf32> -> vector<8x512xf32>
    %c8_100 = arith.constant 8 : index
    %c0_101 = arith.constant 0 : index
    %c0_102 = arith.constant 0 : index
    %157 = vector.load %arg5[%c8_100, %c0_101, %c0_102] : memref<9x8x16xbf16, #tpu.memory_space<vmem>>, vector<1x8x16xbf16>
    %158 = vector.shape_cast %157 : vector<1x8x16xbf16> to vector<8x16xbf16>
    %cst_103 = arith.constant dense<0.000000e+00> : vector<8x512xf32>
    %159 = tpu.matmul %158, %132, %cst_103 {dimension_numbers = #tpu.dot_dimension_numbers<[1], [0], [0], [1], [0, 0, 1, 1], [], []>} : vector<8x16xbf16>, vector<16x512xbf16>, vector<8x512xf32> -> vector<8x512xf32>
    %c0_104 = arith.constant 0 : index
    %c0_105 = arith.constant 0 : index
    %160 = vector.load %arg12[%c0_104, %c0_105] : memref<1x512xi32, #tpu.memory_space<vmem>>, vector<1x512xi32>
    %c0_106 = arith.constant 0 : index
    %c0_107 = arith.constant 0 : index
    %161 = vector.load %arg13[%c0_106, %c0_107] : memref<1x512xi32, #tpu.memory_space<vmem>>, vector<1x512xi32>
    %cst_108 = arith.constant 0.000000e+00 : f32
    %162 = vector.broadcast %cst_108 : f32 to vector<8x512xf32>
    %c1_i32 = arith.constant 1 : i32
    %163 = vector.broadcast %c1_i32 : i32 to vector<1x512xi32>
    %164 = arith.andi %161, %163 : vector<1x512xi32>
    %c0_i32_109 = arith.constant 0 : i32
    %165 = vector.broadcast %c0_i32_109 : i32 to vector<1x512xi32>
    %166 = arith.cmpi eq, %164, %165 : vector<1x512xi32>
    %c384_i32 = arith.constant 384 : i32
    %167 = tpu.dynamic_rotate %144 by %c384_i32 dim 1 : vector<8x512xf32>, i32 -> vector<8x512xf32>
    %168 = vector.shape_cast %166 : vector<1x512xi1> to vector<1x512xi1>
    %169 = vector.broadcast %168 : vector<1x512xi1> to vector<8x512xi1>
    %170 = arith.select %169, %167, %162 : vector<8x512xi1>, vector<8x512xf32>
    %c1_i32_110 = arith.constant 1 : i32
    %171 = vector.broadcast %c1_i32_110 : i32 to vector<1x512xi32>
    %172 = arith.andi %161, %171 : vector<1x512xi32>
    %c1_i32_111 = arith.constant 1 : i32
    %173 = vector.broadcast %c1_i32_111 : i32 to vector<1x512xi32>
    %174 = arith.cmpi eq, %172, %173 : vector<1x512xi32>
    %c7_i32 = arith.constant 7 : i32
    %175 = vector.broadcast %c7_i32 : i32 to vector<1x512xi32>
    %176 = arith.cmpi slt, %161, %175 : vector<1x512xi32>
    %177 = arith.andi %174, %176 : vector<1x512xi1>
    %c127_i32_112 = arith.constant 127 : i32
    %178 = tpu.dynamic_rotate %144 by %c127_i32_112 dim 1 : vector<8x512xf32>, i32 -> vector<8x512xf32>
    %179 = vector.shape_cast %177 : vector<1x512xi1> to vector<1x512xi1>
    %180 = vector.broadcast %179 : vector<1x512xi1> to vector<8x512xi1>
    %181 = arith.select %180, %178, %170 : vector<8x512xi1>, vector<8x512xf32>
    %182 = arith.addf %150, %181 : vector<8x512xf32>
    %cst_113 = arith.constant 0.000000e+00 : f32
    %183 = vector.broadcast %cst_113 : f32 to vector<8x512xf32>
    %c1_i32_114 = arith.constant 1 : i32
    %184 = vector.broadcast %c1_i32_114 : i32 to vector<1x512xi32>
    %185 = arith.andi %160, %184 : vector<1x512xi32>
    %c0_i32_115 = arith.constant 0 : i32
    %186 = vector.broadcast %c0_i32_115 : i32 to vector<1x512xi32>
    %187 = arith.cmpi eq, %185, %186 : vector<1x512xi32>
    %c256_i32 = arith.constant 256 : i32
    %188 = tpu.dynamic_rotate %138 by %c256_i32 dim 1 : vector<8x512xf32>, i32 -> vector<8x512xf32>
    %189 = vector.shape_cast %187 : vector<1x512xi1> to vector<1x512xi1>
    %190 = vector.broadcast %189 : vector<1x512xi1> to vector<8x512xi1>
    %191 = arith.select %190, %188, %183 : vector<8x512xi1>, vector<8x512xf32>
    %c1_i32_116 = arith.constant 1 : i32
    %192 = vector.broadcast %c1_i32_116 : i32 to vector<1x512xi32>
    %193 = arith.andi %160, %192 : vector<1x512xi32>
    %c1_i32_117 = arith.constant 1 : i32
    %194 = vector.broadcast %c1_i32_117 : i32 to vector<1x512xi32>
    %195 = arith.cmpi eq, %193, %194 : vector<1x512xi32>
    %c7_i32_118 = arith.constant 7 : i32
    %196 = vector.broadcast %c7_i32_118 : i32 to vector<1x512xi32>
    %197 = arith.cmpi slt, %160, %196 : vector<1x512xi32>
    %198 = arith.andi %195, %197 : vector<1x512xi1>
    %c252_i32 = arith.constant 252 : i32
    %199 = tpu.dynamic_rotate %138 by %c252_i32 dim 1 : vector<8x512xf32>, i32 -> vector<8x512xf32>
    %200 = vector.shape_cast %198 : vector<1x512xi1> to vector<1x512xi1>
    %201 = vector.broadcast %200 : vector<1x512xi1> to vector<8x512xi1>
    %202 = arith.select %201, %199, %191 : vector<8x512xi1>, vector<8x512xf32>
    %203 = arith.addf %156, %202 : vector<8x512xf32>
    %cst_119 = arith.constant 0.000000e+00 : f32
    %204 = vector.broadcast %cst_119 : f32 to vector<8x512xf32>
    %c1_i32_120 = arith.constant 1 : i32
    %205 = vector.broadcast %c1_i32_120 : i32 to vector<1x512xi32>
    %206 = arith.andi %161, %205 : vector<1x512xi32>
    %c0_i32_121 = arith.constant 0 : i32
    %207 = vector.broadcast %c0_i32_121 : i32 to vector<1x512xi32>
    %208 = arith.cmpi eq, %206, %207 : vector<1x512xi32>
    %c384_i32_122 = arith.constant 384 : i32
    %209 = tpu.dynamic_rotate %153 by %c384_i32_122 dim 1 : vector<8x512xf32>, i32 -> vector<8x512xf32>
    %210 = vector.shape_cast %208 : vector<1x512xi1> to vector<1x512xi1>
    %211 = vector.broadcast %210 : vector<1x512xi1> to vector<8x512xi1>
    %212 = arith.select %211, %209, %204 : vector<8x512xi1>, vector<8x512xf32>
    %c1_i32_123 = arith.constant 1 : i32
    %213 = vector.broadcast %c1_i32_123 : i32 to vector<1x512xi32>
    %214 = arith.andi %161, %213 : vector<1x512xi32>
    %c1_i32_124 = arith.constant 1 : i32
    %215 = vector.broadcast %c1_i32_124 : i32 to vector<1x512xi32>
    %216 = arith.cmpi eq, %214, %215 : vector<1x512xi32>
    %c7_i32_125 = arith.constant 7 : i32
    %217 = vector.broadcast %c7_i32_125 : i32 to vector<1x512xi32>
    %218 = arith.cmpi slt, %161, %217 : vector<1x512xi32>
    %219 = arith.andi %216, %218 : vector<1x512xi1>
    %c127_i32_126 = arith.constant 127 : i32
    %220 = tpu.dynamic_rotate %153 by %c127_i32_126 dim 1 : vector<8x512xf32>, i32 -> vector<8x512xf32>
    %221 = vector.shape_cast %219 : vector<1x512xi1> to vector<1x512xi1>
    %222 = vector.broadcast %221 : vector<1x512xi1> to vector<8x512xi1>
    %223 = arith.select %222, %220, %212 : vector<8x512xi1>, vector<8x512xf32>
    %224 = arith.addf %159, %223 : vector<8x512xf32>
    %cst_127 = arith.constant 0.000000e+00 : f32
    %225 = vector.broadcast %cst_127 : f32 to vector<8x512xf32>
    %c1_i32_128 = arith.constant 1 : i32
    %226 = vector.broadcast %c1_i32_128 : i32 to vector<1x512xi32>
    %227 = arith.andi %160, %226 : vector<1x512xi32>
    %c0_i32_129 = arith.constant 0 : i32
    %228 = vector.broadcast %c0_i32_129 : i32 to vector<1x512xi32>
    %229 = arith.cmpi eq, %227, %228 : vector<1x512xi32>
    %c256_i32_130 = arith.constant 256 : i32
    %230 = tpu.dynamic_rotate %141 by %c256_i32_130 dim 1 : vector<8x512xf32>, i32 -> vector<8x512xf32>
    %231 = vector.shape_cast %229 : vector<1x512xi1> to vector<1x512xi1>
    %232 = vector.broadcast %231 : vector<1x512xi1> to vector<8x512xi1>
    %233 = arith.select %232, %230, %225 : vector<8x512xi1>, vector<8x512xf32>
    %c1_i32_131 = arith.constant 1 : i32
    %234 = vector.broadcast %c1_i32_131 : i32 to vector<1x512xi32>
    %235 = arith.andi %160, %234 : vector<1x512xi32>
    %c1_i32_132 = arith.constant 1 : i32
    %236 = vector.broadcast %c1_i32_132 : i32 to vector<1x512xi32>
    %237 = arith.cmpi eq, %235, %236 : vector<1x512xi32>
    %c7_i32_133 = arith.constant 7 : i32
    %238 = vector.broadcast %c7_i32_133 : i32 to vector<1x512xi32>
    %239 = arith.cmpi slt, %160, %238 : vector<1x512xi32>
    %240 = arith.andi %237, %239 : vector<1x512xi1>
    %c252_i32_134 = arith.constant 252 : i32
    %241 = tpu.dynamic_rotate %141 by %c252_i32_134 dim 1 : vector<8x512xf32>, i32 -> vector<8x512xf32>
    %242 = vector.shape_cast %240 : vector<1x512xi1> to vector<1x512xi1>
    %243 = vector.broadcast %242 : vector<1x512xi1> to vector<8x512xi1>
    %244 = arith.select %243, %241, %233 : vector<8x512xi1>, vector<8x512xf32>
    %245 = arith.addf %224, %244 : vector<8x512xf32>
    %cst_135 = arith.constant 0.000000e+00 : f32
    %246 = vector.broadcast %cst_135 : f32 to vector<8x512xf32>
    %c1_i32_136 = arith.constant 1 : i32
    %247 = vector.broadcast %c1_i32_136 : i32 to vector<1x512xi32>
    %248 = arith.andi %161, %247 : vector<1x512xi32>
    %c0_i32_137 = arith.constant 0 : i32
    %249 = vector.broadcast %c0_i32_137 : i32 to vector<1x512xi32>
    %250 = arith.cmpi eq, %248, %249 : vector<1x512xi32>
    %c384_i32_138 = arith.constant 384 : i32
    %251 = tpu.dynamic_rotate %135 by %c384_i32_138 dim 1 : vector<8x512xf32>, i32 -> vector<8x512xf32>
    %252 = vector.shape_cast %250 : vector<1x512xi1> to vector<1x512xi1>
    %253 = vector.broadcast %252 : vector<1x512xi1> to vector<8x512xi1>
    %254 = arith.select %253, %251, %246 : vector<8x512xi1>, vector<8x512xf32>
    %c1_i32_139 = arith.constant 1 : i32
    %255 = vector.broadcast %c1_i32_139 : i32 to vector<1x512xi32>
    %256 = arith.andi %161, %255 : vector<1x512xi32>
    %c1_i32_140 = arith.constant 1 : i32
    %257 = vector.broadcast %c1_i32_140 : i32 to vector<1x512xi32>
    %258 = arith.cmpi eq, %256, %257 : vector<1x512xi32>
    %c7_i32_141 = arith.constant 7 : i32
    %259 = vector.broadcast %c7_i32_141 : i32 to vector<1x512xi32>
    %260 = arith.cmpi slt, %161, %259 : vector<1x512xi32>
    %261 = arith.andi %258, %260 : vector<1x512xi1>
    %c127_i32_142 = arith.constant 127 : i32
    %262 = tpu.dynamic_rotate %135 by %c127_i32_142 dim 1 : vector<8x512xf32>, i32 -> vector<8x512xf32>
    %263 = vector.shape_cast %261 : vector<1x512xi1> to vector<1x512xi1>
    %264 = vector.broadcast %263 : vector<1x512xi1> to vector<8x512xi1>
    %265 = arith.select %264, %262, %254 : vector<8x512xi1>, vector<8x512xf32>
    %cst_143 = arith.constant 0.000000e+00 : f32
    %266 = vector.broadcast %cst_143 : f32 to vector<8x512xf32>
    %c1_i32_144 = arith.constant 1 : i32
    %267 = vector.broadcast %c1_i32_144 : i32 to vector<1x512xi32>
    %268 = arith.andi %160, %267 : vector<1x512xi32>
    %c0_i32_145 = arith.constant 0 : i32
    %269 = vector.broadcast %c0_i32_145 : i32 to vector<1x512xi32>
    %270 = arith.cmpi eq, %268, %269 : vector<1x512xi32>
    %c256_i32_146 = arith.constant 256 : i32
    %271 = tpu.dynamic_rotate %265 by %c256_i32_146 dim 1 : vector<8x512xf32>, i32 -> vector<8x512xf32>
    %272 = vector.shape_cast %270 : vector<1x512xi1> to vector<1x512xi1>
    %273 = vector.broadcast %272 : vector<1x512xi1> to vector<8x512xi1>
    %274 = arith.select %273, %271, %266 : vector<8x512xi1>, vector<8x512xf32>
    %c1_i32_147 = arith.constant 1 : i32
    %275 = vector.broadcast %c1_i32_147 : i32 to vector<1x512xi32>
    %276 = arith.andi %160, %275 : vector<1x512xi32>
    %c1_i32_148 = arith.constant 1 : i32
    %277 = vector.broadcast %c1_i32_148 : i32 to vector<1x512xi32>
    %278 = arith.cmpi eq, %276, %277 : vector<1x512xi32>
    %c7_i32_149 = arith.constant 7 : i32
    %279 = vector.broadcast %c7_i32_149 : i32 to vector<1x512xi32>
    %280 = arith.cmpi slt, %160, %279 : vector<1x512xi32>
    %281 = arith.andi %278, %280 : vector<1x512xi1>
    %c252_i32_150 = arith.constant 252 : i32
    %282 = tpu.dynamic_rotate %265 by %c252_i32_150 dim 1 : vector<8x512xf32>, i32 -> vector<8x512xf32>
    %283 = vector.shape_cast %281 : vector<1x512xi1> to vector<1x512xi1>
    %284 = vector.broadcast %283 : vector<1x512xi1> to vector<8x512xi1>
    %285 = arith.select %284, %282, %274 : vector<8x512xi1>, vector<8x512xf32>
    %286 = arith.addf %245, %285 : vector<8x512xf32>
    %287 = tpu.concatenate %147, %182, %203, %286 in 1 : vector<8x512xf32>, vector<8x512xf32>, vector<8x512xf32>, vector<8x512xf32> -> vector<8x2048xf32>
    %cst_151 = arith.constant dense<0.000000e+00> : vector<8xf32>
    %288 = vector.multi_reduction <add>, %287, %cst_151 [1] : vector<8x2048xf32> to vector<8xf32>
    %289 = vector.shape_cast %288 : vector<8xf32> to vector<8x1xf32>
    %cst_152 = arith.constant 4.8828125E-4 : f32
    %290 = vector.broadcast %cst_152 : f32 to vector<8x1xf32>
    %291 = arith.mulf %289, %290 : vector<8x1xf32>
    %292 = vector.broadcast %291 : vector<8x1xf32> to vector<8x2048xf32>
    %293 = arith.subf %287, %292 : vector<8x2048xf32>
    %294 = arith.mulf %293, %293 : vector<8x2048xf32>
    %cst_153 = arith.constant dense<0.000000e+00> : vector<8xf32>
    %295 = vector.multi_reduction <add>, %294, %cst_153 [1] : vector<8x2048xf32> to vector<8xf32>
    %296 = vector.shape_cast %295 : vector<8xf32> to vector<8x1xf32>
    %cst_154 = arith.constant 4.8828125E-4 : f32
    %297 = vector.broadcast %cst_154 : f32 to vector<8x1xf32>
    %298 = arith.mulf %296, %297 : vector<8x1xf32>
    %c0_155 = arith.constant 0 : index
    %c0_156 = arith.constant 0 : index
    %299 = vector.load %arg6[%c0_155, %c0_156] : memref<8x1xf32, #tpu.memory_space<vmem>>, vector<8x1xf32>
    %c0_157 = arith.constant 0 : index
    %c0_158 = arith.constant 0 : index
    %300 = vector.load %arg7[%c0_157, %c0_158] : memref<8x1xf32, #tpu.memory_space<vmem>>, vector<8x1xf32>
    %cst_159 = arith.constant 9.99999974E-6 : f32
    %301 = vector.broadcast %cst_159 : f32 to vector<8x1xf32>
    %302 = arith.addf %298, %301 : vector<8x1xf32>
    %303 = math.rsqrt %302 : vector<8x1xf32>
    %304 = arith.mulf %299, %303 : vector<8x1xf32>
    %305 = vector.broadcast %304 : vector<8x1xf32> to vector<8x2048xf32>
    %306 = arith.mulf %293, %305 : vector<8x2048xf32>
    %307 = vector.broadcast %300 : vector<8x1xf32> to vector<8x2048xf32>
    %308 = arith.addf %306, %307 : vector<8x2048xf32>
    %cst_160 = arith.constant 0.000000e+00 : f32
    %309 = vector.broadcast %cst_160 : f32 to vector<8x2048xf32>
    %310 = arith.maximumf %308, %309 : vector<8x2048xf32>
    %311 = arith.truncf %310 : vector<8x2048xf32> to vector<8x2048xbf16>
    %c0_161 = arith.constant 0 : index
    %c0_162 = arith.constant 0 : index
    %c0_163 = arith.constant 0 : index
    %312 = vector.load %arg8[%c0_161, %c0_162, %c0_163] : memref<9x3x8xbf16, #tpu.memory_space<vmem>>, vector<1x3x8xbf16>
    %313 = vector.shape_cast %312 : vector<1x3x8xbf16> to vector<3x8xbf16>
    %cst_164 = arith.constant dense<0.000000e+00> : vector<3x2048xf32>
    %314 = tpu.matmul %313, %311, %cst_164 {dimension_numbers = #tpu.dot_dimension_numbers<[1], [0], [0], [1], [0, 0, 1, 1], [], []>} : vector<3x8xbf16>, vector<8x2048xbf16>, vector<3x2048xf32> -> vector<3x2048xf32>
    %c1_165 = arith.constant 1 : index
    %c0_166 = arith.constant 0 : index
    %c0_167 = arith.constant 0 : index
    %315 = vector.load %arg8[%c1_165, %c0_166, %c0_167] : memref<9x3x8xbf16, #tpu.memory_space<vmem>>, vector<1x3x8xbf16>
    %316 = vector.shape_cast %315 : vector<1x3x8xbf16> to vector<3x8xbf16>
    %cst_168 = arith.constant dense<0.000000e+00> : vector<3x2048xf32>
    %317 = tpu.matmul %316, %311, %cst_168 {dimension_numbers = #tpu.dot_dimension_numbers<[1], [0], [0], [1], [0, 0, 1, 1], [], []>} : vector<3x8xbf16>, vector<8x2048xbf16>, vector<3x2048xf32> -> vector<3x2048xf32>
    %c2_169 = arith.constant 2 : index
    %c0_170 = arith.constant 0 : index
    %c0_171 = arith.constant 0 : index
    %318 = vector.load %arg8[%c2_169, %c0_170, %c0_171] : memref<9x3x8xbf16, #tpu.memory_space<vmem>>, vector<1x3x8xbf16>
    %319 = vector.shape_cast %318 : vector<1x3x8xbf16> to vector<3x8xbf16>
    %cst_172 = arith.constant dense<0.000000e+00> : vector<3x2048xf32>
    %320 = tpu.matmul %319, %311, %cst_172 {dimension_numbers = #tpu.dot_dimension_numbers<[1], [0], [0], [1], [0, 0, 1, 1], [], []>} : vector<3x8xbf16>, vector<8x2048xbf16>, vector<3x2048xf32> -> vector<3x2048xf32>
    %c3_173 = arith.constant 3 : index
    %c0_174 = arith.constant 0 : index
    %c0_175 = arith.constant 0 : index
    %321 = vector.load %arg8[%c3_173, %c0_174, %c0_175] : memref<9x3x8xbf16, #tpu.memory_space<vmem>>, vector<1x3x8xbf16>
    %322 = vector.shape_cast %321 : vector<1x3x8xbf16> to vector<3x8xbf16>
    %cst_176 = arith.constant dense<0.000000e+00> : vector<3x2048xf32>
    %323 = tpu.matmul %322, %311, %cst_176 {dimension_numbers = #tpu.dot_dimension_numbers<[1], [0], [0], [1], [0, 0, 1, 1], [], []>} : vector<3x8xbf16>, vector<8x2048xbf16>, vector<3x2048xf32> -> vector<3x2048xf32>
    %c4_177 = arith.constant 4 : index
    %c0_178 = arith.constant 0 : index
    %c0_179 = arith.constant 0 : index
    %324 = vector.load %arg8[%c4_177, %c0_178, %c0_179] : memref<9x3x8xbf16, #tpu.memory_space<vmem>>, vector<1x3x8xbf16>
    %325 = vector.shape_cast %324 : vector<1x3x8xbf16> to vector<3x8xbf16>
    %cst_180 = arith.constant dense<0.000000e+00> : vector<3x2048xf32>
    %326 = tpu.matmul %325, %311, %cst_180 {dimension_numbers = #tpu.dot_dimension_numbers<[1], [0], [0], [1], [0, 0, 1, 1], [], []>} : vector<3x8xbf16>, vector<8x2048xbf16>, vector<3x2048xf32> -> vector<3x2048xf32>
    %c5_181 = arith.constant 5 : index
    %c0_182 = arith.constant 0 : index
    %c0_183 = arith.constant 0 : index
    %327 = vector.load %arg8[%c5_181, %c0_182, %c0_183] : memref<9x3x8xbf16, #tpu.memory_space<vmem>>, vector<1x3x8xbf16>
    %328 = vector.shape_cast %327 : vector<1x3x8xbf16> to vector<3x8xbf16>
    %cst_184 = arith.constant dense<0.000000e+00> : vector<3x2048xf32>
    %329 = tpu.matmul %328, %311, %cst_184 {dimension_numbers = #tpu.dot_dimension_numbers<[1], [0], [0], [1], [0, 0, 1, 1], [], []>} : vector<3x8xbf16>, vector<8x2048xbf16>, vector<3x2048xf32> -> vector<3x2048xf32>
    %c6_185 = arith.constant 6 : index
    %c0_186 = arith.constant 0 : index
    %c0_187 = arith.constant 0 : index
    %330 = vector.load %arg8[%c6_185, %c0_186, %c0_187] : memref<9x3x8xbf16, #tpu.memory_space<vmem>>, vector<1x3x8xbf16>
    %331 = vector.shape_cast %330 : vector<1x3x8xbf16> to vector<3x8xbf16>
    %cst_188 = arith.constant dense<0.000000e+00> : vector<3x2048xf32>
    %332 = tpu.matmul %331, %311, %cst_188 {dimension_numbers = #tpu.dot_dimension_numbers<[1], [0], [0], [1], [0, 0, 1, 1], [], []>} : vector<3x8xbf16>, vector<8x2048xbf16>, vector<3x2048xf32> -> vector<3x2048xf32>
    %c7_189 = arith.constant 7 : index
    %c0_190 = arith.constant 0 : index
    %c0_191 = arith.constant 0 : index
    %333 = vector.load %arg8[%c7_189, %c0_190, %c0_191] : memref<9x3x8xbf16, #tpu.memory_space<vmem>>, vector<1x3x8xbf16>
    %334 = vector.shape_cast %333 : vector<1x3x8xbf16> to vector<3x8xbf16>
    %cst_192 = arith.constant dense<0.000000e+00> : vector<3x2048xf32>
    %335 = tpu.matmul %334, %311, %cst_192 {dimension_numbers = #tpu.dot_dimension_numbers<[1], [0], [0], [1], [0, 0, 1, 1], [], []>} : vector<3x8xbf16>, vector<8x2048xbf16>, vector<3x2048xf32> -> vector<3x2048xf32>
    %c8_193 = arith.constant 8 : index
    %c0_194 = arith.constant 0 : index
    %c0_195 = arith.constant 0 : index
    %336 = vector.load %arg8[%c8_193, %c0_194, %c0_195] : memref<9x3x8xbf16, #tpu.memory_space<vmem>>, vector<1x3x8xbf16>
    %337 = vector.shape_cast %336 : vector<1x3x8xbf16> to vector<3x8xbf16>
    %cst_196 = arith.constant dense<0.000000e+00> : vector<3x2048xf32>
    %338 = tpu.matmul %337, %311, %cst_196 {dimension_numbers = #tpu.dot_dimension_numbers<[1], [0], [0], [1], [0, 0, 1, 1], [], []>} : vector<3x8xbf16>, vector<8x2048xbf16>, vector<3x2048xf32> -> vector<3x2048xf32>
    %c0_197 = arith.constant 0 : index
    %c0_198 = arith.constant 0 : index
    %339 = vector.load %arg14[%c0_197, %c0_198] : memref<1x2048xi32, #tpu.memory_space<vmem>>, vector<1x2048xi32>
    %c0_199 = arith.constant 0 : index
    %c0_200 = arith.constant 0 : index
    %340 = vector.load %arg15[%c0_199, %c0_200] : memref<1x2048xi32, #tpu.memory_space<vmem>>, vector<1x2048xi32>
    %cst_201 = arith.constant 0.000000e+00 : f32
    %341 = vector.broadcast %cst_201 : f32 to vector<3x2048xf32>
    %c1_i32_202 = arith.constant 1 : i32
    %342 = vector.broadcast %c1_i32_202 : i32 to vector<1x2048xi32>
    %343 = arith.andi %340, %342 : vector<1x2048xi32>
    %c0_i32_203 = arith.constant 0 : i32
    %344 = vector.broadcast %c0_i32_203 : i32 to vector<1x2048xi32>
    %345 = arith.cmpi eq, %343, %344 : vector<1x2048xi32>
    %c1536_i32 = arith.constant 1536 : i32
    %346 = tpu.dynamic_rotate %323 by %c1536_i32 dim 1 : vector<3x2048xf32>, i32 -> vector<3x2048xf32>
    %347 = vector.shape_cast %345 : vector<1x2048xi1> to vector<1x2048xi1>
    %348 = vector.broadcast %347 : vector<1x2048xi1> to vector<3x2048xi1>
    %349 = arith.select %348, %346, %341 : vector<3x2048xi1>, vector<3x2048xf32>
    %c3_i32_204 = arith.constant 3 : i32
    %350 = vector.broadcast %c3_i32_204 : i32 to vector<1x2048xi32>
    %351 = arith.andi %340, %350 : vector<1x2048xi32>
    %c1_i32_205 = arith.constant 1 : i32
    %352 = vector.broadcast %c1_i32_205 : i32 to vector<1x2048xi32>
    %353 = arith.cmpi eq, %351, %352 : vector<1x2048xi32>
    %c384_i32_206 = arith.constant 384 : i32
    %354 = tpu.dynamic_rotate %323 by %c384_i32_206 dim 1 : vector<3x2048xf32>, i32 -> vector<3x2048xf32>
    %355 = vector.shape_cast %353 : vector<1x2048xi1> to vector<1x2048xi1>
    %356 = vector.broadcast %355 : vector<1x2048xi1> to vector<3x2048xi1>
    %357 = arith.select %356, %354, %349 : vector<3x2048xi1>, vector<3x2048xf32>
    %c3_i32_207 = arith.constant 3 : i32
    %358 = vector.broadcast %c3_i32_207 : i32 to vector<1x2048xi32>
    %359 = arith.andi %340, %358 : vector<1x2048xi32>
    %c3_i32_208 = arith.constant 3 : i32
    %360 = vector.broadcast %c3_i32_208 : i32 to vector<1x2048xi32>
    %361 = arith.cmpi eq, %359, %360 : vector<1x2048xi32>
    %c15_i32 = arith.constant 15 : i32
    %362 = vector.broadcast %c15_i32 : i32 to vector<1x2048xi32>
    %363 = arith.cmpi slt, %340, %362 : vector<1x2048xi32>
    %364 = arith.andi %361, %363 : vector<1x2048xi1>
    %c639_i32 = arith.constant 639 : i32
    %365 = tpu.dynamic_rotate %323 by %c639_i32 dim 1 : vector<3x2048xf32>, i32 -> vector<3x2048xf32>
    %366 = vector.shape_cast %364 : vector<1x2048xi1> to vector<1x2048xi1>
    %367 = vector.broadcast %366 : vector<1x2048xi1> to vector<3x2048xi1>
    %368 = arith.select %367, %365, %357 : vector<3x2048xi1>, vector<3x2048xf32>
    %369 = arith.addf %329, %368 : vector<3x2048xf32>
    %cst_209 = arith.constant 0.000000e+00 : f32
    %370 = vector.broadcast %cst_209 : f32 to vector<3x2048xf32>
    %c1_i32_210 = arith.constant 1 : i32
    %371 = vector.broadcast %c1_i32_210 : i32 to vector<1x2048xi32>
    %372 = arith.andi %339, %371 : vector<1x2048xi32>
    %c0_i32_211 = arith.constant 0 : i32
    %373 = vector.broadcast %c0_i32_211 : i32 to vector<1x2048xi32>
    %374 = arith.cmpi eq, %372, %373 : vector<1x2048xi32>
    %c1024_i32 = arith.constant 1024 : i32
    %375 = tpu.dynamic_rotate %317 by %c1024_i32 dim 1 : vector<3x2048xf32>, i32 -> vector<3x2048xf32>
    %376 = vector.shape_cast %374 : vector<1x2048xi1> to vector<1x2048xi1>
    %377 = vector.broadcast %376 : vector<1x2048xi1> to vector<3x2048xi1>
    %378 = arith.select %377, %375, %370 : vector<3x2048xi1>, vector<3x2048xf32>
    %c3_i32_212 = arith.constant 3 : i32
    %379 = vector.broadcast %c3_i32_212 : i32 to vector<1x2048xi32>
    %380 = arith.andi %339, %379 : vector<1x2048xi32>
    %c1_i32_213 = arith.constant 1 : i32
    %381 = vector.broadcast %c1_i32_213 : i32 to vector<1x2048xi32>
    %382 = arith.cmpi eq, %380, %381 : vector<1x2048xi32>
    %c768_i32 = arith.constant 768 : i32
    %383 = tpu.dynamic_rotate %317 by %c768_i32 dim 1 : vector<3x2048xf32>, i32 -> vector<3x2048xf32>
    %384 = vector.shape_cast %382 : vector<1x2048xi1> to vector<1x2048xi1>
    %385 = vector.broadcast %384 : vector<1x2048xi1> to vector<3x2048xi1>
    %386 = arith.select %385, %383, %378 : vector<3x2048xi1>, vector<3x2048xf32>
    %c3_i32_214 = arith.constant 3 : i32
    %387 = vector.broadcast %c3_i32_214 : i32 to vector<1x2048xi32>
    %388 = arith.andi %339, %387 : vector<1x2048xi32>
    %c3_i32_215 = arith.constant 3 : i32
    %389 = vector.broadcast %c3_i32_215 : i32 to vector<1x2048xi32>
    %390 = arith.cmpi eq, %388, %389 : vector<1x2048xi32>
    %c15_i32_216 = arith.constant 15 : i32
    %391 = vector.broadcast %c15_i32_216 : i32 to vector<1x2048xi32>
    %392 = arith.cmpi slt, %339, %391 : vector<1x2048xi32>
    %393 = arith.andi %390, %392 : vector<1x2048xi1>
    %c1276_i32 = arith.constant 1276 : i32
    %394 = tpu.dynamic_rotate %317 by %c1276_i32 dim 1 : vector<3x2048xf32>, i32 -> vector<3x2048xf32>
    %395 = vector.shape_cast %393 : vector<1x2048xi1> to vector<1x2048xi1>
    %396 = vector.broadcast %395 : vector<1x2048xi1> to vector<3x2048xi1>
    %397 = arith.select %396, %394, %386 : vector<3x2048xi1>, vector<3x2048xf32>
    %398 = arith.addf %335, %397 : vector<3x2048xf32>
    %cst_217 = arith.constant 0.000000e+00 : f32
    %399 = vector.broadcast %cst_217 : f32 to vector<3x2048xf32>
    %c1_i32_218 = arith.constant 1 : i32
    %400 = vector.broadcast %c1_i32_218 : i32 to vector<1x2048xi32>
    %401 = arith.andi %340, %400 : vector<1x2048xi32>
    %c0_i32_219 = arith.constant 0 : i32
    %402 = vector.broadcast %c0_i32_219 : i32 to vector<1x2048xi32>
    %403 = arith.cmpi eq, %401, %402 : vector<1x2048xi32>
    %c1536_i32_220 = arith.constant 1536 : i32
    %404 = tpu.dynamic_rotate %332 by %c1536_i32_220 dim 1 : vector<3x2048xf32>, i32 -> vector<3x2048xf32>
    %405 = vector.shape_cast %403 : vector<1x2048xi1> to vector<1x2048xi1>
    %406 = vector.broadcast %405 : vector<1x2048xi1> to vector<3x2048xi1>
    %407 = arith.select %406, %404, %399 : vector<3x2048xi1>, vector<3x2048xf32>
    %c3_i32_221 = arith.constant 3 : i32
    %408 = vector.broadcast %c3_i32_221 : i32 to vector<1x2048xi32>
    %409 = arith.andi %340, %408 : vector<1x2048xi32>
    %c1_i32_222 = arith.constant 1 : i32
    %410 = vector.broadcast %c1_i32_222 : i32 to vector<1x2048xi32>
    %411 = arith.cmpi eq, %409, %410 : vector<1x2048xi32>
    %c384_i32_223 = arith.constant 384 : i32
    %412 = tpu.dynamic_rotate %332 by %c384_i32_223 dim 1 : vector<3x2048xf32>, i32 -> vector<3x2048xf32>
    %413 = vector.shape_cast %411 : vector<1x2048xi1> to vector<1x2048xi1>
    %414 = vector.broadcast %413 : vector<1x2048xi1> to vector<3x2048xi1>
    %415 = arith.select %414, %412, %407 : vector<3x2048xi1>, vector<3x2048xf32>
    %c3_i32_224 = arith.constant 3 : i32
    %416 = vector.broadcast %c3_i32_224 : i32 to vector<1x2048xi32>
    %417 = arith.andi %340, %416 : vector<1x2048xi32>
    %c3_i32_225 = arith.constant 3 : i32
    %418 = vector.broadcast %c3_i32_225 : i32 to vector<1x2048xi32>
    %419 = arith.cmpi eq, %417, %418 : vector<1x2048xi32>
    %c15_i32_226 = arith.constant 15 : i32
    %420 = vector.broadcast %c15_i32_226 : i32 to vector<1x2048xi32>
    %421 = arith.cmpi slt, %340, %420 : vector<1x2048xi32>
    %422 = arith.andi %419, %421 : vector<1x2048xi1>
    %c639_i32_227 = arith.constant 639 : i32
    %423 = tpu.dynamic_rotate %332 by %c639_i32_227 dim 1 : vector<3x2048xf32>, i32 -> vector<3x2048xf32>
    %424 = vector.shape_cast %422 : vector<1x2048xi1> to vector<1x2048xi1>
    %425 = vector.broadcast %424 : vector<1x2048xi1> to vector<3x2048xi1>
    %426 = arith.select %425, %423, %415 : vector<3x2048xi1>, vector<3x2048xf32>
    %427 = arith.addf %338, %426 : vector<3x2048xf32>
    %cst_228 = arith.constant 0.000000e+00 : f32
    %428 = vector.broadcast %cst_228 : f32 to vector<3x2048xf32>
    %c1_i32_229 = arith.constant 1 : i32
    %429 = vector.broadcast %c1_i32_229 : i32 to vector<1x2048xi32>
    %430 = arith.andi %339, %429 : vector<1x2048xi32>
    %c0_i32_230 = arith.constant 0 : i32
    %431 = vector.broadcast %c0_i32_230 : i32 to vector<1x2048xi32>
    %432 = arith.cmpi eq, %430, %431 : vector<1x2048xi32>
    %c1024_i32_231 = arith.constant 1024 : i32
    %433 = tpu.dynamic_rotate %320 by %c1024_i32_231 dim 1 : vector<3x2048xf32>, i32 -> vector<3x2048xf32>
    %434 = vector.shape_cast %432 : vector<1x2048xi1> to vector<1x2048xi1>
    %435 = vector.broadcast %434 : vector<1x2048xi1> to vector<3x2048xi1>
    %436 = arith.select %435, %433, %428 : vector<3x2048xi1>, vector<3x2048xf32>
    %c3_i32_232 = arith.constant 3 : i32
    %437 = vector.broadcast %c3_i32_232 : i32 to vector<1x2048xi32>
    %438 = arith.andi %339, %437 : vector<1x2048xi32>
    %c1_i32_233 = arith.constant 1 : i32
    %439 = vector.broadcast %c1_i32_233 : i32 to vector<1x2048xi32>
    %440 = arith.cmpi eq, %438, %439 : vector<1x2048xi32>
    %c768_i32_234 = arith.constant 768 : i32
    %441 = tpu.dynamic_rotate %320 by %c768_i32_234 dim 1 : vector<3x2048xf32>, i32 -> vector<3x2048xf32>
    %442 = vector.shape_cast %440 : vector<1x2048xi1> to vector<1x2048xi1>
    %443 = vector.broadcast %442 : vector<1x2048xi1> to vector<3x2048xi1>
    %444 = arith.select %443, %441, %436 : vector<3x2048xi1>, vector<3x2048xf32>
    %c3_i32_235 = arith.constant 3 : i32
    %445 = vector.broadcast %c3_i32_235 : i32 to vector<1x2048xi32>
    %446 = arith.andi %339, %445 : vector<1x2048xi32>
    %c3_i32_236 = arith.constant 3 : i32
    %447 = vector.broadcast %c3_i32_236 : i32 to vector<1x2048xi32>
    %448 = arith.cmpi eq, %446, %447 : vector<1x2048xi32>
    %c15_i32_237 = arith.constant 15 : i32
    %449 = vector.broadcast %c15_i32_237 : i32 to vector<1x2048xi32>
    %450 = arith.cmpi slt, %339, %449 : vector<1x2048xi32>
    %451 = arith.andi %448, %450 : vector<1x2048xi1>
    %c1276_i32_238 = arith.constant 1276 : i32
    %452 = tpu.dynamic_rotate %320 by %c1276_i32_238 dim 1 : vector<3x2048xf32>, i32 -> vector<3x2048xf32>
    %453 = vector.shape_cast %451 : vector<1x2048xi1> to vector<1x2048xi1>
    %454 = vector.broadcast %453 : vector<1x2048xi1> to vector<3x2048xi1>
    %455 = arith.select %454, %452, %444 : vector<3x2048xi1>, vector<3x2048xf32>
    %456 = arith.addf %427, %455 : vector<3x2048xf32>
    %cst_239 = arith.constant 0.000000e+00 : f32
    %457 = vector.broadcast %cst_239 : f32 to vector<3x2048xf32>
    %c1_i32_240 = arith.constant 1 : i32
    %458 = vector.broadcast %c1_i32_240 : i32 to vector<1x2048xi32>
    %459 = arith.andi %340, %458 : vector<1x2048xi32>
    %c0_i32_241 = arith.constant 0 : i32
    %460 = vector.broadcast %c0_i32_241 : i32 to vector<1x2048xi32>
    %461 = arith.cmpi eq, %459, %460 : vector<1x2048xi32>
    %c1536_i32_242 = arith.constant 1536 : i32
    %462 = tpu.dynamic_rotate %314 by %c1536_i32_242 dim 1 : vector<3x2048xf32>, i32 -> vector<3x2048xf32>
    %463 = vector.shape_cast %461 : vector<1x2048xi1> to vector<1x2048xi1>
    %464 = vector.broadcast %463 : vector<1x2048xi1> to vector<3x2048xi1>
    %465 = arith.select %464, %462, %457 : vector<3x2048xi1>, vector<3x2048xf32>
    %c3_i32_243 = arith.constant 3 : i32
    %466 = vector.broadcast %c3_i32_243 : i32 to vector<1x2048xi32>
    %467 = arith.andi %340, %466 : vector<1x2048xi32>
    %c1_i32_244 = arith.constant 1 : i32
    %468 = vector.broadcast %c1_i32_244 : i32 to vector<1x2048xi32>
    %469 = arith.cmpi eq, %467, %468 : vector<1x2048xi32>
    %c384_i32_245 = arith.constant 384 : i32
    %470 = tpu.dynamic_rotate %314 by %c384_i32_245 dim 1 : vector<3x2048xf32>, i32 -> vector<3x2048xf32>
    %471 = vector.shape_cast %469 : vector<1x2048xi1> to vector<1x2048xi1>
    %472 = vector.broadcast %471 : vector<1x2048xi1> to vector<3x2048xi1>
    %473 = arith.select %472, %470, %465 : vector<3x2048xi1>, vector<3x2048xf32>
    %c3_i32_246 = arith.constant 3 : i32
    %474 = vector.broadcast %c3_i32_246 : i32 to vector<1x2048xi32>
    %475 = arith.andi %340, %474 : vector<1x2048xi32>
    %c3_i32_247 = arith.constant 3 : i32
    %476 = vector.broadcast %c3_i32_247 : i32 to vector<1x2048xi32>
    %477 = arith.cmpi eq, %475, %476 : vector<1x2048xi32>
    %c15_i32_248 = arith.constant 15 : i32
    %478 = vector.broadcast %c15_i32_248 : i32 to vector<1x2048xi32>
    %479 = arith.cmpi slt, %340, %478 : vector<1x2048xi32>
    %480 = arith.andi %477, %479 : vector<1x2048xi1>
    %c639_i32_249 = arith.constant 639 : i32
    %481 = tpu.dynamic_rotate %314 by %c639_i32_249 dim 1 : vector<3x2048xf32>, i32 -> vector<3x2048xf32>
    %482 = vector.shape_cast %480 : vector<1x2048xi1> to vector<1x2048xi1>
    %483 = vector.broadcast %482 : vector<1x2048xi1> to vector<3x2048xi1>
    %484 = arith.select %483, %481, %473 : vector<3x2048xi1>, vector<3x2048xf32>
    %cst_250 = arith.constant 0.000000e+00 : f32
    %485 = vector.broadcast %cst_250 : f32 to vector<3x2048xf32>
    %c1_i32_251 = arith.constant 1 : i32
    %486 = vector.broadcast %c1_i32_251 : i32 to vector<1x2048xi32>
    %487 = arith.andi %339, %486 : vector<1x2048xi32>
    %c0_i32_252 = arith.constant 0 : i32
    %488 = vector.broadcast %c0_i32_252 : i32 to vector<1x2048xi32>
    %489 = arith.cmpi eq, %487, %488 : vector<1x2048xi32>
    %c1024_i32_253 = arith.constant 1024 : i32
    %490 = tpu.dynamic_rotate %484 by %c1024_i32_253 dim 1 : vector<3x2048xf32>, i32 -> vector<3x2048xf32>
    %491 = vector.shape_cast %489 : vector<1x2048xi1> to vector<1x2048xi1>
    %492 = vector.broadcast %491 : vector<1x2048xi1> to vector<3x2048xi1>
    %493 = arith.select %492, %490, %485 : vector<3x2048xi1>, vector<3x2048xf32>
    %c3_i32_254 = arith.constant 3 : i32
    %494 = vector.broadcast %c3_i32_254 : i32 to vector<1x2048xi32>
    %495 = arith.andi %339, %494 : vector<1x2048xi32>
    %c1_i32_255 = arith.constant 1 : i32
    %496 = vector.broadcast %c1_i32_255 : i32 to vector<1x2048xi32>
    %497 = arith.cmpi eq, %495, %496 : vector<1x2048xi32>
    %c768_i32_256 = arith.constant 768 : i32
    %498 = tpu.dynamic_rotate %484 by %c768_i32_256 dim 1 : vector<3x2048xf32>, i32 -> vector<3x2048xf32>
    %499 = vector.shape_cast %497 : vector<1x2048xi1> to vector<1x2048xi1>
    %500 = vector.broadcast %499 : vector<1x2048xi1> to vector<3x2048xi1>
    %501 = arith.select %500, %498, %493 : vector<3x2048xi1>, vector<3x2048xf32>
    %c3_i32_257 = arith.constant 3 : i32
    %502 = vector.broadcast %c3_i32_257 : i32 to vector<1x2048xi32>
    %503 = arith.andi %339, %502 : vector<1x2048xi32>
    %c3_i32_258 = arith.constant 3 : i32
    %504 = vector.broadcast %c3_i32_258 : i32 to vector<1x2048xi32>
    %505 = arith.cmpi eq, %503, %504 : vector<1x2048xi32>
    %c15_i32_259 = arith.constant 15 : i32
    %506 = vector.broadcast %c15_i32_259 : i32 to vector<1x2048xi32>
    %507 = arith.cmpi slt, %339, %506 : vector<1x2048xi32>
    %508 = arith.andi %505, %507 : vector<1x2048xi1>
    %c1276_i32_260 = arith.constant 1276 : i32
    %509 = tpu.dynamic_rotate %484 by %c1276_i32_260 dim 1 : vector<3x2048xf32>, i32 -> vector<3x2048xf32>
    %510 = vector.shape_cast %508 : vector<1x2048xi1> to vector<1x2048xi1>
    %511 = vector.broadcast %510 : vector<1x2048xi1> to vector<3x2048xi1>
    %512 = arith.select %511, %509, %501 : vector<3x2048xi1>, vector<3x2048xf32>
    %513 = arith.addf %456, %512 : vector<3x2048xf32>
    %514 = tpu.concatenate %326, %369, %398, %513 in 1 : vector<3x2048xf32>, vector<3x2048xf32>, vector<3x2048xf32>, vector<3x2048xf32> -> vector<3x8192xf32>
    %c0_261 = arith.constant 0 : index
    %c0_262 = arith.constant 0 : index
    %515 = vector.load %arg9[%c0_261, %c0_262] : memref<3x1xf32, #tpu.memory_space<vmem>>, vector<3x1xf32>
    %516 = vector.broadcast %515 : vector<3x1xf32> to vector<3x8192xf32>
    %517 = arith.addf %514, %516 : vector<3x8192xf32>
    %518 = math.tanh %517 : vector<3x8192xf32>
    %c0_263 = arith.constant 0 : index
    %c0_264 = arith.constant 0 : index
    %519 = vector.load %arg16[%c0_263, %c0_264] : memref<3x8192xf32, #tpu.memory_space<vmem>>, vector<3x8192xf32>
    tpu.vector_store %arg16[%c0_263, %c0_264], %518 {strides = array<i32>} : memref<3x8192xf32, #tpu.memory_space<vmem>>, vector<3x8192xf32>,
    return
  }
  func.func @transform_0(%arg0: i32) -> (i32, i32) {
    %c0_i32 = arith.constant 0 : i32
    %c0_i32_0 = arith.constant 0 : i32
    %c0_i32_1 = arith.constant 0 : i32
    return %c0_i32, %c0_i32_0 : i32, i32
  }
  func.func @transform_1(%arg0: i32) -> (i32, i32, i32) {
    %c0_i32 = arith.constant 0 : i32
    %c0_i32_0 = arith.constant 0 : i32
    %c0_i32_1 = arith.constant 0 : i32
    %c0_i32_2 = arith.constant 0 : i32
    return %c0_i32, %c0_i32_0, %c0_i32_1 : i32, i32, i32
  }
  func.func @transform_2(%arg0: i32) -> (i32, i32) {
    %c0_i32 = arith.constant 0 : i32
    %c0_i32_0 = arith.constant 0 : i32
    %c0_i32_1 = arith.constant 0 : i32
    return %c0_i32, %c0_i32_0 : i32, i32
  }
  func.func @transform_3(%arg0: i32) -> (i32, i32) {
    %c0_i32 = arith.constant 0 : i32
    %c0_i32_0 = arith.constant 0 : i32
    %c0_i32_1 = arith.constant 0 : i32
    return %c0_i32, %c0_i32_0 : i32, i32
  }
  func.func @transform_4(%arg0: i32) -> (i32, i32, i32) {
    %c0_i32 = arith.constant 0 : i32
    %c0_i32_0 = arith.constant 0 : i32
    %c0_i32_1 = arith.constant 0 : i32
    %c0_i32_2 = arith.constant 0 : i32
    return %c0_i32, %c0_i32_0, %c0_i32_1 : i32, i32, i32
  }
  func.func @transform_5(%arg0: i32) -> (i32, i32) {
    %c0_i32 = arith.constant 0 : i32
    %c0_i32_0 = arith.constant 0 : i32
    %c0_i32_1 = arith.constant 0 : i32
    return %c0_i32, %c0_i32_0 : i32, i32
  }
  func.func @transform_6(%arg0: i32) -> (i32, i32) {
    %c0_i32 = arith.constant 0 : i32
    %c0_i32_0 = arith.constant 0 : i32
    %c0_i32_1 = arith.constant 0 : i32
    return %c0_i32, %c0_i32_0 : i32, i32
  }
  func.func @transform_7(%arg0: i32) -> (i32, i32, i32) {
    %c0_i32 = arith.constant 0 : i32
    %c0_i32_0 = arith.constant 0 : i32
    %c0_i32_1 = arith.constant 0 : i32
    %c0_i32_2 = arith.constant 0 : i32
    return %c0_i32, %c0_i32_0, %c0_i32_1 : i32, i32, i32
  }
  func.func @transform_8(%arg0: i32) -> (i32, i32) {
    %c0_i32 = arith.constant 0 : i32
    %c0_i32_0 = arith.constant 0 : i32
    %c0_i32_1 = arith.constant 0 : i32
    return %c0_i32, %c0_i32_0 : i32, i32
  }
  func.func @transform_9(%arg0: i32) -> (i32, i32) {
    %c0_i32 = arith.constant 0 : i32
    %c0_i32_0 = arith.constant 0 : i32
    %c0_i32_1 = arith.constant 0 : i32
    return %c0_i32, %c0_i32_0 : i32, i32
  }
  func.func @transform_10(%arg0: i32) -> (i32, i32) {
    %c0_i32 = arith.constant 0 : i32
    %c0_i32_0 = arith.constant 0 : i32
    %c0_i32_1 = arith.constant 0 : i32
    return %c0_i32, %c0_i32_0 : i32, i32
  }
  func.func @transform_11(%arg0: i32) -> (i32, i32) {
    %c0_i32 = arith.constant 0 : i32
    %c0_i32_0 = arith.constant 0 : i32
    %c0_i32_1 = arith.constant 0 : i32
    return %c0_i32, %c0_i32_0 : i32, i32
  }
  func.func @transform_12(%arg0: i32) -> (i32, i32) {
    %c0_i32 = arith.constant 0 : i32
    %c0_i32_0 = arith.constant 0 : i32
    %c0_i32_1 = arith.constant 0 : i32
    return %c0_i32, %c0_i32_0 : i32, i32
  }
  func.func @transform_13(%arg0: i32) -> (i32, i32) {
    %c0_i32 = arith.constant 0 : i32
    %c0_i32_0 = arith.constant 0 : i32
    %c0_i32_1 = arith.constant 0 : i32
    return %c0_i32, %c0_i32_0 : i32, i32
  }
  func.func @transform_14(%arg0: i32) -> (i32, i32) {
    %c0_i32 = arith.constant 0 : i32
    %c0_i32_0 = arith.constant 0 : i32
    %c0_i32_1 = arith.constant 0 : i32
    return %c0_i32, %c0_i32_0 : i32, i32
  }
  func.func @transform_15(%arg0: i32) -> (i32, i32) {
    %c0_i32 = arith.constant 0 : i32
    %c0_i32_0 = arith.constant 0 : i32
    %c0_i32_1 = arith.constant 0 : i32
    return %c0_i32, %c0_i32_0 : i32, i32
  }
}

</mosaic_0001>

<bundles_post_ra>
// kernel: generator_forward.1
= control target key start
LH: loop header
LB: loop body
LE: loop exit
PB: predicated region body
PF: predicated region fallthrough
CT: control target
= control target key end

     0   :  { %20 = vsyncpa [#allocation3], 0  ;;  %s11147_s0 = inlined_call_operand.vmem [shape: f32[16,128], index: 0, kind: input, shape index: {}]   ;;  %s11148_s1 = inlined_call_operand.hbm [shape: bf16[9,16,16], index: 1, kind: input, shape index: {}]   ;;  %s11149_s2 = inlined_call_operand.vmem [shape: f32[16,1], index: 2, kind: input, shape index: {}]   ;;  %s11150_s3 = inlined_call_operand.vmem [shape: f32[16,1], index: 3, kind: input, shape index: {}]   ;;  %s11151_s4 = inlined_call_operand.hbm [shape: bf16[9,8,16], index: 4, kind: input, shape index: {}]   ;;  %s11152_s5 = inlined_call_operand.vmem [shape: f32[8,1], index: 5, kind: input, shape index: {}]   ;;  %s11153_s6 = inlined_call_operand.vmem [shape: f32[8,1], index: 6, kind: input, shape index: {}]   ;;  %s11154_s7 = inlined_call_operand.vmem [shape: bf16[9,3,8], index: 7, kind: input, shape index: {}]   ;;  %s11155_s8 = inlined_call_operand.vmem [shape: f32[3,1], index: 8, kind: input, shape index: {}]   ;;  %s11156_s9 = inlined_call_operand.hbm [shape: s32[1,128], index: 9, kind: input, shape index: {}]   ;;  %s11157_s10 = inlined_call_operand.hbm [shape: s32[1,128], index: 10, kind: input, shape index: {}]   ;;  %s11158_s11 = inlined_call_operand.hbm [shape: s32[1,512], index: 11, kind: input, shape index: {}]   ;;  %s11159_s12 = inlined_call_operand.hbm [shape: s32[1,512], index: 12, kind: input, shape index: {}]   ;;  %s11160_s13 = inlined_call_operand.hbm [shape: s32[1,2048], index: 13, kind: input, shape index: {}]   ;;  %s11161_s14 = inlined_call_operand.hbm [shape: s32[1,2048], index: 14, kind: input, shape index: {}]   ;;  %s11162_s15 = inlined_call_operand.vmem [shape: f32[3,8192], index: 15, kind: output, shape index: {}]  }
   0x1   :  { %21 = vsyncpa [#allocation5], 0 }
   0x2   :  { %22 = vsyncpa [#allocation8], 0 }
   0x3   :  { %23 = vsyncpa [#allocation11], 0 }
   0x4   :  { %24 = vsyncpa [#allocation14], 0  ;;  %s7018_s18 = smov [#allocation4]   ;;  %s7019_s20 = smov [#allocation7]  }
   0x5   :  { %s48_s19 = sshll.u32 %s7018_s18, 4  ;;  %s79_s21 = sshll.u32 %s7019_s20, 4  ;;  %s49_s19 = int_to_ptr.vmem [resolvable:$true] %s48_s19  ;;  %s7113_s21 = int_to_ptr.vmem [resolvable:$true] %s79_s21 }
   0x6   :  { %s6832_s24 = scalar_lea.hbm %s11151_s4, 576 }
   0x7   :  { %p6833_p0 = scmp.ne.s32.totalorder %s11151_s4, %s6832_s24  ;;  %p6836_p1 = scmp.lt.u32.totalorder %s6832_s24, %s11151_s4 }
   0x9   :  { %p6838_p2 = pnand %p6836_p1, %p6833_p0 }
   0xb   :  { %6841 = shalt.err (!%p6838_p2)
}
   0xc   :  { %s6842_s29 = scalar_lea.vmem %s49_s19, 576  ;;  %p6847_p4 = scmp.lt.s32.totalorder %s49_s19, %s49_s19 }
   0xd   :  { %p6843_p3 = scmp.ne.s32.totalorder %s49_s19, %s6842_s29  ;;  %p6848_p5 = scmp.lt.s32.totalorder %s6842_s29, %s6842_s29 }
   0xf   :  { %p6849_p6 = por %p6848_p5, %p6847_p4 }
  0x11   :  { %p6850_p7 = pnand %p6849_p6, %p6843_p3 }
  0x13   :  { %6853 = shalt.err (!%p6850_p7)
}
  0x14   :  { %s7020_s30 = smov 64   ;;  %s7021_s16 = smov 4  }
  0x15   :  { %54 = dma.hbm_to_vmem [thread:$0]  %s11151_s4, 576, %s49_s19, [#allocation5], %s7020_s30, %s7020_s30, %s7021_s16  }
  0x16   :  { %s6854_s23 = scalar_lea.hbm %s11157_s10, 16 }
  0x17   :  { %p6855_p8 = scmp.ne.s32.totalorder %s11157_s10, %s6854_s23  ;;  %p6858_p9 = scmp.lt.u32.totalorder %s6854_s23, %s11157_s10 }
  0x19   :  { %p6860_p10 = pnand %p6858_p9, %p6855_p8 }
  0x1b   :  { %6863 = shalt.err (!%p6860_p10)
}
  0x1c   :  { %s6864_s28 = scalar_lea.vmem %s7113_s21, 16  ;;  %s6868_s4 = scalar_lea.vmem %s7113_s21, 32 }
  0x1d   :  { %p6865_p11 = scmp.ne.s32.totalorder %s7113_s21, %s6864_s28  ;;  %p6869_p12 = scmp.lt.s32.totalorder %s7113_s21, %s7113_s21 }
  0x1e   :  { %p6870_p13 = scmp.lt.s32.totalorder %s6868_s4, %s6864_s28 }
  0x20   :  { %p6871_p0 = por %p6870_p13, %p6869_p12 }
  0x22   :  { %p6872_p1 = pnand %p6871_p0, %p6865_p11 }
  0x24   :  { %6875 = shalt.err (!%p6872_p1)
}
  0x25   :  { %82 = dma.hbm_to_vmem [thread:$0]  %s11157_s10, 16, %s7113_s21, [#allocation8]  }
  0x26   :  { %s7022_s17 = smov [#allocation10]   ;;  %s7023_s20 = smov [#allocation2]  }
  0x27   :  { %s99_s18 = sshll.u32 %s7022_s17, 4  ;;  %s32_s22 = sshll.u32 %s7023_s20, 4  ;;  %s100_s18 = int_to_ptr.vmem [resolvable:$true] %s99_s18  ;;  %s7148_s22 = int_to_ptr.vmem [resolvable:$true] %s32_s22 }
  0x28   :  { %s6876_s25 = scalar_lea.hbm %s11159_s12, 64 }
  0x29   :  { %p6877_p2 = scmp.ne.s32.totalorder %s11159_s12, %s6876_s25  ;;  %p6880_p3 = scmp.lt.u32.totalorder %s6876_s25, %s11159_s12 }
  0x2b   :  { %p6882_p4 = pnand %p6880_p3, %p6877_p2 }
  0x2d   :  { %6885 = shalt.err (!%p6882_p4)
}
  0x2e   :  { %s6886_s10 = scalar_lea.vmem %s100_s18, 64  ;;  %p6891_p6 = scmp.lt.s32.totalorder %s100_s18, %s100_s18 }
  0x2f   :  { %p6887_p5 = scmp.ne.s32.totalorder %s100_s18, %s6886_s10  ;;  %p6892_p7 = scmp.lt.s32.totalorder %s6886_s10, %s6886_s10 }
  0x31   :  { %p6893_p8 = por %p6892_p7, %p6891_p6 }
  0x33   :  { %p6894_p9 = pnand %p6893_p8, %p6887_p5 }
  0x35   :  { %6897 = shalt.err (!%p6894_p9)
}
  0x36   :  { %102 = dma.hbm_to_vmem [thread:$0]  %s11159_s12, 64, %s100_s18, [#allocation11]  }
  0x37   :  { %s6898_s20 = scalar_lea.hbm %s11148_s1, 1152 }
  0x38   :  { %p6899_p10 = scmp.ne.s32.totalorder %s11148_s1, %s6898_s20  ;;  %p6902_p11 = scmp.lt.u32.totalorder %s6898_s20, %s11148_s1 }
  0x3a   :  { %p6904_p12 = pnand %p6902_p11, %p6899_p10 }
  0x3c   :  { %6907 = shalt.err (!%p6904_p12)
}
  0x3d   :  { %s6908_s27 = scalar_lea.vmem %s7148_s22, 1152  ;;  %p6913_p0 = scmp.lt.s32.totalorder %s7148_s22, %s7148_s22 }
  0x3e   :  { %p6909_p13 = scmp.ne.s32.totalorder %s7148_s22, %s6908_s27  ;;  %p6914_p1 = scmp.lt.s32.totalorder %s6908_s27, %s6908_s27 }
  0x40   :  { %p6915_p2 = por %p6914_p1, %p6913_p0 }
  0x42   :  { %p6916_p3 = pnand %p6915_p2, %p6909_p13 }
  0x44   :  { %6919 = shalt.err (!%p6916_p3)
}
  0x45   :  { %38 = dma.hbm_to_vmem [thread:$0]  %s11148_s1, 1152, %s7148_s22, [#allocation3], %s7020_s30, %s7020_s30, %s7021_s16  }
  0x46   :  { %s7024_s28 = smov [#allocation6]   ;;  %s7025_s10 = smov [#allocation9]  }
  0x47   :  { %s69_s4 = sshll.u32 %s7024_s28, 4  ;;  %s89_s21 = sshll.u32 %s7025_s10, 4  ;;  %s70_s4 = int_to_ptr.vmem [resolvable:$true] %s69_s4  ;;  %s90_s21 = int_to_ptr.vmem [resolvable:$true] %s89_s21 }
  0x48   :  { %s6920_s17 = scalar_lea.hbm %s11156_s9, 16 }
  0x49   :  { %p6921_p4 = scmp.ne.s32.totalorder %s11156_s9, %s6920_s17  ;;  %p6924_p5 = scmp.lt.u32.totalorder %s6920_s17, %s11156_s9 }
  0x4b   :  { %p6926_p6 = pnand %p6924_p5, %p6921_p4 }
  0x4d   :  { %6929 = shalt.err (!%p6926_p6)
}
  0x4e   :  { %s6930_s1 = scalar_lea.vmem %s70_s4, 16  ;;  %s6934_s30 = scalar_lea.vmem %s70_s4, 32 }
  0x4f   :  { %p6931_p7 = scmp.ne.s32.totalorder %s70_s4, %s6930_s1  ;;  %p6935_p8 = scmp.lt.s32.totalorder %s70_s4, %s70_s4 }
  0x50   :  { %p6936_p9 = scmp.lt.s32.totalorder %s6934_s30, %s6930_s1 }
  0x52   :  { %p6937_p10 = por %p6936_p9, %p6935_p8 }
  0x54   :  { %p6938_p11 = pnand %p6937_p10, %p6931_p7 }
  0x56   :  { %6941 = shalt.err (!%p6938_p11)
}
  0x57   :  { %72 = dma.hbm_to_vmem [thread:$0]  %s11156_s9, 16, %s70_s4, [#allocation5]  }
  0x58   :  { %s6942_s12 = scalar_lea.hbm %s11158_s11, 64 }
  0x59   :  { %p6943_p12 = scmp.ne.s32.totalorder %s11158_s11, %s6942_s12  ;;  %p6946_p13 = scmp.lt.u32.totalorder %s6942_s12, %s11158_s11 }
  0x5b   :  { %p6948_p0 = pnand %p6946_p13, %p6943_p12 }
  0x5d   :  { %6951 = shalt.err (!%p6948_p0)
}
  0x5e   :  { %s6952_s29 = scalar_lea.vmem %s90_s21, 64  ;;  %p6957_p2 = scmp.lt.s32.totalorder %s90_s21, %s90_s21 }
  0x5f   :  { %p6953_p1 = scmp.ne.s32.totalorder %s90_s21, %s6952_s29  ;;  %p6958_p3 = scmp.lt.s32.totalorder %s6952_s29, %s6952_s29 }
  0x61   :  { %p6959_p4 = por %p6958_p3, %p6957_p2 }
  0x63   :  { %p6960_p5 = pnand %p6959_p4, %p6953_p1 }
  0x65   :  { %6963 = shalt.err (!%p6960_p5)
}
  0x66   :  { %92 = dma.hbm_to_vmem [thread:$0]  %s11158_s11, 64, %s90_s21, [#allocation8]  }
  0x67   :  { %s7026_s17 = smov [#allocation12]   ;;  %s7027_s23 = smov [#allocation13]  }
  0x68   :  { %s109_s20 = sshll.u32 %s7026_s17, 4  ;;  %s119_s24 = sshll.u32 %s7027_s23, 4  ;;  %s110_s20 = int_to_ptr.vmem [resolvable:$true] %s109_s20  ;;  %s120_s24 = int_to_ptr.vmem [resolvable:$true] %s119_s24 }
  0x69   :  { %s6964_s30 = scalar_lea.hbm %s11160_s13, 256 }
  0x6a   :  { %p6965_p6 = scmp.ne.s32.totalorder %s11160_s13, %s6964_s30  ;;  %p6968_p7 = scmp.lt.u32.totalorder %s6964_s30, %s11160_s13 }
  0x6c   :  { %p6970_p8 = pnand %p6968_p7, %p6965_p6 }
  0x6e   :  { %6973 = shalt.err (!%p6970_p8)
}
  0x6f   :  { %s6974_s11 = scalar_lea.vmem %s110_s20, 256  ;;  %p6979_p10 = scmp.lt.s32.totalorder %s110_s20, %s110_s20 }
  0x70   :  { %p6975_p9 = scmp.ne.s32.totalorder %s110_s20, %s6974_s11  ;;  %p6980_p11 = scmp.lt.s32.totalorder %s6974_s11, %s6974_s11 }
  0x72   :  { %p6981_p12 = por %p6980_p11, %p6979_p10 }
  0x74   :  { %p6982_p13 = pnand %p6981_p12, %p6975_p9 }
  0x76   :  { %6985 = shalt.err (!%p6982_p13)
}
  0x77   :  { %112 = dma.hbm_to_vmem [thread:$0]  %s11160_s13, 256, %s110_s20, [#allocation11]  }
  0x78   :  { %s6986_s10 = scalar_lea.hbm %s11161_s14, 256 }
  0x79   :  { %p6987_p0 = scmp.ne.s32.totalorder %s11161_s14, %s6986_s10  ;;  %p6990_p1 = scmp.lt.u32.totalorder %s6986_s10, %s11161_s14 }
  0x7b   :  { %p6992_p2 = pnand %p6990_p1, %p6987_p0 }
  0x7d   :  { %6995 = shalt.err (!%p6992_p2)
}
  0x7e   :  { %s6996_s17 = scalar_lea.vmem %s120_s24, 256  ;;  %p7001_p4 = scmp.lt.s32.totalorder %s120_s24, %s120_s24 }
  0x7f   :  { %p6997_p3 = scmp.ne.s32.totalorder %s120_s24, %s6996_s17  ;;  %p7002_p5 = scmp.lt.s32.totalorder %s6996_s17, %s6996_s17 }
  0x81   :  { %p7003_p6 = por %p7002_p5, %p7001_p4 }
  0x83   :  { %p7004_p7 = pnand %p7003_p6, %p6997_p3 }
  0x85   :  { %7007 = shalt.err (!%p7004_p7)
}
  0x86   :  { %122 = dma.hbm_to_vmem [thread:$0]  %s11161_s14, 256, %s120_s24, [#allocation14]  }
  0x87   :  { %7008 = dma.done.wait [#allocation3], 1152  }
  0x88   :  { %7009 = vsyncadd [#allocation3], 4294966144 }
  0x89   :  { %7010 = dma.done.wait [#allocation5], 592  }
  0x8a   :  { %7011 = vsyncadd [#allocation5], 4294966704 }
  0x8b   :  { %7012 = dma.done.wait [#allocation8], 80  }
  0x8c   :  { %7013 = vsyncadd [#allocation8], 4294967216 }
  0x8d   :  { %7014 = dma.done.wait [#allocation11], 320  }
  0x8e   :  { %7015 = vsyncadd [#allocation11], 4294966976 }
  0x8f   :  { %7016 = dma.done.wait [#allocation14], 256  }
  0x90   :  { %7017 = vsyncadd [#allocation14], 4294967040  ;;  %v7028_v0 = vmov 0.0   ;;  %vm7029_vm0 = vmmov 0   ;;  %v148_v1 = vld [vmem:[%s11147_s0] sm:$0xff]  ;;  %v149_v2 = vld [vmem:[%s11147_s0 + $0x8] sm:$0xff]  ;;  %v480_v50 = vlaneseq }
  0x91   :  { %6617 = vmatprep.subr.bf16.mxu0 %v7028_v0  ;;  %6619 = vmatprep.mubr.msk.bf16.mxu0 %vm7029_vm0, %v7028_v0  ;;  %v150_v3 = vpack.c.bf16 %v149_v2, %v148_v1  ;;  %v6688_v4 = vld [vmem:[#allocation2] sm:$0xff]   ;;  %v6689_v5 = vld [vmem:[#allocation2 + $0x8] sm:$0xff]   ;;  %vm158_vm1 = vcmask 130048   ;;  %v6690_v6 = vld [vmem:[#allocation2 + $0x18] sm:$0xff]   ;;  %v11163_v13 = vmov 0   ;;  %s7031_s0 = smov 127  }
  0x92   :  { %6623 = vmatprep.subr.bf16.mxu1 %v7028_v0  ;;  %6625 = vmatprep.mubr.msk.bf16.mxu1 %vm7029_vm0, %v7028_v0  ;;  %v6691_v7 = vld [vmem:[#allocation2 + $0x10] sm:$0xff]   ;;  %v6693_v9 = vld [vmem:[#allocation2 + $0x20] sm:$0xff]   ;;  %v6694_v10 = vld [vmem:[#allocation2 + $0x28] sm:$0xff]   ;;  %s7032_s1 = smov 124   ;;  %v7273_v52 = vshrl.u32 %v480_v50, 7 }
  0x93   :  { %6618 = vmatpush3.bf16.msra.mxu0 %v150_v3  ;;  %6624 = vmatpush3.bf16.msra.mxu1 %v150_v3  ;;  %v6692_v8 = vld [vmem:[#allocation2 + $0x30] sm:$0xff]   ;;  %v6695_v11 = vld [vmem:[#allocation2 + $0x38] sm:$0xff]   ;;  %v6696_v12 = vld [vmem:[#allocation2 + $0x40] sm:$0xff]  }
  0x94   :  { %6635 = vmatprep.subr.bf16.mxu1 %v7028_v0  ;;  %6629 = vmatprep.subr.bf16.mxu0 %v7028_v0  ;;  %v473_v51 = vld [vmem:[#allocation7] sm:$0x1]  ;;  %11555 = vst [vmem:[#allocation20_spill] sm:$0xff] %v7273_v52  ;;  %v7276_v53 = vsub.s32 0, %v7273_v52 }
  0x95   :  { %6686 = vset.pattern.permute.xlu1 %v11163_v13  ;;  %6687 = vset.pattern.permute.xlu0 %v11163_v13  ;;  %vm474_vm2 = vcmp.lt.s32.totalorder %v473_v51, 3 }
  0x96   :  { %6620 = vmatmul.mubr.msk.bf16.vlgmr.msra.gmra.mrb[0].mxu0 %vm158_vm1, %v6688_v4  ;;  %6626 = vmatmul.mubr.msk.bf16.vlgmr.msra.gmra.mrb[0].mxu1 %vm158_vm1, %v6689_v5  ;;  %11556 = vst [vmem:[#allocation21_spill] sm:$0xff] %v7276_v53  ;;  %v479_v54 = vsel %vm474_vm2, 1, %v11163_v13 }
  0x97   :  { %6636 = vmatpush3.bf16.msra.mxu1 %v150_v3  ;;  %6637 = vmatprep.mubr.msk.bf16.mxu1 %vm7029_vm0, %v7028_v0  ;;  %v483_v55 = vrot.slane %v479_v54, %v7276_v53 }
  0x98   :  { %6630 = vmatpush3.bf16.msra.mxu0 %v150_v3  ;;  %6631 = vmatprep.mubr.msk.bf16.mxu0 %vm7029_vm0, %v7028_v0 }
  0x99   :  { %6647 = vmatprep.subr.bf16.mxu1 %v7028_v0  ;;  %6641 = vmatprep.subr.bf16.mxu0 %v7028_v0  ;;  %vm7280_vm3 = vcmp.eq.s32.totalorder %v483_v55, 1 }
  0x9e   :  { %6638 = vmatmul.mubr.msk.bf16.vlgmr.msra.gmra.mrb[4].mxu1 %vm158_vm1, %v6690_v6  ;;  %6632 = vmatmul.mubr.msk.bf16.vlgmr.msra.gmra.mrb[4].mxu0 %vm158_vm1, %v6691_v7 }
  0x9f   :  { %6648 = vmatpush3.bf16.msra.mxu1 %v150_v3  ;;  %6649 = vmatprep.mubr.msk.bf16.mxu1 %vm7029_vm0, %v7028_v0 }
  0xa0   :  { %6642 = vmatpush3.bf16.msra.mxu0 %v150_v3  ;;  %6643 = vmatprep.mubr.msk.bf16.mxu0 %vm7029_vm0, %v7028_v0 }
  0xa1   :  { %6653 = vmatprep.subr.bf16.mxu0 %v7028_v0  ;;  %6659 = vmatprep.subr.bf16.mxu1 %v7028_v0 }
  0xa6   :  { %6650 = vmatmul.mubr.msk.bf16.vlgmr.msra.gmra.mrb[8].mxu1 %vm158_vm1, %v6692_v8  ;;  %6644 = vmatmul.mubr.msk.bf16.vlgmr.msra.gmra.mrb[8].mxu0 %vm158_vm1, %v6693_v9 }
  0xa7   :  { %6654 = vmatpush3.bf16.msra.mxu0 %v150_v3  ;;  %6655 = vmatprep.mubr.msk.bf16.mxu0 %vm7029_vm0, %v7028_v0 }
  0xa8   :  { %6660 = vmatpush3.bf16.msra.mxu1 %v150_v3  ;;  %6661 = vmatprep.mubr.msk.bf16.mxu1 %vm7029_vm0, %v7028_v0 }
  0xa9   :  { %6665 = vmatprep.subr.bf16.mxu0 %v7028_v0 }
  0xae   :  { %6656 = vmatmul.mubr.msk.bf16.vlgmr.msra.gmra.mrb[12].mxu0 %vm158_vm1, %v6694_v10  ;;  %6662 = vmatmul.mubr.msk.bf16.vlgmr.msra.gmra.mrb[12].mxu1 %vm158_vm1, %v6695_v11 }
  0xaf   :  { %6666 = vmatpush3.bf16.msra.mxu0 %v150_v3  ;;  %6667 = vmatprep.mubr.msk.bf16.mxu0 %vm7029_vm0, %v7028_v0 }
  0xb0   :  { %809 = vmatprep.mubr.bf16.mxu1 %v11163_v13 }
  0xb6   :  { %6668 = vmatmul.mubr.msk.bf16.vlgmr.msra.gmra.mrb[16].mxu0 %vm158_vm1, %v6696_v12 }
  0xb7   :  { %850 = vmatprep.mubr.bf16.mxu0 %v11163_v13 }
 0x169   :  { %v196_v14 = vpop.f32.mrb[0].mxu0  ;;  %v248_v15 = vpop.f32.mrb[0].mxu1 }
 0x16a   :  { %661 = vrot.lane.b32.xlu0 %v196_v14, %s7031_s0  ;;  %v6621_v16 = vpop.f32.mrb[1].mxu0  ;;  %v6627_v17 = vpop.f32.mrb[1].mxu1  ;;  %v472_v14 = vld [vmem:[#allocation6] sm:$0x1] }
 0x16b   :  { %v199_v18 = vpop.f32.mrb[2].mxu0  ;;  %v251_v19 = vpop.f32.mrb[2].mxu1  ;;  %vm536_vm4 = vcmp.lt.s32.totalorder %v472_v14, 3  ;;  %v718_v17 = vld [vmem:[%s11150_s3 + $0x8] sm:$0xff] }
 0x16c   :  { %v6622_v20 = vpop.f32.mrb[3].mxu0  ;;  %539 = vrot.lane.b32.xlu1 %v251_v19, %s7032_s1  ;;  %v6628_v21 = vpop.f32.mrb[3].mxu1 }
 0x16e   :  { %663 = vrot.lane.b32.xlu0 %v199_v18, %s7031_s0 }
 0x171   :  { %v352_v22 = vpop.f32.mrb[4].mxu1  ;;  %v300_v23 = vpop.f32.mrb[4].mxu0 }
 0x172   :  { %475 = vrot.lane.b32.xlu1 %v352_v22, %s7031_s0  ;;  %v6639_v24 = vpop.f32.mrb[5].mxu1  ;;  %537 = vrot.lane.b32.xlu0 %v248_v15, %s7032_s1  ;;  %v6633_v25 = vpop.f32.mrb[5].mxu0  ;;  %v541_v15 = vsel %vm536_vm4, 1, %v11163_v13 }
 0x173   :  { %v355_v26 = vpop.f32.mrb[6].mxu1  ;;  %v303_v27 = vpop.f32.mrb[6].mxu0  ;;  %v545_v16 = vrot.slane %v541_v15, %v7276_v53  ;;  %v717_v15 = vld [vmem:[%s11150_s3] sm:$0xff] }
 0x174   :  { %v6640_v28 = vpop.f32.mrb[7].mxu1  ;;  %v6634_v29 = vpop.f32.mrb[7].mxu0 }
 0x175   :  { %vm7300_vm5 = vcmp.eq.s32.totalorder %v545_v16, 1 }
 0x176   :  { %477 = vrot.lane.b32.xlu1 %v355_v26, %s7031_s0  ;;  %653 = vrot.lane.b32.xlu0 %v300_v23, %s7032_s1 }
 0x179   :  { %v459_v30 = vpop.f32.mrb[8].mxu1  ;;  %v7265_v31 = vpop.f32.mrb[8].mxu0 }
 0x17a   :  { %655 = vrot.lane.b32.xlu1 %v303_v27, %s7032_s1  ;;  %v6651_v32 = vpop.f32.mrb[9].mxu1  ;;  %598 = vrot.lane.b32.xlu0 %v459_v30, %s7031_s0  ;;  %v6645_v33 = vpop.f32.mrb[9].mxu0 }
 0x17b   :  { %v462_v34 = vpop.f32.mrb[10].mxu1  ;;  %v7269_v35 = vpop.f32.mrb[10].mxu0 }
 0x17c   :  { %v6652_v36 = vpop.f32.mrb[11].mxu1  ;;  %v6646_v37 = vpop.f32.mrb[11].mxu0 }
 0x17e   :  { %600 = vrot.lane.b32.xlu1 %v462_v34, %s7031_s0 }
 0x181   :  { %v529_v38 = vpop.f32.mrb[12].mxu0  ;;  %v591_v39 = vpop.f32.mrb[12].mxu1 }
 0x182   :  { %v6657_v40 = vpop.f32.mrb[13].mxu0  ;;  %v6663_v41 = vpop.f32.mrb[13].mxu1 }
 0x183   :  { %v532_v42 = vpop.f32.mrb[14].mxu0  ;;  %v594_v43 = vpop.f32.mrb[14].mxu1 }
 0x184   :  { %v6658_v44 = vpop.f32.mrb[15].mxu0  ;;  %v6664_v45 = vpop.f32.mrb[15].mxu1 }
 0x189   :  { %v646_v46 = vpop.f32.mrb[16].mxu0 }
 0x18a   :  { %v6669_v47 = vpop.f32.mrb[17].mxu0 }
 0x18b   :  { %v649_v48 = vpop.f32.mrb[18].mxu0 }
 0x18c   :  { %v6670_v49 = vpop.f32.mrb[19].mxu0 }
 0x1dc   :  { %v662_v57 = vpop.permute.xlu0 %661 }
 0x1dd   :  { %v665_v58 = vsel %vm7280_vm3, %v662_v57, 0.0 }
 0x1de   :  { %667 = vrot.lane.b32.xlu0 %v665_v58, %s7032_s1  ;;  %v540_v59 = vpop.permute.xlu1 %539 }
 0x1df   :  { %v548_v22 = vsel %vm7300_vm5, %v540_v59, 0.0 }
 0x1e0   :  { %v664_v60 = vpop.permute.xlu0 %663  ;;  %v595_v28 = vadd.f32 %v594_v43, %v548_v22 }
 0x1e1   :  { %v666_v61 = vsel %vm7280_vm3, %v664_v60, 0.0 }
 0x1e2   :  { %669 = vrot.lane.b32.xlu1 %v666_v61, %s7032_s1 }
 0x1e4   :  { %v476_v62 = vpop.permute.xlu1 %475  ;;  %v538_v63 = vpop.permute.xlu0 %537 }
 0x1e5   :  { %v485_v0 = vsel %vm7280_vm3, %v476_v62, 0.0  ;;  %v547_v18 = vsel %vm7300_vm5, %v538_v63, 0.0 }
 0x1e6   :  { %v530_v1 = vadd.f32 %v529_v38, %v485_v0  ;;  %v592_v21 = vadd.f32 %v591_v39, %v547_v18 }
 0x1e8   :  { %v478_v2 = vpop.permute.xlu1 %477  ;;  %v654_v3 = vpop.permute.xlu0 %653  ;;  %v675_v20 = vadd.f32 %v530_v1, %v7265_v31 }
 0x1e9   :  { %v486_v4 = vsel %vm7280_vm3, %v478_v2, 0.0  ;;  %v657_v19 = vsel %vm7300_vm5, %v654_v3, 0.0 }
 0x1ea   :  { %v533_v5 = vadd.f32 %v532_v42, %v486_v4  ;;  %v676_v30 = vadd.f32 %v675_v20, %v592_v21 }
 0x1ec   :  { %v656_v6 = vpop.permute.xlu1 %655  ;;  %v599_v7 = vpop.permute.xlu0 %598  ;;  %v680_v27 = vadd.f32 %v533_v5, %v7269_v35 }
 0x1ed   :  { %v602_v8 = vsel %vm7280_vm3, %v599_v7, 0.0  ;;  %v658_v25 = vsel %vm7300_vm5, %v656_v6, 0.0 }
 0x1ee   :  { %v647_v9 = vadd.f32 %v646_v46, %v602_v8  ;;  %v681_v37 = vadd.f32 %v680_v27, %v595_v28 }
 0x1f0   :  { %v601_v10 = vpop.permute.xlu1 %600  ;;  %v659_v24 = vadd.f32 %v657_v19, %v647_v9  ;;  %v715_v9 = vld [vmem:[%s11149_s2] sm:$0xff] }
 0x1f1   :  { %v603_v11 = vsel %vm7280_vm3, %v601_v10, 0.0 }
 0x1f2   :  { %v650_v12 = vadd.f32 %v649_v48, %v603_v11 }
 0x1f4   :  { %v660_v32 = vadd.f32 %v658_v25, %v650_v12  ;;  %v716_v12 = vld [vmem:[%s11149_s2 + $0x8] sm:$0xff] }
 0x250   :  { %v668_v23 = vpop.permute.xlu0 %667 }
 0x251   :  { %v671_v26 = vsel %vm7300_vm5, %v668_v23, 0.0 }
 0x252   :  { %v673_v29 = vadd.f32 %v671_v26, %v659_v24 }
 0x254   :  { %v670_v33 = vpop.permute.xlu1 %669  ;;  %v677_v34 = vadd.f32 %v676_v30, %v673_v29 }
 0x255   :  { %v672_v36 = vsel %vm7300_vm5, %v670_v33, 0.0 }
 0x256   :  { %v674_v38 = vadd.f32 %v672_v36, %v660_v32  ;;  %678 = vadd.xlane.f32.xlu0 %v677_v34 }
 0x258   :  { %v682_v39 = vadd.f32 %v681_v37, %v674_v38 }
 0x25a   :  { %683 = vadd.xlane.f32.xlu1 %v682_v39 }
 0x2e3   :  { %v679_v40 = vpop.xlane.xlu0 %678 }
 0x2e4   :  { %v685_v41 = vmul.f32 0.001953125, %v679_v40 }
 0x2e6   :  { %v687_v42 = vsub.f32 %v7265_v31, %v685_v41  ;;  %v688_v44 = vsub.f32 %v530_v1, %v685_v41  ;;  %v689_v45 = vsub.f32 %v592_v21, %v685_v41  ;;  %v690_v46 = vsub.f32 %v673_v29, %v685_v41 }
 0x2e7   :  { %v684_v43 = vpop.xlane.xlu1 %683 }
 0x2e8   :  { %v686_v47 = vmul.f32 0.001953125, %v684_v43  ;;  %v695_v48 = vmul.f32 %v687_v42, %v687_v42  ;;  %v696_v49 = vmul.f32 %v688_v44, %v688_v44  ;;  %v697_v51 = vmul.f32 %v689_v45, %v689_v45 }
 0x2e9   :  { %v698_v58 = vmul.f32 %v690_v46, %v690_v46 }
 0x2ea   :  { %v703_v54 = vadd.f32 %v696_v49, %v695_v48  ;;  %v691_v55 = vsub.f32 %v7269_v35, %v686_v47  ;;  %v692_v56 = vsub.f32 %v533_v5, %v686_v47  ;;  %v693_v57 = vsub.f32 %v595_v28, %v686_v47 }
 0x2eb   :  { %v694_v60 = vsub.f32 %v674_v38, %v686_v47 }
 0x2ec   :  { %v704_v59 = vadd.f32 %v703_v54, %v697_v51  ;;  %v699_v61 = vmul.f32 %v691_v55, %v691_v55  ;;  %v700_v62 = vmul.f32 %v692_v56, %v692_v56  ;;  %v701_v31 = vmul.f32 %v693_v57, %v693_v57 }
 0x2ed   :  { %v702_v1 = vmul.f32 %v694_v60, %v694_v60 }
 0x2ee   :  { %v705_v63 = vadd.f32 %v704_v59, %v698_v58  ;;  %v708_v0 = vadd.f32 %v700_v62, %v699_v61  ;;  %v1034_v58 = vld [vmem:[#allocation4 + $0xc] sm:$0xf]  ;;  %v1121_v59 = vld [vmem:[#allocation4 + $0x10] sm:$0xf]  ;;  %v1208_v61 = vld [vmem:[#allocation4 + $0x14] sm:$0xf] }
 0x2ef   :  { %v1297_v62 = vld [vmem:[#allocation4 + $0x1c] sm:$0xf] }
 0x2f0   :  { %706 = vadd.xlane.f32.xlu0 %v705_v63  ;;  %v709_v2 = vadd.f32 %v708_v0, %v701_v31  ;;  %v1299_v63 = vld [vmem:[#allocation4 + $0x20] sm:$0xf] }
 0x2f2   :  { %v710_v3 = vadd.f32 %v709_v2, %v702_v1 }
 0x2f4   :  { %711 = vadd.xlane.f32.xlu0 %v710_v3 }
 0x37d   :  { %v707_v4 = vpop.xlane.xlu0 %706 }
 0x37e   :  { %v713_v6 = vmul.f32 0.001953125, %v707_v4 }
 0x380   :  { %v719_v7 = vadd.f32 1e-05, %v713_v6 }
 0x381   :  { %v712_v8 = vpop.xlane.xlu0 %711 }
 0x382   :  { %6697 = vrsqrt.f32 %v719_v7  ;;  %v714_v35 = vmul.f32 0.001953125, %v712_v8  ;;  %v7424_v8 = vld [vmem:[#allocation10] sm:$0xf] }
 0x383   :  { %vm1330_vm12 = vcmp.lt.s32.totalorder %v7424_v8, 7 }
 0x384   :  { %v720_v5 = vadd.f32 1e-05, %v714_v35 }
 0x386   :  { %6699 = vrsqrt.f32 %v720_v5 }
 0x38c   :  { %v6698_v10 = vpop.eup %6697 }
 0x38d   :  { %v723_v11 = vmul.f32 %v6698_v10, %v715_v9 }
 0x38f   :  { %727 = vperm.xlu1 %6686, %v723_v11   ;;  %v1302_v11 = vand.u32 1, %v7424_v8 }
 0x390   :  { %v6700_v14 = vpop.eup %6699 }
 0x391   :  { %v724_v16 = vmul.f32 %v6700_v14, %v716_v12  ;;  %vm1303_vm6 = vcmp.eq.s32.totalorder %v1302_v11, 0  ;;  %vm1329_vm11 = vcmp.eq.s32.totalorder %v1302_v11, 1 }
 0x392   :  { %vm1331_vm13 = vmand %vm1329_vm11, %vm1330_vm12 }
 0x393   :  { %745 = vperm.xlu1 %6686, %v717_v15   ;;  %732 = vperm.xlu0 %6687, %v724_v16  }
 0x397   :  { %750 = vperm.xlu1 %6686, %v718_v17   ;;  %v7446_v17 = vsub.s32 3, %v7273_v52 }
 0x399   :  { %11561 = vst [vmem:[#allocation22_spill] sm:$0xff] %v7446_v17 }
 0x40e   :  { %v728_v18 = vpop.permute.xlu1 %727 }
 0x40f   :  { %v735_v19 = vmul.f32 %v728_v18, %v687_v42  ;;  %v736_v20 = vmul.f32 %v728_v18, %v688_v44  ;;  %v737_v21 = vmul.f32 %v728_v18, %v689_v45  ;;  %v738_v22 = vmul.f32 %v728_v18, %v690_v46 }
 0x410   :  { %v7449_v18 = vsub.s32 1, %v7273_v52 }
 0x412   :  { %v733_v23 = vpop.permute.xlu0 %732  ;;  %v746_v24 = vpop.permute.xlu1 %745  ;;  %11562 = vst [vmem:[#allocation23_spill] sm:$0xff] %v7449_v18 }
 0x413   :  { %v753_v25 = vadd.f32 %v746_v24, %v735_v19  ;;  %v754_v26 = vadd.f32 %v746_v24, %v736_v20  ;;  %v755_v27 = vadd.f32 %v746_v24, %v737_v21  ;;  %v756_v28 = vadd.f32 %v746_v24, %v738_v22 }
 0x414   :  { %v739_v29 = vmul.f32 %v733_v23, %v691_v55  ;;  %v740_v30 = vmul.f32 %v733_v23, %v692_v56  ;;  %v741_v32 = vmul.f32 %v733_v23, %v693_v57  ;;  %v742_v33 = vmul.f32 %v733_v23, %v694_v60  ;;  %v773_v55 = vld [vmem:[#allocation4] sm:$0xf]  ;;  %v860_v56 = vld [vmem:[#allocation4 + $0x4] sm:$0xf]  ;;  %v947_v57 = vld [vmem:[#allocation4 + $0x8] sm:$0xf] }
 0x415   :  { %v761_v40 = vmax.f32 %v753_v25, 0.0  ;;  %v762_v41 = vmax.f32 %v754_v26, 0.0  ;;  %v763_v42 = vmax.f32 %v755_v27, 0.0  ;;  %v764_v44 = vmax.f32 %v756_v28, 0.0  ;;  %v1210_v60 = vld [vmem:[#allocation4 + $0x18] sm:$0xf] }
 0x416   :  { %v751_v34 = vpop.permute.xlu1 %750  ;;  %v1304_v21 = vsel %vm1303_vm6, 1, %v11163_v13  ;;  %v7457_v22 = vsub.s32 2, %v7273_v52 }
 0x417   :  { %v757_v36 = vadd.f32 %v751_v34, %v739_v29  ;;  %v758_v37 = vadd.f32 %v751_v34, %v740_v30  ;;  %v759_v38 = vadd.f32 %v751_v34, %v741_v32  ;;  %v760_v39 = vadd.f32 %v751_v34, %v742_v33 }
 0x418   :  { %11563 = vst [vmem:[#allocation24_spill] sm:$0xff] %v7457_v22  ;;  %v1320_v29 = vrot.slane %v1304_v21, %v7446_v17  ;;  %v1312_v30 = vrot.slane %v1304_v21, %v7449_v18  ;;  %v1308_v32 = vrot.slane %v1304_v21, %v7276_v53  ;;  %v1316_v33 = vrot.slane %v1304_v21, %v7457_v22 }
 0x419   :  { %v765_v45 = vmax.f32 %v757_v36, 0.0  ;;  %v766_v43 = vmax.f32 %v758_v37, 0.0  ;;  %v767_v46 = vmax.f32 %v759_v38, 0.0  ;;  %v768_v47 = vmax.f32 %v760_v39, 0.0 }
 0x41a   :  { %vm7475_vm7 = vcmp.eq.s32.totalorder %v1320_v29, 1  ;;  %vm7479_vm8 = vcmp.eq.s32.totalorder %v1312_v30, 1  ;;  %vm7487_vm9 = vcmp.eq.s32.totalorder %v1308_v32, 1  ;;  %vm7491_vm10 = vcmp.eq.s32.totalorder %v1316_v33, 1 }
 0x41b   :  { %v7332_v48 = vpack.c.bf16 %v765_v45, %v761_v40  ;;  %v7334_v49 = vpack.c.bf16 %v766_v43, %v762_v41  ;;  %v7336_v51 = vpack.c.bf16 %v767_v46, %v763_v42  ;;  %v7338_v54 = vpack.c.bf16 %v768_v47, %v764_v44 }
 0x41c   :  { %v11579_v44 = vmov 0 }
 0x41d   :  { %777 = vmatprep.subr.bf16.mxu1 %v7334_v49  ;;  %818 = vmatprep.subr.bf16.mxu0 %v7338_v54 }
 0x41e   :  { %778 = vmatpush1.bf16.msra.mxu1 %v7332_v48  ;;  %819 = vmatpush1.bf16.msra.mxu0 %v7336_v51 }
 0x41f   :  { %864 = vmatprep.subr.bf16.mxu1 %v7334_v49  ;;  %905 = vmatprep.subr.bf16.mxu0 %v7338_v54 }
 0x421   :  { %6429 = vmatmul.mubr.msk.bf16.vlgmr.msra.gmra.mrb[16].mxu1 %vm158_vm1, %v773_v55  ;;  %6430 = vmatmul.mubr.msk.bf16.vlgmr.msra.gmra.mrb[20].mxu0 %vm158_vm1, %v773_v55 }
 0x422   :  { %865 = vmatpush1.bf16.msra.mxu1 %v7332_v48  ;;  %906 = vmatpush1.bf16.msra.mxu0 %v7336_v51 }
 0x423   :  { %951 = vmatprep.subr.bf16.mxu1 %v7334_v49  ;;  %992 = vmatprep.subr.bf16.mxu0 %v7338_v54 }
 0x424   :  { %896 = vmatprep.mubr.bf16.mxu1 %v11163_v13  ;;  %937 = vmatprep.mubr.bf16.mxu0 %v11163_v13 }
 0x429   :  { %6431 = vmatmul.mubr.msk.bf16.vlgmr.msra.gmra.mrb[20].mxu1 %vm158_vm1, %v860_v56  ;;  %6432 = vmatmul.mubr.msk.bf16.vlgmr.msra.gmra.mrb[24].mxu0 %vm158_vm1, %v860_v56 }
 0x42a   :  { %952 = vmatpush1.bf16.msra.mxu1 %v7332_v48  ;;  %993 = vmatpush1.bf16.msra.mxu0 %v7336_v51 }
 0x42b   :  { %1038 = vmatprep.subr.bf16.mxu1 %v7334_v49  ;;  %1079 = vmatprep.subr.bf16.mxu0 %v7338_v54 }
 0x42c   :  { %983 = vmatprep.mubr.bf16.mxu1 %v11163_v13  ;;  %1024 = vmatprep.mubr.bf16.mxu0 %v11163_v13 }
 0x431   :  { %6433 = vmatmul.mubr.msk.bf16.vlgmr.msra.gmra.mrb[24].mxu1 %vm158_vm1, %v947_v57  ;;  %6434 = vmatmul.mubr.msk.bf16.vlgmr.msra.gmra.mrb[28].mxu0 %vm158_vm1, %v947_v57 }
 0x432   :  { %1039 = vmatpush1.bf16.msra.mxu1 %v7332_v48  ;;  %1080 = vmatpush1.bf16.msra.mxu0 %v7336_v51 }
 0x433   :  { %1125 = vmatprep.subr.bf16.mxu1 %v7334_v49  ;;  %1166 = vmatprep.subr.bf16.mxu0 %v7338_v54 }
 0x434   :  { %1070 = vmatprep.mubr.bf16.mxu1 %v11163_v13  ;;  %1111 = vmatprep.mubr.bf16.mxu0 %v11163_v13 }
 0x439   :  { %6435 = vmatmul.mubr.msk.bf16.vlgmr.msra.gmra.mrb[28].mxu1 %vm158_vm1, %v1034_v58  ;;  %6436 = vmatmul.mubr.msk.bf16.vlgmr.msra.gmra.mrb[32].mxu0 %vm158_vm1, %v1034_v58 }
 0x43a   :  { %1126 = vmatpush1.bf16.msra.mxu1 %v7332_v48  ;;  %1167 = vmatpush1.bf16.msra.mxu0 %v7336_v51 }
 0x43b   :  { %1214 = vmatprep.subr.bf16.mxu1 %v7334_v49  ;;  %1255 = vmatprep.subr.bf16.mxu0 %v7338_v54 }
 0x43c   :  { %1157 = vmatprep.mubr.bf16.mxu1 %v11163_v13  ;;  %1198 = vmatprep.mubr.bf16.mxu0 %v11163_v13 }
 0x441   :  { %6437 = vmatmul.mubr.msk.bf16.vlgmr.msra.gmra.mrb[32].mxu1 %vm158_vm1, %v1121_v59  ;;  %6438 = vmatmul.mubr.msk.bf16.vlgmr.msra.gmra.mrb[36].mxu0 %vm158_vm1, %v1121_v59 }
 0x442   :  { %1215 = vmatpush1.bf16.msra.mxu1 %v7332_v48  ;;  %1256 = vmatpush1.bf16.msra.mxu0 %v7336_v51 }
 0x443   :  { %1375 = vmatprep.subr.bf16.mxu1 %v7334_v49  ;;  %1416 = vmatprep.subr.bf16.mxu0 %v7338_v54 }
 0x444   :  { %1246 = vmatprep.mubr.bf16.mxu1 %v11163_v13  ;;  %1287 = vmatprep.mubr.bf16.mxu0 %v11163_v13 }
 0x449   :  { %6439 = vmatmul.mubr.msk.bf16.vlgmr.msra.gmra.mrb[36].mxu1 %vm158_vm1, %v1210_v60  ;;  %6440 = vmatmul.mubr.msk.bf16.vlgmr.msra.gmra.mrb[40].mxu0 %vm158_vm1, %v1210_v60 }
 0x44a   :  { %1376 = vmatpush1.bf16.msra.mxu1 %v7332_v48  ;;  %1417 = vmatpush1.bf16.msra.mxu0 %v7336_v51 }
 0x44b   :  { %1528 = vmatprep.subr.bf16.mxu1 %v7334_v49  ;;  %1569 = vmatprep.subr.bf16.mxu0 %v7338_v54 }
 0x44c   :  { %1407 = vmatprep.mubr.bf16.mxu1 %v11163_v13  ;;  %1448 = vmatprep.mubr.bf16.mxu0 %v11163_v13 }
 0x451   :  { %6441 = vmatmul.mubr.msk.bf16.vlgmr.msra.gmra.mrb[40].mxu1 %vm158_vm1, %v1208_v61  ;;  %6442 = vmatmul.mubr.msk.bf16.vlgmr.msra.gmra.mrb[44].mxu0 %vm158_vm1, %v1208_v61 }
 0x452   :  { %1529 = vmatpush1.bf16.msra.mxu1 %v7332_v48  ;;  %1570 = vmatpush1.bf16.msra.mxu0 %v7336_v51 }
 0x453   :  { %1633 = vmatprep.subr.bf16.mxu1 %v7334_v49  ;;  %1674 = vmatprep.subr.bf16.mxu0 %v7338_v54 }
 0x454   :  { %1560 = vmatprep.mubr.bf16.mxu1 %v11163_v13  ;;  %1601 = vmatprep.mubr.bf16.mxu0 %v11163_v13 }
 0x459   :  { %6443 = vmatmul.mubr.msk.bf16.vlgmr.msra.gmra.mrb[44].mxu1 %vm158_vm1, %v1297_v62  ;;  %6444 = vmatmul.mubr.msk.bf16.vlgmr.msra.gmra.mrb[48].mxu0 %vm158_vm1, %v1297_v62 }
 0x45a   :  { %1634 = vmatpush1.bf16.msra.mxu1 %v7332_v48  ;;  %1675 = vmatpush1.bf16.msra.mxu0 %v7336_v51 }
 0x45b   :  { %1665 = vmatprep.mubr.bf16.mxu1 %v11163_v13  ;;  %1706 = vmatprep.mubr.bf16.mxu0 %v11163_v13 }
 0x461   :  { %6445 = vmatmul.mubr.msk.bf16.vlgmr.msra.gmra.mrb[48].mxu1 %vm158_vm1, %v1299_v63  ;;  %6446 = vmatmul.mubr.msk.bf16.vlgmr.msra.gmra.mrb[52].mxu0 %vm158_vm1, %v1299_v63 }
 0x462   :  { %2016 = vmatprep.mubr.bf16.mxu1 %v11163_v13  ;;  %2057 = vmatprep.mubr.bf16.mxu0 %v11163_v13 }
 0x4f4   :  { %v7412_v31 = vpop.f32.mrb[16].mxu1  ;;  %v7414_v0 = vpop.f32.mrb[20].mxu0 }
 0x4f5   :  { %v7416_v1 = vpop.f32.mrb[17].mxu1  ;;  %1747 = vrot.lane.b32.xlu1 %v7414_v0, %s7031_s0  ;;  %v7420_v2 = vpop.f32.mrb[21].mxu0 }
 0x4f6   :  { %v815_v3 = vpop.f32.mrb[18].mxu1  ;;  %v856_v4 = vpop.f32.mrb[22].mxu0 }
 0x4f7   :  { %v816_v6 = vpop.f32.mrb[19].mxu1  ;;  %v857_v7 = vpop.f32.mrb[23].mxu0 }
 0x4f9   :  { %1745 = vrot.lane.b32.xlu1 %v7416_v1, %s7031_s0 }
 0x4fc   :  { %v7426_v35 = vpop.f32.mrb[24].mxu0  ;;  %v7428_v5 = vpop.f32.mrb[20].mxu1 }
 0x4fd   :  { %1749 = vrot.lane.b32.xlu1 %v7420_v2, %s7031_s0  ;;  %1491 = vrot.lane.b32.xlu0 %v7426_v35, %s7032_s1  ;;  %v7434_v9 = vpop.f32.mrb[21].mxu1  ;;  %v7436_v10 = vpop.f32.mrb[25].mxu0 }
 0x4fe   :  { %v902_v12 = vpop.f32.mrb[22].mxu1  ;;  %v943_v14 = vpop.f32.mrb[26].mxu0 }
 0x4ff   :  { %v903_v15 = vpop.f32.mrb[23].mxu1  ;;  %v944_v16 = vpop.f32.mrb[27].mxu0 }
 0x501   :  { %1743 = vrot.lane.b32.xlu1 %v7412_v31, %s7031_s0  ;;  %1487 = vrot.lane.b32.xlu0 %v7428_v5, %s7032_s1 }
 0x504   :  { %v7451_v19 = vpop.f32.mrb[24].mxu1  ;;  %v7453_v20 = vpop.f32.mrb[28].mxu0 }
 0x505   :  { %1719 = vrot.lane.b32.xlu0 %v7451_v19, %s7032_s1  ;;  %1493 = vrot.lane.b32.xlu1 %v7436_v10, %s7032_s1  ;;  %v7463_v23 = vpop.f32.mrb[29].mxu0  ;;  %v7465_v24 = vpop.f32.mrb[25].mxu1 }
 0x506   :  { %v989_v25 = vpop.f32.mrb[26].mxu1  ;;  %v1030_v26 = vpop.f32.mrb[30].mxu0 }
 0x507   :  { %v990_v27 = vpop.f32.mrb[27].mxu1  ;;  %v1031_v28 = vpop.f32.mrb[31].mxu0 }
 0x509   :  { %1489 = vrot.lane.b32.xlu1 %v7434_v9, %s7032_s1  ;;  %1725 = vrot.lane.b32.xlu0 %v7463_v23, %s7032_s1 }
 0x50c   :  { %v7483_v37 = vpop.f32.mrb[28].mxu1  ;;  %v7485_v38 = vpop.f32.mrb[32].mxu0 }
 0x50d   :  { %1723 = vrot.lane.b32.xlu1 %v7453_v20, %s7032_s1  ;;  %v7500_v42 = vpop.f32.mrb[29].mxu1  ;;  %v7505_v45 = vpop.f32.mrb[33].mxu0 }
 0x50e   :  { %1334 = vrot.lane.b32.xlu0 %v7500_v42, %s7031_s0  ;;  %v1076_v46 = vpop.f32.mrb[30].mxu1  ;;  %v1117_v48 = vpop.f32.mrb[34].mxu0 }
 0x50f   :  { %v1077_v49 = vpop.f32.mrb[31].mxu1  ;;  %v1118_v51 = vpop.f32.mrb[35].mxu0 }
 0x511   :  { %1332 = vrot.lane.b32.xlu1 %v7483_v37, %s7031_s0 }
 0x514   :  { %v7517_v54 = vpop.f32.mrb[32].mxu1  ;;  %v7519_v55 = vpop.f32.mrb[36].mxu0 }
 0x515   :  { %11572 = vst [vmem:[#allocation25_spill] sm:$0xff] %v7519_v55  ;;  %1336 = vrot.lane.b32.xlu1 %v7485_v38, %s7031_s0  ;;  %v7523_v56 = vpop.f32.mrb[33].mxu1  ;;  %v7525_v57 = vpop.f32.mrb[37].mxu0 }
 0x516   :  { %11573 = vst [vmem:[#allocation26_spill] sm:$0xff] %v7525_v57  ;;  %v1783_v58 = vadd.f32 %v7523_v56, %v7517_v54  ;;  %v1163_v59 = vpop.f32.mrb[34].mxu1  ;;  %v1204_v60 = vpop.f32.mrb[38].mxu0 }
 0x517   :  { %v1164_v61 = vpop.f32.mrb[35].mxu1  ;;  %v1205_v62 = vpop.f32.mrb[39].mxu0 }
 0x518   :  { %v1784_v63 = vadd.f32 %v1783_v58, %v7519_v55  ;;  %v11583_v55 = vmov 0 }
 0x519   :  { %1338 = vrot.lane.b32.xlu1 %v7505_v45, %s7031_s0 }
 0x51a   :  { %v7533_v3 = vadd.f32 %v1784_v63, %v7525_v57 }
 0x51c   :  { %v7535_v4 = vpop.f32.mrb[36].mxu1  ;;  %v7537_v6 = vpop.f32.mrb[40].mxu0 }
 0x51d   :  { %1614 = vrot.lane.b32.xlu0 %v7535_v4, %s7031_s0  ;;  %1721 = vrot.lane.b32.xlu1 %v7465_v24, %s7032_s1  ;;  %v7546_v12 = vpop.f32.mrb[37].mxu1  ;;  %v7551_v15 = vpop.f32.mrb[41].mxu0 }
 0x51e   :  { %v1252_v25 = vpop.f32.mrb[38].mxu1  ;;  %v1293_v26 = vpop.f32.mrb[42].mxu0 }
 0x51f   :  { %v1253_v27 = vpop.f32.mrb[39].mxu1  ;;  %v1294_v28 = vpop.f32.mrb[43].mxu0 }
 0x521   :  { %1616 = vrot.lane.b32.xlu0 %v7546_v12, %s7031_s0  ;;  %1618 = vrot.lane.b32.xlu1 %v7537_v6, %s7031_s0 }
 0x524   :  { %v7563_v29 = vpop.f32.mrb[40].mxu1  ;;  %v7565_v30 = vpop.f32.mrb[44].mxu0 }
 0x525   :  { %1620 = vrot.lane.b32.xlu1 %v7551_v15, %s7031_s0  ;;  %v7569_v32 = vpop.f32.mrb[41].mxu1  ;;  %v7571_v33 = vpop.f32.mrb[45].mxu0 }
 0x526   :  { %v1413_v46 = vpop.f32.mrb[42].mxu1  ;;  %v1454_v48 = vpop.f32.mrb[46].mxu0 }
 0x527   :  { %v1414_v49 = vpop.f32.mrb[43].mxu1  ;;  %v1455_v51 = vpop.f32.mrb[47].mxu0 }
 0x52c   :  { %v7573_v58 = vpop.f32.mrb[44].mxu1  ;;  %v7575_v59 = vpop.f32.mrb[48].mxu0 }
 0x52d   :  { %v7577_v60 = vpop.f32.mrb[45].mxu1  ;;  %v7579_v61 = vpop.f32.mrb[49].mxu0 }
 0x52e   :  { %v1566_v62 = vpop.f32.mrb[46].mxu1  ;;  %v1607_v63 = vpop.f32.mrb[50].mxu0 }
 0x52f   :  { %v1567_v25 = vpop.f32.mrb[47].mxu1  ;;  %v1608_v26 = vpop.f32.mrb[51].mxu0  ;;  %v1347_v62 = vsel %vm1331_vm13, 1, %v11163_v13  ;;  %v1300_v63 = vld [vmem:[#allocation9] sm:$0xf] }
 0x530   :  { %v7594_v25 = vand.u32 127, %v480_v50  ;;  %v1359_v26 = vrot.slane %v1347_v62, %v7457_v22  ;;  %v1457_v21 = vand.u32 1, %v1300_v63  ;;  %vm1485_vm0 = vcmp.lt.s32.totalorder %v1300_v63, 7 }
 0x531   :  { %v1363_v8 = vrot.slane %v1347_v62, %v7446_v17  ;;  %v1741_v50 = vsel %vm7491_vm10, %v7420_v2, 0.0  ;;  %v1351_v63 = vrot.slane %v1347_v62, %v7276_v53  ;;  %v1355_v2 = vrot.slane %v1347_v62, %v7449_v18 }
 0x532   :  { %11574 = vst [vmem:[#allocation27_spill] sm:$0xff] %v7594_v25  ;;  %vm11177_vm14 = vcmp.lt.s32.totalorder %v7594_v25, 127  ;;  %vm1484_vm15 = vcmp.eq.s32.totalorder %v1457_v21, 1  ;;  %vm7598_vm1 = vcmp.eq.s32.totalorder %v1359_v26, 1  ;;  %vm1458_vm3 = vcmp.eq.s32.totalorder %v1457_v21, 0 }
 0x533   :  { %vm1486_vm2 = vmand %vm1484_vm15, %vm1485_vm0  ;;  %vm7614_vm4 = vcmp.eq.s32.totalorder %v1363_v8, 1  ;;  %v1742_v21 = vsel %vm7475_vm7, %v7412_v31, 0.0  ;;  %vm7635_vm5 = vcmp.eq.s32.totalorder %v1351_v63, 1  ;;  %vm7639_vm6 = vcmp.eq.s32.totalorder %v1355_v2, 1 }
 0x534   :  { %v7581_v27 = vpop.f32.mrb[48].mxu1  ;;  %v7583_v28 = vpop.f32.mrb[52].mxu0  ;;  %v1500_v43 = vsel %vm1486_vm2, 1, %v11163_v13  ;;  %v11580_v44 = vsel %vm7635_vm5, 4294967295, %v11579_v44  ;;  %vm11178_vm11 = vcmp.lt.s32.totalorder %v7594_v25, 124  ;;  %v1740_v63 = vsel %vm7479_vm8, %v7414_v0, 0.0 }
 0x535   :  { %v7585_v46 = vpop.f32.mrb[49].mxu1  ;;  %v7587_v48 = vpop.f32.mrb[53].mxu0  ;;  %v1739_v2 = vsel %vm7487_vm9, %v7416_v1, 0.0 }
 0x536   :  { %v1671_v49 = vpop.f32.mrb[50].mxu1  ;;  %v1712_v51 = vpop.f32.mrb[54].mxu0 }
 0x537   :  { %v1672_v16 = vpop.f32.mrb[51].mxu1  ;;  %v1713_v7 = vpop.f32.mrb[55].mxu0 }
 0x567   :  { %v1748_v14 = vpop.permute.xlu1 %1747 }
 0x56b   :  { %v1746_v11 = vpop.permute.xlu1 %1745 }
 0x56c   :  { %v1752_v16 = vsel %vm11177_vm14, %v1746_v11, %v1748_v14 }
 0x56d   :  { %v7610_v49 = vsel %vm7598_vm1, %v1752_v16, %v1741_v50  ;;  %v1459_v50 = vsel %vm1458_vm3, 1, %v11163_v13  ;;  %v1508_v13 = vrot.slane %v1500_v43, %v7449_v18 }
 0x56e   :  { %1767 = vrot.lane.b32.xlu1 %v7610_v49, %s7032_s1  ;;  %v1463_v16 = vrot.slane %v1459_v50, %v7276_v53  ;;  %v1467_v47 = vrot.slane %v1459_v50, %v7449_v18 }
 0x56f   :  { %v1750_v26 = vpop.permute.xlu1 %1749  ;;  %v1492_v41 = vpop.permute.xlu0 %1491  ;;  %vm7682_vm0 = vcmp.eq.s32.totalorder %v1508_v13, 1 }
 0x570   :  { %v1751_v8 = vsel %vm11177_vm14, %v1748_v14, %v1750_v26  ;;  %v1504_v14 = vrot.slane %v1500_v43, %v7276_v53  ;;  %vm7658_vm12 = vcmp.eq.s32.totalorder %v1463_v16, 1  ;;  %vm7662_vm13 = vcmp.eq.s32.totalorder %v1467_v47, 1 }
 0x571   :  { %v7631_v62 = vsel %vm7614_vm4, %v1751_v8, %v1742_v21  ;;  %v1471_v21 = vrot.slane %v1459_v50, %v7457_v22  ;;  %v1475_v8 = vrot.slane %v1459_v50, %v7446_v17  ;;  %v11584_v55 = vsel %vm7658_vm12, 4294967295, %v11583_v55 }
 0x572   :  { %1769 = vrot.lane.b32.xlu0 %v7631_v62, %s7032_s1  ;;  %vm7678_vm15 = vcmp.eq.s32.totalorder %v1504_v14, 1  ;;  %v1480_v16 = vsel %vm7658_vm12, %v7426_v35, 0.0  ;;  %v1481_v14 = vsel %vm7662_vm13, %v7436_v10, 0.0  ;;  %v1716_v36 = vsel %vm7662_vm13, %v7463_v23, 0.0 }
 0x573   :  { %v1744_v52 = vpop.permute.xlu1 %1743  ;;  %v1488_v57 = vpop.permute.xlu0 %1487  ;;  %vm7698_vm2 = vcmp.eq.s32.totalorder %v1471_v21, 1  ;;  %vm7702_vm3 = vcmp.eq.s32.totalorder %v1475_v8, 1  ;;  %v11597_v8 = vmov 0  ;;  %v11627_v21 = vld [vmem:[#allocation25_spill] sm:$0xff] }
 0x574   :  { %v1753_v53 = vsel %vm11177_vm14, %v1744_v52, %v1746_v11  ;;  %v1754_v18 = vsel %vm11177_vm14, %v1750_v26, %v1744_v52  ;;  %v11587_v52 = vmov 0  ;;  %v1516_v11 = vrot.slane %v1500_v43, %v7446_v17 }
 0x575   :  { %v7668_v0 = vsel %vm7635_vm5, %v1754_v18, %v1739_v2  ;;  %v7672_v1 = vsel %vm7639_vm6, %v1753_v53, %v1740_v63  ;;  %v11588_v52 = vsel %vm7678_vm15, 4294967295, %v11587_v52  ;;  %v1512_v18 = vrot.slane %v1500_v43, %v7457_v22 }
 0x576   :  { %1763 = vrot.lane.b32.xlu0 %v7668_v0, %s7032_s1  ;;  %1765 = vrot.lane.b32.xlu1 %v7672_v1, %s7032_s1 }
 0x577   :  { %v1720_v53 = vpop.permute.xlu0 %1719  ;;  %v1494_v26 = vpop.permute.xlu1 %1493  ;;  %vm7716_vm14 = vcmp.eq.s32.totalorder %v1512_v18, 1 }
 0x578   :  { %v1496_v13 = vsel %vm11178_vm11, %v1492_v41, %v1494_v26  ;;  %v1499_v63 = vsel %vm11178_vm11, %v1494_v26, %v1488_v57  ;;  %vm7720_vm11 = vcmp.eq.s32.totalorder %v1516_v11, 1 }
 0x579   :  { %v1521_v35 = vsel %vm7678_vm15, %v1496_v13, %v1480_v16  ;;  %v1522_v10 = vsel %vm7682_vm0, %v1499_v63, %v1481_v14  ;;  %v11598_v8 = vsel %vm7720_vm11, 4294967295, %v11597_v8  ;;  %v1482_v16 = vsel %vm7698_vm2, %v7428_v5, 0.0 }
 0x57a   :  { %v7711_v22 = vadd.f32 %v7573_v58, %v1521_v35  ;;  %v7714_v17 = vadd.f32 %v7577_v60, %v1522_v10  ;;  %v1483_v58 = vsel %vm7702_vm3, %v7434_v9, 0.0  ;;  %vm11599_vm15 = vcmp.lt.s32.totalorder %v7594_v25, 124 }
 0x57b   :  { %v1490_v26 = vpop.permute.xlu1 %1489  ;;  %vm11600_vm12 = vmmov %vm11599_vm15  ;;  %v1726_v14 = vpop.permute.xlu0 %1725 }
 0x57c   :  { %v1497_v60 = vsel %vm11599_vm15, %v1490_v26, %v1492_v41  ;;  %v1498_v18 = vsel %vm11600_vm12, %v1488_v57, %v1490_v26  ;;  %vm11601_vm15 = vcmp.lt.s32.totalorder %v7594_v25, 127  ;;  %v11602_v57 = vsel %vm7479_vm8, %v7485_v38, 0.0 }
 0x57d   :  { %v1523_v11 = vsel %vm7716_vm14, %v1498_v18, %v1482_v16  ;;  %v1524_v13 = vsel %vm7720_vm11, %v1497_v60, %v1483_v58  ;;  %vm11603_vm12 = vmmov %vm11601_vm15  ;;  %v11604_v58 = vsel %vm7491_vm10, %v7505_v45, 0.0 }
 0x57e   :  { %v7739_v63 = vadd.f32 %v7575_v59, %v1523_v11  ;;  %v7742_v5 = vadd.f32 %v7579_v61, %v1524_v13  ;;  %vm11606_vm11 = vmmov %vm11603_vm12  ;;  %v11607_v13 = vsel %vm7487_vm9, %v7500_v42, 0.0 }
 0x57f   :  { %v1724_v9 = vpop.permute.xlu1 %1723 }
 0x580   :  { %v1335_v35 = vpop.permute.xlu0 %1334 }
 0x583   :  { %v1333_v10 = vpop.permute.xlu1 %1332 }
 0x584   :  { %v1345_v41 = vsel %vm11601_vm15, %v1333_v10, %v1335_v35  ;;  %vm11605_vm15 = vmmov %vm11603_vm12 }
 0x585   :  { %v1369_v26 = vsel %vm7639_vm6, %v1345_v41, %v11602_v57 }
 0x586   :  { %v7753_v16 = vadd.f32 %v7569_v32, %v1369_v26 }
 0x587   :  { %v1337_v59 = vpop.permute.xlu1 %1336 }
 0x588   :  { %v1344_v61 = vsel %vm11603_vm12, %v1335_v35, %v1337_v59  ;;  %v11608_v35 = vsel %vm7475_vm7, %v7483_v37, 0.0 }
 0x589   :  { %v1370_v60 = vsel %vm7598_vm1, %v1344_v61, %v11604_v58 }
 0x58a   :  { %v7764_v18 = vadd.f32 %v7565_v30, %v1370_v60 }
 0x58b   :  { %v1339_v38 = vpop.permute.xlu1 %1338 }
 0x58c   :  { %v1343_v11 = vsel %vm11605_vm15, %v1337_v59, %v1339_v38  ;;  %v1346_v32 = vsel %vm11606_vm11, %v1339_v38, %v1333_v10  ;;  %vm11609_vm11 = vcmp.lt.s32.totalorder %v7594_v25, 124  ;;  %v11613_v38 = vsel %vm7491_vm10, %v7551_v15, 0.0 }
 0x58d   :  { %v1368_v45 = vsel %vm7635_vm5, %v1346_v32, %v11607_v13  ;;  %v1371_v30 = vsel %vm7614_vm4, %v1343_v11, %v11608_v35  ;;  %v1730_v61 = vsel %vm11609_vm11, %v1726_v14, %v1720_v53  ;;  %vm11610_vm12 = vmmov %vm11609_vm11  ;;  %v1717_v11 = vsel %vm7698_vm2, %v7451_v19, 0.0 }
 0x58e   :  { %v7783_v41 = vadd.f32 %v7563_v29, %v1368_v45  ;;  %v7786_v57 = vadd.f32 %v7571_v33, %v1371_v30  ;;  %vm11611_vm5 = vmmov %vm11605_vm15  ;;  %v11612_v33 = vsel %vm7479_vm8, %v7537_v6, 0.0  ;;  %v1732_v40 = vsel %vm7682_vm0, %v1730_v61, %v1716_v36 }
 0x58f   :  { %v1615_v10 = vpop.permute.xlu0 %1614  ;;  %v1722_v26 = vpop.permute.xlu1 %1721  ;;  %vm11614_vm8 = vmmov %vm11609_vm11  ;;  %v1718_v30 = vsel %vm7702_vm3, %v7465_v24, 0.0  ;;  %vm11620_vm11 = vnez %v11584_v55  ;;  %v1762_v55 = vsel %vm7702_vm3, %v7672_v1, 0.0 }
 0x590   :  { %v1729_v58 = vsel %vm11610_vm12, %v1720_v53, %v1722_v26  ;;  %v1728_v32 = vsel %vm11614_vm8, %v1722_v26, %v1724_v9  ;;  %vm11615_vm10 = vmmov %vm11611_vm5  ;;  %v11618_v26 = vsel %vm7487_vm9, %v7546_v12, 0.0  ;;  %v1715_v34 = vsel %vm11620_vm11, %v7453_v20, 0.0 }
 0x591   :  { %v1733_v15 = vsel %vm7716_vm14, %v1729_v58, %v1717_v11  ;;  %v1759_v58 = vsel %vm11620_vm11, %v7610_v49, 0.0 }
 0x593   :  { %v1617_v59 = vpop.permute.xlu0 %1616  ;;  %v1619_v42 = vpop.permute.xlu1 %1618 }
 0x594   :  { %v1624_v37 = vsel %vm11605_vm15, %v1615_v10, %v1617_v59  ;;  %v1623_v29 = vsel %vm11611_vm5, %v1617_v59, %v1619_v42 }
 0x595   :  { %v1627_v60 = vsel %vm7639_vm6, %v1624_v37, %v11612_v33  ;;  %v1628_v53 = vsel %vm7598_vm1, %v1623_v29, %v11613_v38  ;;  %vm11616_vm1 = vmmov %vm11614_vm8  ;;  %vm11619_vm6 = vnez %v11580_v44  ;;  %v1786_v44 = vadd.f32 %v7533_v3, %v7783_v41 }
 0x596   :  { %v1670_v6 = vadd.f32 %v7585_v46, %v1627_v60  ;;  %v1709_v31 = vadd.f32 %v7583_v28, %v1628_v53  ;;  %v1727_v23 = vsel %vm11616_vm1, %v1724_v9, %v1726_v14  ;;  %v11617_v46 = vsel %vm7475_vm7, %v7535_v4, 0.0  ;;  %vm11623_vm9 = vmmov %vm11616_vm1 }
 0x597   :  { %v1621_v7 = vpop.permute.xlu1 %1620  ;;  %vm11621_vm7 = vnez %v11598_v8  ;;  %v1787_v12 = vadd.f32 %v1786_v44, %v7753_v16  ;;  %v1760_v60 = vsel %vm7662_vm13, %v7631_v62, 0.0  ;;  %v1761_v38 = vsel %vm7698_vm2, %v7668_v0, 0.0  ;;  %vm11624_vm12 = vmmov %vm11616_vm1 }
 0x598   :  { %v1736_v13 = vadd.f32 %v1732_v40, %v1670_v6  ;;  %v1737_v19 = vadd.f32 %v1733_v15, %v1709_v31  ;;  %v1622_v45 = vsel %vm11615_vm10, %v1619_v42, %v1621_v7  ;;  %v1625_v28 = vsel %vm11611_vm5, %v1621_v7, %v1615_v10  ;;  %vm11625_vm15 = vmmov %vm11616_vm1 }
 0x599   :  { %v1629_v35 = vsel %vm7614_vm4, %v1622_v45, %v11617_v46  ;;  %v1626_v14 = vsel %vm11619_vm6, %v1625_v28, %v11618_v26  ;;  %v1734_v51 = vsel %vm11621_vm7, %v1728_v32, %v1718_v30  ;;  %vm11622_vm4 = vnez %v11588_v52  ;;  %vm11626_vm8 = vmmov %vm11616_vm1 }
 0x59a   :  { %v1711_v9 = vadd.f32 %v7587_v48, %v1629_v35  ;;  %v1668_v4 = vadd.f32 %v7581_v27, %v1626_v14  ;;  %v1731_v24 = vsel %vm11622_vm4, %v1727_v23, %v1715_v34  ;;  %v1788_v48 = vadd.f32 %v1787_v12, %v7764_v18 }
 0x59b   :  { %vm11203_vm13 = vcmask 64512  }
 0x59c   :  { %v1738_v39 = vadd.f32 %v1734_v51, %v1711_v9  ;;  %v1735_v10 = vadd.f32 %v1731_v24, %v1668_v4  ;;  %v1789_v59 = vadd.f32 %v1788_v48, %v7786_v57 }
 0x59e   :  { %v1790_v20 = vadd.f32 %v1789_v59, %v7711_v22 }
 0x5a0   :  { %v1791_v27 = vadd.f32 %v1790_v20, %v7714_v17 }
 0x5a2   :  { %v1792_v3 = vadd.f32 %v1791_v27, %v7739_v63 }
 0x5a4   :  { %v1793_v62 = vadd.f32 %v1792_v3, %v7742_v5 }
 0x5e0   :  { %v1768_v42 = vpop.permute.xlu1 %1767 }
 0x5e4   :  { %v1770_v61 = vpop.permute.xlu0 %1769 }
 0x5e5   :  { %v1771_v37 = vsel %vm11623_vm9, %v1768_v42, %v1770_v61 }
 0x5e6   :  { %v1775_v29 = vsel %vm11622_vm4, %v1771_v37, %v1759_v58 }
 0x5e7   :  { %v1779_v33 = vadd.f32 %v1775_v29, %v1735_v10 }
 0x5e8   :  { %v1764_v49 = vpop.permute.xlu0 %1763  ;;  %v1766_v53 = vpop.permute.xlu1 %1765 }
 0x5e9   :  { %v1774_v11 = vsel %vm11624_vm12, %v1770_v61, %v1764_v49  ;;  %v1772_v52 = vsel %vm11625_vm15, %v1766_v53, %v1768_v42  ;;  %v1773_v50 = vsel %vm11626_vm8, %v1764_v49, %v1766_v53  ;;  %v1794_v31 = vadd.f32 %v1793_v62, %v1779_v33 }
 0x5ea   :  { %v1776_v0 = vsel %vm7682_vm0, %v1774_v11, %v1760_v60  ;;  %v1777_v2 = vsel %vm7716_vm14, %v1773_v50, %v1761_v38  ;;  %v1778_v1 = vsel %vm11621_vm7, %v1772_v52, %v1762_v55  ;;  %v1852_v50 = vld [vmem:[%s11153_s6] sm:$0xff]  ;;  %vm11202_vm14 = vcmask 1043456  }
 0x5eb   :  { %v1780_v43 = vadd.f32 %v1776_v0, %v1736_v13  ;;  %v1781_v36 = vadd.f32 %v1777_v2, %v1737_v19  ;;  %v1782_v6 = vadd.f32 %v1778_v1, %v1738_v39  ;;  %v11628_v19 = vld [vmem:[#allocation26_spill] sm:$0xff]  ;;  %v1851_v1 = vld [vmem:[%s11152_s5] sm:$0xff] }
 0x5ed   :  { %v1795_v40 = vadd.f32 %v1794_v31, %v1780_v43 }
 0x5ef   :  { %v1796_v15 = vadd.f32 %v1795_v40, %v1781_v36 }
 0x5f1   :  { %v1797_v7 = vadd.f32 %v1796_v15, %v1782_v6 }
 0x5f3   :  { %1798 = vadd.xlane.f32.xlu0 %v1797_v7 }
 0x680   :  { %v1799_v32 = vpop.xlane.xlu0 %1798 }
 0x681   :  { %v1800_v45 = vmul.f32 0.00048828125, %v1799_v32 }
 0x683   :  { %v7890_v23 = vsub.f32 %v7517_v54, %v1800_v45  ;;  %v1802_v47 = vsub.f32 %v7523_v56, %v1800_v45  ;;  %v7894_v28 = vsub.f32 %v11627_v21, %v1800_v45  ;;  %v1804_v46 = vsub.f32 %v11628_v19, %v1800_v45 }
 0x684   :  { %v7900_v35 = vsub.f32 %v7783_v41, %v1800_v45  ;;  %v1806_v54 = vsub.f32 %v7753_v16, %v1800_v45  ;;  %v1807_v9 = vsub.f32 %v7764_v18, %v1800_v45  ;;  %v1808_v51 = vsub.f32 %v7786_v57, %v1800_v45 }
 0x685   :  { %v1817_v8 = vmul.f32 %v7890_v23, %v7890_v23  ;;  %v1818_v13 = vmul.f32 %v1802_v47, %v1802_v47  ;;  %v1819_v30 = vmul.f32 %v7894_v28, %v7894_v28  ;;  %v1820_v14 = vmul.f32 %v1804_v46, %v1804_v46 }
 0x686   :  { %v1821_v34 = vmul.f32 %v7900_v35, %v7900_v35  ;;  %v1822_v24 = vmul.f32 %v1806_v54, %v1806_v54  ;;  %v7910_v41 = vsub.f32 %v7711_v22, %v1800_v45  ;;  %v1823_v10 = vmul.f32 %v1807_v9, %v1807_v9 }
 0x687   :  { %v1833_v26 = vadd.f32 %v1818_v13, %v1817_v8  ;;  %v7913_v12 = vsub.f32 %v7714_v17, %v1800_v45  ;;  %v1824_v16 = vmul.f32 %v1808_v51, %v1808_v51  ;;  %v7916_v18 = vsub.f32 %v7739_v63, %v1800_v45 }
 0x688   :  { %v1825_v59 = vmul.f32 %v7910_v41, %v7910_v41  ;;  %v7921_v57 = vsub.f32 %v7742_v5, %v1800_v45  ;;  %v7925_v42 = vsub.f32 %v1779_v33, %v1800_v45  ;;  %v7929_v58 = vsub.f32 %v1780_v43, %v1800_v45 }
 0x689   :  { %v1834_v56 = vadd.f32 %v1833_v26, %v1819_v30  ;;  %v1826_v22 = vmul.f32 %v7913_v12, %v7913_v12  ;;  %v1827_v17 = vmul.f32 %v7916_v18, %v7916_v18  ;;  %v7933_v3 = vsub.f32 %v1781_v36, %v1800_v45 }
 0x68a   :  { %v1828_v63 = vmul.f32 %v7921_v57, %v7921_v57  ;;  %v1829_v5 = vmul.f32 %v7925_v42, %v7925_v42  ;;  %v7937_v60 = vsub.f32 %v1782_v6, %v1800_v45  ;;  %v1830_v33 = vmul.f32 %v7929_v58, %v7929_v58  ;;  %v6108_v6 = vld [vmem:[%s11155_s8] sm:$0x7] }
 0x68b   :  { %v1835_v4 = vadd.f32 %v1834_v56, %v1820_v14  ;;  %v1831_v55 = vmul.f32 %v7933_v3, %v7933_v3 }
 0x68c   :  { %v1832_v53 = vmul.f32 %v7937_v60, %v7937_v60 }
 0x68d   :  { %v1836_v39 = vadd.f32 %v1835_v4, %v1821_v34 }
 0x68f   :  { %v1837_v44 = vadd.f32 %v1836_v39, %v1822_v24 }
 0x691   :  { %v1838_v48 = vadd.f32 %v1837_v44, %v1823_v10 }
 0x693   :  { %v1839_v20 = vadd.f32 %v1838_v48, %v1824_v16 }
 0x695   :  { %v1840_v27 = vadd.f32 %v1839_v20, %v1825_v59 }
 0x697   :  { %v1841_v61 = vadd.f32 %v1840_v27, %v1826_v22 }
 0x699   :  { %v1842_v37 = vadd.f32 %v1841_v61, %v1827_v17 }
 0x69b   :  { %v1843_v29 = vadd.f32 %v1842_v37, %v1828_v63 }
 0x69d   :  { %v1844_v38 = vadd.f32 %v1843_v29, %v1829_v5  ;;  %v8004_v5 = vld [vmem:[%s11154_s7] sm:$0x3] }
 0x69f   :  { %v1845_v49 = vadd.f32 %v1844_v38, %v1830_v33 }
 0x6a1   :  { %v1846_v11 = vadd.f32 %v1845_v49, %v1831_v55 }
 0x6a3   :  { %v1847_v52 = vadd.f32 %v1846_v11, %v1832_v53 }
 0x6a5   :  { %1848 = vadd.xlane.f32.xlu1 %v1847_v52 }
 0x6b6   :  { %1879 = vperm.xlu1 %6686, %v1852_v50  }
 0x732   :  { %v1849_v62 = vpop.xlane.xlu1 %1848 }
 0x733   :  { %v1850_v0 = vmul.f32 0.00048828125, %v1849_v62 }
 0x735   :  { %v1853_v2 = vadd.f32 1e-05, %v1850_v0 }
 0x736   :  { %v7962_v45 = vpop.permute.xlu1 %1879 }
 0x737   :  { %6701 = vrsqrt.f32 %v1853_v2 }
 0x741   :  { %v6702_v43 = vpop.eup %6701 }
 0x742   :  { %v1855_v36 = vmul.f32 %v6702_v43, %v1851_v1  ;;  %v11637_v43 = vmov 0  }
 0x744   :  { %1858 = vperm.xlu0 %6687, %v1855_v36  }
 0x748   :  { %6111 = vperm.xlu0 %6687, %v6108_v6  }
 0x7c3   :  { %v7954_v31 = vpop.permute.xlu0 %1858 }
 0x7c4   :  { %v1862_v40 = vmul.f32 %v7954_v31, %v1802_v47  ;;  %v1864_v15 = vmul.f32 %v7954_v31, %v1804_v46  ;;  %v1861_v7 = vmul.f32 %v7954_v31, %v7890_v23  ;;  %v1863_v32 = vmul.f32 %v7954_v31, %v7894_v28 }
 0x7c5   :  { %v1866_v21 = vmul.f32 %v7954_v31, %v1806_v54  ;;  %v1868_v8 = vmul.f32 %v7954_v31, %v1808_v51  ;;  %v1865_v13 = vmul.f32 %v7954_v31, %v7900_v35  ;;  %v1867_v19 = vmul.f32 %v7954_v31, %v1807_v9 }
 0x7c6   :  { %v1883_v47 = vadd.f32 %v7962_v45, %v1862_v40  ;;  %v1885_v46 = vadd.f32 %v7962_v45, %v1864_v15  ;;  %v1882_v23 = vadd.f32 %v7962_v45, %v1861_v7  ;;  %v1884_v30 = vadd.f32 %v7962_v45, %v1863_v32 }
 0x7c7   :  { %v1887_v28 = vadd.f32 %v7962_v45, %v1866_v21  ;;  %v1889_v26 = vadd.f32 %v7962_v45, %v1868_v8  ;;  %v1886_v54 = vadd.f32 %v7962_v45, %v1865_v13  ;;  %v1888_v14 = vadd.f32 %v7962_v45, %v1867_v19 }
 0x7c8   :  { %v1899_v56 = vmax.f32 %v1883_v47, 0.0  ;;  %v1901_v35 = vmax.f32 %v1885_v46, 0.0  ;;  %v1898_v34 = vmax.f32 %v1882_v23, 0.0  ;;  %v1900_v9 = vmax.f32 %v1884_v30, 0.0  ;;  %v6463_v30 = vld [vmem:[%s11154_s7 + $0x2] sm:$0x3] }
 0x7c9   :  { %v1903_v4 = vmax.f32 %v1887_v28, 0.0  ;;  %v1905_v51 = vmax.f32 %v1889_v26, 0.0  ;;  %v1902_v24 = vmax.f32 %v1886_v54, 0.0  ;;  %v1904_v39 = vmax.f32 %v1888_v14, 0.0  ;;  %v6480_v28 = vld [vmem:[%s11154_s7 + $0x4] sm:$0x3] }
 0x7ca   :  { %v7977_v10 = vpack.c.bf16 %v1899_v56, %v1899_v56  ;;  %v7979_v44 = vpack.c.bf16 %v1901_v35, %v1901_v35  ;;  %v1914_v16 = vpack.c.bf16 %v1898_v34, %v1898_v34  ;;  %v1916_v48 = vpack.c.bf16 %v1900_v9, %v1900_v9  ;;  %v6497_v26 = vld [vmem:[%s11154_s7 + $0x6] sm:$0x3]  ;;  %v6514_v54 = vld [vmem:[%s11154_s7 + $0x8] sm:$0x3]  ;;  %v6532_v14 = vld [vmem:[%s11154_s7 + $0xc] sm:$0x3] }
 0x7cb   :  { %v7981_v59 = vpack.c.bf16 %v1903_v4, %v1903_v4  ;;  %v7983_v20 = vpack.c.bf16 %v1905_v51, %v1905_v51  ;;  %v1918_v22 = vpack.c.bf16 %v1902_v24, %v1902_v24  ;;  %v1920_v27 = vpack.c.bf16 %v1904_v39, %v1904_v39  ;;  %v8322_v56 = vld [vmem:[%s11154_s7 + $0xa] sm:$0x3]  ;;  %v8336_v35 = vld [vmem:[#allocation13 + $0x8] sm:$0xff]  ;;  %v11640_v39 = vld [vmem:[#allocation20_spill] sm:$0xff] }
 0x7cc   :  { %6447 = vmatprep.subr.msk.bf16.mxu1 %vm11202_vm14, %v7977_v10  ;;  %6449 = vmatprep.subr.msk.bf16.mxu0 %vm11202_vm14, %v7979_v44  ;;  %v7990_v17 = vsel %vm11202_vm14, %v1914_v16, 0  ;;  %v7993_v61 = vsel %vm11202_vm14, %v1916_v48, 0  ;;  %v1870_v63 = vmul.f32 %v7954_v31, %v7913_v12  ;;  %v1872_v37 = vmul.f32 %v7954_v31, %v7921_v57  ;;  %11638 = vst [vmem:[#allocation34_spill] sm:$0xff] %v8336_v35  ;;  %v8344_v34 = vld [vmem:[#allocation13] sm:$0xff] }
 0x7cd   :  { %11629 = vst [vmem:[#allocation25_spill] sm:$0xff] %v7981_v59  ;;  %11630 = vst [vmem:[#allocation26_spill] sm:$0xff] %v7983_v20  ;;  %1985 = vmatpush1.bf16.msra.mxu1 %v7990_v17  ;;  %2026 = vmatpush1.bf16.msra.mxu0 %v7993_v61  ;;  %v8007_v29 = vsel %vm11202_vm14, %v1918_v22, 0  ;;  %v1869_v33 = vmul.f32 %v7954_v31, %v7910_v41  ;;  %v1871_v12 = vmul.f32 %v7954_v31, %v7916_v18 }
 0x7ce   :  { %11631 = vst [vmem:[#allocation28_spill] sm:$0xff] %v7990_v17  ;;  %11632 = vst [vmem:[#allocation29_spill] sm:$0xff] %v7993_v61  ;;  %6451 = vmatprep.subr.msk.bf16.mxu1 %vm11202_vm14, %v7981_v59  ;;  %6453 = vmatprep.subr.msk.bf16.mxu0 %vm11202_vm14, %v7983_v20  ;;  %v8018_v57 = vsel %vm11202_vm14, %v1920_v27, 0  ;;  %v1891_v38 = vadd.f32 %v7962_v45, %v1870_v63  ;;  %v1893_v55 = vadd.f32 %v7962_v45, %v1872_v37  ;;  %v11667_v63 = vmov 0 }
 0x7cf   :  { %11633 = vst [vmem:[#allocation30_spill] sm:$0xff] %v8007_v29  ;;  %11634 = vst [vmem:[#allocation31_spill] sm:$0xff] %v8018_v57  ;;  %v1874_v49 = vmul.f32 %v7954_v31, %v7929_v58  ;;  %v1890_v41 = vadd.f32 %v7962_v45, %v1869_v33  ;;  %v1892_v18 = vadd.f32 %v7962_v45, %v1871_v12  ;;  %v3988_v9 = vand.u32 1, %v8336_v35 }
 0x7d0   :  { %v1876_v53 = vmul.f32 %v7954_v31, %v7937_v60  ;;  %v1873_v11 = vmul.f32 %v7954_v31, %v7925_v42  ;;  %6448 = vmatmul.mubr.msk.bf16.vlgmr.msra.gmra.mrb[52].mxu1 %vm11203_vm13, %v8004_v5  ;;  %6450 = vmatmul.mubr.msk.bf16.vlgmr.msra.gmra.mrb[56].mxu0 %vm11203_vm13, %v8004_v5  ;;  %v1907_v52 = vmax.f32 %v1891_v38, 0.0  ;;  %v1909_v50 = vmax.f32 %v1893_v55, 0.0  ;;  %11639 = vst [vmem:[#allocation35_spill] sm:$0xff] %v8344_v34 }
 0x7d1   :  { %v1895_v58 = vadd.f32 %v7962_v45, %v1874_v49  ;;  %v1875_v62 = vmul.f32 %v7954_v31, %v7933_v3  ;;  %2067 = vmatpush1.bf16.msra.mxu1 %v8007_v29  ;;  %2108 = vmatpush1.bf16.msra.mxu0 %v8018_v57  ;;  %v1906_v60 = vmax.f32 %v1890_v41, 0.0  ;;  %v1908_v0 = vmax.f32 %v1892_v18, 0.0 }
 0x7d2   :  { %v1897_v42 = vadd.f32 %v7962_v45, %v1876_v53  ;;  %v8040_v2 = vpack.c.bf16 %v1907_v52, %v1907_v52  ;;  %v8042_v1 = vpack.c.bf16 %v1909_v50, %v1909_v50  ;;  %2098 = vmatprep.mubr.bf16.mxu1 %v11637_v43  ;;  %2139 = vmatprep.mubr.bf16.mxu0 %v11637_v43  ;;  %v3987_v4 = vand.u32 1, %v8344_v34 }
 0x7d3   :  { %v1911_v36 = vmax.f32 %v1895_v58, 0.0  ;;  %v1894_v6 = vadd.f32 %v7962_v45, %v1873_v11  ;;  %v1922_v3 = vpack.c.bf16 %v1906_v60, %v1906_v60  ;;  %v1924_v31 = vpack.c.bf16 %v1908_v0, %v1908_v0  ;;  %v11647_v60 = vld [vmem:[#allocation22_spill] sm:$0xff] }
 0x7d4   :  { %11635 = vst [vmem:[#allocation32_spill] sm:$0xff] %v8040_v2  ;;  %11636 = vst [vmem:[#allocation33_spill] sm:$0xff] %v8042_v1  ;;  %6455 = vmatprep.subr.msk.bf16.mxu1 %vm11202_vm14, %v8040_v2  ;;  %6457 = vmatprep.subr.msk.bf16.mxu0 %vm11202_vm14, %v8042_v1  ;;  %v1913_v40 = vmax.f32 %v1897_v42, 0.0  ;;  %v1896_v15 = vadd.f32 %v7962_v45, %v1875_v62  ;;  %v11187_v51 = vand.u32 3, %v8344_v34  ;;  %vm3990_vm0 = vcmp.eq.s32.totalorder %v3988_v9, 0  ;;  %v11663_v9 = vld [vmem:[#allocation23_spill] sm:$0xff] }
 0x7d5   :  { %v8052_v7 = vpack.c.bf16 %v1911_v36, %v1911_v36  ;;  %v1910_v32 = vmax.f32 %v1894_v6, 0.0  ;;  %v8059_v21 = vsel %vm11202_vm14, %v1922_v3, 0  ;;  %v8062_v8 = vsel %vm11202_vm14, %v1924_v31, 0 }
 0x7d6   :  { %v8064_v13 = vpack.c.bf16 %v1913_v40, %v1913_v40  ;;  %v1912_v19 = vmax.f32 %v1896_v15, 0.0  ;;  %v11186_v24 = vand.u32 3, %v8336_v35  ;;  %v8361_v16 = vsub.s32 4, %v11640_v39 }
 0x7d7   :  { %v1926_v45 = vpack.c.bf16 %v1910_v32, %v1910_v32  ;;  %vm3989_vm2 = vcmp.eq.s32.totalorder %v3987_v4, 0  ;;  %v8366_v48 = vsel %vm3990_vm0, 1, %v11637_v43  ;;  %v8369_v22 = vsub.s32 5, %v11640_v39 }
 0x7d8   :  { %6452 = vmatmul.mubr.msk.bf16.vlgmr.msra.gmra.mrb[56].mxu1 %vm11203_vm13, %v8004_v5  ;;  %6454 = vmatmul.mubr.msk.bf16.vlgmr.msra.gmra.mrb[60].mxu0 %vm11203_vm13, %v8004_v5  ;;  %v1928_v47 = vpack.c.bf16 %v1912_v19, %v1912_v19  ;;  %11641 = vst [vmem:[#allocation20_spill] sm:$0xff] %v8361_v16  ;;  %v8372_v27 = vsub.s32 6, %v11640_v39  ;;  %vm4091_vm3 = vcmp.eq.s32.totalorder %v11187_v51, 1  ;;  %vm8382_vm10 = vcmp.eq.s32.totalorder %v11186_v24, 1 }
 0x7d9   :  { %2149 = vmatpush1.bf16.msra.mxu1 %v8059_v21  ;;  %2190 = vmatpush1.bf16.msra.mxu0 %v8062_v8  ;;  %v8079_v46 = vsel %vm11202_vm14, %v1926_v45, 0  ;;  %11642 = vst [vmem:[#allocation36_spill] sm:$0xff] %v8369_v22  ;;  %v8393_v33 = vsel %vm3989_vm2, 1, %v11637_v43  ;;  %v4044_v12 = vrot.slane %v8366_v48, %v8361_v16  ;;  %v8404_v49 = vsub.s32 7, %v11640_v39  ;;  %v8446_v45 = vld [vmem:[#allocation12 + $0x8] sm:$0xff] }
 0x7da   :  { %6459 = vmatprep.subr.msk.bf16.mxu1 %vm11202_vm14, %v8052_v7  ;;  %6461 = vmatprep.subr.msk.bf16.mxu0 %vm11202_vm14, %v8064_v13  ;;  %v8082_v23 = vsel %vm11202_vm14, %v1928_v47, 0  ;;  %11643 = vst [vmem:[#allocation37_spill] sm:$0xff] %v8372_v27  ;;  %v8407_v41 = vsel %vm4091_vm3, 1, %v11637_v43  ;;  %v4048_v18 = vrot.slane %v8366_v48, %v8369_v22  ;;  %v4052_v11 = vrot.slane %v8366_v48, %v8372_v27 }
 0x7db   :  { %2180 = vmatprep.mubr.bf16.mxu1 %v11637_v43  ;;  %2221 = vmatprep.mubr.bf16.mxu0 %v11637_v43  ;;  %11646 = vst [vmem:[#allocation38_spill] sm:$0xff] %v8404_v49  ;;  %v8418_v50 = vsel %vm8382_vm10, 1, %v11637_v43  ;;  %v4008_v0 = vrot.slane %v8393_v33, %v11647_v60  ;;  %v4012_v42 = vrot.slane %v8393_v33, %v8361_v16  ;;  %vm8432_vm1 = vcmp.eq.s32.totalorder %v4044_v12, 1 }
 0x7dc   :  { %v4020_v36 = vrot.slane %v8393_v33, %v8372_v27  ;;  %v4024_v6 = vrot.slane %v8393_v33, %v8404_v49  ;;  %v4016_v3 = vrot.slane %v8393_v33, %v8369_v22  ;;  %v4110_v31 = vrot.slane %v8407_v41, %v11647_v60  ;;  %11651 = vst [vmem:[#allocation39_spill] sm:$0xff] %v8446_v45 }
 0x7dd   :  { %v11648_v40 = vmov 0  ;;  %v4056_v15 = vrot.slane %v8366_v48, %v8404_v49  ;;  %v4150_v32 = vrot.slane %v8418_v50, %v8369_v22  ;;  %v4154_v19 = vrot.slane %v8418_v50, %v8372_v27 }
 0x7de   :  { %v11649_v40 = vsel %vm8432_vm1, 4294967295, %v11648_v40  ;;  %vm8448_vm5 = vcmp.eq.s32.totalorder %v4048_v18, 1  ;;  %v11652_v47 = vmov 0  ;;  %vm8452_vm6 = vcmp.eq.s32.totalorder %v4052_v11, 1 }
 0x7df   :  { %11650 = vst [vmem:[#allocation22_spill] sm:$0xff] %v11649_v40  ;;  %v11653_v47 = vsel %vm8448_vm5, 4294967295, %v11652_v47  ;;  %vm8466_vm11 = vcmp.eq.s32.totalorder %v4008_v0, 1  ;;  %v4000_v4 = vrot.slane %v8393_v33, %v11663_v9  ;;  %vm8472_vm7 = vcmp.eq.s32.totalorder %v4012_v42, 1 }
 0x7e0   :  { %6456 = vmatmul.mubr.msk.bf16.vlgmr.msra.gmra.mrb[60].mxu1 %vm11203_vm13, %v8004_v5  ;;  %6458 = vmatmul.mubr.msk.bf16.vlgmr.msra.gmra.mrb[64].mxu0 %vm11203_vm13, %v8004_v5  ;;  %11654 = vst [vmem:[#allocation40_spill] sm:$0xff] %v11653_v47  ;;  %v11664_v39 = vmov 0  ;;  %vm8476_vm4 = vcmp.eq.s32.totalorder %v4020_v36, 1  ;;  %vm8488_vm9 = vcmp.eq.s32.totalorder %v4024_v6, 1  ;;  %vm8492_vm12 = vcmp.eq.s32.totalorder %v4016_v3, 1 }
 0x7e1   :  { %2231 = vmatpush1.bf16.msra.mxu1 %v8079_v46  ;;  %2272 = vmatpush1.bf16.msra.mxu0 %v8082_v23  ;;  %v11665_v39 = vsel %vm8472_vm7, 4294967295, %v11664_v39  ;;  %v11668_v63 = vsel %vm8476_vm4, 4294967295, %v11667_v63  ;;  %v4675_v11 = vand.u32 1, %v8446_v45  ;;  %vm8497_vm15 = vcmp.eq.s32.totalorder %v4110_v31, 1 }
 0x7e2   :  { %6464 = vmatprep.subr.msk.bf16.mxu1 %vm11202_vm14, %v7977_v10  ;;  %6466 = vmatprep.subr.msk.bf16.mxu0 %vm11202_vm14, %v7979_v44  ;;  %11666 = vst [vmem:[#allocation23_spill] sm:$0xff] %v11665_v39  ;;  %11669 = vst [vmem:[#allocation42_spill] sm:$0xff] %v11668_v63  ;;  %vm8507_vm8 = vcmp.eq.s32.totalorder %v4150_v32, 1  ;;  %v11679_v0 = vmov 0  ;;  %vm8511_vm0 = vcmp.eq.s32.totalorder %v4154_v19, 1  ;;  %v11682_v42 = vmov 0 }
 0x7e3   :  { %2262 = vmatprep.mubr.bf16.mxu1 %v11637_v43  ;;  %2303 = vmatprep.mubr.bf16.mxu0 %v11637_v43  ;;  %v11680_v0 = vsel %vm8507_vm8, 4294967295, %v11679_v0  ;;  %v11683_v42 = vsel %vm8511_vm0, 4294967295, %v11682_v42  ;;  %v4146_v36 = vrot.slane %v8418_v50, %v8361_v16  ;;  %v4114_v6 = vrot.slane %v8407_v41, %v8361_v16  ;;  %v8525_v32 = vld [vmem:[%s11154_s7 + $0xe] sm:$0x3] }
 0x7e4   :  { %11681 = vst [vmem:[#allocation46_spill] sm:$0xff] %v11680_v0  ;;  %11684 = vst [vmem:[#allocation47_spill] sm:$0xff] %v11683_v42  ;;  %v4122_v24 = vrot.slane %v8407_v41, %v8372_v27  ;;  %v4126_v51 = vrot.slane %v8407_v41, %v8404_v49  ;;  %v4118_v25 = vrot.slane %v8407_v41, %v8369_v22  ;;  %vm8552_vm2 = vcmp.eq.s32.totalorder %v4675_v11, 0 }
 0x7e5   :  { %vm8557_vm3 = vcmp.eq.s32.totalorder %v4056_v15, 1  ;;  %v11688_v27 = vmov 0  ;;  %v11702_v15 = vmov 0  ;;  %v11705_v11 = vmov 0 }
 0x7e6   :  { %v11689_v27 = vsel %vm8557_vm3, 4294967295, %v11688_v27 }
 0x7e7   :  { %11690 = vst [vmem:[#allocation49_spill] sm:$0xff] %v11689_v27 }
 0x7e8   :  { %6460 = vmatmul.mubr.msk.bf16.vlgmr.msra.gmra.mrb[64].mxu1 %vm11203_vm13, %v8004_v5  ;;  %6462 = vmatmul.mubr.msk.bf16.vlgmr.msra.gmra.mrb[68].mxu0 %vm11203_vm13, %v8004_v5 }
 0x7e9   :  { %2318 = vmatpush1.bf16.msra.mxu1 %v7990_v17  ;;  %2359 = vmatpush1.bf16.msra.mxu0 %v7993_v61 }
 0x7ea   :  { %6468 = vmatprep.subr.msk.bf16.mxu1 %vm11202_vm14, %v7981_v59  ;;  %6470 = vmatprep.subr.msk.bf16.mxu0 %vm11202_vm14, %v7983_v20 }
 0x7eb   :  { %2349 = vmatprep.mubr.bf16.mxu1 %v11637_v43  ;;  %2390 = vmatprep.mubr.bf16.mxu0 %v11637_v43 }
 0x7f0   :  { %6465 = vmatmul.mubr.msk.bf16.vlgmr.msra.gmra.mrb[68].mxu1 %vm11203_vm13, %v6463_v30  ;;  %6467 = vmatmul.mubr.msk.bf16.vlgmr.msra.gmra.mrb[72].mxu0 %vm11203_vm13, %v6463_v30 }
 0x7f1   :  { %2400 = vmatpush1.bf16.msra.mxu1 %v8007_v29  ;;  %2441 = vmatpush1.bf16.msra.mxu0 %v8018_v57 }
 0x7f2   :  { %6472 = vmatprep.subr.msk.bf16.mxu1 %vm11202_vm14, %v8040_v2  ;;  %6474 = vmatprep.subr.msk.bf16.mxu0 %vm11202_vm14, %v8042_v1 }
 0x7f3   :  { %2431 = vmatprep.mubr.bf16.mxu1 %v11637_v43  ;;  %2472 = vmatprep.mubr.bf16.mxu0 %v11637_v43 }
 0x7f8   :  { %6469 = vmatmul.mubr.msk.bf16.vlgmr.msra.gmra.mrb[72].mxu1 %vm11203_vm13, %v6463_v30  ;;  %6471 = vmatmul.mubr.msk.bf16.vlgmr.msra.gmra.mrb[76].mxu0 %vm11203_vm13, %v6463_v30 }
 0x7f9   :  { %2482 = vmatpush1.bf16.msra.mxu1 %v8059_v21  ;;  %2523 = vmatpush1.bf16.msra.mxu0 %v8062_v8 }
 0x7fa   :  { %6476 = vmatprep.subr.msk.bf16.mxu1 %vm11202_vm14, %v8052_v7  ;;  %6478 = vmatprep.subr.msk.bf16.mxu0 %vm11202_vm14, %v8064_v13 }
 0x7fb   :  { %2513 = vmatprep.mubr.bf16.mxu1 %v11637_v43  ;;  %2554 = vmatprep.mubr.bf16.mxu0 %v11637_v43 }
 0x800   :  { %6473 = vmatmul.mubr.msk.bf16.vlgmr.msra.gmra.mrb[76].mxu1 %vm11203_vm13, %v6463_v30  ;;  %6475 = vmatmul.mubr.msk.bf16.vlgmr.msra.gmra.mrb[80].mxu0 %vm11203_vm13, %v6463_v30 }
 0x801   :  { %2564 = vmatpush1.bf16.msra.mxu1 %v8079_v46  ;;  %2605 = vmatpush1.bf16.msra.mxu0 %v8082_v23 }
 0x802   :  { %6481 = vmatprep.subr.msk.bf16.mxu1 %vm11202_vm14, %v7977_v10  ;;  %6483 = vmatprep.subr.msk.bf16.mxu0 %vm11202_vm14, %v7979_v44 }
 0x803   :  { %2595 = vmatprep.mubr.bf16.mxu1 %v11637_v43  ;;  %2636 = vmatprep.mubr.bf16.mxu0 %v11637_v43 }
 0x808   :  { %6477 = vmatmul.mubr.msk.bf16.vlgmr.msra.gmra.mrb[80].mxu1 %vm11203_vm13, %v6463_v30  ;;  %6479 = vmatmul.mubr.msk.bf16.vlgmr.msra.gmra.mrb[84].mxu0 %vm11203_vm13, %v6463_v30  ;;  %v11655_v30 = vmov 0 }
 0x809   :  { %2651 = vmatpush1.bf16.msra.mxu1 %v7990_v17  ;;  %2692 = vmatpush1.bf16.msra.mxu0 %v7993_v61  ;;  %v11656_v30 = vsel %vm8452_vm6, 4294967295, %v11655_v30 }
 0x80a   :  { %6485 = vmatprep.subr.msk.bf16.mxu1 %vm11202_vm14, %v7981_v59  ;;  %6487 = vmatprep.subr.msk.bf16.mxu0 %vm11202_vm14, %v7983_v20  ;;  %11657 = vst [vmem:[#allocation41_spill] sm:$0xff] %v11656_v30 }
 0x80b   :  { %2682 = vmatprep.mubr.bf16.mxu1 %v11637_v43  ;;  %2723 = vmatprep.mubr.bf16.mxu0 %v11637_v43 }
 0x810   :  { %6482 = vmatmul.mubr.msk.bf16.vlgmr.msra.gmra.mrb[84].mxu1 %vm11203_vm13, %v6480_v28  ;;  %6484 = vmatmul.mubr.msk.bf16.vlgmr.msra.gmra.mrb[88].mxu0 %vm11203_vm13, %v6480_v28 }
 0x811   :  { %2733 = vmatpush1.bf16.msra.mxu1 %v8007_v29  ;;  %2774 = vmatpush1.bf16.msra.mxu0 %v8018_v57 }
 0x812   :  { %6489 = vmatprep.subr.msk.bf16.mxu1 %vm11202_vm14, %v8040_v2  ;;  %6491 = vmatprep.subr.msk.bf16.mxu0 %vm11202_vm14, %v8042_v1 }
 0x813   :  { %2764 = vmatprep.mubr.bf16.mxu1 %v11637_v43  ;;  %2805 = vmatprep.mubr.bf16.mxu0 %v11637_v43 }
 0x818   :  { %6486 = vmatmul.mubr.msk.bf16.vlgmr.msra.gmra.mrb[88].mxu1 %vm11203_vm13, %v6480_v28  ;;  %6488 = vmatmul.mubr.msk.bf16.vlgmr.msra.gmra.mrb[92].mxu0 %vm11203_vm13, %v6480_v28 }
 0x819   :  { %2815 = vmatpush1.bf16.msra.mxu1 %v8059_v21  ;;  %2856 = vmatpush1.bf16.msra.mxu0 %v8062_v8 }
 0x81a   :  { %6493 = vmatprep.subr.msk.bf16.mxu1 %vm11202_vm14, %v8052_v7  ;;  %6495 = vmatprep.subr.msk.bf16.mxu0 %vm11202_vm14, %v8064_v13 }
 0x81b   :  { %2846 = vmatprep.mubr.bf16.mxu1 %v11637_v43  ;;  %2887 = vmatprep.mubr.bf16.mxu0 %v11637_v43 }
 0x820   :  { %6490 = vmatmul.mubr.msk.bf16.vlgmr.msra.gmra.mrb[92].mxu1 %vm11203_vm13, %v6480_v28  ;;  %6492 = vmatmul.mubr.msk.bf16.vlgmr.msra.gmra.mrb[96].mxu0 %vm11203_vm13, %v6480_v28 }
 0x821   :  { %2897 = vmatpush1.bf16.msra.mxu1 %v8079_v46  ;;  %2938 = vmatpush1.bf16.msra.mxu0 %v8082_v23 }
 0x822   :  { %6498 = vmatprep.subr.msk.bf16.mxu1 %vm11202_vm14, %v7977_v10  ;;  %6500 = vmatprep.subr.msk.bf16.mxu0 %vm11202_vm14, %v7979_v44 }
 0x823   :  { %2928 = vmatprep.mubr.bf16.mxu1 %v11637_v43  ;;  %2969 = vmatprep.mubr.bf16.mxu0 %v11637_v43 }
 0x828   :  { %6494 = vmatmul.mubr.msk.bf16.vlgmr.msra.gmra.mrb[96].mxu1 %vm11203_vm13, %v6480_v28  ;;  %6496 = vmatmul.mubr.msk.bf16.vlgmr.msra.gmra.mrb[100].mxu0 %vm11203_vm13, %v6480_v28  ;;  %v11658_v28 = vld [vmem:[#allocation21_spill] sm:$0xff] }
 0x829   :  { %2984 = vmatpush1.bf16.msra.mxu1 %v7990_v17  ;;  %3025 = vmatpush1.bf16.msra.mxu0 %v7993_v61  ;;  %v4028_v35 = vrot.slane %v8366_v48, %v11658_v28 }
 0x82a   :  { %6502 = vmatprep.subr.msk.bf16.mxu1 %vm11202_vm14, %v7981_v59  ;;  %6504 = vmatprep.subr.msk.bf16.mxu0 %vm11202_vm14, %v7983_v20 }
 0x82b   :  { %3015 = vmatprep.mubr.bf16.mxu1 %v11637_v43  ;;  %3056 = vmatprep.mubr.bf16.mxu0 %v11637_v43 }
 0x830   :  { %6499 = vmatmul.mubr.msk.bf16.vlgmr.msra.gmra.mrb[100].mxu1 %vm11203_vm13, %v6497_v26  ;;  %6501 = vmatmul.mubr.msk.bf16.vlgmr.msra.gmra.mrb[104].mxu0 %vm11203_vm13, %v6497_v26 }
 0x831   :  { %3066 = vmatpush1.bf16.msra.mxu1 %v8007_v29  ;;  %3107 = vmatpush1.bf16.msra.mxu0 %v8018_v57 }
 0x832   :  { %6506 = vmatprep.subr.msk.bf16.mxu1 %vm11202_vm14, %v8040_v2  ;;  %6508 = vmatprep.subr.msk.bf16.mxu0 %vm11202_vm14, %v8042_v1 }
 0x833   :  { %3097 = vmatprep.mubr.bf16.mxu1 %v11637_v43  ;;  %3138 = vmatprep.mubr.bf16.mxu0 %v11637_v43 }
 0x838   :  { %6503 = vmatmul.mubr.msk.bf16.vlgmr.msra.gmra.mrb[104].mxu1 %vm11203_vm13, %v6497_v26  ;;  %6505 = vmatmul.mubr.msk.bf16.vlgmr.msra.gmra.mrb[108].mxu0 %vm11203_vm13, %v6497_v26 }
 0x839   :  { %3148 = vmatpush1.bf16.msra.mxu1 %v8059_v21  ;;  %3189 = vmatpush1.bf16.msra.mxu0 %v8062_v8 }
 0x83a   :  { %6510 = vmatprep.subr.msk.bf16.mxu1 %vm11202_vm14, %v8052_v7  ;;  %6512 = vmatprep.subr.msk.bf16.mxu0 %vm11202_vm14, %v8064_v13 }
 0x83b   :  { %3179 = vmatprep.mubr.bf16.mxu1 %v11637_v43  ;;  %3220 = vmatprep.mubr.bf16.mxu0 %v11637_v43 }
 0x840   :  { %6507 = vmatmul.mubr.msk.bf16.vlgmr.msra.gmra.mrb[108].mxu1 %vm11203_vm13, %v6497_v26  ;;  %6509 = vmatmul.mubr.msk.bf16.vlgmr.msra.gmra.mrb[112].mxu0 %vm11203_vm13, %v6497_v26 }
 0x841   :  { %3230 = vmatpush1.bf16.msra.mxu1 %v8079_v46  ;;  %3271 = vmatpush1.bf16.msra.mxu0 %v8082_v23 }
 0x842   :  { %6515 = vmatprep.subr.msk.bf16.mxu1 %vm11202_vm14, %v7977_v10  ;;  %6517 = vmatprep.subr.msk.bf16.mxu0 %vm11202_vm14, %v7979_v44 }
 0x843   :  { %3261 = vmatprep.mubr.bf16.mxu1 %v11637_v43  ;;  %3302 = vmatprep.mubr.bf16.mxu0 %v11637_v43 }
 0x848   :  { %6511 = vmatmul.mubr.msk.bf16.vlgmr.msra.gmra.mrb[112].mxu1 %vm11203_vm13, %v6497_v26  ;;  %6513 = vmatmul.mubr.msk.bf16.vlgmr.msra.gmra.mrb[116].mxu0 %vm11203_vm13, %v6497_v26  ;;  %v3996_v26 = vrot.slane %v8393_v33, %v11658_v28 }
 0x849   :  { %3317 = vmatpush1.bf16.msra.mxu1 %v7990_v17  ;;  %3358 = vmatpush1.bf16.msra.mxu0 %v7993_v61 }
 0x84a   :  { %6519 = vmatprep.subr.msk.bf16.mxu1 %vm11202_vm14, %v7981_v59  ;;  %6521 = vmatprep.subr.msk.bf16.mxu0 %vm11202_vm14, %v7983_v20  ;;  %vm8561_vm10 = vcmp.eq.s32.totalorder %v3996_v26, 1 }
 0x84b   :  { %3348 = vmatprep.mubr.bf16.mxu1 %v11637_v43  ;;  %3389 = vmatprep.mubr.bf16.mxu0 %v11637_v43 }
 0x850   :  { %6516 = vmatmul.mubr.msk.bf16.vlgmr.msra.gmra.mrb[116].mxu1 %vm11203_vm13, %v6514_v54  ;;  %6518 = vmatmul.mubr.msk.bf16.vlgmr.msra.gmra.mrb[120].mxu0 %vm11203_vm13, %v6514_v54 }
 0x851   :  { %3399 = vmatpush1.bf16.msra.mxu1 %v8007_v29  ;;  %3440 = vmatpush1.bf16.msra.mxu0 %v8018_v57 }
 0x852   :  { %6523 = vmatprep.subr.msk.bf16.mxu1 %vm11202_vm14, %v8040_v2  ;;  %6525 = vmatprep.subr.msk.bf16.mxu0 %vm11202_vm14, %v8042_v1 }
 0x853   :  { %3430 = vmatprep.mubr.bf16.mxu1 %v11637_v43  ;;  %3471 = vmatprep.mubr.bf16.mxu0 %v11637_v43 }
 0x858   :  { %6520 = vmatmul.mubr.msk.bf16.vlgmr.msra.gmra.mrb[120].mxu1 %vm11203_vm13, %v6514_v54  ;;  %6522 = vmatmul.mubr.msk.bf16.vlgmr.msra.gmra.mrb[124].mxu0 %vm11203_vm13, %v6514_v54 }
 0x859   :  { %3481 = vmatpush1.bf16.msra.mxu1 %v8059_v21  ;;  %3522 = vmatpush1.bf16.msra.mxu0 %v8062_v8 }
 0x85a   :  { %6527 = vmatprep.subr.msk.bf16.mxu1 %vm11202_vm14, %v8052_v7  ;;  %6529 = vmatprep.subr.msk.bf16.mxu0 %vm11202_vm14, %v8064_v13 }
 0x85b   :  { %3512 = vmatprep.mubr.bf16.mxu1 %v11637_v43  ;;  %3553 = vmatprep.mubr.bf16.mxu0 %v11637_v43 }
 0x860   :  { %6524 = vmatmul.mubr.msk.bf16.vlgmr.msra.gmra.mrb[124].mxu1 %vm11203_vm13, %v6514_v54  ;;  %6526 = vmatmul.mubr.msk.bf16.vlgmr.msra.gmra.mrb[128].mxu0 %vm11203_vm13, %v6514_v54 }
 0x861   :  { %3563 = vmatpush1.bf16.msra.mxu1 %v8079_v46  ;;  %3604 = vmatpush1.bf16.msra.mxu0 %v8082_v23 }
 0x862   :  { %6533 = vmatprep.subr.msk.bf16.mxu1 %vm11202_vm14, %v7977_v10  ;;  %6535 = vmatprep.subr.msk.bf16.mxu0 %vm11202_vm14, %v7979_v44 }
 0x863   :  { %3594 = vmatprep.mubr.bf16.mxu1 %v11637_v43  ;;  %3635 = vmatprep.mubr.bf16.mxu0 %v11637_v43 }
 0x868   :  { %6528 = vmatmul.mubr.msk.bf16.vlgmr.msra.gmra.mrb[128].mxu1 %vm11203_vm13, %v6514_v54  ;;  %6530 = vmatmul.mubr.msk.bf16.vlgmr.msra.gmra.mrb[132].mxu0 %vm11203_vm13, %v6514_v54  ;;  %v11659_v54 = vld [vmem:[#allocation24_spill] sm:$0xff] }
 0x869   :  { %3652 = vmatpush1.bf16.msra.mxu1 %v7990_v17  ;;  %3693 = vmatpush1.bf16.msra.mxu0 %v7993_v61  ;;  %v4036_v34 = vrot.slane %v8366_v48, %v11659_v54  ;;  %v4106_v26 = vrot.slane %v8407_v41, %v11659_v54 }
 0x86a   :  { %6537 = vmatprep.subr.msk.bf16.mxu1 %vm11202_vm14, %v7981_v59  ;;  %6539 = vmatprep.subr.msk.bf16.mxu0 %vm11202_vm14, %v7983_v20 }
 0x86b   :  { %3683 = vmatprep.mubr.bf16.mxu1 %v11637_v43  ;;  %3724 = vmatprep.mubr.bf16.mxu0 %v11637_v43 }
 0x870   :  { %6534 = vmatmul.mubr.msk.bf16.vlgmr.msra.gmra.mrb[132].mxu1 %vm11203_vm13, %v6532_v14  ;;  %6536 = vmatmul.mubr.msk.bf16.vlgmr.msra.gmra.mrb[136].mxu0 %vm11203_vm13, %v6532_v14 }
 0x871   :  { %3734 = vmatpush1.bf16.msra.mxu1 %v8007_v29  ;;  %3775 = vmatpush1.bf16.msra.mxu0 %v8018_v57 }
 0x872   :  { %6541 = vmatprep.subr.msk.bf16.mxu1 %vm11202_vm14, %v8040_v2  ;;  %6543 = vmatprep.subr.msk.bf16.mxu0 %vm11202_vm14, %v8042_v1 }
 0x873   :  { %3765 = vmatprep.mubr.bf16.mxu1 %v11637_v43  ;;  %3806 = vmatprep.mubr.bf16.mxu0 %v11637_v43 }
 0x878   :  { %6538 = vmatmul.mubr.msk.bf16.vlgmr.msra.gmra.mrb[136].mxu1 %vm11203_vm13, %v6532_v14  ;;  %6540 = vmatmul.mubr.msk.bf16.vlgmr.msra.gmra.mrb[140].mxu0 %vm11203_vm13, %v6532_v14 }
 0x879   :  { %3816 = vmatpush1.bf16.msra.mxu1 %v8059_v21  ;;  %3857 = vmatpush1.bf16.msra.mxu0 %v8062_v8 }
 0x87a   :  { %6545 = vmatprep.subr.msk.bf16.mxu1 %vm11202_vm14, %v8052_v7  ;;  %6547 = vmatprep.subr.msk.bf16.mxu0 %vm11202_vm14, %v8064_v13 }
 0x87b   :  { %3847 = vmatprep.mubr.bf16.mxu1 %v11637_v43  ;;  %3888 = vmatprep.mubr.bf16.mxu0 %v11637_v43 }
 0x880   :  { %6542 = vmatmul.mubr.msk.bf16.vlgmr.msra.gmra.mrb[140].mxu1 %vm11203_vm13, %v6532_v14  ;;  %6544 = vmatmul.mubr.msk.bf16.vlgmr.msra.gmra.mrb[144].mxu0 %vm11203_vm13, %v6532_v14 }
 0x881   :  { %3898 = vmatpush1.bf16.msra.mxu1 %v8079_v46  ;;  %3939 = vmatpush1.bf16.msra.mxu0 %v8082_v23 }
 0x882   :  { %6551 = vmatprep.subr.msk.bf16.mxu1 %vm11202_vm14, %v7977_v10  ;;  %6553 = vmatprep.subr.msk.bf16.mxu0 %vm11202_vm14, %v7979_v44 }
 0x883   :  { %3929 = vmatprep.mubr.bf16.mxu1 %v11637_v43  ;;  %3970 = vmatprep.mubr.bf16.mxu0 %v11637_v43 }
 0x888   :  { %6546 = vmatmul.mubr.msk.bf16.vlgmr.msra.gmra.mrb[144].mxu1 %vm11203_vm13, %v6532_v14  ;;  %6548 = vmatmul.mubr.msk.bf16.vlgmr.msra.gmra.mrb[148].mxu0 %vm11203_vm13, %v6532_v14  ;;  %v4004_v14 = vrot.slane %v8393_v33, %v11659_v54  ;;  %v11670_v33 = vmov 0 }
 0x889   :  { %4347 = vmatpush1.bf16.msra.mxu1 %v7990_v17  ;;  %4388 = vmatpush1.bf16.msra.mxu0 %v7993_v61  ;;  %v11671_v33 = vsel %vm8488_vm9, 4294967295, %v11670_v33 }
 0x88a   :  { %6555 = vmatprep.subr.msk.bf16.mxu1 %vm11202_vm14, %v7981_v59  ;;  %6557 = vmatprep.subr.msk.bf16.mxu0 %vm11202_vm14, %v7983_v20  ;;  %11672 = vst [vmem:[#allocation43_spill] sm:$0xff] %v11671_v33 }
 0x88b   :  { %4378 = vmatprep.mubr.bf16.mxu1 %v11637_v43  ;;  %4419 = vmatprep.mubr.bf16.mxu0 %v11637_v43 }
 0x890   :  { %6552 = vmatmul.mubr.msk.bf16.vlgmr.msra.gmra.mrb[148].mxu1 %vm11203_vm13, %v8322_v56  ;;  %6554 = vmatmul.mubr.msk.bf16.vlgmr.msra.gmra.mrb[152].mxu0 %vm11203_vm13, %v8322_v56 }
 0x891   :  { %4429 = vmatpush1.bf16.msra.mxu1 %v8007_v29  ;;  %4470 = vmatpush1.bf16.msra.mxu0 %v8018_v57 }
 0x892   :  { %6559 = vmatprep.subr.msk.bf16.mxu1 %vm11202_vm14, %v8040_v2  ;;  %6561 = vmatprep.subr.msk.bf16.mxu0 %vm11202_vm14, %v8042_v1 }
 0x893   :  { %4460 = vmatprep.mubr.bf16.mxu1 %v11637_v43  ;;  %4501 = vmatprep.mubr.bf16.mxu0 %v11637_v43 }
 0x898   :  { %6556 = vmatmul.mubr.msk.bf16.vlgmr.msra.gmra.mrb[152].mxu1 %vm11203_vm13, %v8322_v56  ;;  %6558 = vmatmul.mubr.msk.bf16.vlgmr.msra.gmra.mrb[156].mxu0 %vm11203_vm13, %v8322_v56 }
 0x899   :  { %4511 = vmatpush1.bf16.msra.mxu1 %v8059_v21  ;;  %4552 = vmatpush1.bf16.msra.mxu0 %v8062_v8 }
 0x89a   :  { %6563 = vmatprep.subr.msk.bf16.mxu1 %vm11202_vm14, %v8052_v7  ;;  %6565 = vmatprep.subr.msk.bf16.mxu0 %vm11202_vm14, %v8064_v13 }
 0x89b   :  { %4542 = vmatprep.mubr.bf16.mxu1 %v11637_v43  ;;  %4583 = vmatprep.mubr.bf16.mxu0 %v11637_v43 }
 0x8a0   :  { %6560 = vmatmul.mubr.msk.bf16.vlgmr.msra.gmra.mrb[156].mxu1 %vm11203_vm13, %v8322_v56  ;;  %6562 = vmatmul.mubr.msk.bf16.vlgmr.msra.gmra.mrb[160].mxu0 %vm11203_vm13, %v8322_v56 }
 0x8a1   :  { %4593 = vmatpush1.bf16.msra.mxu1 %v8079_v46  ;;  %4634 = vmatpush1.bf16.msra.mxu0 %v8082_v23 }
 0x8a2   :  { %6567 = vmatprep.subr.msk.bf16.mxu1 %vm11202_vm14, %v7977_v10  ;;  %6569 = vmatprep.subr.msk.bf16.mxu0 %vm11202_vm14, %v7979_v44 }
 0x8a3   :  { %v8386_v37 = vpop.f32.mrb[52].mxu1  ;;  %v8388_v5 = vpop.f32.mrb[56].mxu0  ;;  %4624 = vmatprep.mubr.bf16.mxu1 %v11637_v43  ;;  %4665 = vmatprep.mubr.bf16.mxu0 %v11637_v43 }
 0x8a4   :  { %5932 = vrot.lane.b32.xlu0 %v8386_v37, %s7031_s0  ;;  %v8399_v38 = vpop.f32.mrb[53].mxu1  ;;  %v8401_v55 = vpop.f32.mrb[57].mxu0  ;;  %v5914_v47 = vsel %vm8452_vm6, %v8388_v5, 0.0 }
 0x8a5   :  { %5934 = vrot.lane.b32.xlu1 %v8399_v38, %s7031_s0  ;;  %v2022_v53 = vpop.f32.mrb[54].mxu1  ;;  %v2063_v52 = vpop.f32.mrb[58].mxu0 }
 0x8a6   :  { %v2023_v58 = vpop.f32.mrb[55].mxu1  ;;  %v2064_v62 = vpop.f32.mrb[59].mxu0  ;;  %v11673_v53 = vmov 0  ;;  %v11676_v52 = vmov 0 }
 0x8a7   :  { %v11674_v53 = vsel %vm8492_vm12, 4294967295, %v11673_v53  ;;  %v11677_v52 = vsel %vm8497_vm15, 4294967295, %v11676_v52  ;;  %vm8577_vm12 = vcmp.eq.s32.totalorder %v4146_v36, 1  ;;  %v11708_v36 = vmov 0 }
 0x8a8   :  { %6564 = vmatmul.mubr.msk.bf16.vlgmr.msra.gmra.mrb[160].mxu1 %vm11203_vm13, %v8322_v56  ;;  %6566 = vmatmul.mubr.msk.bf16.vlgmr.msra.gmra.mrb[164].mxu0 %vm11203_vm13, %v8322_v56  ;;  %v11660_v56 = vmov 0  ;;  %11675 = vst [vmem:[#allocation44_spill] sm:$0xff] %v11674_v53  ;;  %11678 = vst [vmem:[#allocation45_spill] sm:$0xff] %v11677_v52  ;;  %vm8569_vm13 = vcmp.eq.s32.totalorder %v4000_v4, 1  ;;  %v11697_v52 = vmov 0  ;;  %v11703_v15 = vsel %vm8577_vm12, 4294967295, %v11702_v15 }
 0x8a9   :  { %5034 = vmatpush1.bf16.msra.mxu1 %v7990_v17  ;;  %5075 = vmatpush1.bf16.msra.mxu0 %v7993_v61  ;;  %v11661_v56 = vsel %vm8466_vm11, 4294967295, %v11660_v56  ;;  %v11698_v52 = vsel %vm8569_vm13, 4294967295, %v11697_v52  ;;  %11704 = vst [vmem:[#allocation53_spill] sm:$0xff] %v11703_v15  ;;  %v4098_v4 = vrot.slane %v8407_v41, %v11658_v28  ;;  %vm8597_vm13 = vcmp.eq.s32.totalorder %v4126_v51, 1 }
 0x8aa   :  { %5936 = vrot.lane.b32.xlu0 %v8388_v5, %s7031_s0  ;;  %6571 = vmatprep.subr.msk.bf16.mxu1 %vm11202_vm14, %v7981_v59  ;;  %11662 = vst [vmem:[#allocation21_spill] sm:$0xff] %v11661_v56  ;;  %11699 = vst [vmem:[#allocation52_spill] sm:$0xff] %v11698_v52  ;;  %v4138_v51 = vrot.slane %v8418_v50, %v11659_v54  ;;  %v11750_v61 = vmov 0 }
 0x8ab   :  { %6573 = vmatprep.subr.msk.bf16.mxu0 %vm11202_vm14, %v7983_v20  ;;  %5938 = vrot.lane.b32.xlu1 %v8401_v55, %s7031_s0  ;;  %v8484_v12 = vpop.f32.mrb[56].mxu1  ;;  %v8486_v18 = vpop.f32.mrb[60].mxu0  ;;  %vm8565_vm14 = vcmp.eq.s32.totalorder %v4004_v14, 1  ;;  %v4032_v14 = vrot.slane %v8366_v48, %v11663_v9 }
 0x8ac   :  { %v8501_v58 = vpop.f32.mrb[61].mxu0  ;;  %v8503_v62 = vpop.f32.mrb[57].mxu1  ;;  %5065 = vmatprep.mubr.bf16.mxu1 %v11637_v43  ;;  %5106 = vmatprep.mubr.bf16.mxu0 %v11637_v43 }
 0x8ad   :  { %v5903_v3 = vsel %vm8466_vm11, %v8501_v58, 0.0  ;;  %v2104_v31 = vpop.f32.mrb[58].mxu1  ;;  %v2145_v19 = vpop.f32.mrb[62].mxu0 }
 0x8ae   :  { %5940 = vrot.lane.b32.xlu0 %v8484_v12, %s7031_s0  ;;  %v2105_v56 = vpop.f32.mrb[59].mxu1  ;;  %v2146_v31 = vpop.f32.mrb[63].mxu0  ;;  %v4158_v19 = vrot.slane %v8418_v50, %v8404_v49  ;;  %v8544_v20 = vsel %vm8497_vm15, %v8386_v37, %v5903_v3  ;;  %v11691_v3 = vmov 0  ;;  %vm11700_vm15 = vcmask 64512  }
 0x8af   :  { %11685 = vst [vmem:[#allocation48_spill] sm:$0xff] %v8544_v20  ;;  %5942 = vrot.lane.b32.xlu1 %v8503_v62, %s7031_s0  ;;  %v4102_v56 = vrot.slane %v8407_v41, %v11663_v9  ;;  %v4040_v31 = vrot.slane %v8366_v48, %v11647_v60  ;;  %v11692_v3 = vsel %vm8561_vm10, 4294967295, %v11691_v3  ;;  %v11694_v20 = vmov 0  ;;  %vm11701_vm11 = vmmov %vm11700_vm15 }
 0x8b0   :  { %11693 = vst [vmem:[#allocation50_spill] sm:$0xff] %v11692_v3  ;;  %v11695_v20 = vsel %vm8565_vm14, 4294967295, %v11694_v20  ;;  %6568 = vmatmul.mubr.msk.bf16.vlgmr.msra.gmra.mrb[164].mxu1 %vm11700_vm15, %v8525_v32  ;;  %6570 = vmatmul.mubr.msk.bf16.vlgmr.msra.gmra.mrb[168].mxu0 %vm11701_vm11, %v8525_v32  ;;  %vm8589_vm15 = vcmp.eq.s32.totalorder %v4114_v6, 1  ;;  %vm8593_vm11 = vcmp.eq.s32.totalorder %v4122_v24, 1  ;;  %v11711_v49 = vmov 0 }
 0x8b1   :  { %11696 = vst [vmem:[#allocation51_spill] sm:$0xff] %v11695_v20  ;;  %5116 = vmatpush1.bf16.msra.mxu1 %v8007_v29  ;;  %5157 = vmatpush1.bf16.msra.mxu0 %v8018_v57  ;;  %v11706_v11 = vsel %vm8589_vm15, 4294967295, %v11705_v11  ;;  %v11709_v36 = vsel %vm8593_vm11, 4294967295, %v11708_v36  ;;  %v11712_v49 = vsel %vm8597_vm13, 4294967295, %v11711_v49  ;;  %vm8601_vm14 = vcmp.eq.s32.totalorder %v4118_v25, 1 }
 0x8b2   :  { %11707 = vst [vmem:[#allocation54_spill] sm:$0xff] %v11706_v11  ;;  %11710 = vst [vmem:[#allocation55_spill] sm:$0xff] %v11709_v36  ;;  %v11714_v48 = vmov 0  ;;  %5944 = vrot.lane.b32.xlu0 %v8486_v18, %s7031_s0  ;;  %vm11717_vm10 = vcmask 1043456   ;;  %v8612_v24 = vsel %vm8552_vm2, 1, %v11637_v43  ;;  %v4130_v25 = vrot.slane %v8418_v50, %v11658_v28  ;;  %5147 = vmatprep.mubr.bf16.mxu1 %v11637_v43 }
 0x8b3   :  { %11713 = vst [vmem:[#allocation56_spill] sm:$0xff] %v11712_v49  ;;  %v11715_v48 = vsel %vm8601_vm14, 4294967295, %v11714_v48  ;;  %6575 = vmatprep.subr.msk.bf16.mxu1 %vm11717_vm10, %v8040_v2  ;;  %v4134_v41 = vrot.slane %v8418_v50, %v11663_v9  ;;  %v5912_v6 = vsel %vm8432_vm1, %v8386_v37, 0.0  ;;  %v5913_v2 = vsel %vm8448_vm5, %v8399_v38, 0.0  ;;  %vm11718_vm2 = vmmov %vm11717_vm10  ;;  %5946 = vrot.lane.b32.xlu1 %v8501_v58, %s7031_s0  ;;  %v8630_v59 = vpop.f32.mrb[60].mxu1  ;;  %v2223_v57 = vpop.f32.mrb[64].mxu0 }
 0x8b4   :  { %11716 = vst [vmem:[#allocation57_spill] sm:$0xff] %v11715_v48  ;;  %6577 = vmatprep.subr.msk.bf16.mxu0 %vm11718_vm2, %v8042_v1  ;;  %v11719_v29 = vand.u32 3, %v8446_v45  ;;  %v4142_v37 = vrot.slane %v8418_v50, %v11647_v60  ;;  %v5904_v40 = vsel %vm8472_vm7, %v8630_v59, 0.0  ;;  %v5906_v1 = vsel %vm8476_vm4, %v2223_v57, 0.0  ;;  %v2225_v45 = vpop.f32.mrb[65].mxu0  ;;  %v2184_v17 = vpop.f32.mrb[61].mxu1  ;;  %5188 = vmatprep.mubr.bf16.mxu0 %v11637_v43 }
 0x8b5   :  { %v5907_v50 = vsel %vm8488_vm9, %v2225_v45, 0.0  ;;  %v8658_v39 = vsel %vm8511_vm0, %v2225_v45, %v5914_v47  ;;  %vm11724_vm2 = vnez %v11674_v53  ;;  %v2227_v0 = vpop.f32.mrb[66].mxu0  ;;  %v8676_v47 = vsel %vm8593_vm11, %v8401_v55, %v5906_v1 }
 0x8b6   :  { %vm8634_vm10 = vcmp.eq.s32.totalorder %v11719_v29, 1  ;;  %v8650_v29 = vsel %vm8507_vm8, %v2223_v57, %v5913_v2  ;;  %11723 = vst [vmem:[#allocation59_spill] sm:$0xff] %v8658_v39  ;;  %v5905_v63 = vsel %vm11724_vm2, %v2184_v17, 0.0  ;;  %v8664_v2 = vsel %vm8577_vm12, %v2184_v17, %v5912_v6  ;;  %5948 = vrot.lane.b32.xlu0 %v8630_v59, %s7031_s0  ;;  %v2228_v22 = vpop.f32.mrb[67].mxu0  ;;  %11727 = vst [vmem:[#allocation62_spill] sm:$0xff] %v8676_v47 }
 0x8b7   :  { %11722 = vst [vmem:[#allocation58_spill] sm:$0xff] %v8650_v29  ;;  %11725 = vst [vmem:[#allocation60_spill] sm:$0xff] %v8664_v2  ;;  %v2186_v29 = vpop.f32.mrb[62].mxu1  ;;  %v8671_v42 = vsel %vm8601_vm14, %v8388_v5, %v5905_v63  ;;  %v8681_v6 = vsel %vm8597_vm13, %v8484_v12, %v5907_v50  ;;  %5950 = vrot.lane.b32.xlu1 %v2184_v17, %s7031_s0  ;;  %vm8689_vm0 = vcmp.eq.s32.totalorder %v4028_v35, 1  ;;  %v11730_v22 = vmov 0 }
 0x8b8   :  { %v2187_v30 = vpop.f32.mrb[63].mxu1  ;;  %11726 = vst [vmem:[#allocation61_spill] sm:$0xff] %v8671_v42  ;;  %11728 = vst [vmem:[#allocation63_spill] sm:$0xff] %v8681_v6  ;;  %v11731_v22 = vsel %vm8689_vm0, 4294967295, %v11730_v22  ;;  %vm8693_vm14 = vcmp.eq.s32.totalorder %v4158_v19, 1  ;;  %v11733_v5 = vmov 0  ;;  %v4719_v0 = vrot.slane %v8612_v24, %v11663_v9 }
 0x8b9   :  { %v8686_v30 = vsel %vm8589_vm15, %v8399_v38, %v5904_v40  ;;  %11732 = vst [vmem:[#allocation65_spill] sm:$0xff] %v11731_v22  ;;  %v11734_v5 = vsel %vm8693_vm14, 4294967295, %v11733_v5  ;;  %vm8697_vm9 = vcmp.eq.s32.totalorder %v4036_v34, 1  ;;  %v11736_v1 = vmov 0 }
 0x8ba   :  { %11729 = vst [vmem:[#allocation64_spill] sm:$0xff] %v8686_v30  ;;  %11735 = vst [vmem:[#allocation66_spill] sm:$0xff] %v11734_v5  ;;  %v11737_v1 = vsel %vm8697_vm9, 4294967295, %v11736_v1  ;;  %v8704_v63 = vsel %vm8634_vm10, 1, %v11637_v43  ;;  %vm11739_vm13 = vcmask 64512   ;;  %vm8710_vm2 = vcmp.eq.s32.totalorder %v4102_v56, 1  ;;  %5952 = vrot.lane.b32.xlu0 %v2223_v57, %s7031_s0 }
 0x8bb   :  { %11738 = vst [vmem:[#allocation67_spill] sm:$0xff] %v11737_v1  ;;  %6572 = vmatmul.mubr.msk.bf16.vlgmr.msra.gmra.mrb[168].mxu1 %vm11739_vm13, %v8525_v32  ;;  %vm11740_vm12 = vmmov %vm11739_vm13  ;;  %v11741_v17 = vmov 0  ;;  %vm8714_vm11 = vcmp.eq.s32.totalorder %v4040_v31, 1  ;;  %v11744_v35 = vmov 0  ;;  %vm8718_vm15 = vcmp.eq.s32.totalorder %v4106_v26, 1  ;;  %5954 = vrot.lane.b32.xlu1 %v2225_v45, %s7031_s0 }
 0x8bc   :  { %6574 = vmatmul.mubr.msk.bf16.vlgmr.msra.gmra.mrb[172].mxu0 %vm11740_vm12, %v8525_v32  ;;  %v11742_v17 = vsel %vm8710_vm2, 4294967295, %v11741_v17  ;;  %v11745_v35 = vsel %vm8714_vm11, 4294967295, %v11744_v35  ;;  %v11747_v34 = vmov 0  ;;  %vm8722_vm10 = vcmp.eq.s32.totalorder %v4032_v14, 1  ;;  %5198 = vmatpush1.bf16.msra.mxu1 %v8059_v21 }
 0x8bd   :  { %11743 = vst [vmem:[#allocation68_spill] sm:$0xff] %v11742_v17  ;;  %11746 = vst [vmem:[#allocation69_spill] sm:$0xff] %v11745_v35  ;;  %v11748_v34 = vsel %vm8718_vm15, 4294967295, %v11747_v34  ;;  %v11751_v61 = vsel %vm8722_vm10, 4294967295, %v11750_v61  ;;  %5239 = vmatpush1.bf16.msra.mxu0 %v8062_v8  ;;  %vm8728_vm13 = vcmp.eq.s32.totalorder %v4098_v4, 1  ;;  %v11753_v38 = vmov 0  ;;  %5229 = vmatprep.mubr.bf16.mxu1 %v11637_v43 }
 0x8be   :  { %11749 = vst [vmem:[#allocation70_spill] sm:$0xff] %v11748_v34  ;;  %11752 = vst [vmem:[#allocation71_spill] sm:$0xff] %v11751_v61  ;;  %v11754_v38 = vsel %vm8728_vm13, 4294967295, %v11753_v38  ;;  %v4715_v40 = vrot.slane %v8612_v24, %v11658_v28  ;;  %vm8736_vm12 = vcmp.eq.s32.totalorder %v4138_v51, 1  ;;  %v11756_v19 = vmov 0  ;;  %5270 = vmatprep.mubr.bf16.mxu0 %v11637_v43 }
 0x8bf   :  { %11755 = vst [vmem:[#allocation72_spill] sm:$0xff] %v11754_v38  ;;  %v11757_v19 = vsel %vm8736_vm12, 4294967295, %v11756_v19  ;;  %vm11759_vm8 = vcmask 1043456   ;;  %v4817_v56 = vrot.slane %v8704_v63, %v11658_v28  ;;  %vm8745_vm4 = vcmp.eq.s32.totalorder %v4130_v25, 1 }
 0x8c0   :  { %11758 = vst [vmem:[#allocation73_spill] sm:$0xff] %v11757_v19  ;;  %6579 = vmatprep.subr.msk.bf16.mxu1 %vm11759_vm8, %v8052_v7  ;;  %v11760_v31 = vmov 0  ;;  %vm8749_vm7 = vcmp.eq.s32.totalorder %v4134_v41, 1  ;;  %v11763_v26 = vmov 0  ;;  %vm8753_vm6 = vcmp.eq.s32.totalorder %v4142_v37, 1  ;;  %v2264_v41 = vpop.f32.mrb[64].mxu1 }
 0x8c1   :  { %v11761_v31 = vsel %vm8745_vm4, 4294967295, %v11760_v31  ;;  %v11764_v26 = vsel %vm8749_vm7, 4294967295, %v11763_v26  ;;  %v11766_v14 = vmov 0  ;;  %v5915_v57 = vsel %vm8557_vm3, %v8401_v55, 0.0  ;;  %v2305_v37 = vpop.f32.mrb[68].mxu0  ;;  %v2266_v39 = vpop.f32.mrb[65].mxu1  ;;  %5956 = vrot.lane.b32.xlu0 %v2264_v41, %s7031_s0 }
 0x8c2   :  { %11762 = vst [vmem:[#allocation74_spill] sm:$0xff] %v11761_v31  ;;  %11765 = vst [vmem:[#allocation75_spill] sm:$0xff] %v11764_v26  ;;  %v11767_v14 = vsel %vm8753_vm6, 4294967295, %v11766_v14  ;;  %vm11769_vm8 = vnez %v11692_v3  ;;  %vm11770_vm5 = vnez %v11695_v20  ;;  %vm11771_vm1 = vnez %v11698_v52  ;;  %v2307_v30 = vpop.f32.mrb[69].mxu0  ;;  %5958 = vrot.lane.b32.xlu1 %v2266_v39, %s7031_s0 }
 0x8c3   :  { %11768 = vst [vmem:[#allocation76_spill] sm:$0xff] %v11767_v14  ;;  %v5900_v4 = vsel %vm11769_vm8, %v8484_v12, 0.0  ;;  %v5902_v51 = vsel %vm11770_vm5, %v8486_v18, 0.0  ;;  %v5901_v25 = vsel %vm11771_vm1, %v8503_v62, 0.0  ;;  %vm11772_vm12 = vcmask 1043456   ;;  %v2309_v2 = vpop.f32.mrb[70].mxu0 }
 0x8c4   :  { %6581 = vmatprep.subr.msk.bf16.mxu0 %vm11772_vm12, %v8064_v13  ;;  %v5908_v55 = vsel %vm8689_vm0, %v2264_v41, 0.0  ;;  %v8776_v12 = vsel %vm8693_vm14, %v2264_v41, %v5915_v57  ;;  %v5910_v29 = vsel %vm8697_vm9, %v2305_v37, 0.0  ;;  %v8782_v50 = vsel %vm8710_vm2, %v2305_v37, %v5901_v25  ;;  %v2310_v47 = vpop.f32.mrb[71].mxu0  ;;  %v11825_v14 = vld [vmem:[#allocation25_spill] sm:$0xff] }
 0x8c5   :  { %11773 = vst [vmem:[#allocation77_spill] sm:$0xff] %v8776_v12  ;;  %11774 = vst [vmem:[#allocation78_spill] sm:$0xff] %v8782_v50  ;;  %v5911_v45 = vsel %vm8714_vm11, %v2307_v30, 0.0  ;;  %v8790_v57 = vsel %vm8718_vm15, %v2307_v30, %v5902_v51  ;;  %v5909_v12 = vsel %vm8722_vm10, %v2266_v39, 0.0  ;;  %v8796_v25 = vsel %vm8728_vm13, %v2266_v39, %v5900_v4  ;;  %v2268_v50 = vpop.f32.mrb[66].mxu1  ;;  %5960 = vrot.lane.b32.xlu0 %v2305_v37, %s7031_s0 }
 0x8c6   :  { %11775 = vst [vmem:[#allocation79_spill] sm:$0xff] %v8790_v57  ;;  %11776 = vst [vmem:[#allocation80_spill] sm:$0xff] %v8796_v25  ;;  %v2269_v6 = vpop.f32.mrb[67].mxu1  ;;  %v8802_v35 = vsel %vm8745_vm4, %v8503_v62, %v5908_v55  ;;  %v8807_v51 = vsel %vm8749_vm7, %v8486_v18, %v5909_v12  ;;  %vm11779_vm12 = vnez %v11757_v19  ;;  %v8817_v2 = vsel %vm8753_vm6, %v8630_v59, %v5911_v45  ;;  %v8826_v18 = vld [vmem:[#allocation12] sm:$0xff] }
 0x8c7   :  { %11777 = vst [vmem:[#allocation81_spill] sm:$0xff] %v8802_v35  ;;  %11778 = vst [vmem:[#allocation82_spill] sm:$0xff] %v8807_v51  ;;  %v8812_v4 = vsel %vm11779_vm12, %v8501_v58, %v5910_v29  ;;  %v4821_v62 = vrot.slane %v8704_v63, %v11663_v9  ;;  %vm11782_vm15 = vcmask 64512   ;;  %vm8830_vm7 = vcmp.eq.s32.totalorder %v4715_v40, 1  ;;  %5962 = vrot.lane.b32.xlu1 %v2307_v30, %s7031_s0  ;;  %v8848_v47 = vpop.f32.mrb[68].mxu1  ;;  %v2392_v6 = vpop.f32.mrb[72].mxu0 }
 0x8c8   :  { %11780 = vst [vmem:[#allocation83_spill] sm:$0xff] %v8812_v4  ;;  %11781 = vst [vmem:[#allocation84_spill] sm:$0xff] %v8817_v2  ;;  %6576 = vmatmul.mubr.msk.bf16.vlgmr.msra.gmra.mrb[172].mxu1 %vm11782_vm15, %v8525_v32  ;;  %v11785_v58 = vmov 0  ;;  %vm11788_vm6 = vcmask 1043456   ;;  %vm8837_vm13 = vcmp.eq.s32.totalorder %v4719_v0, 1  ;;  %v11789_v39 = vmov 0 }
 0x8c9   :  { %vm11783_vm11 = vmmov %vm11782_vm15  ;;  %11784 = vst [vmem:[#allocation85_spill] sm:$0xff] %v8826_v18  ;;  %5280 = vmatpush1.bf16.msra.mxu1 %v8079_v46  ;;  %v11786_v58 = vsel %vm8830_vm7, 4294967295, %v11785_v58  ;;  %v11790_v39 = vsel %vm8837_vm13, 4294967295, %v11789_v39  ;;  %vm8841_vm15 = vcmp.eq.s32.totalorder %v4817_v56, 1  ;;  %v11792_v59 = vmov 0  ;;  %v8858_v56 = vpop.f32.mrb[69].mxu1  ;;  %5311 = vmatprep.mubr.bf16.mxu1 %v11637_v43 }
 0x8ca   :  { %6578 = vmatmul.mubr.msk.bf16.vlgmr.msra.gmra.mrb[176].mxu0 %vm11783_vm11, %v8525_v32  ;;  %11787 = vst [vmem:[#allocation86_spill] sm:$0xff] %v11786_v58  ;;  %6583 = vmatprep.subr.msk.bf16.mxu1 %vm11788_vm6, %v7977_v10  ;;  %11791 = vst [vmem:[#allocation87_spill] sm:$0xff] %v11790_v39  ;;  %v11793_v59 = vsel %vm8841_vm15, 4294967295, %v11792_v59  ;;  %vm8850_vm10 = vcmp.eq.s32.totalorder %v4821_v62, 1  ;;  %v11796_v40 = vmov 0  ;;  %v4674_v10 = vand.u32 1, %v8826_v18 }
 0x8cb   :  { %5321 = vmatpush1.bf16.msra.mxu0 %v8082_v23  ;;  %11794 = vst [vmem:[#allocation88_spill] sm:$0xff] %v11793_v59  ;;  %vm11795_vm11 = vmmov %vm11788_vm6  ;;  %v11797_v40 = vsel %vm8850_vm10, 4294967295, %v11796_v40  ;;  %v4768_v0 = vsel %vm8830_vm7, %v8848_v47, 0.0  ;;  %5352 = vmatprep.mubr.bf16.mxu0 %v11637_v43  ;;  %v2394_v30 = vpop.f32.mrb[73].mxu0  ;;  %v4727_v41 = vrot.slane %v8612_v24, %v11647_v60  ;;  %v4769_v55 = vsel %vm8837_vm13, %v8858_v56, 0.0  ;;  %v2355_v12 = vpop.f32.mrb[70].mxu1 }
 0x8cc   :  { %6585 = vmatprep.subr.msk.bf16.mxu0 %vm11795_vm11, %v7979_v44  ;;  %11798 = vst [vmem:[#allocation89_spill] sm:$0xff] %v11797_v40  ;;  %v4723_v44 = vrot.slane %v8612_v24, %v11659_v54  ;;  %v8872_v29 = vsel %vm8841_vm15, %v2392_v6, %v4768_v0  ;;  %v2396_v50 = vpop.f32.mrb[74].mxu0  ;;  %v4731_v45 = vrot.slane %v8612_v24, %v8361_v16  ;;  %v2356_v57 = vpop.f32.mrb[71].mxu1  ;;  %v11801_v25 = vld [vmem:[#allocation36_spill] sm:$0xff]  ;;  %vm8894_vm6 = vcmp.eq.s32.totalorder %v4674_v10, 0  ;;  %v11816_v4 = vld [vmem:[#allocation29_spill] sm:$0xff] }
 0x8cd   :  { %11799 = vst [vmem:[#allocation90_spill] sm:$0xff] %v8872_v29  ;;  %v4825_v62 = vrot.slane %v8704_v63, %v11659_v54  ;;  %4884 = vrot.lane.b32.xlu0 %v8848_v47, %s7032_s1  ;;  %v8882_v37 = vsel %vm8850_vm10, %v2394_v30, %v4769_v55  ;;  %v2397_v12 = vpop.f32.mrb[75].mxu0  ;;  %v4735_v0 = vrot.slane %v8612_v24, %v11801_v25  ;;  %v11804_v57 = vmov 0  ;;  %v11823_v35 = vld [vmem:[#allocation37_spill] sm:$0xff] }
 0x8ce   :  { %11800 = vst [vmem:[#allocation91_spill] sm:$0xff] %v8882_v37  ;;  %v4829_v50 = vrot.slane %v8704_v63, %v11647_v60  ;;  %v4833_v29 = vrot.slane %v8704_v63, %v8361_v16  ;;  %4886 = vrot.lane.b32.xlu1 %v8858_v56, %s7032_s1  ;;  %v4837_v2 = vrot.slane %v8704_v63, %v11801_v25  ;;  %vm8898_vm11 = vcmp.eq.s32.totalorder %v4723_v44, 1  ;;  %v11815_v44 = vld [vmem:[#allocation28_spill] sm:$0xff] }
 0x8cf   :  { %v11805_v57 = vsel %vm8898_vm11, 4294967295, %v11804_v57  ;;  %vm8902_vm4 = vcmp.eq.s32.totalorder %v4727_v41, 1  ;;  %v11807_v12 = vmov 0  ;;  %vm11810_vm12 = vcmask 64512  }
 0x8d0   :  { %11806 = vst [vmem:[#allocation92_spill] sm:$0xff] %v11805_v57  ;;  %v11808_v12 = vsel %vm8902_vm4, 4294967295, %v11807_v12  ;;  %6580 = vmatmul.mubr.msk.bf16.vlgmr.msra.gmra.mrb[176].mxu1 %vm11810_vm12, %v8525_v32  ;;  %vm11811_vm14 = vmmov %vm11810_vm12  ;;  %v11812_v37 = vand.u32 3, %v8826_v18  ;;  %vm8918_vm2 = vcmp.eq.s32.totalorder %v4731_v45, 1  ;;  %v11817_v41 = vmov 0  ;;  %v11824_v18 = vld [vmem:[#allocation38_spill] sm:$0xff] }
 0x8d1   :  { %11809 = vst [vmem:[#allocation93_spill] sm:$0xff] %v11808_v12  ;;  %5461 = vmatpush1.bf16.msra.mxu1 %v11815_v44  ;;  %v11818_v41 = vsel %vm8918_vm2, 4294967295, %v11817_v41  ;;  %vm8922_vm9 = vcmp.eq.s32.totalorder %v4825_v62, 1  ;;  %v11820_v51 = vmov 0  ;;  %4888 = vrot.lane.b32.xlu0 %v2392_v6, %s7032_s1  ;;  %vm8933_vm12 = vcmp.eq.s32.totalorder %v4735_v0, 1  ;;  %v11835_v0 = vld [vmem:[#allocation26_spill] sm:$0xff] }
 0x8d2   :  { %6582 = vmatmul.mubr.msk.bf16.vlgmr.msra.gmra.mrb[180].mxu0 %vm11811_vm14, %v8525_v32  ;;  %vm8912_vm0 = vcmp.eq.s32.totalorder %v11812_v37, 1  ;;  %11819 = vst [vmem:[#allocation28_spill] sm:$0xff] %v11818_v41  ;;  %v11821_v51 = vsel %vm8922_vm9, 4294967295, %v11820_v51  ;;  %v4739_v32 = vrot.slane %v8612_v24, %v11823_v35  ;;  %v4743_v37 = vrot.slane %v8612_v24, %v11824_v18  ;;  %4890 = vrot.lane.b32.xlu1 %v2394_v30, %s7032_s1  ;;  %v2474_v44 = vpop.f32.mrb[76].mxu0 }
 0x8d3   :  { %5502 = vmatpush1.bf16.msra.mxu0 %v11816_v4  ;;  %11822 = vst [vmem:[#allocation29_spill] sm:$0xff] %v11821_v51  ;;  %vm11826_vm14 = vcmask 1043456   ;;  %v11827_v4 = vmov 0  ;;  %vm8937_vm1 = vcmp.eq.s32.totalorder %v4829_v50, 1  ;;  %v11829_v45 = vmov 0  ;;  %v2433_v50 = vpop.f32.mrb[72].mxu1  ;;  %5492 = vmatprep.mubr.bf16.mxu1 %v11637_v43 }
 0x8d4   :  { %6587 = vmatprep.subr.msk.bf16.mxu1 %vm11826_vm14, %v11825_v14  ;;  %v11828_v4 = vsel %vm8933_vm12, 4294967295, %v11827_v4  ;;  %v11830_v45 = vsel %vm8937_vm1, 4294967295, %v11829_v45  ;;  %vm8941_vm5 = vcmp.eq.s32.totalorder %v4833_v29, 1  ;;  %v11832_v62 = vmov 0  ;;  %6589 = vmatprep.subr.msk.bf16.mxu0 %vm11826_vm14, %v11835_v0  ;;  %v2435_v26 = vpop.f32.mrb[73].mxu1  ;;  %v2476_v38 = vpop.f32.mrb[77].mxu0 }
 0x8d5   :  { %11831 = vst [vmem:[#allocation37_spill] sm:$0xff] %v11830_v45  ;;  %v11833_v62 = vsel %vm8941_vm5, 4294967295, %v11832_v62  ;;  %v8948_v24 = vsel %vm8894_vm6, 1, %v11637_v43  ;;  %v4770_v14 = vsel %vm8898_vm11, %v2392_v6, 0.0  ;;  %vm8955_vm8 = vcmp.eq.s32.totalorder %v4837_v2, 1  ;;  %5533 = vmatprep.mubr.bf16.mxu0 %v11637_v43  ;;  %v2437_v31 = vpop.f32.mrb[74].mxu1  ;;  %4892 = vrot.lane.b32.xlu0 %v2433_v50, %s7032_s1 }
 0x8d6   :  { %11834 = vst [vmem:[#allocation38_spill] sm:$0xff] %v11833_v62  ;;  %v11836_v29 = vmov 0  ;;  %v4841_v34 = vrot.slane %v8704_v63, %v11823_v35  ;;  %v8964_v55 = vsel %vm8912_vm0, 1, %v11637_v43  ;;  %v4771_v6 = vsel %vm8902_vm4, %v2394_v30, 0.0  ;;  %v2478_v19 = vpop.f32.mrb[78].mxu0  ;;  %v2438_v31 = vpop.f32.mrb[75].mxu1  ;;  %4894 = vrot.lane.b32.xlu1 %v2435_v26, %s7032_s1 }
 0x8d7   :  { %v11837_v29 = vsel %vm8955_vm8, 4294967295, %v11836_v29  ;;  %v4772_v0 = vsel %vm8918_vm2, %v2433_v50, 0.0  ;;  %v8972_v2 = vsel %vm8922_vm9, %v2433_v50, %v4770_v14  ;;  %v4845_v10 = vrot.slane %v8704_v63, %v11824_v18  ;;  %v11848_v50 = vld [vmem:[#allocation30_spill] sm:$0xff] }
 0x8d8   :  { %11838 = vst [vmem:[#allocation25_spill] sm:$0xff] %v8972_v2  ;;  %v4773_v61 = vsel %vm8933_vm12, %v2435_v26, 0.0  ;;  %v8982_v30 = vsel %vm8937_vm1, %v2435_v26, %v4771_v6  ;;  %v8986_v14 = vsel %vm8941_vm5, %v2474_v44, %v4772_v0  ;;  %v8991_v2 = vld [vmem:[%s11154_s7 + $0x10] sm:$0x3]  ;;  %v4683_v63 = vrot.slane %v8948_v24, %v11658_v28 }
 0x8d9   :  { %11839 = vst [vmem:[#allocation26_spill] sm:$0xff] %v8982_v30  ;;  %11840 = vst [vmem:[#allocation94_spill] sm:$0xff] %v8986_v14  ;;  %v8998_v6 = vsel %vm8955_vm8, %v2476_v38, %v4773_v61  ;;  %v2479_v30 = vpop.f32.mrb[79].mxu0  ;;  %v4687_v0 = vrot.slane %v8948_v24, %v11663_v9  ;;  %v4785_v14 = vrot.slane %v8964_v55, %v11658_v28  ;;  %vm9007_vm0 = vcmp.eq.s32.totalorder %v4739_v32, 1  ;;  %v11849_v26 = vld [vmem:[#allocation31_spill] sm:$0xff] }
 0x8da   :  { %11841 = vst [vmem:[#allocation95_spill] sm:$0xff] %v8998_v6  ;;  %v4789_v19 = vrot.slane %v8964_v55, %v11663_v9  ;;  %v11842_v5 = vmov 0  ;;  %vm11844_vm6 = vcmask 64512   ;;  %vm9015_vm3 = vcmp.eq.s32.totalorder %v4743_v37, 1  ;;  %4896 = vrot.lane.b32.xlu0 %v2474_v44, %s7032_s1  ;;  %v11856_v37 = vld [vmem:[#allocation32_spill] sm:$0xff]  ;;  %v11862_v6 = vld [vmem:[#allocation33_spill] sm:$0xff]  ;;  %4898 = vrot.lane.b32.xlu1 %v2476_v38, %s7032_s1 }
 0x8db   :  { %v11843_v5 = vsel %vm9007_vm0, 4294967295, %v11842_v5  ;;  %6584 = vmatmul.mubr.msk.bf16.vlgmr.msra.gmra.mrb[180].mxu1 %vm11844_vm6, %v8991_v2  ;;  %vm11845_vm14 = vmmov %vm11844_vm6  ;;  %v11846_v61 = vmov 0  ;;  %vm9021_vm8 = vcmp.eq.s32.totalorder %v4683_v63, 1  ;;  %v11850_v30 = vmov 0 }
 0x8dc   :  { %6586 = vmatmul.mubr.msk.bf16.vlgmr.msra.gmra.mrb[184].mxu0 %vm11845_vm14, %v8991_v2  ;;  %v11847_v61 = vsel %vm9015_vm3, 4294967295, %v11846_v61  ;;  %5543 = vmatpush1.bf16.msra.mxu1 %v11848_v50  ;;  %v11851_v30 = vsel %vm9021_vm8, 4294967295, %v11850_v30  ;;  %vm9025_vm5 = vcmp.eq.s32.totalorder %v4841_v34, 1  ;;  %v11852_v32 = vmov 0 }
 0x8dd   :  { %5584 = vmatpush1.bf16.msra.mxu0 %v11849_v26  ;;  %v11853_v32 = vsel %vm9025_vm5, 4294967295, %v11852_v32  ;;  %vm9029_vm6 = vcmp.eq.s32.totalorder %v4845_v10, 1  ;;  %v11854_v31 = vmov 0  ;;  %vm11857_vm14 = vcmask 1043456   ;;  %5574 = vmatprep.mubr.bf16.mxu1 %v11637_v43 }
 0x8de   :  { %v11855_v31 = vsel %vm9029_vm6, 4294967295, %v11854_v31  ;;  %6591 = vmatprep.subr.msk.bf16.mxu1 %vm11857_vm14, %v11856_v37  ;;  %vm9036_vm1 = vcmp.eq.s32.totalorder %v4687_v0, 1  ;;  %v11858_v50 = vmov 0  ;;  %v4691_v63 = vrot.slane %v8948_v24, %v11659_v54  ;;  %vm11863_vm9 = vmmov %vm11857_vm14  ;;  %v2515_v0 = vpop.f32.mrb[76].mxu1  ;;  %v2556_v37 = vpop.f32.mrb[80].mxu0  ;;  %5615 = vmatprep.mubr.bf16.mxu0 %v11637_v43 }
 0x8df   :  { %v11859_v50 = vsel %vm9036_vm1, 4294967295, %v11858_v50  ;;  %vm9042_vm12 = vcmp.eq.s32.totalorder %v4785_v14, 1  ;;  %v11860_v34 = vmov 0  ;;  %v4695_v10 = vrot.slane %v8948_v24, %v11647_v60  ;;  %6593 = vmatprep.subr.msk.bf16.mxu0 %vm11863_vm9, %v11862_v6  ;;  %v2558_v52 = vpop.f32.mrb[81].mxu0  ;;  %4900 = vrot.lane.b32.xlu0 %v2515_v0, %s7032_s1 }
 0x8e0   :  { %v11861_v34 = vsel %vm9042_vm12, 4294967295, %v11860_v34  ;;  %v4774_v26 = vsel %vm9007_vm0, %v2474_v44, 0.0  ;;  %vm9053_vm14 = vcmp.eq.s32.totalorder %v4789_v19, 1  ;;  %v11864_v22 = vmov 0  ;;  %v2517_v19 = vpop.f32.mrb[77].mxu1 }
 0x8e1   :  { %v11865_v22 = vsel %vm9053_vm14, 4294967295, %v11864_v22  ;;  %v4699_v14 = vrot.slane %v8948_v24, %v8361_v16  ;;  %v4793_v17 = vrot.slane %v8964_v55, %v11659_v54  ;;  %v4775_v44 = vsel %vm9015_vm3, %v2476_v38, 0.0  ;;  %v2519_v27 = vpop.f32.mrb[78].mxu1  ;;  %4902 = vrot.lane.b32.xlu1 %v2517_v19, %s7032_s1 }
 0x8e2   :  { %v4760_v6 = vsel %vm9021_vm8, %v2515_v0, 0.0  ;;  %v9067_v1 = vsel %vm9025_vm5, %v2515_v0, %v4774_v26  ;;  %v4707_v20 = vrot.slane %v8948_v24, %v11823_v35  ;;  %v4761_v3 = vsel %vm9036_vm1, %v2517_v19, 0.0  ;;  %v2520_v49 = vpop.f32.mrb[79].mxu1 }
 0x8e3   :  { %11866 = vst [vmem:[#allocation30_spill] sm:$0xff] %v9067_v1  ;;  %v9077_v38 = vsel %vm9029_vm6, %v2517_v19, %v4775_v44  ;;  %v9081_v26 = vsel %vm9042_vm12, %v2556_v37, %v4760_v6  ;;  %v2560_v1 = vpop.f32.mrb[82].mxu0  ;;  %v4801_v42 = vrot.slane %v8964_v55, %v8361_v16  ;;  %v9088_v54 = vsel %vm9053_vm14, %v2558_v52, %v4761_v3 }
 0x8e4   :  { %11867 = vst [vmem:[#allocation31_spill] sm:$0xff] %v9077_v38  ;;  %11868 = vst [vmem:[#allocation32_spill] sm:$0xff] %v9081_v26  ;;  %v2561_v48 = vpop.f32.mrb[83].mxu0  ;;  %v4711_v44 = vrot.slane %v8948_v24, %v11824_v18  ;;  %v4703_v27 = vrot.slane %v8948_v24, %v11801_v25  ;;  %v4797_v1 = vrot.slane %v8964_v55, %v11647_v60  ;;  %vm9103_vm9 = vcmp.eq.s32.totalorder %v4691_v63, 1 }
 0x8e5   :  { %11869 = vst [vmem:[#allocation33_spill] sm:$0xff] %v9088_v54  ;;  %v4805_v0 = vrot.slane %v8964_v55, %v11801_v25  ;;  %v4809_v3 = vrot.slane %v8964_v55, %v11823_v35  ;;  %v4813_v49 = vrot.slane %v8964_v55, %v11824_v18  ;;  %v11870_v48 = vmov 0  ;;  %4904 = vrot.lane.b32.xlu0 %v2556_v37, %s7032_s1 }
 0x8e6   :  { %v11871_v48 = vsel %vm9103_vm9, 4294967295, %v11870_v48  ;;  %vm11872_vm14 = vcmask 64512   ;;  %vm9111_vm6 = vcmp.eq.s32.totalorder %v4695_v10, 1  ;;  %v11874_v24 = vmov 0  ;;  %4906 = vrot.lane.b32.xlu1 %v2558_v52, %s7032_s1 }
 0x8e7   :  { %6588 = vmatmul.mubr.msk.bf16.vlgmr.msra.gmra.mrb[184].mxu1 %vm11872_vm14, %v8991_v2  ;;  %vm11873_vm12 = vmmov %vm11872_vm14  ;;  %v11875_v24 = vsel %vm9111_vm6, 4294967295, %v11874_v24  ;;  %vm9117_vm1 = vcmp.eq.s32.totalorder %v4699_v14, 1  ;;  %v11876_v55 = vmov 0  ;;  %vm9121_vm5 = vcmp.eq.s32.totalorder %v4793_v17, 1 }
 0x8e8   :  { %6590 = vmatmul.mubr.msk.bf16.vlgmr.msra.gmra.mrb[188].mxu0 %vm11873_vm12, %v8991_v2  ;;  %5625 = vmatpush1.bf16.msra.mxu1 %v8059_v21  ;;  %v11877_v55 = vsel %vm9117_vm1, 4294967295, %v11876_v55  ;;  %v11878_v63 = vmov 0  ;;  %vm9125_vm14 = vcmp.eq.s32.totalorder %v4707_v20, 1  ;;  %v11880_v6 = vmov 0 }
 0x8e9   :  { %5666 = vmatpush1.bf16.msra.mxu0 %v8062_v8  ;;  %v11879_v63 = vsel %vm9121_vm5, 4294967295, %v11878_v63  ;;  %v11881_v6 = vsel %vm9125_vm14, 4294967295, %v11880_v6  ;;  %vm11882_vm12 = vcmask 1043456   ;;  %vm9132_vm8 = vcmp.eq.s32.totalorder %v4801_v42, 1  ;;  %v2638_v42 = vpop.f32.mrb[84].mxu0  ;;  %5656 = vmatprep.mubr.bf16.mxu1 %v11637_v43 }
 0x8ea   :  { %6595 = vmatprep.subr.msk.bf16.mxu1 %vm11882_vm12, %v8052_v7  ;;  %v11883_v21 = vmov 0  ;;  %vm9136_vm3 = vcmp.eq.s32.totalorder %v4711_v44, 1  ;;  %v11885_v8 = vmov 0  ;;  %vm9140_vm0 = vcmp.eq.s32.totalorder %v4703_v27, 1  ;;  %6597 = vmatprep.subr.msk.bf16.mxu0 %vm11882_vm12, %v8064_v13  ;;  %v2597_v7 = vpop.f32.mrb[80].mxu1 }
 0x8eb   :  { %v11884_v21 = vsel %vm9132_vm8, 4294967295, %v11883_v21  ;;  %v11886_v8 = vsel %vm9136_vm3, 4294967295, %v11885_v8  ;;  %v11888_v17 = vmov 0  ;;  %vm9144_vm2 = vcmp.eq.s32.totalorder %v4797_v1, 1  ;;  %5697 = vmatprep.mubr.bf16.mxu0 %v11637_v43  ;;  %4908 = vrot.lane.b32.xlu0 %v2597_v7, %s7032_s1 }
 0x8ec   :  { %11887 = vst [vmem:[#allocation96_spill] sm:$0xff] %v11886_v8  ;;  %v11889_v17 = vsel %vm9140_vm0, 4294967295, %v11888_v17  ;;  %v11890_v20 = vmov 0  ;;  %v4762_v10 = vsel %vm9103_vm9, %v2556_v37, 0.0  ;;  %vm9153_vm4 = vcmp.eq.s32.totalorder %v4805_v0, 1  ;;  %v2640_v0 = vpop.f32.mrb[85].mxu0 }
 0x8ed   :  { %v11891_v20 = vsel %vm9144_vm2, 4294967295, %v11890_v20  ;;  %v11892_v14 = vmov 0  ;;  %vm9157_vm11 = vcmp.eq.s32.totalorder %v4809_v3, 1  ;;  %v11894_v19 = vmov 0  ;;  %v2599_v3 = vpop.f32.mrb[81].mxu1  ;;  %v2642_v26 = vpop.f32.mrb[86].mxu0 }
 0x8ee   :  { %v11893_v14 = vsel %vm9153_vm4, 4294967295, %v11892_v14  ;;  %v11895_v19 = vsel %vm9157_vm11, 4294967295, %v11894_v19  ;;  %vm9161_vm10 = vcmp.eq.s32.totalorder %v4813_v49, 1  ;;  %v11897_v44 = vmov 0  ;;  %v2601_v54 = vpop.f32.mrb[82].mxu1  ;;  %v2643_v16 = vpop.f32.mrb[87].mxu0  ;;  %4910 = vrot.lane.b32.xlu1 %v2599_v3, %s7032_s1 }
 0x8ef   :  { %11896 = vst [vmem:[#allocation97_spill] sm:$0xff] %v11895_v19  ;;  %v11898_v44 = vsel %vm9161_vm10, 4294967295, %v11897_v44  ;;  %v4763_v37 = vsel %vm9111_vm6, %v2558_v52, 0.0  ;;  %v4764_v13 = vsel %vm9117_vm1, %v2597_v7, 0.0  ;;  %v9171_v27 = vsel %vm9121_vm5, %v2597_v7, %v4762_v10  ;;  %v2602_v38 = vpop.f32.mrb[83].mxu1  ;;  %4912 = vrot.lane.b32.xlu0 %v2638_v42, %s7032_s1  ;;  %v2725_v54 = vpop.f32.mrb[88].mxu0 }
 0x8f0   :  { %11899 = vst [vmem:[#allocation98_spill] sm:$0xff] %v11898_v44  ;;  %11900 = vst [vmem:[#allocation99_spill] sm:$0xff] %v9171_v27  ;;  %v4766_v1 = vsel %vm9125_vm14, %v2638_v42, 0.0  ;;  %v9179_v49 = vsel %vm9132_vm8, %v2638_v42, %v4764_v13  ;;  %v4767_v52 = vsel %vm9136_vm3, %v2640_v0, 0.0  ;;  %v4765_v10 = vsel %vm9140_vm0, %v2599_v3, 0.0  ;;  %v9214_v16 = vpop.f32.mrb[84].mxu1 }
 0x8f1   :  { %11901 = vst [vmem:[#allocation100_spill] sm:$0xff] %v9179_v49  ;;  %v9187_v27 = vsel %vm9144_vm2, %v2599_v3, %v4763_v37  ;;  %v9193_v13 = vsel %vm9157_vm11, %v8848_v47, %v4766_v1  ;;  %v9197_v49 = vsel %vm9153_vm4, %v2640_v0, %v4765_v10  ;;  %v9202_v37 = vsel %vm9161_vm10, %v8858_v56, %v4767_v52  ;;  %v9220_v56 = vpop.f32.mrb[85].mxu1 }
 0x8f2   :  { %11902 = vst [vmem:[#allocation101_spill] sm:$0xff] %v9187_v27  ;;  %11903 = vst [vmem:[#allocation102_spill] sm:$0xff] %v9193_v13  ;;  %vm11906_vm12 = vcmask 64512   ;;  %4914 = vrot.lane.b32.xlu1 %v2640_v0, %s7032_s1  ;;  %v5796_v47 = vsel %vm8830_vm7, %v9214_v16, 0.0  ;;  %v2688_v38 = vpop.f32.mrb[86].mxu1  ;;  %vm11914_vm7 = vnez %v11818_v41  ;;  %vm11920_vm10 = vnez %v11833_v62 }
 0x8f3   :  { %11904 = vst [vmem:[#allocation103_spill] sm:$0xff] %v9197_v49  ;;  %11905 = vst [vmem:[#allocation104_spill] sm:$0xff] %v9202_v37  ;;  %6592 = vmatmul.mubr.msk.bf16.vlgmr.msra.gmra.mrb[188].mxu1 %vm11906_vm12, %v8991_v2  ;;  %v9227_v26 = vsel %vm8841_vm15, %v2725_v54, %v5796_v47  ;;  %5822 = vrot.lane.b32.xlu0 %v9220_v56, %s7032_s1  ;;  %v2689_v42 = vpop.f32.mrb[87].mxu1  ;;  %vm11912_vm15 = vnez %v11805_v57 }
 0x8f4   :  { %vm11907_vm3 = vmmov %vm11906_vm12  ;;  %5707 = vmatpush1.bf16.msra.mxu1 %v8079_v46  ;;  %5738 = vmatprep.mubr.bf16.mxu1 %v11637_v43  ;;  %v2727_v46 = vpop.f32.mrb[89].mxu0  ;;  %11908 = vst [vmem:[#allocation105_spill] sm:$0xff] %v9227_v26  ;;  %v5798_v3 = vsel %vm11912_vm15, %v2725_v54, 0.0  ;;  %v2766_v52 = vpop.f32.mrb[88].mxu1  ;;  %vm11918_vm15 = vnez %v11830_v45 }
 0x8f5   :  { %6594 = vmatmul.mubr.msk.bf16.vlgmr.msra.gmra.mrb[192].mxu0 %vm11907_vm3, %v8991_v2  ;;  %v2729_v7 = vpop.f32.mrb[90].mxu0  ;;  %vm11909_vm3 = vnez %v11797_v40 }
 0x8f6   :  { %5748 = vmatpush1.bf16.msra.mxu0 %v8082_v23  ;;  %5779 = vmatprep.mubr.bf16.mxu0 %v11637_v43  ;;  %v5797_v23 = vsel %vm8837_vm13, %v9220_v56, 0.0  ;;  %v2730_v0 = vpop.f32.mrb[91].mxu0  ;;  %vm11911_vm13 = vmmov %vm11906_vm12 }
 0x8f7   :  { %v9233_v1 = vsel %vm11909_vm3, %v2727_v46, %v5797_v23  ;;  %5820 = vrot.lane.b32.xlu1 %v9214_v16, %s7032_s1  ;;  %5826 = vrot.lane.b32.xlu0 %v2727_v46, %s7032_s1  ;;  %v2807_v10 = vpop.f32.mrb[92].mxu0  ;;  %vm11913_vm3 = vnez %v11808_v12  ;;  %v5800_v23 = vsel %vm11914_vm7, %v2766_v52, 0.0  ;;  %vm11926_vm7 = vnez %v11851_v30  ;;  %v11963_v12 = vld [vmem:[#allocation46_spill] sm:$0xff] }
 0x8f8   :  { %11910 = vst [vmem:[#allocation106_spill] sm:$0xff] %v9233_v1  ;;  %v5799_v47 = vsel %vm11913_vm3, %v2727_v46, 0.0  ;;  %v2809_v7 = vpop.f32.mrb[93].mxu0  ;;  %v9261_v46 = vsel %vm11920_vm10, %v2807_v10, %v5800_v23  ;;  %vm11925_vm10 = vnez %v11847_v61  ;;  %vm11927_vm3 = vnez %v11853_v32 }
 0x8f9   :  { %11921 = vst [vmem:[#allocation109_spill] sm:$0xff] %v9261_v46  ;;  %v2811_v37 = vpop.f32.mrb[94].mxu0 }
 0x8fa   :  { %v2812_v27 = vpop.f32.mrb[95].mxu0  ;;  %v5803_v37 = vsel %vm11925_vm10, %v2809_v7, 0.0 }
 0x8fb   :  { %6596 = vmatmul.mubr.msk.bf16.vlgmr.msra.gmra.mrb[192].mxu1 %vm11906_vm12, %v8991_v2  ;;  %5824 = vrot.lane.b32.xlu1 %v2725_v54, %s7032_s1  ;;  %vm11915_vm12 = vnez %v11821_v51  ;;  %v11957_v51 = vld [vmem:[#allocation41_spill] sm:$0xff] }
 0x8fc   :  { %v9251_v38 = vsel %vm11915_vm12, %v2766_v52, %v5798_v3  ;;  %vm11922_vm12 = vnez %v11837_v29 }
 0x8fd   :  { %6598 = vmatmul.mubr.msk.bf16.vlgmr.msra.gmra.mrb[196].mxu0 %vm11911_vm13, %v8991_v2  ;;  %11916 = vst [vmem:[#allocation107_spill] sm:$0xff] %v9251_v38  ;;  %v2768_v2 = vpop.f32.mrb[89].mxu1  ;;  %vm11917_vm13 = vnez %v11828_v4  ;;  %v11955_v38 = vld [vmem:[#allocation40_spill] sm:$0xff] }
 0x8fe   :  { %v5801_v42 = vsel %vm11917_vm13, %v2768_v2, 0.0  ;;  %v9257_v54 = vsel %vm11918_vm15, %v2768_v2, %v5799_v47  ;;  %v2770_v0 = vpop.f32.mrb[90].mxu1  ;;  %5830 = vrot.lane.b32.xlu0 %v2768_v2, %s7032_s1  ;;  %vm11924_vm15 = vnez %v11843_v5  ;;  %vm11932_vm13 = vnez %v11861_v34 }
 0x8ff   :  { %11919 = vst [vmem:[#allocation108_spill] sm:$0xff] %v9257_v54  ;;  %v2771_v13 = vpop.f32.mrb[91].mxu1  ;;  %v9266_v3 = vsel %vm11922_vm12, %v2809_v7, %v5801_v42  ;;  %5828 = vrot.lane.b32.xlu1 %v2766_v52, %s7032_s1  ;;  %v5802_v47 = vsel %vm11924_vm15, %v2807_v10, 0.0  ;;  %v2889_v0 = vpop.f32.mrb[96].mxu0  ;;  %vm11929_vm12 = vnez %v11859_v50  ;;  %vm11930_vm15 = vnez %v11855_v31 }
 0x900   :  { %11923 = vst [vmem:[#allocation110_spill] sm:$0xff] %v9266_v3  ;;  %v2848_v23 = vpop.f32.mrb[92].mxu1  ;;  %v2891_v2 = vpop.f32.mrb[97].mxu0 }
 0x901   :  { %v5788_v13 = vsel %vm11926_vm7, %v2848_v23, 0.0  ;;  %v9279_v27 = vsel %vm11927_vm3, %v2848_v23, %v5802_v47  ;;  %v2850_v52 = vpop.f32.mrb[93].mxu1  ;;  %v2893_v1 = vpop.f32.mrb[98].mxu0  ;;  %vm11934_vm7 = vnez %v11865_v22 }
 0x902   :  { %5834 = vrot.lane.b32.xlu0 %v2809_v7, %s7032_s1  ;;  %11928 = vst [vmem:[#allocation111_spill] sm:$0xff] %v9279_v27  ;;  %v5789_v42 = vsel %vm11929_vm12, %v2850_v52, 0.0  ;;  %v2852_v26 = vpop.f32.mrb[94].mxu1  ;;  %v9289_v7 = vsel %vm11932_vm13, %v2889_v0, %v5788_v13  ;;  %v2894_v27 = vpop.f32.mrb[99].mxu0  ;;  %v5791_v1 = vsel %vm9111_vm6, %v2891_v2, 0.0 }
 0x903   :  { %5832 = vrot.lane.b32.xlu1 %v2807_v10, %s7032_s1  ;;  %v9285_v10 = vsel %vm11930_vm15, %v2850_v52, %v5803_v37  ;;  %11933 = vst [vmem:[#allocation113_spill] sm:$0xff] %v9289_v7  ;;  %v2853_v3 = vpop.f32.mrb[95].mxu1  ;;  %v9294_v47 = vsel %vm11934_vm7, %v2891_v2, %v5789_v42  ;;  %v5790_v26 = vsel %vm9103_vm9, %v2889_v0, 0.0  ;;  %v2971_v13 = vpop.f32.mrb[100].mxu0 }
 0x904   :  { %11931 = vst [vmem:[#allocation112_spill] sm:$0xff] %v9285_v10  ;;  %11935 = vst [vmem:[#allocation114_spill] sm:$0xff] %v9294_v47  ;;  %v2930_v37 = vpop.f32.mrb[96].mxu1  ;;  %v2973_v42 = vpop.f32.mrb[101].mxu0 }
 0x905   :  { %v5792_v3 = vsel %vm9117_vm1, %v2930_v37, 0.0  ;;  %v9307_v27 = vsel %vm9121_vm5, %v2930_v37, %v5790_v26  ;;  %vm11939_vm1 = vnez %v11886_v8  ;;  %v2975_v10 = vpop.f32.mrb[102].mxu0 }
 0x906   :  { %5838 = vrot.lane.b32.xlu0 %v2850_v52, %s7032_s1  ;;  %11936 = vst [vmem:[#allocation115_spill] sm:$0xff] %v9307_v27  ;;  %v2932_v52 = vpop.f32.mrb[97].mxu1  ;;  %v5795_v26 = vsel %vm11939_vm1, %v2973_v42, 0.0 }
 0x907   :  { %5836 = vrot.lane.b32.xlu1 %v2848_v23, %s7032_s1  ;;  %v5794_v23 = vsel %vm9125_vm14, %v2971_v13, 0.0  ;;  %v5793_v47 = vsel %vm9140_vm0, %v2932_v52, 0.0  ;;  %v2934_v27 = vpop.f32.mrb[98].mxu1  ;;  %vm11942_vm14 = vnez %v11898_v44 }
 0x908   :  { %v9325_v7 = vsel %vm9153_vm4, %v2973_v42, %v5793_v47  ;;  %v9331_v46 = vsel %vm9157_vm11, %v9214_v16, %v5794_v23 }
 0x909   :  { %11940 = vst [vmem:[#allocation118_spill] sm:$0xff] %v9325_v7  ;;  %11941 = vst [vmem:[#allocation119_spill] sm:$0xff] %v9331_v46 }
 0x90a   :  { %5842 = vrot.lane.b32.xlu0 %v2891_v2, %s7032_s1  ;;  %v9319_v2 = vsel %vm9144_vm2, %v2932_v52, %v5791_v1  ;;  %v9336_v1 = vsel %vm11942_vm14, %v9220_v56, %v5795_v26  ;;  %v11944_v56 = vld [vmem:[#allocation35_spill] sm:$0xff] }
 0x90b   :  { %5840 = vrot.lane.b32.xlu1 %v2889_v0, %s7032_s1  ;;  %v9313_v0 = vsel %vm9132_vm8, %v2971_v13, %v5792_v3  ;;  %11938 = vst [vmem:[#allocation117_spill] sm:$0xff] %v9319_v2  ;;  %v2935_v3 = vpop.f32.mrb[99].mxu1  ;;  %11943 = vst [vmem:[#allocation120_spill] sm:$0xff] %v9336_v1  ;;  %v11945_v26 = vand.u32 3, %v11944_v56  ;;  %vm4193_vm11 = vcmp.lt.s32.totalorder %v11944_v56, 15 }
 0x90c   :  { %11937 = vst [vmem:[#allocation116_spill] sm:$0xff] %v9313_v0  ;;  %v2976_v0 = vpop.f32.mrb[103].mxu0  ;;  %v3017_v10 = vpop.f32.mrb[100].mxu1 }
 0x90d   :  { %v3058_v47 = vpop.f32.mrb[104].mxu0  ;;  %v3019_v27 = vpop.f32.mrb[101].mxu1  ;;  %vm4191_vm14 = vcmp.eq.s32.totalorder %v11945_v26, 3 }
 0x90e   :  { %5846 = vrot.lane.b32.xlu0 %v2932_v52, %s7032_s1  ;;  %v9341_v52 = vpop.f32.mrb[105].mxu0  ;;  %v3021_v0 = vpop.f32.mrb[102].mxu1  ;;  %vm4195_vm8 = vmand %vm4191_vm14, %vm4193_vm11  ;;  %vm11964_vm14 = vnez %v11963_v12 }
 0x90f   :  { %5844 = vrot.lane.b32.xlu1 %v2930_v37, %s7032_s1  ;;  %v3062_v3 = vpop.f32.mrb[106].mxu0  ;;  %v3022_v16 = vpop.f32.mrb[103].mxu1  ;;  %v11946_v37 = vld [vmem:[#allocation34_spill] sm:$0xff]  ;;  %v9374_v2 = vsel %vm4195_vm8, 1, %v11637_v43 }
 0x910   :  { %v3063_v23 = vpop.f32.mrb[107].mxu0  ;;  %vm4194_vm4 = vcmp.lt.s32.totalorder %v11946_v37, 15  ;;  %v4262_v34 = vrot.slane %v9374_v2, %v11647_v60 }
 0x911   :  { %v9356_v0 = vpop.f32.mrb[108].mxu0  ;;  %v11948_v23 = vld [vmem:[#allocation21_spill] sm:$0xff] }
 0x912   :  { %5850 = vrot.lane.b32.xlu0 %v2973_v42, %s7032_s1  ;;  %v9354_v42 = vpop.f32.mrb[104].mxu1  ;;  %v9360_v16 = vpop.f32.mrb[109].mxu0  ;;  %vm11949_vm0 = vnez %v11948_v23 }
 0x913   :  { %5848 = vrot.lane.b32.xlu1 %v2971_v13, %s7032_s1  ;;  %v11947_v13 = vand.u32 3, %v11946_v37  ;;  %v9358_v3 = vpop.f32.mrb[105].mxu1  ;;  %v4076_v56 = vsel %vm11949_vm0, %v9360_v16, 0.0  ;;  %v11950_v37 = vld [vmem:[#allocation45_spill] sm:$0xff]  ;;  %vm12010_vm0 = vnez %v11828_v4  ;;  %v12021_v4 = vld [vmem:[#allocation66_spill] sm:$0xff] }
 0x914   :  { %v3103_v26 = vpop.f32.mrb[106].mxu1  ;;  %vm11951_vm5 = vnez %v11950_v37 }
 0x915   :  { %vm4192_vm1 = vcmp.eq.s32.totalorder %v11947_v13, 3  ;;  %v3144_v13 = vpop.f32.mrb[110].mxu0  ;;  %v9367_v1 = vsel %vm11951_vm5, %v3017_v10, %v4076_v56  ;;  %v3104_v46 = vpop.f32.mrb[107].mxu1  ;;  %v4270_v56 = vrot.slane %v9374_v2, %v11801_v25 }
 0x916   :  { %4197 = vrot.lane.b32.xlu0 %v3017_v10, %s7031_s0  ;;  %vm4196_vm2 = vmand %vm4192_vm1, %vm4194_vm4  ;;  %11952 = vst [vmem:[#allocation35_spill] sm:$0xff] %v9367_v1  ;;  %v3145_v7 = vpop.f32.mrb[111].mxu0  ;;  %v9379_v26 = vpop.permute.xlu0 %6111  ;;  %v4274_v46 = vrot.slane %v9374_v2, %v11823_v35  ;;  %v11953_v13 = vld [vmem:[#allocation22_spill] sm:$0xff]  ;;  %vm11956_vm4 = vnez %v11955_v38 }
 0x917   :  { %4199 = vrot.lane.b32.xlu1 %v3019_v27, %s7031_s0  ;;  %v9377_v54 = vsel %vm4196_vm2, 1, %v11637_v43  ;;  %v4278_v7 = vrot.slane %v9374_v2, %v11824_v18  ;;  %vm11954_vm1 = vnez %v11953_v13  ;;  %v4086_v49 = vsel %vm11956_vm4, %v3019_v27, 0.0  ;;  %v9395_v37 = vpop.f32.mrb[108].mxu1  ;;  %v3222_v23 = vpop.f32.mrb[112].mxu0  ;;  %v11961_v38 = vld [vmem:[#allocation42_spill] sm:$0xff] }
 0x918   :  { %v4085_v1 = vsel %vm11954_vm1, %v3017_v10, 0.0  ;;  %v4282_v62 = vrot.slane %v9377_v54, %v11658_v28  ;;  %v4286_v45 = vrot.slane %v9377_v54, %v11663_v9  ;;  %vm11958_vm2 = vnez %v11957_v51  ;;  %v11959_v10 = vld [vmem:[#allocation23_spill] sm:$0xff]  ;;  %v3183_v57 = vpop.f32.mrb[109].mxu1  ;;  %v3224_v44 = vpop.f32.mrb[113].mxu0 }
 0x919   :  { %v4087_v41 = vsel %vm11958_vm2, %v3058_v47, 0.0  ;;  %vm11960_vm8 = vnez %v11959_v10  ;;  %vm11962_vm11 = vnez %v11961_v38  ;;  %v9410_v59 = vsel %vm11964_vm14, %v3222_v23, %v4086_v49  ;;  %v3185_v49 = vpop.f32.mrb[110].mxu1 }
 0x91a   :  { %4201 = vrot.lane.b32.xlu0 %v3058_v47, %s7031_s0  ;;  %v4077_v13 = vsel %vm11960_vm8, %v9395_v37, 0.0  ;;  %v4079_v40 = vsel %vm11962_vm11, %v3222_v23, 0.0  ;;  %11965 = vst [vmem:[#allocation34_spill] sm:$0xff] %v9410_v59  ;;  %vm11966_vm1 = vnez %v11706_v11  ;;  %vm11968_vm2 = vnez %v11709_v36  ;;  %v3226_v59 = vpop.f32.mrb[114].mxu0  ;;  %v11974_v11 = vld [vmem:[#allocation47_spill] sm:$0xff]  ;;  %v11984_v49 = vld [vmem:[#allocation56_spill] sm:$0xff] }
 0x91b   :  { %4203 = vrot.lane.b32.xlu1 %v9341_v52, %s7031_s0  ;;  %v9414_v39 = vsel %vm11966_vm1, %v3019_v27, %v4077_v13  ;;  %v9419_v51 = vsel %vm11968_vm2, %v9341_v52, %v4079_v40  ;;  %vm11970_vm8 = vnez %v11674_v53  ;;  %vm11971_vm11 = vnez %v11703_v15  ;;  %v9435_v40 = vpop.permute.xlu0 %5932  ;;  %v3186_v13 = vpop.f32.mrb[111].mxu1 }
 0x91c   :  { %11967 = vst [vmem:[#allocation121_spill] sm:$0xff] %v9414_v39  ;;  %11969 = vst [vmem:[#allocation122_spill] sm:$0xff] %v9419_v51  ;;  %v4078_v10 = vsel %vm11970_vm8, %v3183_v57, 0.0  ;;  %v9425_v38 = vsel %vm11971_vm11, %v3183_v57, %v4085_v1  ;;  %vm11973_vm14 = vnez %v11671_v33  ;;  %vm11975_vm1 = vnez %v11974_v11  ;;  %v11981_v1 = vld [vmem:[#allocation57_spill] sm:$0xff]  ;;  %v11987_v51 = vld [vmem:[#allocation24_spill] sm:$0xff]  ;;  %v9499_v15 = vpop.f32.mrb[112].mxu1 }
 0x91d   :  { %11972 = vst [vmem:[#allocation123_spill] sm:$0xff] %v9425_v38  ;;  %v4080_v12 = vsel %vm11973_vm14, %v3224_v44, 0.0  ;;  %v9431_v27 = vsel %vm11975_vm1, %v3224_v44, %v4087_v41  ;;  %11977 = vst [vmem:[#allocation125_spill] sm:$0xff] %v9435_v40  ;;  %vm9437_vm2 = vcmp.eq.s32.totalorder %v4270_v56, 1  ;;  %v11978_v39 = vmov 0  ;;  %v5935_v41 = vpop.permute.xlu1 %5934  ;;  %v11988_v56 = vld [vmem:[#allocation27_spill] sm:$0xff] }
 0x91e   :  { %4205 = vrot.lane.b32.xlu0 %v9354_v42, %s7031_s0  ;;  %11976 = vst [vmem:[#allocation124_spill] sm:$0xff] %v9431_v27  ;;  %v11979_v39 = vsel %vm9437_vm2, 4294967295, %v11978_v39  ;;  %vm11982_vm11 = vnez %v11981_v1  ;;  %vm11985_vm8 = vnez %v11984_v49  ;;  %v3227_v27 = vpop.f32.mrb[115].mxu0  ;;  %v4290_v13 = vrot.slane %v9377_v54, %v11987_v51  ;;  %v12016_v11 = vld [vmem:[#allocation68_spill] sm:$0xff]  ;;  %v12019_v33 = vld [vmem:[#allocation65_spill] sm:$0xff] }
 0x91f   :  { %4207 = vrot.lane.b32.xlu1 %v9358_v3, %s7031_s0  ;;  %11980 = vst [vmem:[#allocation126_spill] sm:$0xff] %v11979_v39  ;;  %v9443_v59 = vsel %vm11982_vm11, %v3058_v47, %v4078_v10  ;;  %v9448_v38 = vsel %vm11985_vm8, %v9354_v42, %v4080_v12  ;;  %vm11989_vm1 = vcmp.lt.s32.totalorder %v11988_v56, 127  ;;  %vm9456_vm14 = vcmp.eq.s32.totalorder %v4274_v46, 1  ;;  %v11992_v47 = vld [vmem:[#allocation61_spill] sm:$0xff]  ;;  %v9497_v49 = vpop.f32.mrb[116].mxu0 }
 0x920   :  { %11983 = vst [vmem:[#allocation127_spill] sm:$0xff] %v9443_v59  ;;  %11986 = vst [vmem:[#allocation128_spill] sm:$0xff] %v9448_v38  ;;  %v5978_v36 = vsel %vm11989_vm1, %v9435_v40, %v5935_v41  ;;  %v11990_v1 = vmov 0  ;;  %vm9465_vm8 = vcmp.eq.s32.totalorder %v4278_v7, 1  ;;  %vm9469_vm11 = vcmp.eq.s32.totalorder %v4282_v62, 1  ;;  %v12001_v46 = vld [vmem:[#allocation49_spill] sm:$0xff] }
 0x921   :  { %v11991_v1 = vsel %vm9456_vm14, 4294967295, %v11990_v1  ;;  %v9463_v12 = vsel %vm9437_vm2, %v5978_v36, %v11992_v47  ;;  %v11996_v10 = vmov 0  ;;  %vm9473_vm4 = vcmp.eq.s32.totalorder %v4286_v45, 1  ;;  %v12003_v7 = vld [vmem:[#allocation20_spill] sm:$0xff]  ;;  %v12004_v45 = vld [vmem:[#allocation50_spill] sm:$0xff]  ;;  %v12006_v59 = vld [vmem:[#allocation51_spill] sm:$0xff] }
 0x922   :  { %4209 = vrot.lane.b32.xlu0 %v9356_v0, %s7031_s0  ;;  %v11997_v10 = vsel %vm9469_vm11, 4294967295, %v11996_v10  ;;  %v11999_v27 = vmov 0  ;;  %vm12002_vm1 = vnez %v12001_v46  ;;  %v4294_v36 = vrot.slane %v9377_v54, %v11647_v60  ;;  %v3265_v40 = vpop.f32.mrb[113].mxu1 }
 0x923   :  { %4211 = vrot.lane.b32.xlu1 %v9360_v16, %s7031_s0  ;;  %11998 = vst [vmem:[#allocation27_spill] sm:$0xff] %v11997_v10  ;;  %v12000_v27 = vsel %vm9473_vm4, 4294967295, %v11999_v27  ;;  %v4088_v38 = vsel %vm12002_vm1, %v9341_v52, 0.0  ;;  %v4298_v47 = vrot.slane %v9377_v54, %v12003_v7  ;;  %v4302_v62 = vrot.slane %v9377_v54, %v11801_v25  ;;  %v12008_v52 = vld [vmem:[#allocation52_spill] sm:$0xff] }
 0x924   :  { %vm12005_vm2 = vnez %v12004_v45  ;;  %vm12007_vm5 = vnez %v12006_v59  ;;  %vm12009_vm1 = vnez %v12008_v52  ;;  %v6009_v53 = vsel %vm12010_vm0, %v9463_v12, 0.0  ;;  %v5937_v45 = vpop.permute.xlu0 %5936  ;;  %v12014_v59 = vld [vmem:[#allocation67_spill] sm:$0xff] }
 0x925   :  { %v4073_v39 = vsel %vm12005_vm2, %v9354_v42, 0.0  ;;  %v4075_v46 = vsel %vm12007_vm5, %v9356_v0, 0.0  ;;  %vm9504_vm6 = vcmp.eq.s32.totalorder %v4290_v13, 1  ;;  %v12011_v42 = vmov 0 }
 0x926   :  { %4213 = vrot.lane.b32.xlu0 %v9395_v37, %s7031_s0  ;;  %v12012_v42 = vsel %vm9504_vm6, 4294967295, %v12011_v42  ;;  %vm12015_vm2 = vnez %v12014_v59  ;;  %vm12020_vm5 = vnez %v12019_v33  ;;  %vm12022_vm0 = vnez %v12021_v4  ;;  %v12025_v59 = vld [vmem:[#allocation73_spill] sm:$0xff] }
 0x927   :  { %4215 = vrot.lane.b32.xlu1 %v3183_v57, %s7031_s0  ;;  %v11993_v57 = vmov 0  ;;  %12013 = vst [vmem:[#allocation61_spill] sm:$0xff] %v12012_v42  ;;  %v4083_v52 = vsel %vm12015_vm2, %v9497_v49, 0.0  ;;  %v4081_v25 = vsel %vm12020_vm5, %v9499_v15, 0.0  ;;  %v9522_v13 = vsel %vm12022_vm0, %v9499_v15, %v4088_v38  ;;  %v9538_v38 = vpop.f32.mrb[117].mxu0 }
 0x928   :  { %v11994_v57 = vsel %vm9465_vm8, 4294967295, %v11993_v57  ;;  %12023 = vst [vmem:[#allocation129_spill] sm:$0xff] %v9522_v13  ;;  %vm12024_vm9 = vcmp.lt.s32.totalorder %v11988_v56, 127  ;;  %vm12026_vm2 = vnez %v12025_v59  ;;  %v4258_v50 = vrot.slane %v9374_v2, %v11987_v51 }
 0x929   :  { %11995 = vst [vmem:[#allocation24_spill] sm:$0xff] %v11994_v57  ;;  %v5977_v58 = vsel %vm12024_vm9, %v5935_v41, %v5937_v45  ;;  %v9529_v19 = vsel %vm12026_vm2, %v9360_v16, %v4083_v52  ;;  %vm12033_vm0 = vmmov %vm12024_vm9  ;;  %v12034_v41 = vld [vmem:[#allocation72_spill] sm:$0xff]  ;;  %v12037_v16 = vld [vmem:[#allocation75_spill] sm:$0xff] }
 0x92a   :  { %4217 = vrot.lane.b32.xlu0 %v3222_v23, %s7031_s0  ;;  %v4074_v23 = vsel %vm12009_vm1, %v9358_v3, 0.0  ;;  %vm12017_vm1 = vnez %v12016_v11  ;;  %12027 = vst [vmem:[#allocation73_spill] sm:$0xff] %v9529_v19  ;;  %v12031_v11 = vld [vmem:[#allocation71_spill] sm:$0xff]  ;;  %vm12035_vm9 = vnez %v12034_v41  ;;  %vm12038_vm2 = vnez %v12037_v16  ;;  %v3267_v19 = vpop.f32.mrb[114].mxu1  ;;  %v12070_v57 = vld [vmem:[#allocation82_spill] sm:$0xff] }
 0x92b   :  { %4219 = vrot.lane.b32.xlu1 %v3224_v44, %s7031_s0  ;;  %v9514_v44 = vsel %vm12017_vm1, %v9497_v49, %v4074_v23  ;;  %v5939_v23 = vpop.permute.xlu1 %5938  ;;  %vm12032_vm5 = vnez %v12031_v11  ;;  %v9544_v8 = vsel %vm12035_vm9, %v3265_v40, %v4073_v39  ;;  %v12045_v39 = vld [vmem:[#allocation76_spill] sm:$0xff]  ;;  %v12049_v16 = vld [vmem:[#allocation63_spill] sm:$0xff] }
 0x92c   :  { %12018 = vst [vmem:[#allocation20_spill] sm:$0xff] %v9514_v44  ;;  %v12028_v44 = vld [vmem:[#allocation74_spill] sm:$0xff]  ;;  %v4082_v4 = vsel %vm12032_vm5, %v3265_v40, 0.0  ;;  %v5976_v13 = vsel %vm12033_vm0, %v5937_v45, %v5939_v23  ;;  %12036 = vst [vmem:[#allocation71_spill] sm:$0xff] %v9544_v8  ;;  %vm12046_vm9 = vnez %v12045_v39  ;;  %vm12062_vm5 = vnez %v11843_v5 }
 0x92d   :  { %vm12029_vm1 = vnez %v12028_v44  ;;  %v9549_v52 = vsel %vm12038_vm2, %v9356_v0, %v4082_v4  ;;  %v12042_v45 = vld [vmem:[#allocation70_spill] sm:$0xff]  ;;  %vm12050_vm2 = vnez %v11837_v29  ;;  %v4250_v29 = vrot.slane %v9374_v2, %v11658_v28 }
 0x92e   :  { %v9534_v33 = vsel %vm12029_vm1, %v9358_v3, %v4081_v25  ;;  %12039 = vst [vmem:[#allocation130_spill] sm:$0xff] %v9549_v52  ;;  %v12040_v25 = vld [vmem:[#allocation69_spill] sm:$0xff]  ;;  %6038 = vrot.lane.b32.xlu0 %v9463_v12, %s7032_s1  ;;  %vm12043_vm0 = vnez %v12042_v45  ;;  %v12048_v0 = vld [vmem:[#allocation62_spill] sm:$0xff]  ;;  %v3268_v52 = vpop.f32.mrb[115].mxu1 }
 0x92f   :  { %12030 = vst [vmem:[#allocation74_spill] sm:$0xff] %v9534_v33  ;;  %vm12041_vm1 = vnez %v12040_v25  ;;  %v3308_v33 = vpop.f32.mrb[118].mxu0  ;;  %v9559_v41 = vsel %vm12043_vm0, %v9538_v38, %v4075_v46  ;;  %v9569_v4 = vsel %vm9456_vm14, %v5977_v58, %v12048_v0  ;;  %v5941_v46 = vpop.permute.xlu0 %5940  ;;  %v4310_v58 = vrot.slane %v9377_v54, %v11824_v18 }
 0x930   :  { %v4084_v3 = vsel %vm12041_vm1, %v9538_v38, 0.0  ;;  %12044 = vst [vmem:[#allocation69_spill] sm:$0xff] %v9559_v41  ;;  %v5987_v33 = vsel %vm9465_vm8, %v5976_v13, %v12049_v16  ;;  %v3309_v19 = vpop.f32.mrb[119].mxu0  ;;  %6040 = vrot.lane.b32.xlu1 %v9569_v4, %s7032_s1  ;;  %v4306_v52 = vrot.slane %v9377_v54, %v11823_v35  ;;  %vm12055_vm8 = vcmp.lt.s32.totalorder %v11988_v56, 127  ;;  %v5943_v16 = vpop.permute.xlu1 %5942 }
 0x931   :  { %v9564_v8 = vsel %vm12046_vm9, %v9395_v37, %v4084_v3  ;;  %v9578_v41 = vsel %vm12050_vm2, %v5987_v33, %v6009_v53  ;;  %vm9580_vm9 = vcmp.eq.s32.totalorder %v4294_v36, 1  ;;  %v12052_v37 = vmov 0  ;;  %vm12063_vm0 = vmmov %vm12055_vm8  ;;  %v3391_v5 = vpop.f32.mrb[120].mxu0 }
 0x932   :  { %12047 = vst [vmem:[#allocation70_spill] sm:$0xff] %v9564_v8  ;;  %12051 = vst [vmem:[#allocation76_spill] sm:$0xff] %v9578_v41  ;;  %v12053_v37 = vsel %vm9580_vm9, 4294967295, %v12052_v37  ;;  %v5975_v13 = vsel %vm12055_vm8, %v5939_v23, %v5941_v46  ;;  %vm9590_vm14 = vcmp.eq.s32.totalorder %v4298_v47, 1  ;;  %v12056_v3 = vmov 0  ;;  %6042 = vrot.lane.b32.xlu0 %v5987_v33, %s7032_s1  ;;  %v12064_v47 = vld [vmem:[#allocation81_spill] sm:$0xff] }
 0x933   :  { %12054 = vst [vmem:[#allocation62_spill] sm:$0xff] %v12053_v37  ;;  %v12057_v3 = vsel %vm9590_vm14, 4294967295, %v12056_v3  ;;  %vm9594_vm2 = vcmp.eq.s32.totalorder %v4302_v62, 1  ;;  %v12059_v53 = vmov 0  ;;  %v6010_v36 = vsel %vm12062_vm5, %v9569_v4, 0.0  ;;  %v12065_v62 = vld [vmem:[#allocation39_spill] sm:$0xff] }
 0x934   :  { %12058 = vst [vmem:[#allocation63_spill] sm:$0xff] %v12057_v3  ;;  %v12060_v53 = vsel %vm9594_vm2, 4294967295, %v12059_v53  ;;  %v5974_v54 = vsel %vm12063_vm0, %v5941_v46, %v5943_v16  ;;  %v5988_v23 = vsel %vm9469_vm11, %v5975_v13, %v12064_v47  ;;  %v12066_v0 = vand.u32 3, %v12065_v62  ;;  %v3350_v8 = vpop.f32.mrb[116].mxu1  ;;  %v6831_v13 = vld [vmem:[#allocation12 + $0x8] sm:$0xff]  ;;  %4223 = vrot.lane.b32.xlu1 %v3265_v40, %s7031_s0  ;;  %v5945_v47 = vpop.permute.xlu0 %5944 }
 0x935   :  { %12061 = vst [vmem:[#allocation131_spill] sm:$0xff] %v12060_v53  ;;  %v6011_v41 = vsel %vm11925_vm10, %v5987_v33, 0.0  ;;  %v9619_v46 = vsel %vm11927_vm3, %v5988_v23, %v6010_v36  ;;  %v9624_v10 = vsel %vm9473_vm4, %v5974_v54, %v12070_v57  ;;  %v6116_v62 = vadd.f32 %v9379_v26, %v3391_v5  ;;  %v3352_v33 = vpop.f32.mrb[117].mxu1  ;;  %v5947_v54 = vpop.permute.xlu1 %5946 }
 0x936   :  { %vm9611_vm8 = vcmp.eq.s32.totalorder %v12066_v0, 3  ;;  %12069 = vst [vmem:[#allocation81_spill] sm:$0xff] %v9619_v46  ;;  %v6114_v61 = vadd.f32 %v9379_v26, %v3350_v8  ;;  %v9632_v32 = vsel %vm11930_vm15, %v9624_v10, %v6011_v41  ;;  %vm9634_vm10 = vcmp.eq.s32.totalorder %v4310_v58, 1  ;;  %v3393_v0 = vpop.f32.mrb[121].mxu0  ;;  %vm12079_vm15 = vmmov %vm12063_vm0  ;;  %4221 = vrot.lane.b32.xlu0 %v9499_v15, %s7031_s0  ;;  %v12080_v46 = vld [vmem:[#allocation83_spill] sm:$0xff] }
 0x937   :  { %12071 = vst [vmem:[#allocation39_spill] sm:$0xff] %v9632_v32  ;;  %v12072_v36 = vmov 0  ;;  %vm9638_vm3 = vcmp.eq.s32.totalorder %v4306_v52, 1  ;;  %v12075_v57 = vmov 0  ;;  %v5973_v40 = vsel %vm12063_vm0, %v5943_v16, %v5945_v47  ;;  %v3354_v16 = vpop.f32.mrb[118].mxu1  ;;  %v3395_v5 = vpop.f32.mrb[122].mxu0 }
 0x938   :  { %v12073_v36 = vsel %vm9634_vm10, 4294967295, %v12072_v36  ;;  %v12076_v57 = vsel %vm9638_vm3, 4294967295, %v12075_v57  ;;  %v6115_v8 = vadd.f32 %v9379_v26, %v3352_v33  ;;  %vm12078_vm5 = vnez %v11851_v30  ;;  %v12085_v16 = vld [vmem:[#allocation84_spill] sm:$0xff]  ;;  %4227 = vrot.lane.b32.xlu1 %v9538_v38, %s7031_s0  ;;  %v5949_v19 = vpop.permute.xlu0 %5948 }
 0x939   :  { %12074 = vst [vmem:[#allocation82_spill] sm:$0xff] %v12073_v36  ;;  %12077 = vst [vmem:[#allocation132_spill] sm:$0xff] %v12076_v57  ;;  %v5996_v31 = vsel %vm12078_vm5, %v5988_v23, 0.0  ;;  %v4254_v41 = vrot.slane %v9374_v2, %v11663_v9  ;;  %6703 = vtanh.f32 %v6116_v62  ;;  %v5972_v58 = vsel %vm12079_vm15, %v5945_v47, %v5947_v54  ;;  %v3355_v47 = vpop.f32.mrb[119].mxu1  ;;  %v3396_v62 = vpop.f32.mrb[123].mxu0  ;;  %v12234_v36 = vld [vmem:[#allocation22_spill] sm:$0xff] }
 0x93a   :  { %v6117_v52 = vadd.f32 %v9379_v26, %v3393_v0  ;;  %v5990_v33 = vsel %vm9504_vm6, %v5973_v40, %v12080_v46  ;;  %vm12081_vm0 = vcmp.lt.s32.totalorder %v6831_v13, 15  ;;  %6705 = vtanh.f32 %v6114_v61  ;;  %v5951_v40 = vpop.permute.xlu1 %5950  ;;  %4225 = vrot.lane.b32.xlu0 %v9497_v49, %s7031_s0  ;;  %v3432_v5 = vpop.f32.mrb[120].mxu1  ;;  %v12097_v49 = vld [vmem:[#allocation58_spill] sm:$0xff] }
 0x93b   :  { %vm9660_vm5 = vmand %vm9611_vm8, %vm12081_vm0  ;;  %v5997_v15 = vsel %vm11929_vm12, %v9624_v10, 0.0  ;;  %v9669_v0 = vsel %vm11932_vm13, %v5990_v33, %v5996_v31  ;;  %v9674_v46 = vsel %vm9580_vm9, %v5972_v58, %v12085_v16  ;;  %6707 = vtanh.f32 %v6115_v8  ;;  %v12090_v58 = vld [vmem:[#allocation60_spill] sm:$0xff]  ;;  %v3434_v16 = vpop.f32.mrb[121].mxu1 }
 0x93c   :  { %12084 = vst [vmem:[#allocation83_spill] sm:$0xff] %v9669_v0  ;;  %v9681_v13 = vsel %vm11934_vm7, %v9674_v46, %v5997_v15  ;;  %6709 = vtanh.f32 %v6117_v52  ;;  %vm12087_vm12 = vmmov %vm12079_vm15  ;;  %v4266_v38 = vrot.slane %v9374_v2, %v12003_v7  ;;  %v9694_v22 = vsel %vm9660_vm5, 1, %v11637_v43  ;;  %v3473_v52 = vpop.f32.mrb[124].mxu0  ;;  %6044 = vrot.lane.b32.xlu1 %v5988_v23, %s7032_s1  ;;  %v5953_v62 = vpop.permute.xlu0 %5952 }
 0x93d   :  { %12086 = vst [vmem:[#allocation84_spill] sm:$0xff] %v9681_v13  ;;  %v5971_v61 = vsel %vm12087_vm12, %v5947_v54, %v5949_v19  ;;  %vm12088_vm7 = vmmov %vm12087_vm12  ;;  %vm12089_vm13 = vnez %v11871_v48  ;;  %vm9707_vm8 = vcmp.eq.s32.totalorder %v4250_v29, 1  ;;  %v12091_v2 = vmov 0 }
 0x93e   :  { %v5970_v8 = vsel %vm12088_vm7, %v5949_v19, %v5951_v40  ;;  %v5998_v31 = vsel %vm12089_vm13, %v5990_v33, 0.0  ;;  %v9705_v54 = vsel %vm9590_vm14, %v5971_v61, %v12090_v58  ;;  %v12092_v2 = vsel %vm9707_vm8, 4294967295, %v12091_v2  ;;  %6046 = vrot.lane.b32.xlu0 %v9624_v10, %s7032_s1 }
 0x93f   :  { %12093 = vst [vmem:[#allocation60_spill] sm:$0xff] %v12092_v2  ;;  %vm12094_vm15 = vnez %v11875_v24  ;;  %vm12095_vm0 = vnez %v11879_v63  ;;  %v9722_v47 = vsel %vm9594_vm2, %v5970_v8, %v12097_v49  ;;  %vm9724_vm5 = vcmp.eq.s32.totalorder %v4254_v41, 1  ;;  %v5955_v8 = vpop.permute.xlu1 %5954 }
 0x940   :  { %v5999_v30 = vsel %vm12094_vm15, %v9674_v46, 0.0  ;;  %v9717_v48 = vsel %vm12095_vm0, %v9705_v54, %v5998_v31  ;;  %v12098_v29 = vmov 0  ;;  %v6120_v24 = vadd.f32 %v9379_v26, %v3473_v52  ;;  %6048 = vrot.lane.b32.xlu1 %v5990_v33, %s7032_s1  ;;  %v12125_v33 = vld [vmem:[#allocation85_spill] sm:$0xff] }
 0x941   :  { %12096 = vst [vmem:[#allocation133_spill] sm:$0xff] %v9717_v48  ;;  %v12099_v29 = vsel %vm9724_vm5, 4294967295, %v12098_v29  ;;  %v6118_v15 = vadd.f32 %v9379_v26, %v3432_v5  ;;  %vm12101_vm12 = vnez %v11891_v20  ;;  %vm9736_vm7 = vcmp.eq.s32.totalorder %v4258_v50, 1  ;;  %v3475_v20 = vpop.f32.mrb[125].mxu0  ;;  %v12138_v48 = vld [vmem:[#allocation86_spill] sm:$0xff] }
 0x942   :  { %12100 = vst [vmem:[#allocation58_spill] sm:$0xff] %v12099_v29  ;;  %v9734_v63 = vsel %vm12101_vm12, %v9722_v47, %v5999_v30  ;;  %v12103_v19 = vmov 0  ;;  %vm9740_vm13 = vcmp.eq.s32.totalorder %v4262_v34, 1  ;;  %v12106_v41 = vmov 0  ;;  %v3477_v5 = vpop.f32.mrb[126].mxu0  ;;  %v12115_v30 = vld [vmem:[#allocation59_spill] sm:$0xff]  ;;  %6050 = vrot.lane.b32.xlu0 %v9674_v46, %s7032_s1 }
 0x943   :  { %12102 = vst [vmem:[#allocation134_spill] sm:$0xff] %v9734_v63  ;;  %v12104_v19 = vsel %vm9736_vm7, 4294967295, %v12103_v19  ;;  %v12107_v41 = vsel %vm9740_vm13, 4294967295, %v12106_v41  ;;  %v4977_v23 = vrot.slane %v9694_v22, %v11987_v51  ;;  %vm12109_vm15 = vcmp.lt.s32.totalorder %v11988_v56, 127  ;;  %v3478_v49 = vpop.f32.mrb[127].mxu0  ;;  %v12133_v46 = vld [vmem:[#allocation96_spill] sm:$0xff] }
 0x944   :  { %12105 = vst [vmem:[#allocation135_spill] sm:$0xff] %v12104_v19  ;;  %12108 = vst [vmem:[#allocation136_spill] sm:$0xff] %v12107_v41  ;;  %v5969_v61 = vsel %vm12109_vm15, %v5951_v40, %v5953_v62  ;;  %v6119_v31 = vadd.f32 %v9379_v26, %v3434_v16  ;;  %vm12110_vm0 = vnez %v11877_v55  ;;  %vm9752_vm12 = vcmp.eq.s32.totalorder %v4266_v38, 1  ;;  %v3436_v40 = vpop.f32.mrb[122].mxu1  ;;  %6052 = vrot.lane.b32.xlu1 %v9705_v54, %s7032_s1  ;;  %v12209_v41 = vld [vmem:[#allocation32_spill] sm:$0xff] }
 0x945   :  { %v6000_v50 = vsel %vm12110_vm0, %v9705_v54, 0.0  ;;  %v12111_v58 = vmov 0  ;;  %6711 = vtanh.f32 %v6120_v24  ;;  %vm12114_vm2 = vmmov %vm12109_vm15  ;;  %v6121_v52 = vadd.f32 %v9379_v26, %v3475_v20  ;;  %v3437_v38 = vpop.f32.mrb[123].mxu1  ;;  %v6704_v20 = vpop.eup %6703 }
 0x946   :  { %v12112_v58 = vsel %vm9752_vm12, 4294967295, %v12111_v58  ;;  %v5968_v34 = vsel %vm12114_vm2, %v5953_v62, %v5955_v8  ;;  %v9764_v55 = vsel %vm9638_vm3, %v5969_v61, %v12115_v30  ;;  %6713 = vtanh.f32 %v6118_v15  ;;  %v12117_v62 = vld [vmem:[#allocation77_spill] sm:$0xff]  ;;  %v5957_v15 = vpop.permute.xlu0 %5956  ;;  %6054 = vrot.lane.b32.xlu0 %v9722_v47, %s7032_s1 }
 0x947   :  { %12113 = vst [vmem:[#allocation137_spill] sm:$0xff] %v12112_v58  ;;  %vm12116_vm15 = vnez %v11889_v17  ;;  %v9772_v16 = vsel %vm9634_vm10, %v5968_v34, %v12117_v62  ;;  %vm12118_vm2 = vnez %v11884_v21  ;;  %6715 = vtanh.f32 %v6119_v31  ;;  %v6706_v21 = vpop.eup %6705  ;;  %v3555_v62 = vpop.f32.mrb[128].mxu0 }
 0x948   :  { %v6001_v24 = vsel %vm12116_vm15, %v9722_v47, 0.0  ;;  %v9777_v10 = vsel %vm12118_vm2, %v9764_v55, %v6000_v50  ;;  %vm12120_vm0 = vnez %v11893_v14  ;;  %vm9785_vm15 = vcmp.eq.s32.totalorder %v4977_v23, 1  ;;  %v5959_v50 = vpop.permute.xlu1 %5958  ;;  %v6708_v23 = vpop.eup %6707  ;;  %v12132_v14 = vld [vmem:[#allocation78_spill] sm:$0xff] }
 0x949   :  { %12119 = vst [vmem:[#allocation59_spill] sm:$0xff] %v9777_v10  ;;  %v9783_v17 = vsel %vm12120_vm0, %v9772_v16, %v6001_v24  ;;  %6717 = vtanh.f32 %v6121_v52  ;;  %vm12124_vm2 = vcmp.lt.s32.totalorder %v11988_v56, 127  ;;  %v12126_v40 = vand.u32 3, %v12125_v33  ;;  %v12130_v52 = vld [vmem:[#allocation80_spill] sm:$0xff]  ;;  %v6710_v49 = vpop.eup %6709  ;;  %v12135_v10 = vld [vmem:[#allocation97_spill] sm:$0xff]  ;;  %v3557_v54 = vpop.f32.mrb[129].mxu0 }
 0x94a   :  { %12121 = vst [vmem:[#allocation77_spill] sm:$0xff] %v9783_v17  ;;  %v5967_v31 = vsel %vm12124_vm2, %v5955_v8, %v5957_v15  ;;  %vm12129_vm0 = vmmov %vm12124_vm2  ;;  %vm12131_vm2 = vnez %v11881_v6  ;;  %v6306_v24 = vcombine.low %v6706_v21, %v6708_v23  ;;  %v6307_v6 = vcombine.low %v6704_v20, %v6710_v49 }
 0x94b   :  { %vm9795_vm10 = vcmp.eq.s32.totalorder %v12126_v40, 3  ;;  %v5966_v30 = vsel %vm12129_vm0, %v5957_v15, %v5959_v50  ;;  %v5980_v8 = vsel %vm9707_vm8, %v5967_v31, %v12130_v52  ;;  %v6002_v38 = vsel %vm12131_vm2, %v9764_v55, 0.0  ;;  %v3514_v40 = vpop.f32.mrb[124].mxu1  ;;  %v5961_v52 = vpop.permute.xlu0 %5960 }
 0x94c   :  { %v5981_v15 = vsel %vm9724_vm5, %v5966_v30, %v12132_v14  ;;  %vm12134_vm0 = vnez %v12133_v46  ;;  %vm12136_vm8 = vnez %v12135_v10  ;;  %v6124_v21 = vadd.f32 %v9379_v26, %v3555_v62  ;;  %v3516_v63 = vpop.f32.mrb[125].mxu1  ;;  %6370 = vst [vmem:[%s11162_s15] sm:$0x77] %v6306_v24  ;;  %v5963_v20 = vpop.permute.xlu1 %5962  ;;  %v12143_v62 = vld [vmem:[#allocation98_spill] sm:$0xff]  ;;  %6371 = vst [vmem:[%s11162_s15 + $0x8] sm:$0x77] %v6307_v6  ;;  %6028 = vrot.lane.b32.xlu1 %v5980_v8, %s7032_s1 }
 0x94d   :  { %v6003_v34 = vsel %vm12134_vm0, %v9772_v16, 0.0  ;;  %v9820_v31 = vsel %vm12136_vm8, %v5980_v8, %v6002_v38  ;;  %v6122_v23 = vadd.f32 %v9379_v26, %v3514_v40  ;;  %vm12139_vm2 = vnez %v12138_v48  ;;  %v12141_v38 = vld [vmem:[#allocation87_spill] sm:$0xff]  ;;  %v3518_v46 = vpop.f32.mrb[126].mxu1  ;;  %6030 = vrot.lane.b32.xlu0 %v5981_v15, %s7032_s1 }
 0x94e   :  { %12137 = vst [vmem:[#allocation85_spill] sm:$0xff] %v9820_v31  ;;  %v6004_v14 = vsel %vm12139_vm2, %v5980_v8, 0.0  ;;  %vm12140_vm8 = vcmp.lt.s32.totalorder %v11988_v56, 127  ;;  %v6123_v30 = vadd.f32 %v9379_v26, %v3516_v63  ;;  %vm12142_vm0 = vnez %v12141_v38  ;;  %v3519_v38 = vpop.f32.mrb[127].mxu1  ;;  %v12151_v31 = vld [vmem:[#allocation64_spill] sm:$0xff] }
 0x94f   :  { %v5965_v10 = vsel %vm12140_vm8, %v5959_v50, %v5961_v52  ;;  %v6005_v49 = vsel %vm12142_vm0, %v5981_v15, 0.0  ;;  %vm12144_vm3 = vnez %v12143_v62  ;;  %6719 = vtanh.f32 %v6124_v21  ;;  %vm12146_vm2 = vmmov %vm12140_vm8  ;;  %v12147_v50 = vld [vmem:[#allocation125_spill] sm:$0xff]  ;;  %v12149_v62 = vld [vmem:[#allocation79_spill] sm:$0xff]  ;;  %v9861_v47 = vpop.permute.xlu0 %4884 }
 0x950   :  { %v9838_v40 = vsel %vm12144_vm3, %v5981_v15, %v6003_v34  ;;  %v5964_v48 = vsel %vm12146_vm2, %v5961_v52, %v5963_v20  ;;  %vm12148_vm8 = vmmov %vm12146_vm2  ;;  %v6125_v24 = vadd.f32 %v9379_v26, %v3557_v54  ;;  %v3559_v34 = vpop.f32.mrb[130].mxu0  ;;  %6721 = vtanh.f32 %v6122_v23  ;;  %v6712_v54 = vpop.eup %6711  ;;  %v12152_v23 = vld [vmem:[#allocation92_spill] sm:$0xff] }
 0x951   :  { %12145 = vst [vmem:[#allocation80_spill] sm:$0xff] %v9838_v40  ;;  %v5979_v63 = vsel %vm12148_vm8, %v5963_v20, %v12147_v50  ;;  %v5982_v6 = vsel %vm9736_vm7, %v5965_v10, %v12149_v62  ;;  %v3560_v21 = vpop.f32.mrb[131].mxu0  ;;  %v12150_v40 = vld [vmem:[#allocation48_spill] sm:$0xff]  ;;  %6723 = vtanh.f32 %v6123_v30  ;;  %vm12153_vm3 = vnez %v12152_v23  ;;  %v12157_v34 = vld [vmem:[#allocation93_spill] sm:$0xff]  ;;  %v4887_v38 = vpop.permute.xlu1 %4886 }
 0x952   :  { %v5983_v52 = vsel %vm9740_vm13, %v5964_v48, %v12150_v40  ;;  %v5984_v20 = vsel %vm9752_vm12, %v5979_v63, %v12151_v31  ;;  %v6006_v50 = vsel %vm12153_vm3, %v5982_v6, 0.0  ;;  %v12154_v46 = vld [vmem:[#allocation88_spill] sm:$0xff]  ;;  %vm12158_vm2 = vnez %v12157_v34  ;;  %v6714_v48 = vpop.eup %6713  ;;  %v12159_v31 = vld [vmem:[#allocation89_spill] sm:$0xff]  ;;  %6032 = vrot.lane.b32.xlu1 %v5982_v6, %s7032_s1 }
 0x953   :  { %vm12155_vm0 = vnez %v12154_v46  ;;  %v6007_v40 = vsel %vm12158_vm2, %v5983_v52, 0.0  ;;  %6725 = vtanh.f32 %v6125_v24  ;;  %vm12160_vm8 = vnez %v12159_v31  ;;  %v12162_v8 = vld [vmem:[#allocation28_spill] sm:$0xff]  ;;  %v12164_v62 = vld [vmem:[#allocation29_spill] sm:$0xff]  ;;  %v6716_v23 = vpop.eup %6715  ;;  %6034 = vrot.lane.b32.xlu0 %v5983_v52, %s7032_s1 }
 0x954   :  { %v9867_v10 = vsel %vm12155_vm0, %v5982_v6, %v6004_v14  ;;  %v9873_v30 = vsel %vm12160_vm8, %v5983_v52, %v6005_v49  ;;  %vm12163_vm13 = vnez %v12162_v8  ;;  %vm12165_vm7 = vnez %v12164_v62  ;;  %v12175_v46 = vld [vmem:[#allocation37_spill] sm:$0xff]  ;;  %v6718_v15 = vpop.eup %6717  ;;  %v3637_v8 = vpop.f32.mrb[132].mxu0 }
 0x955   :  { %12156 = vst [vmem:[#allocation78_spill] sm:$0xff] %v9867_v10  ;;  %12161 = vst [vmem:[#allocation96_spill] sm:$0xff] %v9873_v30  ;;  %v6008_v63 = vsel %vm12163_vm13, %v5984_v20, 0.0  ;;  %v9879_v21 = vsel %vm12165_vm7, %v5984_v20, %v6006_v50  ;;  %vm12167_vm3 = vcmp.lt.s32.totalorder %v11988_v56, 124  ;;  %vm12169_vm0 = vcmp.lt.s32.totalorder %v12125_v33, 15  ;;  %v12178_v33 = vld [vmem:[#allocation38_spill] sm:$0xff] }
 0x956   :  { %12166 = vst [vmem:[#allocation97_spill] sm:$0xff] %v9879_v21  ;;  %v9884_v14 = vsel %vm12167_vm3, %v9861_v47, %v4887_v38  ;;  %vm9891_vm2 = vmand %vm9795_vm10, %vm12169_vm0  ;;  %v12172_v24 = vrot.slane %v9694_v22, %v11647_v60  ;;  %v12173_v50 = vmov 0  ;;  %vm12176_vm13 = vnez %v12175_v46  ;;  %v3596_v62 = vpop.f32.mrb[128].mxu1  ;;  %6036 = vrot.lane.b32.xlu1 %v5984_v20, %s7032_s1  ;;  %v12236_v10 = vld [vmem:[#allocation41_spill] sm:$0xff] }
 0x957   :  { %12168 = vst [vmem:[#allocation86_spill] sm:$0xff] %v9884_v14  ;;  %v9905_v34 = vsel %vm12176_vm13, %v9463_v12, %v6007_v40  ;;  %vm12179_vm8 = vnez %v12178_v33  ;;  %v6308_v31 = vcombine.low %v6714_v48, %v6716_v23  ;;  %v12182_v30 = vrot.slane %v9694_v22, %v12003_v7  ;;  %v12185_v40 = vld [vmem:[#allocation36_spill] sm:$0xff]  ;;  %v4889_v48 = vpop.permute.xlu0 %4888  ;;  %v3598_v33 = vpop.f32.mrb[129].mxu1  ;;  %vm12187_vm0 = vmmov %vm12167_vm3 }
 0x958   :  { %vm9898_vm7 = vcmp.eq.s32.totalorder %v12172_v24, 1  ;;  %12177 = vst [vmem:[#allocation87_spill] sm:$0xff] %v9905_v34  ;;  %v9910_v5 = vsel %vm12179_vm8, %v9569_v4, %v6008_v63  ;;  %v12183_v12 = vmov 0  ;;  %v4989_v4 = vrot.slane %v9694_v22, %v12185_v40  ;;  %vm12195_vm8 = vmmov %vm12187_vm0 }
 0x959   :  { %v12174_v50 = vsel %vm9898_vm7, 4294967295, %v12173_v50  ;;  %12180 = vst [vmem:[#allocation98_spill] sm:$0xff] %v9910_v5  ;;  %vm9919_vm10 = vcmp.eq.s32.totalorder %v12182_v30, 1  ;;  %v6309_v63 = vcombine.low %v6712_v54, %v6718_v15  ;;  %v6128_v23 = vadd.f32 %v9379_v26, %v3637_v8  ;;  %6372 = vst [vmem:[%s11162_s15 + $0x10] sm:$0x77] %v6308_v31  ;;  %v4891_v54 = vpop.permute.xlu1 %4890  ;;  %v3639_v15 = vpop.f32.mrb[133].mxu0 }
 0x95a   :  { %v12184_v12 = vsel %vm9919_vm10, 4294967295, %v12183_v12  ;;  %v6126_v46 = vadd.f32 %v9379_v26, %v3596_v62  ;;  %v4993_v24 = vrot.slane %v9694_v22, %v11823_v35  ;;  %v9935_v30 = vsel %vm12167_vm3, %v4887_v38, %v4889_v48  ;;  %v3600_v62 = vpop.f32.mrb[130].mxu1  ;;  %vm12197_vm3 = vmmov %vm12187_vm0 }
 0x95b   :  { %12186 = vst [vmem:[#allocation125_spill] sm:$0xff] %v9935_v30  ;;  %v6127_v6 = vadd.f32 %v9379_v26, %v3598_v33  ;;  %v9941_v8 = vsel %vm9891_vm2, 1, %v11637_v43  ;;  %6373 = vst [vmem:[%s11162_s15 + $0x18] sm:$0x77] %v6309_v63  ;;  %6727 = vtanh.f32 %v6128_v23  ;;  %v9948_v31 = vsel %vm12187_vm0, %v4889_v48, %v4891_v54  ;;  %v3641_v33 = vpop.f32.mrb[134].mxu0  ;;  %v3601_v49 = vpop.f32.mrb[131].mxu1 }
 0x95c   :  { %12188 = vst [vmem:[#allocation79_spill] sm:$0xff] %v9948_v31  ;;  %v6129_v38 = vadd.f32 %v9379_v26, %v3639_v15  ;;  %6729 = vtanh.f32 %v6126_v46  ;;  %v3642_v34 = vpop.f32.mrb[135].mxu0  ;;  %vm9960_vm2 = vcmp.eq.s32.totalorder %v4989_v4, 1  ;;  %v12191_v23 = vmov 0  ;;  %v6720_v15 = vpop.eup %6719  ;;  %vm12207_vm12 = vmmov %vm12197_vm3 }
 0x95d   :  { %v12192_v23 = vsel %vm9960_vm2, 4294967295, %v12191_v23  ;;  %v4997_v52 = vrot.slane %v9694_v22, %v11824_v18  ;;  %6731 = vtanh.f32 %v6127_v6  ;;  %v4893_v62 = vpop.permute.xlu0 %4892  ;;  %v4937_v34 = vrot.slane %v9941_v8, %v11658_v28  ;;  %v6722_v33 = vpop.eup %6721 }
 0x95e   :  { %vm9969_vm13 = vcmp.eq.s32.totalorder %v4993_v24, 1  ;;  %v12193_v46 = vmov 0  ;;  %6733 = vtanh.f32 %v6129_v38  ;;  %v9975_v4 = vsel %vm12195_vm8, %v4891_v54, %v4893_v62  ;;  %v4895_v49 = vpop.permute.xlu1 %4894  ;;  %v6724_v48 = vpop.eup %6723 }
 0x95f   :  { %v12194_v46 = vsel %vm9969_vm13, 4294967295, %v12193_v46  ;;  %12196 = vst [vmem:[#allocation48_spill] sm:$0xff] %v9975_v4  ;;  %v9979_v6 = vsel %vm12197_vm3, %v4893_v62, %v4895_v49  ;;  %v6726_v43 = vpop.eup %6725  ;;  %v6310_v21 = vcombine.low %v6722_v33, %v6724_v48  ;;  %v9985_v17 = vpop.f32.mrb[132].mxu1  ;;  %v4941_v54 = vrot.slane %v9941_v8, %v11663_v9 }
 0x960   :  { %12198 = vst [vmem:[#allocation64_spill] sm:$0xff] %v9979_v6  ;;  %v9987_v38 = vpop.f32.mrb[136].mxu0  ;;  %vm9995_vm0 = vcmp.eq.s32.totalorder %v4997_v52, 1  ;;  %v12201_v31 = vmov 0  ;;  %v6311_v13 = vcombine.low %v6720_v15, %v6726_v43  ;;  %5393 = vrot.lane.b32.xlu0 %v9985_v17, %s7031_s0  ;;  %v10001_v48 = vpop.f32.mrb[133].mxu1  ;;  %vm10003_vm8 = vcmp.eq.s32.totalorder %v4937_v34, 1 }
 0x961   :  { %v12202_v31 = vsel %vm9995_vm0, 4294967295, %v12201_v31  ;;  %v4897_v24 = vpop.permute.xlu0 %4896  ;;  %v12203_v33 = vmov 0  ;;  %6374 = vst [vmem:[%s11162_s15 + $0x20] sm:$0x77] %v6310_v21  ;;  %5395 = vrot.lane.b32.xlu1 %v10001_v48, %s7031_s0  ;;  %v3689_v43 = vpop.f32.mrb[134].mxu1  ;;  %v12215_v30 = vmov 0  ;;  %vm12237_vm4 = vnez %v12236_v10 }
 0x962   :  { %v12204_v33 = vsel %vm10003_vm8, 4294967295, %v12203_v33  ;;  %v10012_v52 = vsel %vm12197_vm3, %v4895_v49, %v4897_v24  ;;  %v4899_v62 = vpop.permute.xlu1 %4898  ;;  %6375 = vst [vmem:[%s11162_s15 + $0x28] sm:$0x77] %v6311_v13  ;;  %v10023_v34 = vpop.f32.mrb[137].mxu0  ;;  %vm10033_vm3 = vcmp.eq.s32.totalorder %v4941_v54, 1  ;;  %v12210_v13 = vmov 0 }
 0x963   :  { %12205 = vst [vmem:[#allocation92_spill] sm:$0xff] %v12204_v33  ;;  %12206 = vst [vmem:[#allocation88_spill] sm:$0xff] %v10012_v52  ;;  %v10021_v15 = vsel %vm12207_vm12, %v4897_v24, %v4899_v62  ;;  %v3690_v21 = vpop.f32.mrb[135].mxu1  ;;  %v3730_v4 = vpop.f32.mrb[138].mxu0  ;;  %v12211_v13 = vsel %vm10033_vm3, 4294967295, %v12210_v13  ;;  %v4953_v49 = vrot.slane %v9941_v8, %v12003_v7  ;;  %vm12220_vm14 = vcmp.lt.s32.totalorder %v11988_v56, 124 }
 0x964   :  { %12212 = vst [vmem:[#allocation93_spill] sm:$0xff] %v12211_v13  ;;  %5397 = vrot.lane.b32.xlu0 %v9987_v38, %s7031_s0  ;;  %v3731_v21 = vpop.f32.mrb[139].mxu0  ;;  %v10058_v58 = vpop.f32.mrb[136].mxu1  ;;  %v12226_v14 = vmov 0  ;;  %v12246_v10 = vld [vmem:[#allocation54_spill] sm:$0xff]  ;;  %v12256_v52 = vld [vmem:[#allocation44_spill] sm:$0xff] }
 0x965   :  { %v6728_v24 = vpop.eup %6727  ;;  %v10037_v19 = vpop.permute.xlu0 %4900  ;;  %5399 = vrot.lane.b32.xlu1 %v10023_v34, %s7031_s0 }
 0x966   :  { %v6730_v4 = vpop.eup %6729  ;;  %v10046_v20 = vsel %vm12207_vm12, %v4899_v62, %v10037_v19  ;;  %v10048_v54 = vpop.permute.xlu1 %4902  ;;  %v4957_v62 = vrot.slane %v9941_v8, %v12185_v40  ;;  %vm10068_vm12 = vcmp.eq.s32.totalorder %v4953_v49, 1 }
 0x967   :  { %12213 = vst [vmem:[#allocation89_spill] sm:$0xff] %v10046_v20  ;;  %v6732_v43 = vpop.eup %6731  ;;  %v10056_v7 = vpop.f32.mrb[140].mxu0  ;;  %v12216_v30 = vsel %vm10068_vm12, 4294967295, %v12215_v30 }
 0x968   :  { %v6734_v63 = vpop.eup %6733  ;;  %v6312_v6 = vcombine.low %v6730_v4, %v6732_v43  ;;  %v10064_v5 = vpop.f32.mrb[141].mxu0  ;;  %5401 = vrot.lane.b32.xlu0 %v10058_v58, %s7031_s0  ;;  %12217 = vst [vmem:[#allocation28_spill] sm:$0xff] %v12216_v30  ;;  %v12218_v4 = vld [vmem:[#allocation21_spill] sm:$0xff] }
 0x969   :  { %v6313_v2 = vcombine.low %v6728_v24, %v6734_v63  ;;  %v10062_v29 = vpop.permute.xlu0 %4904  ;;  %vm12219_vm5 = vnez %v12218_v4  ;;  %v10078_v63 = vpop.f32.mrb[137].mxu1  ;;  %v12222_v24 = vld [vmem:[#allocation45_spill] sm:$0xff] }
 0x96a   :  { %6376 = vst [vmem:[%s11162_s15 + $0x30] sm:$0x77] %v6312_v6  ;;  %v4907_v43 = vpop.permute.xlu1 %4906  ;;  %v5364_v40 = vsel %vm12219_vm5, %v10064_v5, 0.0  ;;  %vm12223_vm9 = vnez %v12222_v24  ;;  %5403 = vrot.lane.b32.xlu1 %v10078_v63, %s7031_s0  ;;  %v3771_v4 = vpop.f32.mrb[138].mxu1  ;;  %vm10099_vm5 = vcmp.eq.s32.totalorder %v4957_v62, 1  ;;  %v12230_v62 = vld [vmem:[#allocation40_spill] sm:$0xff] }
 0x96b   :  { %6377 = vst [vmem:[%s11162_s15 + $0x38] sm:$0x77] %v6313_v2  ;;  %v10086_v49 = vsel %vm12220_vm14, %v10062_v29, %v4907_v43  ;;  %v10091_v6 = vsel %vm12223_vm9, %v9985_v17, %v5364_v40  ;;  %v3812_v21 = vpop.f32.mrb[142].mxu0  ;;  %v3772_v0 = vpop.f32.mrb[139].mxu1  ;;  %v12227_v14 = vsel %vm10099_vm5, 4294967295, %v12226_v14  ;;  %v4973_v40 = vrot.slane %v9694_v22, %v11663_v9 }
 0x96c   :  { %12221 = vst [vmem:[#allocation29_spill] sm:$0xff] %v10086_v49  ;;  %12224 = vst [vmem:[#allocation37_spill] sm:$0xff] %v10091_v6  ;;  %v3813_v32 = vpop.f32.mrb[143].mxu0  ;;  %5405 = vrot.lane.b32.xlu0 %v10056_v7, %s7031_s0  ;;  %vm12231_vm9 = vnez %v12230_v62  ;;  %v10125_v6 = vpop.f32.mrb[140].mxu1  ;;  %v5375_v49 = vsel %vm12237_vm4, %v9987_v38, 0.0  ;;  %v12238_v21 = vld [vmem:[#allocation46_spill] sm:$0xff]  ;;  %vm12247_vm4 = vnez %v12246_v10 }
 0x96d   :  { %v10105_v24 = vpop.permute.xlu0 %4908  ;;  %v5374_v4 = vsel %vm12231_vm9, %v10001_v48, 0.0  ;;  %v3890_v2 = vpop.f32.mrb[144].mxu0  ;;  %vm10127_vm6 = vcmp.eq.s32.totalorder %v4973_v40, 1  ;;  %vm12239_vm11 = vnez %v12238_v21  ;;  %v12249_v21 = vld [vmem:[#allocation43_spill] sm:$0xff]  ;;  %v12258_v10 = vld [vmem:[#allocation53_spill] sm:$0xff] }
 0x96e   :  { %v10112_v32 = vsel %vm12220_vm14, %v4907_v43, %v10105_v24  ;;  %v10114_v0 = vpop.permute.xlu1 %4910  ;;  %5407 = vrot.lane.b32.xlu1 %v10064_v5, %s7031_s0  ;;  %vm12235_vm14 = vnez %v12234_v36  ;;  %v10141_v62 = vsel %vm12239_vm11, %v3890_v2, %v5374_v4  ;;  %v3892_v53 = vpop.f32.mrb[145].mxu0  ;;  %v12243_v36 = vld [vmem:[#allocation42_spill] sm:$0xff]  ;;  %vm12250_vm11 = vnez %v12249_v21 }
 0x96f   :  { %12228 = vst [vmem:[#allocation38_spill] sm:$0xff] %v10112_v32  ;;  %v5373_v57 = vsel %vm12235_vm14, %v9985_v17, 0.0  ;;  %12240 = vst [vmem:[#allocation36_spill] sm:$0xff] %v10141_v62  ;;  %v12241_v32 = vld [vmem:[#allocation23_spill] sm:$0xff]  ;;  %vm12244_vm14 = vnez %v12243_v36  ;;  %v5368_v4 = vsel %vm12250_vm11, %v3892_v53, 0.0  ;;  %v3851_v42 = vpop.f32.mrb[141].mxu1 }
 0x970   :  { %vm12242_vm9 = vnez %v12241_v32  ;;  %5409 = vrot.lane.b32.xlu0 %v10125_v6, %s7031_s0  ;;  %v5367_v17 = vsel %vm12244_vm14, %v3890_v2, 0.0  ;;  %v12251_v62 = vld [vmem:[#allocation47_spill] sm:$0xff]  ;;  %vm12257_vm14 = vnez %v12256_v52 }
 0x971   :  { %v10137_v9 = vpop.permute.xlu0 %4912  ;;  %v5365_v40 = vsel %vm12242_vm9, %v10125_v6, 0.0  ;;  %vm12252_vm5 = vnez %v12251_v62  ;;  %vm12254_vm9 = vcmp.lt.s32.totalorder %v11988_v56, 124  ;;  %v5366_v20 = vsel %vm12257_vm14, %v3851_v42, 0.0  ;;  %v3894_v62 = vpop.f32.mrb[146].mxu0 }
 0x972   :  { %v10150_v3 = vpop.permute.xlu1 %4914  ;;  %v10155_v37 = vsel %vm12247_vm4, %v10001_v48, %v5365_v40  ;;  %v10161_v32 = vsel %vm12252_vm5, %v3892_v53, %v5375_v49  ;;  %vm12259_vm4 = vnez %v12258_v10  ;;  %5411 = vrot.lane.b32.xlu1 %v3851_v42, %s7031_s0  ;;  %v3853_v40 = vpop.f32.mrb[142].mxu1  ;;  %v12268_v10 = vld [vmem:[#allocation56_spill] sm:$0xff] }
 0x973   :  { %12245 = vst [vmem:[#allocation32_spill] sm:$0xff] %v10150_v3  ;;  %12248 = vst [vmem:[#allocation21_spill] sm:$0xff] %v10155_v37  ;;  %v10167_v36 = vsel %vm12254_vm9, %v10150_v3, %v9861_v47  ;;  %v10173_v48 = vsel %vm12259_vm4, %v3851_v42, %v5373_v57  ;;  %v3854_v49 = vpop.f32.mrb[143].mxu1  ;;  %v3895_v21 = vpop.f32.mrb[147].mxu0  ;;  %v12262_v47 = vld [vmem:[#allocation57_spill] sm:$0xff]  ;;  %v12265_v57 = vld [vmem:[#allocation55_spill] sm:$0xff]  ;;  %vm12269_vm9 = vnez %v12268_v10 }
 0x974   :  { %12253 = vst [vmem:[#allocation45_spill] sm:$0xff] %v10161_v32  ;;  %12255 = vst [vmem:[#allocation40_spill] sm:$0xff] %v10167_v36  ;;  %vm12263_vm5 = vnez %v12262_v47  ;;  %5413 = vrot.lane.b32.xlu0 %v3890_v2, %s7031_s0  ;;  %vm12266_vm11 = vnez %v12265_v57  ;;  %v10194_v40 = vsel %vm12269_vm9, %v10058_v58, %v5368_v4  ;;  %v12271_v49 = vld [vmem:[#allocation49_spill] sm:$0xff]  ;;  %vm12273_vm4 = vcmp.lt.s32.totalorder %v11988_v56, 124  ;;  %v12275_v2 = vld [vmem:[#allocation51_spill] sm:$0xff]  ;;  %v3931_v10 = vpop.f32.mrb[144].mxu1 }
 0x975   :  { %12260 = vst [vmem:[#allocation22_spill] sm:$0xff] %v10173_v48  ;;  %v10183_v52 = vsel %vm12263_vm5, %v9987_v38, %v5366_v20  ;;  %v5823_v3 = vpop.permute.xlu0 %5822  ;;  %v10189_v42 = vsel %vm12266_vm11, %v10023_v34, %v5367_v17  ;;  %12270 = vst [vmem:[#allocation23_spill] sm:$0xff] %v10194_v40  ;;  %vm12272_vm14 = vnez %v12271_v49  ;;  %vm12276_vm5 = vnez %v12275_v2  ;;  %v12277_v4 = vld [vmem:[#allocation50_spill] sm:$0xff]  ;;  %v12279_v47 = vld [vmem:[#allocation52_spill] sm:$0xff] }
 0x976   :  { %12264 = vst [vmem:[#allocation41_spill] sm:$0xff] %v10183_v52  ;;  %12267 = vst [vmem:[#allocation46_spill] sm:$0xff] %v10189_v42  ;;  %v10196_v62 = vpop.permute.xlu1 %5820  ;;  %v5376_v20 = vsel %vm12272_vm14, %v10023_v34, 0.0  ;;  %5415 = vrot.lane.b32.xlu1 %v3892_v53, %s7031_s0  ;;  %v5363_v17 = vsel %vm12276_vm5, %v10056_v7, 0.0  ;;  %vm12278_vm11 = vnez %v12277_v4  ;;  %vm12280_vm9 = vnez %v12279_v47  ;;  %v3972_v34 = vpop.f32.mrb[148].mxu0  ;;  %v12282_v53 = vld [vmem:[#allocation67_spill] sm:$0xff] }
 0x977   :  { %v10204_v38 = vsel %vm12273_vm4, %v10196_v62, %v5823_v3  ;;  %v5361_v21 = vsel %vm12278_vm11, %v10058_v58, 0.0  ;;  %v5362_v57 = vsel %vm12280_vm9, %v10078_v63, 0.0  ;;  %vm12283_vm14 = vnez %v12282_v53  ;;  %v12284_v2 = vld [vmem:[#allocation68_spill] sm:$0xff]  ;;  %v12287_v58 = vld [vmem:[#allocation65_spill] sm:$0xff]  ;;  %v12289_v47 = vld [vmem:[#allocation66_spill] sm:$0xff]  ;;  %v3974_v37 = vpop.f32.mrb[149].mxu0 }
 0x978   :  { %12274 = vst [vmem:[#allocation42_spill] sm:$0xff] %v10204_v38  ;;  %v5371_v48 = vsel %vm12283_vm14, %v3972_v34, 0.0  ;;  %vm12285_vm4 = vnez %v12284_v2  ;;  %vm12288_vm5 = vnez %v12287_v58  ;;  %vm12290_vm11 = vnez %v12289_v47  ;;  %5417 = vrot.lane.b32.xlu0 %v3931_v10, %s7031_s0 }
 0x979   :  { %v10224_v40 = vsel %vm12285_vm4, %v3972_v34, %v5362_v57  ;;  %v5827_v4 = vpop.permute.xlu0 %5826  ;;  %v5369_v42 = vsel %vm12288_vm5, %v3931_v10, 0.0  ;;  %v10230_v52 = vsel %vm12290_vm11, %v3931_v10, %v5376_v20  ;;  %v5372_v53 = vsel %vm12041_vm1, %v3974_v37, 0.0  ;;  %v3933_v57 = vpop.f32.mrb[145].mxu1 }
 0x97a   :  { %12286 = vst [vmem:[#allocation54_spill] sm:$0xff] %v10224_v40  ;;  %12291 = vst [vmem:[#allocation43_spill] sm:$0xff] %v10230_v52  ;;  %v5825_v36 = vpop.permute.xlu1 %5824  ;;  %vm12292_vm9 = vnez %v12042_v45  ;;  %vm12294_vm14 = vnez %v12028_v44  ;;  %vm12296_vm4 = vnez %v12025_v59  ;;  %vm12298_vm5 = vcmp.lt.s32.totalorder %v11988_v56, 124  ;;  %5419 = vrot.lane.b32.xlu1 %v3933_v57, %s7031_s0  ;;  %v3935_v59 = vpop.f32.mrb[146].mxu1 }
 0x97b   :  { %v10237_v2 = vsel %vm12292_vm9, %v3974_v37, %v5363_v17  ;;  %v10242_v58 = vsel %vm12294_vm14, %v10078_v63, %v5369_v42  ;;  %v10247_v20 = vsel %vm12296_vm4, %v10064_v5, %v5371_v48  ;;  %v10251_v10 = vsel %vm12298_vm5, %v5823_v3, %v5825_v36  ;;  %vm12300_vm1 = vmmov %vm12298_vm5  ;;  %v12303_v17 = vld [vmem:[#allocation72_spill] sm:$0xff]  ;;  %v3976_v5 = vpop.f32.mrb[150].mxu0  ;;  %v3936_v63 = vpop.f32.mrb[147].mxu1  ;;  %v12306_v3 = vld [vmem:[#allocation75_spill] sm:$0xff] }
 0x97c   :  { %12293 = vst [vmem:[#allocation47_spill] sm:$0xff] %v10237_v2  ;;  %12295 = vst [vmem:[#allocation44_spill] sm:$0xff] %v10242_v58  ;;  %v10255_v25 = vsel %vm12300_vm1, %v5825_v36, %v5827_v4  ;;  %vm12302_vm11 = vnez %v12031_v11  ;;  %vm12304_vm9 = vnez %v12303_v17  ;;  %v3977_v48 = vpop.f32.mrb[151].mxu0  ;;  %vm12307_vm14 = vnez %v12306_v3  ;;  %5421 = vrot.lane.b32.xlu0 %v3972_v34, %s7031_s0  ;;  %v12371_v58 = vld [vmem:[#allocation128_spill] sm:$0xff] }
 0x97d   :  { %12297 = vst [vmem:[#allocation53_spill] sm:$0xff] %v10247_v20  ;;  %12299 = vst [vmem:[#allocation57_spill] sm:$0xff] %v10251_v10  ;;  %v5370_v45 = vsel %vm12302_vm11, %v3933_v57, 0.0  ;;  %v10261_v44 = vsel %vm12304_vm9, %v3933_v57, %v5361_v21  ;;  %vm12309_vm4 = vnez %v12045_v39  ;;  %v5831_v17 = vpop.permute.xlu0 %5830  ;;  %v12372_v10 = vld [vmem:[#allocation24_spill] sm:$0xff]  ;;  %v12480_v13 = vld [vmem:[#allocation41_spill] sm:$0xff] }
 0x97e   :  { %12301 = vst [vmem:[#allocation55_spill] sm:$0xff] %v10255_v25  ;;  %12305 = vst [vmem:[#allocation56_spill] sm:$0xff] %v10261_v44  ;;  %v10267_v42 = vsel %vm12307_vm14, %v10056_v7, %v5370_v45  ;;  %v10272_v11 = vsel %vm12309_vm4, %v10125_v6, %v5372_v53  ;;  %v5829_v7 = vpop.permute.xlu1 %5828  ;;  %5423 = vrot.lane.b32.xlu1 %v3974_v37, %s7031_s0  ;;  %v10292_v6 = vpop.f32.mrb[152].mxu0  ;;  %vm12373_vm0 = vnez %v12372_v10 }
 0x97f   :  { %12308 = vst [vmem:[#allocation49_spill] sm:$0xff] %v10267_v42  ;;  %12310 = vst [vmem:[#allocation51_spill] sm:$0xff] %v10272_v11  ;;  %v10289_v39 = vsel %vm12300_vm1, %v5829_v7, %v5831_v17  ;;  %v10294_v53 = vpop.f32.mrb[148].mxu1  ;;  %v10308_v3 = vpop.f32.mrb[153].mxu0 }
 0x980   :  { %vm12313_vm5 = vmmov %vm12300_vm1  ;;  %12315 = vst [vmem:[#allocation52_spill] sm:$0xff] %v10289_v39  ;;  %6058 = vrot.lane.b32.xlu0 %v9772_v16, %s7032_s1  ;;  %v10306_v48 = vpop.f32.mrb[149].mxu1  ;;  %v4425_v57 = vpop.f32.mrb[154].mxu0  ;;  %v4945_v16 = vrot.slane %v9941_v8, %v11987_v51 }
 0x981   :  { %v10285_v45 = vsel %vm12313_vm5, %v5827_v4, %v5829_v7  ;;  %v5835_v63 = vpop.permute.xlu0 %5834  ;;  %vm12318_vm11 = vmmov %vm12300_vm1  ;;  %v4384_v4 = vpop.f32.mrb[150].mxu1 }
 0x982   :  { %12314 = vst [vmem:[#allocation50_spill] sm:$0xff] %v10285_v45  ;;  %v5833_v37 = vpop.permute.xlu1 %5832  ;;  %vm12320_vm9 = vmmov %vm12300_vm1  ;;  %6056 = vrot.lane.b32.xlu1 %v9764_v55, %s7032_s1  ;;  %v4385_v21 = vpop.f32.mrb[151].mxu1  ;;  %vm10338_vm5 = vcmp.eq.s32.totalorder %v4945_v16, 1 }
 0x983   :  { %v10312_v7 = vsel %vm12318_vm11, %v5831_v17, %v5833_v37  ;;  %v10316_v34 = vsel %vm12320_vm9, %v5833_v37, %v5835_v63  ;;  %v4426_v32 = vpop.f32.mrb[155].mxu0  ;;  %vm12324_vm14 = vmmov %vm12300_vm1  ;;  %v4949_v21 = vrot.slane %v9941_v8, %v11647_v60  ;;  %v10346_v4 = vpop.f32.mrb[152].mxu1 }
 0x984   :  { %12319 = vst [vmem:[#allocation67_spill] sm:$0xff] %v10312_v7  ;;  %12321 = vst [vmem:[#allocation68_spill] sm:$0xff] %v10316_v34  ;;  %v12328_v32 = vmov 0  ;;  %v10344_v57 = vpop.f32.mrb[156].mxu0  ;;  %v4464_v2 = vpop.f32.mrb[153].mxu1 }
 0x985   :  { %v5839_v44 = vpop.permute.xlu0 %5838  ;;  %vm12326_vm4 = vmmov %vm12300_vm1  ;;  %v12329_v32 = vsel %vm10338_vm5, 4294967295, %v12328_v32  ;;  %v4505_v40 = vpop.f32.mrb[157].mxu0  ;;  %vm10364_vm9 = vcmp.eq.s32.totalorder %v4949_v21, 1  ;;  %v4965_v21 = vrot.slane %v9941_v8, %v11824_v18 }
 0x986   :  { %v5837_v5 = vpop.permute.xlu1 %5836  ;;  %12330 = vst [vmem:[#allocation72_spill] sm:$0xff] %v12329_v32  ;;  %vm12334_vm11 = vmmov %vm12300_vm1  ;;  %v4466_v39 = vpop.f32.mrb[154].mxu1 }
 0x987   :  { %v10332_v55 = vsel %vm12324_vm14, %v5835_v63, %v5837_v5  ;;  %v10336_v51 = vsel %vm12326_vm4, %v5837_v5, %v5839_v44  ;;  %v4507_v52 = vpop.f32.mrb[158].mxu0  ;;  %v12336_v63 = vmov 0  ;;  %v4961_v5 = vrot.slane %v9941_v8, %v11823_v35  ;;  %v4467_v17 = vpop.f32.mrb[155].mxu1  ;;  %vm12341_vm14 = vmmov %vm12300_vm1 }
 0x988   :  { %12325 = vst [vmem:[#allocation65_spill] sm:$0xff] %v10332_v55  ;;  %12327 = vst [vmem:[#allocation66_spill] sm:$0xff] %v10336_v51  ;;  %v12337_v63 = vsel %vm10364_vm9, 4294967295, %v12336_v63  ;;  %v4508_v51 = vpop.f32.mrb[159].mxu0  ;;  %v4969_v39 = vrot.slane %v9694_v22, %v11658_v28  ;;  %v4544_v55 = vpop.f32.mrb[156].mxu1 }
 0x989   :  { %v5843_v16 = vpop.permute.xlu0 %5842  ;;  %12338 = vst [vmem:[#allocation139_spill] sm:$0xff] %v12337_v63  ;;  %vm12342_vm4 = vmmov %vm12300_vm1  ;;  %v12393_v63 = vld [vmem:[#allocation70_spill] sm:$0xff]  ;;  %v12499_v51 = vld [vmem:[#allocation49_spill] sm:$0xff] }
 0x98a   :  { %v5841_v34 = vpop.permute.xlu1 %5840  ;;  %vm10423_vm13 = vcmp.eq.s32.totalorder %v4969_v39, 1 }
 0x98b   :  { %v10358_v60 = vsel %vm12300_vm1, %v5839_v44, %v5841_v34  ;;  %v10362_v7 = vsel %vm12334_vm11, %v5841_v34, %v5843_v16  ;;  %vm10388_vm1 = vcmp.eq.s32.totalorder %v4961_v5, 1  ;;  %v10394_v44 = vpop.f32.mrb[160].mxu0  ;;  %vm12346_vm11 = vnez %v12227_v14  ;;  %v12490_v14 = vld [vmem:[#allocation119_spill] sm:$0xff] }
 0x98c   :  { %12333 = vst [vmem:[#allocation75_spill] sm:$0xff] %v10358_v60  ;;  %12335 = vst [vmem:[#allocation138_spill] sm:$0xff] %v10362_v7  ;;  %v12345_v7 = vld [vmem:[#allocation118_spill] sm:$0xff]  ;;  %v10409_v22 = vpop.f32.mrb[161].mxu0 }
 0x98d   :  { %v5847_v52 = vpop.permute.xlu0 %5846  ;;  %v4589_v45 = vpop.f32.mrb[162].mxu0 }
 0x98e   :  { %v5845_v34 = vpop.permute.xlu1 %5844  ;;  %v4590_v36 = vpop.f32.mrb[163].mxu0 }
 0x98f   :  { %v10382_v35 = vsel %vm12341_vm14, %v5843_v16, %v5845_v34  ;;  %v10386_v17 = vsel %vm12342_vm4, %v5845_v34, %v5847_v52  ;;  %v4546_v34 = vpop.f32.mrb[157].mxu1  ;;  %vm12348_vm14 = vmmov %vm12342_vm4  ;;  %vm10411_vm4 = vcmp.eq.s32.totalorder %v4965_v21, 1  ;;  %v12362_v21 = vld [vmem:[#allocation127_spill] sm:$0xff]  ;;  %v10447_v49 = vpop.f32.mrb[164].mxu0 }
 0x990   :  { %vm12352_vm2 = vmmov %vm12348_vm14  ;;  %v4548_v59 = vpop.f32.mrb[158].mxu1  ;;  %v10457_v20 = vpop.f32.mrb[165].mxu0 }
 0x991   :  { %v5851_v5 = vpop.permute.xlu0 %5850  ;;  %vm12354_vm10 = vmmov %vm12352_vm2  ;;  %v4549_v25 = vpop.f32.mrb[159].mxu1 }
 0x992   :  { %v5849_v37 = vpop.permute.xlu1 %5848  ;;  %v10407_v28 = vsel %vm12348_vm14, %v5851_v5, %v10196_v62  ;;  %v12363_v25 = vld [vmem:[#allocation126_spill] sm:$0xff]  ;;  %v10449_v38 = vpop.f32.mrb[160].mxu1 }
 0x993   :  { %12349 = vst [vmem:[#allocation118_spill] sm:$0xff] %v10407_v28  ;;  %v10417_v18 = vsel %vm12352_vm2, %v5847_v52, %v5849_v37  ;;  %v10421_v16 = vsel %vm12354_vm10, %v5849_v37, %v5851_v5  ;;  %vm12361_vm10 = vcmp.lt.s32.totalorder %v11988_v56, 127  ;;  %vm12364_vm2 = vnez %v12363_v25  ;;  %v10453_v62 = vpop.f32.mrb[161].mxu1 }
 0x994   :  { %12353 = vst [vmem:[#allocation140_spill] sm:$0xff] %v10417_v18  ;;  %12355 = vst [vmem:[#allocation141_spill] sm:$0xff] %v10421_v16  ;;  %v4671_v16 = vpop.f32.mrb[166].mxu0 }
 0x995   :  { %v10439_v59 = vpop.permute.xlu0 %4197  ;;  %vm12365_vm14 = vmmov %vm12361_vm10  ;;  %v4672_v8 = vpop.f32.mrb[167].mxu0 }
 0x996   :  { %v4200_v39 = vpop.permute.xlu1 %4199  ;;  %vm12369_vm7 = vmmov %vm12365_vm14  ;;  %v12375_v8 = vld [vmem:[#allocation74_spill] sm:$0xff] }
 0x997   :  { %v4243_v5 = vsel %vm12361_vm10, %v10439_v59, %v4200_v39  ;;  %vm12366_vm10 = vcmp.lt.s32.totalorder %v11988_v56, 124 }
 0x998   :  { %v4332_v36 = vsel %vm12364_vm2, %v4243_v5, %v12362_v21  ;;  %v4922_v21 = vsel %vm12366_vm10, %v10037_v19, %v10048_v54  ;;  %v12367_v5 = vld [vmem:[#allocation122_spill] sm:$0xff]  ;;  %vm12368_vm2 = vnez %v11991_v1 }
 0x999   :  { %v10451_v52 = vadd.f32 %v4464_v2, %v4332_v36  ;;  %v4202_v11 = vpop.permute.xlu0 %4201  ;;  %v4630_v36 = vpop.f32.mrb[162].mxu1 }
 0x99a   :  { %v4242_v45 = vsel %vm12365_vm14, %v4200_v39, %v4202_v11  ;;  %v4204_v28 = vpop.permute.xlu1 %4203  ;;  %vm12370_vm14 = vmmov %vm12366_vm10  ;;  %v4631_v18 = vpop.f32.mrb[163].mxu1  ;;  %v12380_v36 = vld [vmem:[#allocation130_spill] sm:$0xff] }
 0x99b   :  { %v4333_v37 = vsel %vm12368_vm2, %v4242_v45, %v12367_v5  ;;  %v4241_v2 = vsel %vm12369_vm7, %v4202_v11, %v4204_v28  ;;  %v4921_v39 = vsel %vm12370_vm14, %v10048_v54, %v10062_v29  ;;  %v10480_v11 = vsel %vm12366_vm10, %v10105_v24, %v10114_v0  ;;  %vm12378_vm10 = vmmov %vm12369_vm7 }
 0x99c   :  { %v4504_v42 = vadd.f32 %v10344_v57, %v4333_v37  ;;  %v4334_v19 = vsel %vm12373_vm0, %v4241_v2, %v12371_v58  ;;  %v12374_v57 = vld [vmem:[#allocation99_spill] sm:$0xff] }
 0x99d   :  { %v4506_v16 = vadd.f32 %v4505_v40, %v4334_v19  ;;  %v4206_v45 = vpop.permute.xlu0 %4205  ;;  %v5016_v58 = vsel %vm10338_vm5, %v4922_v21, %v12374_v57  ;;  %v12376_v37 = vld [vmem:[#allocation27_spill] sm:$0xff]  ;;  %v12379_v40 = vld [vmem:[#allocation101_spill] sm:$0xff]  ;;  %v5108_v21 = vpop.f32.mrb[168].mxu0 }
 0x99e   :  { %v6136_v5 = vadd.f32 %v9379_v26, %v4504_v42  ;;  %v4240_v29 = vsel %vm12369_vm7, %v4204_v28, %v4206_v45  ;;  %v4208_v54 = vpop.permute.xlu1 %4207  ;;  %vm12377_vm14 = vnez %v12376_v37  ;;  %v5017_v42 = vsel %vm10364_vm9, %v4921_v39, %v12379_v40  ;;  %v5067_v57 = vpop.f32.mrb[164].mxu1 }
 0x99f   :  { %v6137_v18 = vadd.f32 %v9379_v26, %v4506_v16  ;;  %v4335_v2 = vsel %vm12377_vm14, %v4240_v29, %v12375_v8  ;;  %v4239_v24 = vsel %vm12378_vm10, %v4206_v45, %v4208_v54  ;;  %vm12381_vm7 = vnez %v12000_v27  ;;  %v12382_v16 = vld [vmem:[#allocation102_spill] sm:$0xff] }
 0x9a0   :  { %6735 = vtanh.f32 %v6136_v5  ;;  %v4545_v28 = vadd.f32 %v4544_v55, %v4335_v2  ;;  %v4336_v19 = vsel %vm12381_vm7, %v4239_v24, %v12380_v36  ;;  %v5020_v29 = vsel %vm10388_vm1, %v10480_v11, %v12382_v16  ;;  %v5069_v5 = vpop.f32.mrb[165].mxu1 }
 0x9a1   :  { %6737 = vtanh.f32 %v6137_v18  ;;  %v4547_v8 = vadd.f32 %v4546_v34, %v4336_v19  ;;  %v5109_v45 = vadd.f32 %v5108_v21, %v5016_v58  ;;  %v4210_v32 = vpop.permute.xlu0 %4209  ;;  %v12383_v55 = vsel %vm10003_vm8, %v10021_v15, %v12209_v41  ;;  %v12386_v58 = vld [vmem:[#allocation89_spill] sm:$0xff]  ;;  %v5110_v15 = vpop.f32.mrb[169].mxu0 }
 0x9a2   :  { %v5068_v39 = vadd.f32 %v5067_v57, %v12383_v55  ;;  %vm12384_vm10 = vcmp.lt.s32.totalorder %v11988_v56, 124  ;;  %v6138_v24 = vadd.f32 %v9379_v26, %v4545_v28  ;;  %vm12385_vm9 = vcmp.lt.s32.totalorder %v11988_v56, 127  ;;  %v4212_v11 = vpop.permute.xlu1 %4211  ;;  %v12387_v18 = vld [vmem:[#allocation33_spill] sm:$0xff]  ;;  %v5112_v16 = vpop.f32.mrb[170].mxu0 }
 0x9a3   :  { %v10513_v2 = vsel %vm12384_vm10, %v10114_v0, %v10137_v9  ;;  %v4238_v34 = vsel %vm12385_vm9, %v4208_v54, %v4210_v32  ;;  %v12388_v40 = vsel %vm10033_vm3, %v12386_v58, %v12387_v18  ;;  %v6139_v36 = vadd.f32 %v9379_v26, %v4547_v8  ;;  %v12389_v21 = vld [vmem:[#allocation73_spill] sm:$0xff]  ;;  %vm12392_vm5 = vmmov %vm12385_vm9  ;;  %v5071_v54 = vpop.f32.mrb[166].mxu1  ;;  %v12394_v58 = vld [vmem:[#allocation62_spill] sm:$0xff] }
 0x9a4   :  { %v5070_v41 = vadd.f32 %v5069_v5, %v12388_v40  ;;  %v6148_v19 = vadd.f32 %v9379_v26, %v5109_v45  ;;  %v12390_v0 = vld [vmem:[#allocation61_spill] sm:$0xff]  ;;  %v4237_v28 = vsel %vm12392_vm5, %v4210_v32, %v4212_v11  ;;  %6739 = vtanh.f32 %v6138_v24  ;;  %v5072_v18 = vpop.f32.mrb[167].mxu1  ;;  %v5113_v45 = vpop.f32.mrb[171].mxu0  ;;  %v12396_v40 = vld [vmem:[#allocation32_spill] sm:$0xff]  ;;  %v12398_v54 = vld [vmem:[#allocation123_spill] sm:$0xff] }
 0x9a5   :  { %vm12391_vm10 = vnez %v12390_v0  ;;  %vm12395_vm9 = vnez %v12394_v58  ;;  %v6146_v8 = vadd.f32 %v9379_v26, %v5068_v39  ;;  %6741 = vtanh.f32 %v6139_v36  ;;  %v12399_v36 = vld [vmem:[#allocation63_spill] sm:$0xff]  ;;  %v12402_v16 = vld [vmem:[#allocation104_spill] sm:$0xff] }
 0x9a6   :  { %v4337_v57 = vsel %vm12391_vm10, %v4238_v34, %v12389_v21  ;;  %v4338_v5 = vsel %vm12395_vm9, %v4237_v28, %v12393_v63  ;;  %vm12397_vm10 = vcmp.lt.s32.totalorder %v11988_v56, 124  ;;  %v5111_v24 = vadd.f32 %v5110_v15, %v5017_v42  ;;  %v4214_v21 = vpop.permute.xlu0 %4213  ;;  %vm12401_vm9 = vmmov %vm12392_vm5 }
 0x9a7   :  { %v4586_v55 = vadd.f32 %v10394_v44, %v4337_v57  ;;  %v10539_v34 = vsel %vm12397_vm10, %v10137_v9, %v12396_v40  ;;  %v4588_v32 = vadd.f32 %v10409_v22, %v4338_v5  ;;  %6743 = vtanh.f32 %v6148_v19  ;;  %v4216_v57 = vpop.permute.xlu1 %4215  ;;  %v5149_v19 = vpop.f32.mrb[168].mxu1  ;;  %v12404_v5 = vld [vmem:[#allocation131_spill] sm:$0xff]  ;;  %v12407_v40 = vld [vmem:[#allocation100_spill] sm:$0xff] }
 0x9a8   :  { %v6147_v63 = vadd.f32 %v9379_v26, %v5070_v41  ;;  %v4236_v39 = vsel %vm12392_vm5, %v4212_v11, %v4214_v21  ;;  %6745 = vtanh.f32 %v6146_v8  ;;  %v6149_v9 = vadd.f32 %v9379_v26, %v5111_v24  ;;  %v5190_v41 = vpop.f32.mrb[172].mxu0 }
 0x9a9   :  { %v6140_v44 = vadd.f32 %v9379_v26, %v4586_v55  ;;  %v6141_v28 = vadd.f32 %v9379_v26, %v4588_v32  ;;  %vm12400_vm10 = vnez %v12399_v36  ;;  %v4235_v15 = vsel %vm12401_vm9, %v4214_v21, %v4216_v57  ;;  %v12403_v55 = vld [vmem:[#allocation34_spill] sm:$0xff]  ;;  %v5151_v21 = vpop.f32.mrb[169].mxu1 }
 0x9aa   :  { %v4339_v22 = vsel %vm12400_vm10, %v4236_v39, %v12398_v54  ;;  %v5021_v11 = vsel %vm10411_vm4, %v10513_v2, %v12402_v16  ;;  %vm12405_vm5 = vnez %v12404_v5  ;;  %v5191_v18 = vadd.f32 %v5190_v41, %v5020_v29  ;;  %v4218_v45 = vpop.permute.xlu0 %4217  ;;  %v5192_v29 = vpop.f32.mrb[173].mxu0  ;;  %v12409_v41 = vld [vmem:[#allocation124_spill] sm:$0xff] }
 0x9ab   :  { %6747 = vtanh.f32 %v6140_v44  ;;  %v4627_v42 = vadd.f32 %v10449_v38, %v4339_v22  ;;  %v4340_v8 = vsel %vm12405_vm5, %v4235_v15, %v12403_v55  ;;  %v12406_v38 = vld [vmem:[#allocation29_spill] sm:$0xff]  ;;  %v6736_v44 = vpop.eup %6735  ;;  %v10570_v54 = vpop.permute.xlu1 %4219  ;;  %v12410_v16 = vld [vmem:[#allocation132_spill] sm:$0xff]  ;;  %vm12412_vm5 = vmmov %vm12401_vm9  ;;  %vm12436_vm8 = vcmp.lt.s32.totalorder %v11988_v56, 127 }
 0x9ac   :  { %6749 = vtanh.f32 %v6141_v28  ;;  %v12408_v32 = vsel %vm10068_vm12, %v12406_v38, %v12407_v40  ;;  %v4629_v2 = vadd.f32 %v10453_v62, %v4340_v8  ;;  %v4234_v28 = vsel %vm12401_vm9, %v4216_v57, %v4218_v45  ;;  %v6738_v22 = vpop.eup %6737  ;;  %v5194_v62 = vpop.f32.mrb[174].mxu0  ;;  %v12414_v40 = vld [vmem:[#allocation82_spill] sm:$0xff] }
 0x9ad   :  { %v5150_v24 = vadd.f32 %v5149_v19, %v12408_v32  ;;  %6751 = vtanh.f32 %v6147_v63  ;;  %v6142_v39 = vadd.f32 %v9379_v26, %v4627_v42  ;;  %v6152_v15 = vadd.f32 %v9379_v26, %v5191_v18  ;;  %v5153_v42 = vpop.f32.mrb[170].mxu1  ;;  %v12413_v18 = vld [vmem:[#allocation129_spill] sm:$0xff]  ;;  %v12419_v62 = vld [vmem:[#allocation90_spill] sm:$0xff] }
 0x9ae   :  { %6753 = vtanh.f32 %v6149_v9  ;;  %vm12411_vm12 = vnez %v12410_v16  ;;  %v4233_v63 = vsel %vm12412_vm5, %v4218_v45, %v10570_v54  ;;  %v6317_v55 = vcombine.low %v6736_v44, %v6738_v22  ;;  %v5154_v38 = vpop.f32.mrb[171].mxu1  ;;  %v5195_v9 = vpop.f32.mrb[175].mxu0  ;;  %v12416_v45 = vld [vmem:[#allocation38_spill] sm:$0xff] }
 0x9af   :  { %v4341_v19 = vsel %vm12411_vm12, %v4234_v28, %v12409_v41  ;;  %6755 = vtanh.f32 %v6142_v39  ;;  %v6143_v57 = vadd.f32 %v9379_v26, %v4629_v2  ;;  %vm12415_vm9 = vnez %v12414_v40  ;;  %v12417_v41 = vld [vmem:[#allocation103_spill] sm:$0xff]  ;;  %v10590_v39 = vpop.permute.xlu0 %6038  ;;  %v6740_v2 = vpop.eup %6739  ;;  %vm12437_vm12 = vmmov %vm12436_vm8 }
 0x9b0   :  { %v4668_v8 = vadd.f32 %v10447_v49, %v4341_v19  ;;  %6757 = vtanh.f32 %v6152_v15  ;;  %v4342_v32 = vsel %vm12415_vm9, %v4233_v63, %v12413_v18  ;;  %v6150_v28 = vadd.f32 %v9379_v26, %v5150_v24  ;;  %6381 = vst [vmem:[%s11162_s15 + $0x58] sm:$0x77] %v6317_v55  ;;  %v6742_v24 = vpop.eup %6741  ;;  %v6041_v63 = vpop.permute.xlu1 %6040  ;;  %v12422_v18 = vld [vmem:[#allocation86_spill] sm:$0xff] }
 0x9b1   :  { %v12418_v42 = vsel %vm12346_vm11, %v12416_v45, %v12417_v41  ;;  %6759 = vtanh.f32 %v6143_v57  ;;  %v4670_v22 = vadd.f32 %v10457_v20, %v4342_v32  ;;  %v5193_v15 = vadd.f32 %v5192_v29, %v5021_v11  ;;  %v6744_v55 = vpop.eup %6743  ;;  %v5272_v11 = vpop.f32.mrb[176].mxu0 }
 0x9b2   :  { %v5152_v44 = vadd.f32 %v5151_v21, %v12418_v42  ;;  %v6144_v49 = vadd.f32 %v9379_v26, %v4668_v8  ;;  %v6135_v19 = vadd.f32 %v9379_v26, %v10451_v52  ;;  %6761 = vtanh.f32 %v6150_v28  ;;  %v5231_v29 = vpop.f32.mrb[172].mxu1  ;;  %v6746_v9 = vpop.eup %6745 }
 0x9b3   :  { %v5022_v38 = vsel %vm10423_vm13, %v10539_v34, %v12419_v62  ;;  %v6318_v57 = vcombine.low %v6740_v2, %v6742_v24  ;;  %v6145_v8 = vadd.f32 %v9379_v26, %v4670_v22  ;;  %v6153_v20 = vadd.f32 %v9379_v26, %v5193_v15  ;;  %v12423_v34 = vld [vmem:[#allocation25_spill] sm:$0xff]  ;;  %v10616_v45 = vpop.permute.xlu0 %6042  ;;  %v5233_v42 = vpop.f32.mrb[173].mxu1  ;;  %v12427_v22 = vld [vmem:[#allocation91_spill] sm:$0xff] }
 0x9b4   :  { %v6151_v21 = vadd.f32 %v9379_v26, %v5152_v44  ;;  %6763 = vtanh.f32 %v6144_v49  ;;  %vm12420_vm5 = vcmp.lt.s32.totalorder %v11988_v56, 124  ;;  %v12424_v32 = vsel %vm9785_vm15, %v12422_v18, %v12423_v34  ;;  %v12426_v49 = vld [vmem:[#allocation40_spill] sm:$0xff]  ;;  %v5235_v62 = vpop.f32.mrb[174].mxu1  ;;  %v4224_v18 = vpop.permute.xlu1 %4223 }
 0x9b5   :  { %v10609_v52 = vsel %vm12420_vm5, %v10590_v39, %v6041_v63  ;;  %v5273_v28 = vadd.f32 %v5272_v11, %v12424_v32  ;;  %v5232_v41 = vadd.f32 %v5231_v29, %v5022_v38  ;;  %v6748_v44 = vpop.eup %6747  ;;  %6382 = vst [vmem:[%s11162_s15 + $0x60] sm:$0x77] %v6318_v57  ;;  %v10624_v2 = vsel %vm12420_vm5, %v6041_v63, %v10616_v45  ;;  %v5236_v11 = vpop.f32.mrb[175].mxu1 }
 0x9b6   :  { %6765 = vtanh.f32 %v6151_v21  ;;  %12421 = vst [vmem:[#allocation127_spill] sm:$0xff] %v10609_v52  ;;  %12425 = vst [vmem:[#allocation126_spill] sm:$0xff] %v10624_v2  ;;  %v12428_v15 = vsel %vm10127_vm6, %v12426_v49, %v12427_v22  ;;  %v5274_v21 = vpop.f32.mrb[177].mxu0  ;;  %vm12430_vm9 = vnez %v12202_v31  ;;  %v6750_v57 = vpop.eup %6749  ;;  %vm12432_vm5 = vnez %v12174_v50 }
 0x9b7   :  { %6767 = vtanh.f32 %v6145_v8  ;;  %v5234_v24 = vadd.f32 %v5233_v42, %v12428_v15  ;;  %v6156_v8 = vadd.f32 %v9379_v26, %v5273_v28  ;;  %v6154_v34 = vadd.f32 %v9379_v26, %v5232_v41  ;;  %v5276_v32 = vpop.f32.mrb[178].mxu0  ;;  %v6752_v42 = vpop.eup %6751  ;;  %v12433_v15 = vld [vmem:[#allocation125_spill] sm:$0xff] }
 0x9b8   :  { %6769 = vtanh.f32 %v6153_v20  ;;  %v6319_v49 = vcombine.low %v6748_v44, %v6750_v57  ;;  %v12434_v20 = vld [vmem:[#allocation26_spill] sm:$0xff]  ;;  %v5277_v38 = vpop.f32.mrb[179].mxu0  ;;  %v6754_v52 = vpop.eup %6753  ;;  %v6322_v33 = vcombine.low %v6746_v9, %v6752_v42  ;;  %v12441_v57 = vld [vmem:[#allocation71_spill] sm:$0xff]  ;;  %vm12447_vm10 = vnez %v12194_v46 }
 0x9b9   :  { %6771 = vtanh.f32 %v6135_v19  ;;  %v6155_v22 = vadd.f32 %v9379_v26, %v5234_v24  ;;  %v12435_v62 = vsel %vm12432_vm5, %v12433_v15, %v12434_v20  ;;  %v4222_v63 = vpop.permute.xlu0 %4221  ;;  %v6756_v29 = vpop.eup %6755  ;;  %v6323_v19 = vcombine.low %v6744_v55, %v6754_v52  ;;  %v12439_v38 = vld [vmem:[#allocation58_spill] sm:$0xff]  ;;  %v12444_v15 = vld [vmem:[#allocation121_spill] sm:$0xff] }
 0x9ba   :  { %v5275_v28 = vadd.f32 %v5274_v21, %v12435_v62  ;;  %6773 = vtanh.f32 %v6156_v8  ;;  %6383 = vst [vmem:[%s11162_s15 + $0x68] sm:$0x77] %v6319_v49  ;;  %v4231_v44 = vsel %vm12436_vm8, %v4222_v63, %v4224_v18  ;;  %v6758_v24 = vpop.eup %6757  ;;  %6386 = vst [vmem:[%s11162_s15 + $0x80] sm:$0x77] %v6322_v33  ;;  %v4232_v9 = vsel %vm12437_vm12, %v10570_v54, %v4222_v63  ;;  %v12438_v21 = vld [vmem:[#allocation20_spill] sm:$0xff]  ;;  %v4228_v52 = vpop.permute.xlu1 %4227  ;;  %v12445_v20 = vld [vmem:[#allocation137_spill] sm:$0xff] }
 0x9bb   :  { %6775 = vtanh.f32 %v6154_v34  ;;  %vm12440_vm5 = vnez %v12439_v38  ;;  %v6760_v11 = vpop.eup %6759  ;;  %6387 = vst [vmem:[%s11162_s15 + $0x88] sm:$0x77] %v6323_v19  ;;  %v12442_v8 = vld [vmem:[#allocation60_spill] sm:$0xff]  ;;  %v4244_v54 = vsel %vm12437_vm12, %v4228_v52, %v10439_v59  ;;  %v5354_v63 = vpop.f32.mrb[180].mxu0  ;;  %v12449_v19 = vld [vmem:[#allocation30_spill] sm:$0xff]  ;;  %vm12476_vm3 = vcmp.lt.s32.totalorder %v11988_v56, 124 }
 0x9bc   :  { %v6157_v41 = vadd.f32 %v9379_v26, %v5275_v28  ;;  %6777 = vtanh.f32 %v6155_v22  ;;  %v4328_v55 = vsel %vm12440_vm5, %v4231_v44, %v12438_v21  ;;  %vm12443_vm8 = vnez %v12442_v8  ;;  %v5313_v32 = vpop.f32.mrb[176].mxu1  ;;  %v6762_v42 = vpop.eup %6761  ;;  %v12448_v28 = vld [vmem:[#allocation64_spill] sm:$0xff] }
 0x9bd   :  { %v4327_v33 = vsel %vm12443_vm8, %v4232_v9, %v12441_v57  ;;  %v4383_v34 = vadd.f32 %v10306_v48, %v4328_v55  ;;  %v6320_v49 = vcombine.low %v6756_v29, %v6760_v11  ;;  %vm12446_vm5 = vnez %v12445_v20  ;;  %v4226_v44 = vpop.permute.xlu0 %4225  ;;  %v5315_v9 = vpop.f32.mrb[177].mxu1  ;;  %vm12451_vm8 = vmmov %vm12437_vm12 }
 0x9be   :  { %6779 = vtanh.f32 %v6157_v41  ;;  %v4381_v22 = vadd.f32 %v10294_v53, %v4327_v33  ;;  %v4331_v62 = vsel %vm12446_vm5, %v4244_v54, %v12444_v15  ;;  %v12450_v41 = vsel %vm12447_vm10, %v12448_v28, %v12449_v19  ;;  %v6764_v21 = vpop.eup %6763  ;;  %v5356_v11 = vpop.f32.mrb[181].mxu0  ;;  %v12453_v15 = vld [vmem:[#allocation135_spill] sm:$0xff] }
 0x9bf   :  { %v5355_v48 = vadd.f32 %v5354_v63, %v12450_v41  ;;  %v6131_v59 = vadd.f32 %v9379_v26, %v4383_v34  ;;  %v4463_v55 = vadd.f32 %v10346_v4, %v4331_v62  ;;  %v4229_v53 = vsel %vm12437_vm12, %v4226_v44, %v4228_v52  ;;  %v5317_v57 = vpop.f32.mrb[178].mxu1  ;;  %6384 = vst [vmem:[%s11162_s15 + $0x70] sm:$0x77] %v6320_v49  ;;  %v12452_v34 = vld [vmem:[#allocation69_spill] sm:$0xff]  ;;  %v12455_v62 = vld [vmem:[#allocation35_spill] sm:$0xff]  ;;  %v12456_v52 = vld [vmem:[#allocation136_spill] sm:$0xff] }
 0x9c0   :  { %v4230_v29 = vsel %vm12451_vm8, %v4224_v18, %v4226_v44  ;;  %v6766_v33 = vpop.eup %6765  ;;  %v6130_v54 = vadd.f32 %v9379_v26, %v4381_v22  ;;  %vm12454_vm5 = vnez %v12453_v15  ;;  %vm12457_vm12 = vnez %v12456_v52  ;;  %v10698_v18 = vpop.permute.xlu1 %6044 }
 0x9c1   :  { %v6160_v63 = vadd.f32 %v9379_v26, %v5355_v48  ;;  %v4329_v4 = vsel %vm12454_vm5, %v4230_v29, %v12452_v34  ;;  %v4330_v28 = vsel %vm12457_vm12, %v4229_v53, %v12455_v62  ;;  %v5318_v19 = vpop.f32.mrb[179].mxu1  ;;  %v6768_v41 = vpop.eup %6767  ;;  %v6324_v44 = vcombine.low %v6762_v42, %v6766_v33 }
 0x9c2   :  { %6781 = vtanh.f32 %v6131_v59  ;;  %v6134_v49 = vadd.f32 %v9379_v26, %v4463_v55  ;;  %v4422_v22 = vadd.f32 %v10292_v6, %v4329_v4  ;;  %v5358_v57 = vpop.f32.mrb[182].mxu0  ;;  %v6770_v48 = vpop.eup %6769  ;;  %v6321_v20 = vcombine.low %v6764_v21, %v6768_v41  ;;  %v12463_v4 = vld [vmem:[#allocation94_spill] sm:$0xff]  ;;  %v12467_v19 = vld [vmem:[#allocation95_spill] sm:$0xff] }
 0x9c3   :  { %6783 = vtanh.f32 %v6130_v54  ;;  %v4424_v29 = vadd.f32 %v10308_v3, %v4330_v28  ;;  %vm12458_vm8 = vcmp.lt.s32.totalorder %v11988_v56, 124  ;;  %v10709_v34 = vpop.permute.xlu0 %6046  ;;  %v5359_v42 = vpop.f32.mrb[183].mxu0  ;;  %6388 = vst [vmem:[%s11162_s15 + $0x90] sm:$0x77] %v6324_v44  ;;  %v6325_v6 = vcombine.low %v6758_v24, %v6770_v48  ;;  %v12462_v54 = vld [vmem:[#allocation79_spill] sm:$0xff]  ;;  %v12466_v28 = vld [vmem:[#allocation48_spill] sm:$0xff] }
 0x9c4   :  { %v10707_v53 = vsel %vm12458_vm8, %v10616_v45, %v10698_v18  ;;  %v6772_v59 = vpop.eup %6771  ;;  %6785 = vtanh.f32 %v6134_v49  ;;  %v6132_v21 = vadd.f32 %v9379_v26, %v4422_v22  ;;  %6385 = vst [vmem:[%s11162_s15 + $0x78] sm:$0x77] %v6321_v20  ;;  %vm12461_vm8 = vnez %v12184_v12  ;;  %v10733_v49 = vpop.permute.xlu1 %6048  ;;  %v12469_v20 = vld [vmem:[#allocation88_spill] sm:$0xff]  ;;  %v12470_v57 = vld [vmem:[#allocation31_spill] sm:$0xff] }
 0x9c5   :  { %12459 = vst [vmem:[#allocation122_spill] sm:$0xff] %v10707_v53  ;;  %v6774_v33 = vpop.eup %6773  ;;  %v6133_v45 = vadd.f32 %v9379_v26, %v4424_v29  ;;  %v12464_v24 = vsel %vm12461_vm8, %v12462_v54, %v12463_v4  ;;  %vm12465_vm12 = vnez %v12192_v23  ;;  %6389 = vst [vmem:[%s11162_s15 + $0x98] sm:$0x77] %v6325_v6  ;;  %v12471_v48 = vsel %vm12430_vm9, %v12469_v20, %v12470_v57  ;;  %v10743_v29 = vpop.f32.mrb[180].mxu1 }
 0x9c6   :  { %v5314_v62 = vadd.f32 %v5313_v32, %v12464_v24  ;;  %v12468_v41 = vsel %vm12465_vm12, %v12466_v28, %v12467_v19  ;;  %v6776_v22 = vpop.eup %6775  ;;  %6787 = vtanh.f32 %v6132_v21  ;;  %v5357_v32 = vadd.f32 %v5356_v11, %v12471_v48  ;;  %v10745_v42 = vpop.f32.mrb[184].mxu0 }
 0x9c7   :  { %v5316_v44 = vadd.f32 %v5315_v9, %v12468_v41  ;;  %12472 = vst [vmem:[#allocation128_spill] sm:$0xff] %v10745_v42  ;;  %v6778_v54 = vpop.eup %6777  ;;  %6789 = vtanh.f32 %v6133_v45  ;;  %v10749_v24 = vpop.permute.xlu0 %6050  ;;  %vm12481_vm5 = vnez %v12363_v25  ;;  %vm12482_vm9 = vcmp.lt.s32.totalorder %v11988_v56, 124  ;;  %v12486_v25 = vld [vmem:[#allocation46_spill] sm:$0xff] }
 0x9c8   :  { %v6158_v9 = vadd.f32 %v9379_v26, %v5314_v62  ;;  %v10751_v6 = vpop.f32.mrb[181].mxu1  ;;  %v6780_v21 = vpop.eup %6779  ;;  %v6326_v28 = vcombine.low %v6776_v22, %v6778_v54  ;;  %6791 = vtanh.f32 %v6160_v63  ;;  %v6161_v19 = vadd.f32 %v9379_v26, %v5357_v32 }
 0x9c9   :  { %v6159_v4 = vadd.f32 %v9379_v26, %v5316_v44  ;;  %12473 = vst [vmem:[#allocation24_spill] sm:$0xff] %v10751_v6  ;;  %v5498_v11 = vpop.f32.mrb[182].mxu1  ;;  %v10754_v41 = vpop.f32.mrb[185].mxu0  ;;  %v6327_v20 = vcombine.low %v6774_v33, %v6780_v21  ;;  %v12487_v6 = vld [vmem:[#allocation77_spill] sm:$0xff] }
 0x9ca   :  { %12474 = vst [vmem:[#allocation99_spill] sm:$0xff] %v10754_v41  ;;  %6793 = vtanh.f32 %v6158_v9  ;;  %v10756_v57 = vpop.permute.xlu1 %6052  ;;  %v5499_v45 = vpop.f32.mrb[183].mxu1  ;;  %6390 = vst [vmem:[%s11162_s15 + $0xa0] sm:$0x77] %v6326_v28 }
 0x9cb   :  { %6795 = vtanh.f32 %v6159_v4  ;;  %v5539_v62 = vpop.f32.mrb[186].mxu0  ;;  %6391 = vst [vmem:[%s11162_s15 + $0xa8] sm:$0x77] %v6327_v20  ;;  %v10764_v63 = vpop.permute.xlu0 %6054 }
 0x9cc   :  { %6797 = vtanh.f32 %v6161_v19  ;;  %v5540_v44 = vpop.f32.mrb[187].mxu0  ;;  %v6782_v22 = vpop.eup %6781 }
 0x9cd   :  { %v6784_v33 = vpop.eup %6783  ;;  %v10768_v9 = vpop.f32.mrb[184].mxu1 }
 0x9ce   :  { %v10766_v48 = vpop.permute.xlu1 %6028  ;;  %v6786_v32 = vpop.eup %6785  ;;  %v6314_v54 = vcombine.low %v6784_v33, %v6782_v22  ;;  %12475 = vst [vmem:[#allocation74_spill] sm:$0xff] %v10768_v9 }
 0x9cf   :  { %v5617_v21 = vpop.f32.mrb[188].mxu0  ;;  %v6316_v28 = vcombine.low %v6786_v32, %v6772_v59  ;;  %v10770_v4 = vpop.permute.xlu0 %6030 }
 0x9d0   :  { %v5578_v11 = vpop.f32.mrb[185].mxu1  ;;  %v6788_v45 = vpop.eup %6787  ;;  %6378 = vst [vmem:[%s11162_s15 + $0x40] sm:$0x77] %v6314_v54 }
 0x9d1   :  { %v5619_v19 = vpop.f32.mrb[189].mxu0  ;;  %v5580_v20 = vpop.f32.mrb[186].mxu1  ;;  %6380 = vst [vmem:[%s11162_s15 + $0x50] sm:$0x77] %v6316_v28 }
 0x9d2   :  { %v6790_v62 = vpop.eup %6789  ;;  %v10778_v44 = vpop.permute.xlu1 %6032 }
 0x9d3   :  { %v5581_v22 = vpop.f32.mrb[187].mxu1  ;;  %v6792_v33 = vpop.eup %6791  ;;  %v6315_v59 = vcombine.low %v6788_v45, %v6790_v62 }
 0x9d4   :  { %v5621_v32 = vpop.f32.mrb[190].mxu0  ;;  %v6794_v3 = vpop.eup %6793  ;;  %v12477_v22 = vld [vmem:[#allocation81_spill] sm:$0xff] }
 0x9d5   :  { %v5622_v9 = vpop.f32.mrb[191].mxu0  ;;  %v6796_v41 = vpop.eup %6795  ;;  %6379 = vst [vmem:[%s11162_s15 + $0x48] sm:$0x77] %v6315_v59 }
 0x9d6   :  { %v6798_v54 = vpop.eup %6797  ;;  %v6328_v20 = vcombine.low %v6794_v3, %v6796_v41  ;;  %v10783_v55 = vpop.permute.xlu0 %6034 }
 0x9d7   :  { %v10785_v53 = vpop.permute.xlu1 %6036  ;;  %v6329_v28 = vcombine.low %v6792_v33, %v6798_v54  ;;  %v5658_v62 = vpop.f32.mrb[188].mxu1 }
 0x9d8   :  { %v10791_v45 = vsel %vm12476_vm3, %v10785_v53, %v10590_v39  ;;  %v5699_v9 = vpop.f32.mrb[192].mxu0  ;;  %6392 = vst [vmem:[%s11162_s15 + $0xb0] sm:$0x77] %v6328_v20  ;;  %v5660_v41 = vpop.f32.mrb[189].mxu1  ;;  %vm12479_vm3 = vcmp.lt.s32.totalorder %v11988_v56, 127 }
 0x9d9   :  { %v5701_v59 = vpop.f32.mrb[193].mxu0  ;;  %6393 = vst [vmem:[%s11162_s15 + $0xb8] sm:$0x77] %v6329_v28  ;;  %v5662_v33 = vpop.f32.mrb[190].mxu1  ;;  %v6063_v28 = vsel %vm12482_vm9, %v10749_v24, %v10756_v57  ;;  %vm12483_vm10 = vmmov %vm12479_vm3 }
 0x9da   :  { %v5703_v39 = vpop.f32.mrb[194].mxu0  ;;  %v10803_v32 = vpop.permute.xlu0 %5393 }
 0x9db   :  { %12478 = vst [vmem:[#allocation27_spill] sm:$0xff] %v10803_v32  ;;  %v5663_v54 = vpop.f32.mrb[191].mxu1  ;;  %v5396_v52 = vpop.permute.xlu1 %5395 }
 0x9dc   :  { %v5704_v42 = vpop.f32.mrb[195].mxu0  ;;  %v5439_v20 = vsel %vm12479_vm3, %v10803_v32, %v5396_v52  ;;  %v12484_v32 = vsel %vm12346_vm11, %v10382_v35, %v12345_v7 }
 0x9dd   :  { %v5446_v3 = vsel %vm12481_vm5, %v5439_v20, %v12480_v13  ;;  %v5740_v42 = vpop.f32.mrb[192].mxu1  ;;  %vm12485_vm5 = vmmov %vm12479_vm3 }
 0x9de   :  { %v5579_v33 = vadd.f32 %v5578_v11, %v5446_v3  ;;  %v5398_v39 = vpop.permute.xlu0 %5397  ;;  %v5742_v11 = vpop.f32.mrb[193].mxu1 }
 0x9df   :  { %v5438_v54 = vsel %vm12483_vm10, %v5396_v52, %v5398_v39  ;;  %v5400_v2 = vpop.permute.xlu1 %5399  ;;  %v10827_v3 = vpop.f32.mrb[196].mxu0  ;;  %v6081_v52 = vsel %vm12346_vm11, %v6063_v28, %v12487_v6  ;;  %vm12488_vm10 = vmmov %vm12482_vm9  ;;  %v12491_v6 = vsel %vm10388_vm1, %v10386_v17, %v12490_v14 }
 0x9e0   :  { %v5889_v15 = vadd.f32 %v12484_v32, %v5579_v33  ;;  %v5437_v13 = vsel %vm12485_vm5, %v5398_v39, %v5400_v2  ;;  %v5447_v20 = vsel %vm12368_vm2, %v5438_v54, %v12486_v25  ;;  %v6062_v7 = vsel %vm12488_vm10, %v10756_v57, %v10764_v63  ;;  %v12489_v32 = vld [vmem:[#allocation23_spill] sm:$0xff]  ;;  %v10839_v39 = vpop.f32.mrb[197].mxu0  ;;  %v5744_v1 = vpop.f32.mrb[194].mxu1  ;;  %vm12492_vm11 = vmmov %vm12479_vm3 }
 0x9e1   :  { %v5618_v35 = vadd.f32 %v5617_v21, %v5447_v20  ;;  %v5448_v33 = vsel %vm12373_vm0, %v5437_v13, %v12489_v32  ;;  %v5785_v30 = vpop.f32.mrb[198].mxu0  ;;  %v5745_v21 = vpop.f32.mrb[195].mxu1  ;;  %v12493_v13 = vld [vmem:[#allocation85_spill] sm:$0xff]  ;;  %vm12498_vm0 = vmmov %vm12479_vm3  ;;  %vm12505_vm2 = vnez %v12390_v0 }
 0x9e2   :  { %v10841_v54 = vadd.f32 %v6081_v52, %v5889_v15  ;;  %v5620_v25 = vadd.f32 %v5619_v19, %v5448_v33  ;;  %v5402_v38 = vpop.permute.xlu0 %5401  ;;  %v5786_v10 = vpop.f32.mrb[199].mxu0  ;;  %v6082_v20 = vsel %vm10388_vm1, %v6062_v7, %v12493_v13  ;;  %v12494_v15 = vld [vmem:[#allocation140_spill] sm:$0xff]  ;;  %vm12503_vm1 = vmmov %vm12498_vm0  ;;  %v12504_v13 = vld [vmem:[#allocation53_spill] sm:$0xff] }
 0x9e3   :  { %v5890_v28 = vadd.f32 %v12491_v6, %v5618_v35  ;;  %v5436_v57 = vsel %vm12492_vm11, %v5400_v2, %v5402_v38  ;;  %v12495_v19 = vld [vmem:[#allocation120_spill] sm:$0xff]  ;;  %v5404_v32 = vpop.permute.xlu1 %5403  ;;  %v12501_v6 = vld [vmem:[#allocation105_spill] sm:$0xff]  ;;  %vm12513_vm3 = vmmov %vm12488_vm10  ;;  %vm12521_vm11 = vnez %v12399_v36 }
 0x9e4   :  { %v12496_v30 = vsel %vm10411_vm4, %v12494_v15, %v12495_v19  ;;  %v12497_v33 = vld [vmem:[#allocation44_spill] sm:$0xff]  ;;  %v5435_v2 = vsel %vm12498_vm0, %v5402_v38, %v5404_v32  ;;  %vm12517_vm5 = vmmov %vm12498_vm0 }
 0x9e5   :  { %v10858_v52 = vadd.f32 %v12496_v30, %v5620_v25  ;;  %v5449_v17 = vsel %vm12377_vm14, %v5436_v57, %v12497_v33  ;;  %v10863_v35 = vadd.f32 %v6082_v20, %v5890_v28  ;;  %v5450_v7 = vsel %vm12381_vm7, %v5435_v2, %v12499_v51  ;;  %v12500_v25 = vld [vmem:[#allocation141_spill] sm:$0xff]  ;;  %vm12506_vm14 = vmmov %vm12482_vm9  ;;  %v12508_v20 = vld [vmem:[#allocation106_spill] sm:$0xff] }
 0x9e6   :  { %v5659_v1 = vadd.f32 %v5658_v62, %v5449_v17  ;;  %v5406_v14 = vpop.permute.xlu0 %5405  ;;  %v12502_v21 = vsel %vm10423_vm13, %v12500_v25, %v12501_v6  ;;  %v5661_v37 = vadd.f32 %v5660_v41, %v5450_v7  ;;  %v6074_v27 = vsel %vm12506_vm14, %v10766_v48, %v10770_v4  ;;  %v12507_v62 = vld [vmem:[#allocation118_spill] sm:$0xff]  ;;  %vm12510_vm7 = vmmov %vm12498_vm0 }
 0x9e7   :  { %v5434_v28 = vsel %vm12503_vm1, %v5404_v32, %v5406_v14  ;;  %v5408_v57 = vpop.permute.xlu1 %5407  ;;  %v12509_v15 = vsel %vm10127_vm6, %v12507_v62, %v12508_v20  ;;  %v12511_v32 = vld [vmem:[#allocation51_spill] sm:$0xff]  ;;  %vm12512_vm9 = vnez %v12394_v58  ;;  %v6073_v17 = vsel %vm12513_vm3, %v10770_v4, %v10778_v44  ;;  %v12514_v2 = vld [vmem:[#allocation42_spill] sm:$0xff]  ;;  %vm12519_vm10 = vmmov %vm12513_vm3 }
 0x9e8   :  { %v10875_v10 = vadd.f32 %v12502_v21, %v5659_v1  ;;  %v5451_v38 = vsel %vm12505_vm2, %v5434_v28, %v12504_v13  ;;  %v10891_v19 = vadd.f32 %v12509_v15, %v5661_v37  ;;  %v5433_v41 = vsel %vm12510_vm7, %v5406_v14, %v5408_v57  ;;  %v12515_v1 = vld [vmem:[#allocation107_spill] sm:$0xff]  ;;  %v12518_v14 = vld [vmem:[#allocation97_spill] sm:$0xff]  ;;  %v12520_v21 = vld [vmem:[#allocation22_spill] sm:$0xff] }
 0x9e9   :  { %v5700_v30 = vadd.f32 %v5699_v9, %v5451_v38  ;;  %v5452_v0 = vsel %vm12512_vm9, %v5433_v41, %v12511_v32  ;;  %v12516_v51 = vsel %vm9785_vm15, %v12514_v2, %v12515_v1  ;;  %v6086_v58 = vsel %vm9785_vm15, %v6074_v27, %v12518_v14  ;;  %v12524_v13 = vld [vmem:[#allocation108_spill] sm:$0xff]  ;;  %vm12526_vm15 = vmmov %vm12513_vm3  ;;  %v12527_v62 = vld [vmem:[#allocation87_spill] sm:$0xff] }
 0x9ea   :  { %v5410_v33 = vpop.permute.xlu0 %5409  ;;  %v5702_v25 = vadd.f32 %v5701_v59, %v5452_v0  ;;  %v6072_v6 = vsel %vm12519_vm10, %v10778_v44, %v10783_v55  ;;  %vm12522_vm0 = vnez %v12174_v50  ;;  %v12523_v59 = vld [vmem:[#allocation57_spill] sm:$0xff]  ;;  %v10930_v44 = vsel %vm12526_vm15, %v10698_v18, %v10709_v34  ;;  %vm12528_vm2 = vmmov %vm12513_vm3  ;;  %v12529_v15 = vld [vmem:[#allocation36_spill] sm:$0xff] }
 0x9eb   :  { %v5894_v7 = vadd.f32 %v12516_v51, %v5700_v30  ;;  %v5432_v9 = vsel %vm12517_vm5, %v5408_v57, %v5410_v33  ;;  %v5412_v4 = vpop.permute.xlu1 %5411  ;;  %v12525_v57 = vsel %vm12522_vm0, %v12523_v59, %v12524_v13  ;;  %v6087_v36 = vsel %vm12522_vm0, %v6073_v17, %v12527_v62  ;;  %v12531_v18 = vld [vmem:[#allocation55_spill] sm:$0xff]  ;;  %v12532_v0 = vld [vmem:[#allocation109_spill] sm:$0xff]  ;;  %vm12534_vm7 = vmmov %vm12528_vm2 }
 0x9ec   :  { %v5453_v37 = vsel %vm12521_vm11, %v5432_v9, %v12520_v21  ;;  %v5895_v38 = vadd.f32 %v12525_v57, %v5702_v25  ;;  %v5431_v61 = vsel %vm12503_vm1, %v5410_v33, %v5412_v4  ;;  %v6071_v20 = vsel %vm12528_vm2, %v10783_v55, %v10785_v53  ;;  %v12535_v55 = vld [vmem:[#allocation98_spill] sm:$0xff]  ;;  %vm12536_vm9 = vmmov %vm12503_vm1 }
 0x9ed   :  { %v6102_v28 = vadd.f32 %v6086_v58, %v5894_v7  ;;  %v5741_v27 = vadd.f32 %v5740_v42, %v5453_v37  ;;  %vm12530_vm14 = vnez %v12404_v5  ;;  %v12533_v33 = vsel %vm12461_vm8, %v12531_v18, %v12532_v0  ;;  %v12538_v25 = vld [vmem:[#allocation110_spill] sm:$0xff]  ;;  %v12541_v58 = vld [vmem:[#allocation72_spill] sm:$0xff]  ;;  %v12545_v37 = vld [vmem:[#allocation45_spill] sm:$0xff] }
 0x9ee   :  { %v5454_v41 = vsel %vm12530_vm14, %v5431_v61, %v12529_v15  ;;  %v5414_v42 = vpop.permute.xlu0 %5413  ;;  %v6103_v32 = vadd.f32 %v6087_v36, %v5895_v38  ;;  %v10952_v53 = vsel %vm12534_vm7, %v10709_v34, %v10733_v49  ;;  %v6088_v5 = vsel %vm12461_vm8, %v6072_v6, %v12535_v55  ;;  %v12540_v34 = vld [vmem:[#allocation133_spill] sm:$0xff]  ;;  %v12543_v6 = vld [vmem:[#allocation76_spill] sm:$0xff]  ;;  %vm12544_vm8 = vmmov %vm12503_vm1 }
 0x9ef   :  { %v6172_v30 = vadd.f32 %v9379_v26, %v6102_v28  ;;  %v5896_v50 = vadd.f32 %v12533_v33, %v5741_v27  ;;  %v5743_v17 = vadd.f32 %v5742_v11, %v5454_v41  ;;  %v5430_v2 = vsel %vm12536_vm9, %v5412_v4, %v5414_v42  ;;  %v5416_v1 = vpop.permute.xlu1 %5415  ;;  %v12537_v11 = vld [vmem:[#allocation50_spill] sm:$0xff]  ;;  %vm12547_vm10 = vmmov %vm12528_vm2  ;;  %v12548_v27 = vld [vmem:[#allocation43_spill] sm:$0xff] }
 0x9f0   :  { %v6173_v51 = vadd.f32 %v9379_v26, %v6103_v32  ;;  %v12539_v9 = vsel %vm12465_vm12, %v12537_v11, %v12538_v25  ;;  %vm12542_vm3 = vnez %v12541_v58  ;;  %v6089_v4 = vsel %vm12465_vm12, %v6071_v20, %v12543_v6  ;;  %vm12550_vm11 = vmmov %vm12503_vm1  ;;  %v12552_v20 = vld [vmem:[#allocation52_spill] sm:$0xff]  ;;  %v12553_v15 = vld [vmem:[#allocation111_spill] sm:$0xff] }
 0x9f1   :  { %6799 = vtanh.f32 %v6172_v30  ;;  %v6104_v7 = vadd.f32 %v6088_v5, %v5896_v50  ;;  %v5897_v14 = vadd.f32 %v12539_v9, %v5743_v17  ;;  %v6078_v12 = vsel %vm12542_vm3, %v10930_v44, %v12540_v34  ;;  %v12558_v32 = vld [vmem:[#allocation56_spill] sm:$0xff]  ;;  %vm12560_vm2 = vmmov %vm12544_vm8  ;;  %v12563_v17 = vld [vmem:[#allocation67_spill] sm:$0xff] }
 0x9f2   :  { %v5429_v21 = vsel %vm12544_vm8, %v5414_v42, %v5416_v1  ;;  %vm12546_vm5 = vnez %v12410_v16  ;;  %v5418_v59 = vpop.permute.xlu0 %5417  ;;  %6801 = vtanh.f32 %v6173_v51  ;;  %v10983_v23 = vsel %vm12547_vm10, %v10733_v49, %v10749_v24  ;;  %v12556_v42 = vld [vmem:[#allocation139_spill] sm:$0xff]  ;;  %v12569_v51 = vld [vmem:[#allocation54_spill] sm:$0xff]  ;;  %vm12572_vm8 = vmmov %vm12560_vm2 }
 0x9f3   :  { %v5455_v28 = vsel %vm12546_vm5, %v5430_v2, %v12545_v37  ;;  %v6174_v13 = vadd.f32 %v9379_v26, %v6104_v7  ;;  %v6105_v57 = vadd.f32 %v6089_v4, %v5897_v14  ;;  %v6167_v61 = vadd.f32 %v9379_v26, %v10841_v54  ;;  %v5420_v36 = vpop.permute.xlu1 %5419  ;;  %v12555_v54 = vld [vmem:[#allocation134_spill] sm:$0xff]  ;;  %v12566_v5 = vld [vmem:[#allocation59_spill] sm:$0xff]  ;;  %v12567_v2 = vld [vmem:[#allocation28_spill] sm:$0xff] }
 0x9f4   :  { %v5782_v38 = vadd.f32 %v10827_v3, %v5455_v28  ;;  %vm12549_vm12 = vnez %v12414_v40  ;;  %v5428_v62 = vsel %vm12550_vm11, %v5416_v1, %v5418_v59  ;;  %vm12551_vm0 = vnez %v12194_v46  ;;  %v12570_v46 = vld [vmem:[#allocation58_spill] sm:$0xff]  ;;  %v12573_v25 = vld [vmem:[#allocation127_spill] sm:$0xff]  ;;  %v12576_v6 = vld [vmem:[#allocation92_spill] sm:$0xff] }
 0x9f5   :  { %v5456_v16 = vsel %vm12549_vm12, %v5429_v21, %v12548_v27  ;;  %6803 = vtanh.f32 %v6174_v13  ;;  %v6175_v3 = vadd.f32 %v9379_v26, %v6105_v57  ;;  %v12554_v49 = vsel %vm12551_vm0, %v12552_v20, %v12553_v15  ;;  %v12578_v4 = vld [vmem:[#allocation68_spill] sm:$0xff]  ;;  %v12579_v21 = vld [vmem:[#allocation113_spill] sm:$0xff]  ;;  %v12582_v57 = vld [vmem:[#allocation47_spill] sm:$0xff] }
 0x9f6   :  { %v5898_v24 = vadd.f32 %v12554_v49, %v5782_v38  ;;  %v5784_v41 = vadd.f32 %v10839_v39, %v5456_v16  ;;  %vm12557_vm1 = vnez %v12556_v42  ;;  %v6168_v30 = vadd.f32 %v9379_v26, %v10863_v35  ;;  %v5422_v33 = vpop.permute.xlu0 %5421  ;;  %v12583_v38 = vld [vmem:[#allocation135_spill] sm:$0xff]  ;;  %vm12585_vm12 = vmmov %vm12560_vm2  ;;  %v12617_v42 = vld [vmem:[#allocation116_spill] sm:$0xff] }
 0x9f7   :  { %v6079_v40 = vsel %vm12557_vm1, %v10952_v53, %v12555_v54  ;;  %vm12559_vm15 = vnez %v12442_v8  ;;  %v5427_v0 = vsel %vm12560_vm2, %v5418_v59, %v5420_v36  ;;  %6805 = vtanh.f32 %v6175_v3  ;;  %v12564_v53 = vld [vmem:[#allocation112_spill] sm:$0xff]  ;;  %vm12587_vm11 = vmmov %vm12560_vm2  ;;  %v12588_v3 = vld [vmem:[#allocation126_spill] sm:$0xff] }
 0x9f8   :  { %v5441_v18 = vsel %vm12559_vm15, %v5428_v62, %v12558_v32  ;;  %v12561_v39 = vsel %vm12551_vm0, %v10791_v45, %v12477_v22  ;;  %vm12562_vm14 = vnez %v12202_v31  ;;  %vm12568_vm7 = vnez %v12567_v2  ;;  %v5424_v22 = vpop.permute.xlu1 %5423  ;;  %v12581_v59 = vld [vmem:[#allocation24_spill] sm:$0xff]  ;;  %v12589_v20 = vld [vmem:[#allocation83_spill] sm:$0xff]  ;;  %v12594_v54 = vld [vmem:[#allocation114_spill] sm:$0xff] }
 0x9f9   :  { %v6106_v50 = vadd.f32 %v12561_v39, %v5898_v24  ;;  %v12565_v35 = vsel %vm12562_vm14, %v12563_v17, %v12564_v53  ;;  %v5495_v8 = vadd.f32 %v10743_v29, %v5441_v18  ;;  %v6080_v1 = vsel %vm12568_vm7, %v10983_v23, %v12566_v5  ;;  %v12574_v29 = vld [vmem:[#allocation39_spill] sm:$0xff]  ;;  %v12591_v24 = vld [vmem:[#allocation93_spill] sm:$0xff]  ;;  %v12596_v18 = vld [vmem:[#allocation128_spill] sm:$0xff] }
 0x9fa   :  { %v5899_v55 = vadd.f32 %v12565_v35, %v5784_v41  ;;  %6807 = vtanh.f32 %v6167_v61  ;;  %vm12571_vm9 = vnez %v12570_v46  ;;  %v5426_v45 = vsel %vm12572_vm8, %v5420_v36, %v5422_v33  ;;  %v12586_v61 = vld [vmem:[#allocation27_spill] sm:$0xff]  ;;  %v6059_v16 = vpop.permute.xlu0 %6058  ;;  %v12593_v41 = vld [vmem:[#allocation65_spill] sm:$0xff]  ;;  %v12598_v39 = vld [vmem:[#allocation136_spill] sm:$0xff] }
 0x9fb   :  { %v5442_v7 = vsel %vm12571_vm9, %v5427_v0, %v12569_v51  ;;  %v6176_v11 = vadd.f32 %v9379_v26, %v6106_v50  ;;  %v12575_v9 = vsel %vm12562_vm14, %v12573_v25, %v12574_v29  ;;  %vm12577_vm5 = vnez %v12576_v6  ;;  %v6800_v62 = vpop.eup %6799  ;;  %v12600_v17 = vld [vmem:[#allocation21_spill] sm:$0xff]  ;;  %v12604_v51 = vld [vmem:[#allocation122_spill] sm:$0xff]  ;;  %v12605_v46 = vld [vmem:[#allocation84_spill] sm:$0xff] }
 0x9fc   :  { %v6107_v14 = vadd.f32 %v12575_v9, %v5899_v55  ;;  %v12580_v37 = vsel %vm12577_vm5, %v12578_v4, %v12579_v21  ;;  %v5497_v13 = vadd.f32 %v12581_v59, %v5442_v7  ;;  %6809 = vtanh.f32 %v6168_v30  ;;  %v12601_v53 = vld [vmem:[#allocation137_spill] sm:$0xff]  ;;  %v6057_v25 = vpop.permute.xlu1 %6056  ;;  %v12608_v9 = vld [vmem:[#allocation66_spill] sm:$0xff]  ;;  %v12621_v44 = vld [vmem:[#allocation80_spill] sm:$0xff] }
 0x9fd   :  { %v5884_v28 = vadd.f32 %v12580_v37, %v5495_v8  ;;  %vm12584_vm10 = vnez %v12583_v38  ;;  %v5425_v31 = vsel %vm12585_vm12, %v5422_v33, %v5424_v22  ;;  %v5440_v27 = vsel %vm12587_vm11, %v5424_v22, %v12586_v61  ;;  %v12597_v33 = vld [vmem:[#allocation37_spill] sm:$0xff]  ;;  %v6802_v8 = vpop.eup %6801  ;;  %v12607_v22 = vld [vmem:[#allocation99_spill] sm:$0xff]  ;;  %v12611_v4 = vld [vmem:[#allocation74_spill] sm:$0xff] }
 0x9fe   :  { %v5443_v23 = vsel %vm12584_vm10, %v5426_v45, %v12582_v57  ;;  %6811 = vtanh.f32 %v6176_v11  ;;  %v6177_v36 = vadd.f32 %v9379_v26, %v6107_v14  ;;  %v12590_v15 = vsel %vm12577_vm5, %v12588_v3, %v12589_v20  ;;  %v12609_v14 = vld [vmem:[#allocation115_spill] sm:$0xff]  ;;  %v12612_v37 = vld [vmem:[#allocation96_spill] sm:$0xff]  ;;  %v12614_v38 = vld [vmem:[#allocation117_spill] sm:$0xff] }
 0x9ff   :  { %v6092_v49 = vadd.f32 %v12590_v15, %v5884_v28  ;;  %vm12592_vm0 = vnez %v12591_v24  ;;  %v5536_v0 = vadd.f32 %v12596_v18, %v5443_v23  ;;  %vm12599_vm15 = vnez %v12598_v39  ;;  %v6804_v59 = vpop.eup %6803  ;;  %v12613_v57 = vld [vmem:[#allocation75_spill] sm:$0xff] }
 0xa00   :  { %v12595_v30 = vsel %vm12592_vm0, %v12593_v41, %v12594_v54  ;;  %v5444_v50 = vsel %vm12599_vm15, %v5425_v31, %v12597_v33  ;;  %vm12602_vm2 = vnez %v12601_v53  ;;  %vm12603_vm14 = vcmp.lt.s32.totalorder %v11988_v56, 124  ;;  %v12622_v41 = vld [vmem:[#allocation78_spill] sm:$0xff] }
 0xa01   :  { %v5885_v32 = vadd.f32 %v12595_v30, %v5497_v13  ;;  %v5445_v35 = vsel %vm12602_vm2, %v5440_v27, %v12600_v17  ;;  %v6075_v55 = vsel %vm12603_vm14, %v6059_v16, %v10766_v48  ;;  %6813 = vtanh.f32 %v6177_v36  ;;  %v12616_v27 = vld [vmem:[#allocation138_spill] sm:$0xff]  ;;  %v6806_v20 = vpop.eup %6805 }
 0xa02   :  { %v6162_v5 = vadd.f32 %v9379_v26, %v6092_v49  ;;  %v12606_v7 = vsel %vm12592_vm0, %v12604_v51, %v12605_v46  ;;  %v5538_v11 = vadd.f32 %v12607_v22, %v5444_v50  ;;  %v6335_v29 = vcombine.low %v6800_v62, %v6802_v8 }
 0xa03   :  { %v6093_v45 = vadd.f32 %v12606_v7, %v5885_v32  ;;  %v12610_v6 = vsel %vm12542_vm3, %v12608_v9, %v12609_v14  ;;  %v5577_v21 = vadd.f32 %v12611_v4, %v5445_v35  ;;  %v6085_v28 = vsel %vm10127_vm6, %v6075_v55, %v12612_v37  ;;  %vm12619_vm6 = vmmov %vm12603_vm14 }
 0xa04   :  { %v5886_v48 = vadd.f32 %v12610_v6, %v5536_v0  ;;  %6815 = vtanh.f32 %v6162_v5  ;;  %v12615_v23 = vsel %vm12557_vm1, %v12613_v57, %v12614_v38  ;;  %v6101_v61 = vadd.f32 %v6085_v28, %v10891_v19  ;;  %6399 = vst [vmem:[%s11162_s15 + $0xe8] sm:$0x77] %v6335_v29  ;;  %vm12620_vm1 = vmmov %vm12619_vm6 }
 0xa05   :  { %v6163_v13 = vadd.f32 %v9379_v26, %v6093_v45  ;;  %v5887_v31 = vadd.f32 %v12615_v23, %v5538_v11  ;;  %v12618_v62 = vsel %vm12568_vm7, %v12616_v27, %v12617_v42  ;;  %v6060_v3 = vsel %vm12619_vm6, %v6057_v25, %v6059_v16 }
 0xa06   :  { %v6094_v43 = vadd.f32 %v6078_v12, %v5886_v48  ;;  %v5888_v36 = vadd.f32 %v12618_v62, %v5577_v21  ;;  %v6061_v19 = vsel %vm12620_vm1, %v10764_v63, %v6057_v25  ;;  %v6171_v15 = vadd.f32 %v9379_v26, %v6101_v61  ;;  %v6808_v12 = vpop.eup %6807 }
 0xa07   :  { %6817 = vtanh.f32 %v6163_v13  ;;  %v6095_v58 = vadd.f32 %v6079_v40, %v5887_v31  ;;  %v6083_v34 = vsel %vm10411_vm4, %v6061_v19, %v12621_v44  ;;  %v6336_v2 = vcombine.low %v6804_v59, %v6806_v20  ;;  %v6810_v54 = vpop.eup %6809 }
 0xa08   :  { %v6164_v49 = vadd.f32 %v9379_v26, %v6094_v43  ;;  %v6096_v24 = vadd.f32 %v6080_v1, %v5888_v36  ;;  %v6084_v16 = vsel %vm10423_vm13, %v6060_v3, %v12622_v41  ;;  %6819 = vtanh.f32 %v6171_v15  ;;  %v6812_v1 = vpop.eup %6811 }
 0xa09   :  { %v6165_v56 = vadd.f32 %v9379_v26, %v6095_v58  ;;  %v6099_v63 = vadd.f32 %v6083_v34, %v10858_v52  ;;  %v6100_v40 = vadd.f32 %v6084_v16, %v10875_v10  ;;  %6400 = vst [vmem:[%s11162_s15 + $0xf0] sm:$0x77] %v6336_v2 }
 0xa0a   :  { %6821 = vtanh.f32 %v6164_v49  ;;  %v6166_v60 = vadd.f32 %v9379_v26, %v6096_v24 }
 0xa0b   :  { %6823 = vtanh.f32 %v6165_v56  ;;  %v6169_v47 = vadd.f32 %v9379_v26, %v6099_v63  ;;  %v6170_v30 = vadd.f32 %v9379_v26, %v6100_v40  ;;  %v6814_v32 = vpop.eup %6813 }
 0xa0c   :  { %6825 = vtanh.f32 %v6166_v60  ;;  %v6337_v52 = vcombine.low %v6812_v1, %v6814_v32 }
 0xa0d   :  { %6827 = vtanh.f32 %v6169_v47 }
 0xa0e   :  { %6829 = vtanh.f32 %v6170_v30  ;;  %v6816_v10 = vpop.eup %6815  ;;  %6401 = vst [vmem:[%s11162_s15 + $0xf8] sm:$0x77] %v6337_v52 }
 0xa11   :  { %v6818_v18 = vpop.eup %6817 }
 0xa12   :  { %v6330_v0 = vcombine.low %v6816_v10, %v6818_v18  ;;  %v6820_v33 = vpop.eup %6819 }
 0xa14   :  { %v6822_v39 = vpop.eup %6821  ;;  %6394 = vst [vmem:[%s11162_s15 + $0xc0] sm:$0x77] %v6330_v0 }
 0xa15   :  { %v6824_v50 = vpop.eup %6823 }
 0xa16   :  { %v6826_v26 = vpop.eup %6825  ;;  %v6331_v17 = vcombine.low %v6822_v39, %v6824_v50 }
 0xa17   :  { %v6828_v53 = vpop.eup %6827  ;;  %v6332_v35 = vcombine.low %v6826_v26, %v6808_v12 }
 0xa18   :  { %v6830_v55 = vpop.eup %6829  ;;  %6395 = vst [vmem:[%s11162_s15 + $0xc8] sm:$0x77] %v6331_v17  ;;  %v6333_v8 = vcombine.low %v6810_v54, %v6828_v53 }
 0xa19   :  { %6396 = vst [vmem:[%s11162_s15 + $0xd0] sm:$0x77] %v6332_v35  ;;  %v6334_v5 = vcombine.low %v6830_v55, %v6820_v33 }
 0xa1a   :  { %6397 = vst [vmem:[%s11162_s15 + $0xd8] sm:$0x77] %v6333_v8 }
 0xa1b   :  { %6398 = vst [vmem:[%s11162_s15 + $0xe0] sm:$0x77] %v6334_v5 }
 0xa1c   :  { %6406 = vsyncpa [#allocation3], 1 }
 0xa1d   :  { %6407 = vsyncpa [#allocation5], 1 }
 0xa1e   :  { %6408 = vsyncpa [#allocation8], 1 }
 0xa1f   :  { %6409 = vsyncpa [#allocation11], 1 }
 0xa20   :  { %6410 = vsyncpa [#allocation14], 1 }

</bundles_post_ra>
